<compile_context>
chip_gen: v7x
topology: tpu7x:2x2x1
jax: 0.10.0
libtpu: 0.0.40
codegen_flags: <defaults>
</compile_context>

<pallas_src>
import functools

import jax
import jax.numpy as jnp
from jax.experimental import pallas as pl
from jax.experimental.pallas import tpu as pltpu

FEAT_DIM = 1280
HIDDEN = 1024


def _round_up(x, m):
    return ((x + m - 1) // m) * m


def _vmem_capacity_bytes():
    """Physical per-core VMEM, with a conservative (v7x-sized) fallback."""
    try:
        cap = getattr(pltpu.get_tpu_info(), "vmem_capacity_bytes", None)
        if cap:
            return int(cap)
    except Exception:
        pass
    return 64 * 1024 * 1024


def _dann_head_kernel(pooled_ref, w_fused_ref, b_fused_ref, w_d2_ref, b_d2_ref,
                      out_ref, *, npad):
    # pooled_ref: [TB, 1280] bf16 (AdaptiveAvgPool done in f32 by XLA upstream).
    # GradientReversalLayer.forward is x.view_as(x) * 1.0 -> identity (no-op).
    # Dropout layers are identity in the (inference) forward pass.

    # Fused [class head | domain layer 1] matmul on the MXU (bf16 in, f32 acc).
    fused = jnp.dot(pooled_ref[...], w_fused_ref[...],
                    preferred_element_type=jnp.float32)
    fused = fused + b_fused_ref[...]                      # [TB, npad + 1024] f32

    y_pad = fused[:, :npad]                               # class logits (padded)
    h = fused[:, npad:]                                   # domain hidden [TB, 1024]

    # Mish(h) = h * tanh(softplus(h)); softplus via overflow-safe logaddexp (EUP).
    h = h * jnp.tanh(jnp.logaddexp(h, 0.0))

    # Domain output: N=1 -> VPU multiply + lane reduce (no MXU column waste).
    d = jnp.sum(h * w_d2_ref[...], axis=-1, keepdims=True) + b_d2_ref[0, 0]

    # Lane-dense output slab: y in cols [0, nc), d in the last column.
    col = jax.lax.broadcasted_iota(jnp.int32, y_pad.shape, 1)
    out_ref[...] = jnp.where(col == npad - 1, d, y_pad)


def dann_heads(feats_nchw, params):
    """feats_nchw: [B, 1280, H, W] encoder feature map (f32). Returns (y, d)."""
    B, C, H, W = feats_nchw.shape
    assert C == FEAT_DIM
    num_classes = params["w_cls"].shape[1]

    NPAD = _round_up(num_classes + 1, 128)     # class columns + 1 slot for d
    NF = NPAD + HIDDEN                         # fused matmul width

    # ---- encoder tail in XLA: AdaptiveAvgPool2d((1,1)) + Flatten(1), f32. ----
    # Single HBM pass over the feature map; only the pooled activations are
    # quantized to bf16 for the MXU.
    pooled = jnp.mean(feats_nchw, axis=(2, 3))            # [B, 1280] f32
    pooled_bf = pooled.astype(jnp.bfloat16)

    # ---- batch tiling: multiple of 8, <= 256; >= 2 grid steps if possible ----
    TB = min(256, _round_up(B, 8))
    if B > 8 and _round_up(B, TB) // TB < 2:
        TB = _round_up((B + 1) // 2, 8)       # split for v7x megacore sharding
    B_pad = _round_up(B, TB)
    if B_pad != B:
        pooled_bf = jnp.pad(pooled_bf, ((0, B_pad - B), (0, 0)))
    grid = (B_pad // TB,)

    # ---- fuse class head and first domain layer into one lane-dense bf16 W ----
    w_cls_pad = jnp.zeros((FEAT_DIM, NPAD), jnp.float32)
    w_cls_pad = w_cls_pad.at[:, :num_classes].set(params["w_cls"])
    b_cls_pad = jnp.zeros((1, NPAD), jnp.float32)
    b_cls_pad = b_cls_pad.at[:, :num_classes].set(params["b_cls"])
    w_fused = jnp.concatenate([w_cls_pad, params["w_d1"]], axis=1).astype(jnp.bfloat16)
    b_fused = jnp.concatenate([b_cls_pad, params["b_d1"]], axis=1)   # f32
    w_d2_row = params["w_d2"].T                                      # [1, 1024] f32
    b_d2 = params["b_d2"]                                            # [1, 1] f32 (SMEM)

    # ---- generation-aware VMEM budget (tiny now: pooled tiles + weights) ----
    est = (2 * TB * FEAT_DIM * 2            # pooled tile, double-buffered
           + FEAT_DIM * NF * 2 + NF * 4     # resident fused W + bias
           + HIDDEN * 4                     # w_d2 row
           + 2 * TB * NPAD * 4              # output tile, double-buffered
           + 2 * TB * NF * 4)               # f32 matmul intermediate headroom
    vmem_limit = int(min(int(_vmem_capacity_bytes() * 0.75),
                         max(16 * 1024 * 1024, 4 * est)))

    kernel = functools.partial(_dann_head_kernel, npad=NPAD)

    def build(single_buffer_weights):
        def const_spec(shape):
            # Resident weights: constant block index; single-buffer if supported.
            if single_buffer_weights:
                return pl.BlockSpec(shape, lambda i: (0, 0),
                                    pipeline_mode=pl.Buffered(1))
            return pl.BlockSpec(shape, lambda i: (0, 0))

        return pl.pallas_call(
            kernel,
            out_shape=jax.ShapeDtypeStruct((B_pad, NPAD), jnp.float32),
            grid_spec=pltpu.PrefetchScalarGridSpec(
                num_scalar_prefetch=0,
                grid=grid,
                in_specs=[
                    pl.BlockSpec((TB, FEAT_DIM), lambda i: (i, 0)),      # pooled tile
                    const_spec((FEAT_DIM, NF)),                          # fused W
                    const_spec((1, NF)),                                 # fused bias
                    const_spec((1, HIDDEN)),                             # w_d2 row
                    pl.BlockSpec(memory_space=pltpu.MemorySpace.SMEM),   # b_d2 scalar
                ],
                out_specs=pl.BlockSpec((TB, NPAD), lambda i: (i, 0)),
            ),
            compiler_params=pltpu.CompilerParams(
                dimension_semantics=("parallel",),
                vmem_limit_bytes=vmem_limit,
            ),
        )

    args = (pooled_bf, w_fused, b_fused, w_d2_row, b_d2)
    try:
        slab = build(hasattr(pl, "Buffered"))(*args)
    except Exception:
        # Fallback: default double-buffering if Buffered(1) is unsupported here.
        slab = build(False)(*args)

    y = slab[:B, :num_classes]
    d = slab[:B, NPAD - 1:NPAD]
    return y, d


def init_params(key, num_classes):
    k1, k2, k3, k4, k5, k6 = jax.random.split(key, 6)
    scale_cls = 1.0 / jnp.sqrt(FEAT_DIM)
    scale_d1 = 1.0 / jnp.sqrt(FEAT_DIM)
    scale_d2 = 1.0 / jnp.sqrt(HIDDEN)
    return {
        # stored [in, out] so the kernel does x @ W + b
        "w_cls": jax.random.uniform(k1, (FEAT_DIM, num_classes), jnp.float32,
                                    -scale_cls, scale_cls),
        "b_cls": jax.random.uniform(k2, (1, num_classes), jnp.float32,
                                    -scale_cls, scale_cls),
        "w_d1": jax.random.uniform(k3, (FEAT_DIM, HIDDEN), jnp.float32,
                                   -scale_d1, scale_d1),
        "b_d1": jax.random.uniform(k4, (1, HIDDEN), jnp.float32,
                                   -scale_d1, scale_d1),
        "w_d2": jax.random.uniform(k5, (HIDDEN, 1), jnp.float32,
                                   -scale_d2, scale_d2),
        "b_d2": jax.random.uniform(k6, (1, 1), jnp.float32,
                                   -scale_d2, scale_d2),
    }


if __name__ == "__main__":
    key = jax.random.PRNGKey(0)
    k_feat, k_param = jax.random.split(key)

    B, H, W = 2, 4, 4
    num_classes = 10

    # deterministic synthetic encoder feature map (output of EfficientNetV2-S features)
    feats = jax.random.normal(k_feat, (B, FEAT_DIM, H, W), dtype=jnp.float32)
    params = init_params(k_param, num_classes)

    y, d = dann_heads(feats, params)
    jax.block_until_ready((y, d))

    # pure-JAX reference: f32 pool (like PyTorch), bf16 matmuls with f32 acc.
    pooled_ref = jnp.mean(feats, axis=(2, 3))
    pooled_bf_ref = pooled_ref.astype(jnp.bfloat16)
    y_ref = jnp.dot(pooled_bf_ref, params["w_cls"].astype(jnp.bfloat16),
                    preferred_element_type=jnp.float32) + params["b_cls"]
    h_ref = jnp.dot(pooled_bf_ref, params["w_d1"].astype(jnp.bfloat16),
                    preferred_element_type=jnp.float32) + params["b_d1"]
    h_ref = h_ref * jnp.tanh(jax.nn.softplus(h_ref))
    d_ref = jnp.sum(h_ref * params["w_d2"].T, axis=-1, keepdims=True) + params["b_d2"]

    assert y.shape == (B, num_classes) and d.shape == (B, 1)
    assert jnp.allclose(y, y_ref, atol=1e-2, rtol=1e-2)
    assert jnp.allclose(d, d_ref, atol=1e-2, rtol=1e-2)

    print("KERNEL_OK")
</pallas_src>

<mosaic_0001>
module attributes {stable_mosaic.version = 11 : i64} {
  func.func @_dann_head_kernel(%arg0: i32, %arg1: memref<8x1280xbf16, #tpu.memory_space<vmem>>, %arg2: memref<1280x1152xbf16, #tpu.memory_space<vmem>>, %arg3: memref<1x1152xf32, #tpu.memory_space<vmem>>, %arg4: memref<1x1024xf32, #tpu.memory_space<vmem>>, %arg5: memref<1x1xf32, #tpu.memory_space<smem>>, %arg6: memref<8x128xf32, #tpu.memory_space<vmem>>) attributes {dimension_semantics = [#tpu.dimension_semantics<parallel>], iteration_bounds = array<i64: 1>, scalar_prefetch = 0 : i64, scratch_operands = 0 : i64, tpu.core_type = #tpu.core_type<tc>, window_params = [{transform_indices = @transform_0, window_bounds = array<i64: 8, 1280>}, {pipeline_mode = #tpu.pipeline_mode<synchronous>, transform_indices = @transform_1, window_bounds = array<i64: 1280, 1152>}, {pipeline_mode = #tpu.pipeline_mode<synchronous>, transform_indices = @transform_2, window_bounds = array<i64: 1, 1152>}, {pipeline_mode = #tpu.pipeline_mode<synchronous>, transform_indices = @transform_3, window_bounds = array<i64: 1, 1024>}, {transform_indices = @transform_4, window_bounds = array<i64: 1, 1>}, {transform_indices = @transform_5, window_bounds = array<i64: 8, 128>}]} {
    %c0 = arith.constant 0 : index
    %c0_0 = arith.constant 0 : index
    %0 = vector.load %arg1[%c0, %c0_0] : memref<8x1280xbf16, #tpu.memory_space<vmem>>, vector<8x1280xbf16>
    %c0_1 = arith.constant 0 : index
    %c0_2 = arith.constant 0 : index
    %1 = vector.load %arg2[%c0_1, %c0_2] : memref<1280x1152xbf16, #tpu.memory_space<vmem>>, vector<1280x1152xbf16>
    %cst = arith.constant dense<0.000000e+00> : vector<8x1152xf32>
    %2 = tpu.matmul %0, %1, %cst {dimension_numbers = #tpu.dot_dimension_numbers<[1], [0], [0], [1], [0, 0, 1, 1], [], []>} : vector<8x1280xbf16>, vector<1280x1152xbf16>, vector<8x1152xf32> -> vector<8x1152xf32>
    %c0_3 = arith.constant 0 : index
    %c0_4 = arith.constant 0 : index
    %3 = vector.load %arg3[%c0_3, %c0_4] : memref<1x1152xf32, #tpu.memory_space<vmem>>, vector<1x1152xf32>
    %4 = vector.broadcast %3 : vector<1x1152xf32> to vector<8x1152xf32>
    %5 = arith.addf %2, %4 : vector<8x1152xf32>
    %6 = vector.extract_strided_slice %5 {offsets = [0, 0], sizes = [8, 128], strides = [1, 1]} : vector<8x1152xf32> to vector<8x128xf32>
    %7 = vector.extract_strided_slice %5 {offsets = [0, 128], sizes = [8, 1024], strides = [1, 1]} : vector<8x1152xf32> to vector<8x1024xf32>
    %cst_5 = arith.constant 0.000000e+00 : f32
    %8 = vector.broadcast %cst_5 : f32 to vector<8x1024xf32>
    %9 = arith.maximumf %7, %8 : vector<8x1024xf32>
    %10 = vector.broadcast %cst_5 : f32 to vector<8x1024xf32>
    %11 = arith.subf %7, %10 : vector<8x1024xf32>
    %12 = arith.cmpf one, %11, %11 : vector<8x1024xf32>
    %13 = vector.broadcast %cst_5 : f32 to vector<8x1024xf32>
    %14 = arith.addf %7, %13 : vector<8x1024xf32>
    %15 = math.absf %11 : vector<8x1024xf32>
    %cst_6 = arith.constant 0.000000e+00 : f32
    %16 = vector.broadcast %cst_6 : f32 to vector<8x1024xf32>
    %17 = arith.subf %16, %15 : vector<8x1024xf32>
    %18 = math.exp %17 : vector<8x1024xf32>
    %19 = math.log1p %18 : vector<8x1024xf32>
    %20 = arith.addf %9, %19 : vector<8x1024xf32>
    %21 = arith.select %12, %14, %20 : vector<8x1024xi1>, vector<8x1024xf32>
    %22 = math.tanh %21 : vector<8x1024xf32>
    %23 = arith.mulf %7, %22 : vector<8x1024xf32>
    %c0_7 = arith.constant 0 : index
    %c0_8 = arith.constant 0 : index
    %24 = vector.load %arg4[%c0_7, %c0_8] : memref<1x1024xf32, #tpu.memory_space<vmem>>, vector<1x1024xf32>
    %25 = vector.broadcast %24 : vector<1x1024xf32> to vector<8x1024xf32>
    %26 = arith.mulf %23, %25 : vector<8x1024xf32>
    %cst_9 = arith.constant dense<0.000000e+00> : vector<8xf32>
    %27 = vector.multi_reduction <add>, %26, %cst_9 [1] : vector<8x1024xf32> to vector<8xf32>
    %28 = vector.shape_cast %27 : vector<8xf32> to vector<8x1xf32>
    %c0_10 = arith.constant 0 : index
    %c0_11 = arith.constant 0 : index
    %29 = memref.load %arg5[%c0_10, %c0_11] : memref<1x1xf32, #tpu.memory_space<smem>>
    %30 = vector.broadcast %29 : f32 to vector<8x1xf32>
    %31 = arith.addf %28, %30 : vector<8x1xf32>
    %32 = tpu.iota {dimensions = array<i32: 1>} : vector<8x128xi32>
    %c127_i32 = arith.constant 127 : i32
    %33 = vector.broadcast %c127_i32 : i32 to vector<8x128xi32>
    %34 = arith.cmpi eq, %32, %33 : vector<8x128xi32>
    %35 = vector.shape_cast %31 : vector<8x1xf32> to vector<8x1xf32>
    %36 = vector.broadcast %35 : vector<8x1xf32> to vector<8x128xf32>
    %37 = arith.select %34, %36, %6 : vector<8x128xi1>, vector<8x128xf32>
    %c0_12 = arith.constant 0 : index
    %c0_13 = arith.constant 0 : index
    %38 = vector.load %arg6[%c0_12, %c0_13] : memref<8x128xf32, #tpu.memory_space<vmem>>, vector<8x128xf32>
    tpu.vector_store %arg6[%c0_12, %c0_13], %37 {strides = array<i32>} : memref<8x128xf32, #tpu.memory_space<vmem>>, vector<8x128xf32>,
    return
  }
  func.func @transform_0(%arg0: i32) -> (i32, i32) {
    %c0_i32 = arith.constant 0 : i32
    %c0_i32_0 = arith.constant 0 : i32
    return %arg0, %c0_i32 : i32, i32
  }
  func.func @transform_1(%arg0: i32) -> (i32, i32) {
    %c0_i32 = arith.constant 0 : i32
    %c0_i32_0 = arith.constant 0 : i32
    %c0_i32_1 = arith.constant 0 : i32
    return %c0_i32, %c0_i32_0 : i32, i32
  }
  func.func @transform_2(%arg0: i32) -> (i32, i32) {
    %c0_i32 = arith.constant 0 : i32
    %c0_i32_0 = arith.constant 0 : i32
    %c0_i32_1 = arith.constant 0 : i32
    return %c0_i32, %c0_i32_0 : i32, i32
  }
  func.func @transform_3(%arg0: i32) -> (i32, i32) {
    %c0_i32 = arith.constant 0 : i32
    %c0_i32_0 = arith.constant 0 : i32
    %c0_i32_1 = arith.constant 0 : i32
    return %c0_i32, %c0_i32_0 : i32, i32
  }
  func.func @transform_4(%arg0: i32) -> (i32, i32) {
    %c0_i32 = arith.constant 0 : i32
    %c0_i32_0 = arith.constant 0 : i32
    %c0_i32_1 = arith.constant 0 : i32
    return %c0_i32, %c0_i32_0 : i32, i32
  }
  func.func @transform_5(%arg0: i32) -> (i32, i32) {
    %c0_i32 = arith.constant 0 : i32
    %c0_i32_0 = arith.constant 0 : i32
    return %arg0, %c0_i32 : i32, i32
  }
}

module attributes {stable_mosaic.version = 11 : i64} {
  func.func @_dann_head_kernel(%arg0: i32, %arg1: memref<8x1280xbf16, #tpu.memory_space<vmem>>, %arg2: memref<1280x1152xbf16, #tpu.memory_space<vmem>>, %arg3: memref<1x1152xf32, #tpu.memory_space<vmem>>, %arg4: memref<1x1024xf32, #tpu.memory_space<vmem>>, %arg5: memref<1x1xf32, #tpu.memory_space<smem>>, %arg6: memref<8x128xf32, #tpu.memory_space<vmem>>) attributes {dimension_semantics = [#tpu.dimension_semantics<parallel>], iteration_bounds = array<i64: 1>, scalar_prefetch = 0 : i64, scratch_operands = 0 : i64, tpu.core_type = #tpu.core_type<tc>, window_params = [{transform_indices = @transform_0, window_bounds = array<i64: 8, 1280>}, {pipeline_mode = #tpu.pipeline_mode<synchronous>, transform_indices = @transform_1, window_bounds = array<i64: 1280, 1152>}, {pipeline_mode = #tpu.pipeline_mode<synchronous>, transform_indices = @transform_2, window_bounds = array<i64: 1, 1152>}, {pipeline_mode = #tpu.pipeline_mode<synchronous>, transform_indices = @transform_3, window_bounds = array<i64: 1, 1024>}, {transform_indices = @transform_4, window_bounds = array<i64: 1, 1>}, {transform_indices = @transform_5, window_bounds = array<i64: 8, 128>}]} {
    %c0 = arith.constant 0 : index
    %c0_0 = arith.constant 0 : index
    %0 = vector.load %arg1[%c0, %c0_0] : memref<8x1280xbf16, #tpu.memory_space<vmem>>, vector<8x1280xbf16>
    %c0_1 = arith.constant 0 : index
    %c0_2 = arith.constant 0 : index
    %1 = vector.load %arg2[%c0_1, %c0_2] : memref<1280x1152xbf16, #tpu.memory_space<vmem>>, vector<1280x1152xbf16>
    %cst = arith.constant dense<0.000000e+00> : vector<8x1152xf32>
    %2 = tpu.matmul %0, %1, %cst {dimension_numbers = #tpu.dot_dimension_numbers<[1], [0], [0], [1], [0, 0, 1, 1], [], []>} : vector<8x1280xbf16>, vector<1280x1152xbf16>, vector<8x1152xf32> -> vector<8x1152xf32>
    %c0_3 = arith.constant 0 : index
    %c0_4 = arith.constant 0 : index
    %3 = vector.load %arg3[%c0_3, %c0_4] : memref<1x1152xf32, #tpu.memory_space<vmem>>, vector<1x1152xf32>
    %4 = vector.broadcast %3 : vector<1x1152xf32> to vector<8x1152xf32>
    %5 = arith.addf %2, %4 : vector<8x1152xf32>
    %6 = vector.extract_strided_slice %5 {offsets = [0, 0], sizes = [8, 128], strides = [1, 1]} : vector<8x1152xf32> to vector<8x128xf32>
    %7 = vector.extract_strided_slice %5 {offsets = [0, 128], sizes = [8, 1024], strides = [1, 1]} : vector<8x1152xf32> to vector<8x1024xf32>
    %cst_5 = arith.constant 0.000000e+00 : f32
    %8 = vector.broadcast %cst_5 : f32 to vector<8x1024xf32>
    %9 = arith.maximumf %7, %8 : vector<8x1024xf32>
    %10 = vector.broadcast %cst_5 : f32 to vector<8x1024xf32>
    %11 = arith.subf %7, %10 : vector<8x1024xf32>
    %12 = arith.cmpf one, %11, %11 : vector<8x1024xf32>
    %13 = vector.broadcast %cst_5 : f32 to vector<8x1024xf32>
    %14 = arith.addf %7, %13 : vector<8x1024xf32>
    %15 = math.absf %11 : vector<8x1024xf32>
    %cst_6 = arith.constant 0.000000e+00 : f32
    %16 = vector.broadcast %cst_6 : f32 to vector<8x1024xf32>
    %17 = arith.subf %16, %15 : vector<8x1024xf32>
    %18 = math.exp %17 : vector<8x1024xf32>
    %19 = math.log1p %18 : vector<8x1024xf32>
    %20 = arith.addf %9, %19 : vector<8x1024xf32>
    %21 = arith.select %12, %14, %20 : vector<8x1024xi1>, vector<8x1024xf32>
    %22 = math.tanh %21 : vector<8x1024xf32>
    %23 = arith.mulf %7, %22 : vector<8x1024xf32>
    %c0_7 = arith.constant 0 : index
    %c0_8 = arith.constant 0 : index
    %24 = vector.load %arg4[%c0_7, %c0_8] : memref<1x1024xf32, #tpu.memory_space<vmem>>, vector<1x1024xf32>
    %25 = vector.broadcast %24 : vector<1x1024xf32> to vector<8x1024xf32>
    %26 = arith.mulf %23, %25 : vector<8x1024xf32>
    %cst_9 = arith.constant dense<0.000000e+00> : vector<8xf32>
    %27 = vector.multi_reduction <add>, %26, %cst_9 [1] : vector<8x1024xf32> to vector<8xf32>
    %28 = vector.shape_cast %27 : vector<8xf32> to vector<8x1xf32>
    %c0_10 = arith.constant 0 : index
    %c0_11 = arith.constant 0 : index
    %29 = memref.load %arg5[%c0_10, %c0_11] : memref<1x1xf32, #tpu.memory_space<smem>>
    %30 = vector.broadcast %29 : f32 to vector<8x1xf32>
    %31 = arith.addf %28, %30 : vector<8x1xf32>
    %32 = tpu.iota {dimensions = array<i32: 1>} : vector<8x128xi32>
    %c127_i32 = arith.constant 127 : i32
    %33 = vector.broadcast %c127_i32 : i32 to vector<8x128xi32>
    %34 = arith.cmpi eq, %32, %33 : vector<8x128xi32>
    %35 = vector.shape_cast %31 : vector<8x1xf32> to vector<8x1xf32>
    %36 = vector.broadcast %35 : vector<8x1xf32> to vector<8x128xf32>
    %37 = arith.select %34, %36, %6 : vector<8x128xi1>, vector<8x128xf32>
    %c0_12 = arith.constant 0 : index
    %c0_13 = arith.constant 0 : index
    %38 = vector.load %arg6[%c0_12, %c0_13] : memref<8x128xf32, #tpu.memory_space<vmem>>, vector<8x128xf32>
    tpu.vector_store %arg6[%c0_12, %c0_13], %37 {strides = array<i32>} : memref<8x128xf32, #tpu.memory_space<vmem>>, vector<8x128xf32>,
    return
  }
  func.func @transform_0(%arg0: i32) -> (i32, i32) {
    %c0_i32 = arith.constant 0 : i32
    %c0_i32_0 = arith.constant 0 : i32
    return %arg0, %c0_i32 : i32, i32
  }
  func.func @transform_1(%arg0: i32) -> (i32, i32) {
    %c0_i32 = arith.constant 0 : i32
    %c0_i32_0 = arith.constant 0 : i32
    %c0_i32_1 = arith.constant 0 : i32
    return %c0_i32, %c0_i32_0 : i32, i32
  }
  func.func @transform_2(%arg0: i32) -> (i32, i32) {
    %c0_i32 = arith.constant 0 : i32
    %c0_i32_0 = arith.constant 0 : i32
    %c0_i32_1 = arith.constant 0 : i32
    return %c0_i32, %c0_i32_0 : i32, i32
  }
  func.func @transform_3(%arg0: i32) -> (i32, i32) {
    %c0_i32 = arith.constant 0 : i32
    %c0_i32_0 = arith.constant 0 : i32
    %c0_i32_1 = arith.constant 0 : i32
    return %c0_i32, %c0_i32_0 : i32, i32
  }
  func.func @transform_4(%arg0: i32) -> (i32, i32) {
    %c0_i32 = arith.constant 0 : i32
    %c0_i32_0 = arith.constant 0 : i32
    %c0_i32_1 = arith.constant 0 : i32
    return %c0_i32, %c0_i32_0 : i32, i32
  }
  func.func @transform_5(%arg0: i32) -> (i32, i32) {
    %c0_i32 = arith.constant 0 : i32
    %c0_i32_0 = arith.constant 0 : i32
    return %arg0, %c0_i32 : i32, i32
  }
}

</mosaic_0001>

<bundles_post_ra>
// kernel: tpu_custom_call.1
= control target key start
LH: loop header
LB: loop body
LE: loop exit
PB: predicated region body
PF: predicated region fallthrough
CT: control target
= control target key end

     0   :  { %11 = vsyncpa [#allocation4], 0  ;;  %s8379_s0 = inlined_call_operand.hbm [shape: bf16[8,1280], index: 0, kind: input, shape index: {}]   ;;  %s8380_s1 = inlined_call_operand.hbm [shape: bf16[1280,1152], index: 1, kind: input, shape index: {}]   ;;  %s8381_s2 = inlined_call_operand.hbm [shape: f32[1,1152], index: 2, kind: input, shape index: {}]   ;;  %s8382_s3 = inlined_call_operand.hbm [shape: f32[1,1024], index: 3, kind: input, shape index: {}]   ;;  %s8383_s4 = inlined_call_operand.<no memory space> [shape: f32[1,1], index: 4, kind: input, shape index: {}]   ;;  %s8384_s5 = inlined_call_operand.hbm [shape: f32[8,128], index: 5, kind: output, shape index: {}]  }
   0x1   :  { %12 = vsyncpa [#allocation7], 0 }
   0x2   :  { %13 = vsyncpa [#allocation10], 0 }
   0x3   :  { %14 = vsyncpa [#allocation5], 0  ;;  %s8041_s18 = smov [#allocation6]   ;;  %s7923_s22 = scalar_lea.hbm %s8380_s1, 92160 }
   0x4   :  { %s30_s19 = sshll.u32 %s8041_s18, 4  ;;  %p7924_p0 = scmp.ne.s32.totalorder %s8380_s1, %s7923_s22  ;;  %s31_s19 = int_to_ptr.vmem [resolvable:$true] %s30_s19 }
   0x5   :  { %p7927_p1 = scmp.lt.u32.totalorder %s7923_s22, %s8380_s1 }
   0x7   :  { %p7929_p2 = pnand %p7927_p1, %p7924_p0 }
   0x9   :  { %7932 = shalt.err (!%p7929_p2)
}
   0xa   :  { %s7933_s27 = scalar_lea.vmem %s31_s19, 92160  ;;  %p7938_p4 = scmp.lt.s32.totalorder %s31_s19, %s31_s19 }
   0xb   :  { %p7934_p3 = scmp.ne.s32.totalorder %s31_s19, %s7933_s27  ;;  %p7939_p5 = scmp.lt.s32.totalorder %s7933_s27, %s7933_s27 }
   0xd   :  { %p7940_p6 = por %p7939_p5, %p7938_p4 }
   0xf   :  { %p7941_p7 = pnand %p7940_p6, %p7934_p3 }
  0x11   :  { %7944 = shalt.err (!%p7941_p7)
}
  0x12   :  { %s8042_s28 = smov 576   ;;  %s8043_s29 = smov 36  }
  0x13   :  { %36 = dma.hbm_to_vmem [thread:$0]  %s8380_s1, 92160, %s31_s19, [#allocation7], %s8042_s28, %s8042_s28, %s8043_s29  }
  0x14   :  { %s8044_s7 = smov [#allocation3]   ;;  %s8045_s9 = smov [#allocation8]  }
  0x15   :  { %s21_s8 = sshll.u32 %s8044_s7, 4  ;;  %s43_s10 = sshll.u32 %s8045_s9, 4  ;;  %s22_s8 = int_to_ptr.vmem [resolvable:$true] %s21_s8  ;;  %s44_s10 = int_to_ptr.vmem [resolvable:$true] %s43_s10 }
  0x16   :  { %s7945_s13 = scalar_lea.hbm %s8379_s0, 640 }
  0x17   :  { %p7946_p8 = scmp.ne.s32.totalorder %s8379_s0, %s7945_s13  ;;  %p7949_p9 = scmp.lt.u32.totalorder %s7945_s13, %s8379_s0 }
  0x19   :  { %p7951_p10 = pnand %p7949_p9, %p7946_p8 }
  0x1b   :  { %7954 = shalt.err (!%p7951_p10)
}
  0x1c   :  { %s7955_s1 = scalar_lea.vmem %s22_s8, 640  ;;  %p7960_p12 = scmp.lt.s32.totalorder %s22_s8, %s22_s8 }
  0x1d   :  { %p7956_p11 = scmp.ne.s32.totalorder %s22_s8, %s7955_s1  ;;  %p7961_p13 = scmp.lt.s32.totalorder %s7955_s1, %s7955_s1 }
  0x1f   :  { %p7962_p0 = por %p7961_p13, %p7960_p12 }
  0x21   :  { %p7963_p1 = pnand %p7962_p0, %p7956_p11 }
  0x23   :  { %7966 = shalt.err (!%p7963_p1)
}
  0x24   :  { %24 = dma.hbm_to_vmem [thread:$0]  %s8379_s0, 640, %s22_s8, [#allocation4]  }
  0x25   :  { %s7967_s22 = scalar_lea.hbm %s8381_s2, 144 }
  0x26   :  { %p7968_p2 = scmp.ne.s32.totalorder %s8381_s2, %s7967_s22  ;;  %p7971_p3 = scmp.lt.u32.totalorder %s7967_s22, %s8381_s2 }
  0x28   :  { %p7973_p4 = pnand %p7971_p3, %p7968_p2 }
  0x2a   :  { %7976 = shalt.err (!%p7973_p4)
}
  0x2b   :  { %s7977_s27 = scalar_lea.vmem %s44_s10, 144  ;;  %s7981_s28 = scalar_lea.vmem %s44_s10, 160 }
  0x2c   :  { %p7978_p5 = scmp.ne.s32.totalorder %s44_s10, %s7977_s27  ;;  %p7982_p6 = scmp.lt.s32.totalorder %s44_s10, %s44_s10 }
  0x2d   :  { %p7983_p7 = scmp.lt.s32.totalorder %s7981_s28, %s7977_s27 }
  0x2f   :  { %p7984_p8 = por %p7983_p7, %p7982_p6 }
  0x31   :  { %p7985_p9 = pnand %p7984_p8, %p7978_p5 }
  0x33   :  { %7988 = shalt.err (!%p7985_p9)
}
  0x34   :  { %46 = dma.hbm_to_vmem [thread:$0]  %s8381_s2, 144, %s44_s10, [#allocation7]  }
  0x35   :  { %s8046_s30 = smov [#allocation9]   ;;  %s7989_s9 = scalar_lea.hbm %s8382_s3, 128 }
  0x36   :  { %s53_s6 = sshll.u32 %s8046_s30, 4  ;;  %p7990_p10 = scmp.ne.s32.totalorder %s8382_s3, %s7989_s9  ;;  %s54_s6 = int_to_ptr.vmem [resolvable:$true] %s53_s6 }
  0x37   :  { %p7993_p11 = scmp.lt.u32.totalorder %s7989_s9, %s8382_s3 }
  0x39   :  { %p7995_p12 = pnand %p7993_p11, %p7990_p10 }
  0x3b   :  { %7998 = shalt.err (!%p7995_p12)
}
  0x3c   :  { %s7999_s15 = scalar_lea.vmem %s54_s6, 128  ;;  %p8004_p0 = scmp.lt.s32.totalorder %s54_s6, %s54_s6 }
  0x3d   :  { %p8000_p13 = scmp.ne.s32.totalorder %s54_s6, %s7999_s15  ;;  %p8005_p1 = scmp.lt.s32.totalorder %s7999_s15, %s7999_s15 }
  0x3f   :  { %p8006_p2 = por %p8005_p1, %p8004_p0 }
  0x41   :  { %p8007_p3 = pnand %p8006_p2, %p8000_p13 }
  0x43   :  { %8010 = shalt.err (!%p8007_p3)
}
  0x44   :  { %56 = dma.hbm_to_vmem [thread:$0]  %s8382_s3, 128, %s54_s6, [#allocation10]  }
  0x45   :  { %8033 = dma.done.wait [#allocation4], 640  }
  0x46   :  { %8034 = vsyncadd [#allocation4], 4294966656 }
  0x47   :  { %8035 = dma.done.wait [#allocation7], 92304  }
  0x48   :  { %8036 = vsyncadd [#allocation7], 4294874992 }
  0x49   :  { %8037 = dma.done.wait [#allocation10], 128  }
  0x4a   :  { %8038 = vsyncadd [#allocation10], 4294967168  ;;  %v6825_v0 = vld [vmem:[#allocation6 + $0x4] ss:$36 sps:$4 sm:$0xff]   ;;  %v6827_v1 = vld [vmem:[#allocation6 + $0xc] ss:$36 sps:$4 sm:$0xff]  }
  0x4b   :  { %4641 = vmatprep.subr.bf16.mxu0 %v6825_v0  ;;  %v6829_v2 = vld [vmem:[#allocation6] ss:$36 sps:$4 sm:$0xff]   ;;  %v6830_v3 = vld [vmem:[#allocation6 + $0x8] ss:$36 sps:$4 sm:$0xff]   ;;  %4846 = vmatprep.subr.bf16.mxu1 %v6827_v1  ;;  %v6833_v5 = vld [vmem:[#allocation6 + $0x54] ss:$36 sps:$4 sm:$0xff]  }
  0x4c   :  { %v6831_v4 = vld [vmem:[#allocation6 + $0x4c] ss:$36 sps:$4 sm:$0xff]   ;;  %4642 = vmatpush1.bf16.msra.mxu0 %v6829_v2  ;;  %4847 = vmatpush1.bf16.msra.mxu1 %v6830_v3  ;;  %v6837_v8 = vld [vmem:[#allocation6 + $0x94] ss:$36 sps:$4 sm:$0xff]   ;;  %v6839_v9 = vld [vmem:[#allocation6 + $0x9c] ss:$36 sps:$4 sm:$0xff]  }
  0x4d   :  { %v6835_v6 = vld [vmem:[#allocation6 + $0x48] ss:$36 sps:$4 sm:$0xff]   ;;  %4643 = vmatprep.subr.bf16.mxu0 %v6831_v4  ;;  %v6836_v7 = vld [vmem:[#allocation6 + $0x50] ss:$36 sps:$4 sm:$0xff]   ;;  %4848 = vmatprep.subr.bf16.mxu1 %v6833_v5  ;;  %v6842_v11 = vld [vmem:[#allocation6 + $0x98] ss:$36 sps:$4 sm:$0xff]  }
  0x4e   :  { %v6841_v10 = vld [vmem:[#allocation6 + $0x90] ss:$36 sps:$4 sm:$0xff]   ;;  %v6843_v12 = vld [vmem:[#allocation6 + $0xdc] ss:$36 sps:$4 sm:$0xff]   ;;  %v6845_v13 = vld [vmem:[#allocation6 + $0xe4] ss:$36 sps:$4 sm:$0xff]  }
  0x4f   :  { %v6847_v14 = vld [vmem:[#allocation6 + $0xd8] ss:$36 sps:$4 sm:$0xff]   ;;  %v6848_v15 = vld [vmem:[#allocation6 + $0xe0] ss:$36 sps:$4 sm:$0xff]   ;;  %v6851_v17 = vld [vmem:[#allocation6 + $0x12c] ss:$36 sps:$4 sm:$0xff]  }
  0x50   :  { %4644 = vmatpush1.bf16.msra.mxu0 %v6835_v6  ;;  %4849 = vmatpush1.bf16.msra.mxu1 %v6836_v7  ;;  %v6849_v16 = vld [vmem:[#allocation6 + $0x124] ss:$36 sps:$4 sm:$0xff]   ;;  %v6855_v20 = vld [vmem:[#allocation6 + $0x16c] ss:$36 sps:$4 sm:$0xff]   ;;  %v6857_v21 = vld [vmem:[#allocation6 + $0x174] ss:$36 sps:$4 sm:$0xff]  }
  0x51   :  { %4645 = vmatprep.subr.bf16.mxu0 %v6837_v8  ;;  %4850 = vmatprep.subr.bf16.mxu1 %v6839_v9  ;;  %v6853_v18 = vld [vmem:[#allocation6 + $0x120] ss:$36 sps:$4 sm:$0xff]   ;;  %v6854_v19 = vld [vmem:[#allocation6 + $0x128] ss:$36 sps:$4 sm:$0xff]   ;;  %v6860_v23 = vld [vmem:[#allocation6 + $0x170] ss:$36 sps:$4 sm:$0xff]  }
  0x52   :  { %v6859_v22 = vld [vmem:[#allocation6 + $0x168] ss:$36 sps:$4 sm:$0xff]   ;;  %v6861_v24 = vld [vmem:[#allocation6 + $0x1b4] ss:$36 sps:$4 sm:$0xff]   ;;  %v6863_v25 = vld [vmem:[#allocation6 + $0x1bc] ss:$36 sps:$4 sm:$0xff]  }
  0x53   :  { %v6865_v26 = vld [vmem:[#allocation6 + $0x1b0] ss:$36 sps:$4 sm:$0xff]   ;;  %v6866_v27 = vld [vmem:[#allocation6 + $0x1b8] ss:$36 sps:$4 sm:$0xff]   ;;  %v6869_v29 = vld [vmem:[#allocation6 + $0x204] ss:$36 sps:$4 sm:$0xff]  }
  0x54   :  { %4646 = vmatpush1.bf16.msra.mxu0 %v6841_v10  ;;  %4851 = vmatpush1.bf16.msra.mxu1 %v6842_v11  ;;  %v6867_v28 = vld [vmem:[#allocation6 + $0x1fc] ss:$36 sps:$4 sm:$0xff]   ;;  %v6873_v32 = vld [vmem:[#allocation6 + $0x244] ss:$36 sps:$4 sm:$0xff]   ;;  %v6875_v33 = vld [vmem:[#allocation6 + $0x24c] ss:$36 sps:$4 sm:$0xff]  }
  0x55   :  { %4647 = vmatprep.subr.bf16.mxu0 %v6843_v12  ;;  %4852 = vmatprep.subr.bf16.mxu1 %v6845_v13  ;;  %v6871_v30 = vld [vmem:[#allocation6 + $0x1f8] ss:$36 sps:$4 sm:$0xff]   ;;  %v6872_v31 = vld [vmem:[#allocation6 + $0x200] ss:$36 sps:$4 sm:$0xff]   ;;  %v6878_v35 = vld [vmem:[#allocation6 + $0x248] ss:$36 sps:$4 sm:$0xff]  }
  0x56   :  { %v6877_v34 = vld [vmem:[#allocation6 + $0x240] ss:$36 sps:$4 sm:$0xff]   ;;  %v6879_v36 = vld [vmem:[#allocation6 + $0x28c] ss:$36 sps:$4 sm:$0xff]   ;;  %v6881_v37 = vld [vmem:[#allocation6 + $0x294] ss:$36 sps:$4 sm:$0xff]  }
  0x57   :  { %v6883_v38 = vld [vmem:[#allocation6 + $0x288] ss:$36 sps:$4 sm:$0xff]   ;;  %v6884_v39 = vld [vmem:[#allocation6 + $0x290] ss:$36 sps:$4 sm:$0xff]   ;;  %v6887_v41 = vld [vmem:[#allocation6 + $0x2dc] ss:$36 sps:$4 sm:$0xff]  }
  0x58   :  { %4648 = vmatpush1.bf16.msra.mxu0 %v6847_v14  ;;  %4853 = vmatpush1.bf16.msra.mxu1 %v6848_v15  ;;  %v6885_v40 = vld [vmem:[#allocation6 + $0x2d4] ss:$36 sps:$4 sm:$0xff]   ;;  %v6891_v44 = vld [vmem:[#allocation6 + $0x31c] ss:$36 sps:$4 sm:$0xff]   ;;  %v6893_v45 = vld [vmem:[#allocation6 + $0x324] ss:$36 sps:$4 sm:$0xff]  }
  0x59   :  { %4649 = vmatprep.subr.bf16.mxu0 %v6849_v16  ;;  %4854 = vmatprep.subr.bf16.mxu1 %v6851_v17  ;;  %v6889_v42 = vld [vmem:[#allocation6 + $0x2d0] ss:$36 sps:$4 sm:$0xff]   ;;  %v6890_v43 = vld [vmem:[#allocation6 + $0x2d8] ss:$36 sps:$4 sm:$0xff]   ;;  %v6896_v49 = vld [vmem:[#allocation6 + $0x320] ss:$36 sps:$4 sm:$0xff]  }
  0x5a   :  { %v72_v46 = vld [vmem:[#allocation3] sm:$0xff]  ;;  %v6897_v50 = vld [vmem:[#allocation6 + $0x364] ss:$36 sps:$4 sm:$0xff]   ;;  %v6899_v51 = vld [vmem:[#allocation6 + $0x36c] ss:$36 sps:$4 sm:$0xff]   ;;  %s8047_s17 = smov [#allocation11]  }
  0x5b   :  { %v6895_v47 = vld [vmem:[#allocation6 + $0x318] ss:$36 sps:$4 sm:$0xff]   ;;  %v8126_v48 = vcombine.high %v72_v46, %v72_v46  ;;  %v6901_v52 = vld [vmem:[#allocation6 + $0x360] ss:$36 sps:$4 sm:$0xff]   ;;  %v6902_v53 = vld [vmem:[#allocation6 + $0x368] ss:$36 sps:$4 sm:$0xff]   ;;  %v8130_v5 = vcombine.low %v72_v46, %v72_v46 }
  0x5c   :  { %4650 = vmatpush1.bf16.msra.mxu0 %v6853_v18  ;;  %4855 = vmatpush1.bf16.msra.mxu1 %v6854_v19  ;;  %v6903_v54 = vld [vmem:[#allocation6 + $0x3ac] ss:$36 sps:$4 sm:$0xff]   ;;  %v6905_v55 = vld [vmem:[#allocation6 + $0x3b4] ss:$36 sps:$4 sm:$0xff]   ;;  %v6911_v59 = vld [vmem:[#allocation6 + $0x3fc] ss:$36 sps:$4 sm:$0xff]  }
  0x5d   :  { %4651 = vmatprep.subr.bf16.mxu0 %v6855_v20  ;;  %4856 = vmatprep.subr.bf16.mxu1 %v6857_v21  ;;  %v6907_v56 = vld [vmem:[#allocation6 + $0x3a8] ss:$36 sps:$4 sm:$0xff]   ;;  %v6908_v57 = vld [vmem:[#allocation6 + $0x3b0] ss:$36 sps:$4 sm:$0xff]   ;;  %v6914_v61 = vld [vmem:[#allocation6 + $0x3f8] ss:$36 sps:$4 sm:$0xff]  }
  0x5e   :  { %4673 = vmatprep.mubr.bf16.mxu0 %v8126_v48  ;;  %4878 = vmatprep.mubr.bf16.mxu1 %v8126_v48  ;;  %v6909_v58 = vld [vmem:[#allocation6 + $0x3f4] ss:$36 sps:$4 sm:$0xff]   ;;  %v6915_v62 = vld [vmem:[#allocation6 + $0x43c] ss:$36 sps:$4 sm:$0xff]   ;;  %v6917_v63 = vld [vmem:[#allocation6 + $0x444] ss:$36 sps:$4 sm:$0xff]  }
  0x5f   :  { %v6913_v60 = vld [vmem:[#allocation6 + $0x3f0] ss:$36 sps:$4 sm:$0xff]   ;;  %v6919_v0 = vld [vmem:[#allocation6 + $0x438] ss:$36 sps:$4 sm:$0xff]   ;;  %v6920_v1 = vld [vmem:[#allocation6 + $0x440] ss:$36 sps:$4 sm:$0xff]  }
  0x60   :  { %4652 = vmatpush1.bf16.msra.mxu0 %v6859_v22  ;;  %4857 = vmatpush1.bf16.msra.mxu1 %v6860_v23  ;;  %v6924_v2 = vld [vmem:[#allocation6 + $0x484] ss:$36 sps:$4 sm:$0xff]   ;;  %v6927_v3 = vld [vmem:[#allocation6 + $0x48c] ss:$36 sps:$4 sm:$0xff]   ;;  %v6934_v8 = vld [vmem:[#allocation6 + $0x4d4] ss:$36 sps:$4 sm:$0xff]  }
  0x61   :  { %4653 = vmatprep.subr.bf16.mxu0 %v6861_v24  ;;  %4858 = vmatprep.subr.bf16.mxu1 %v6863_v25  ;;  %v6922_v4 = vld [vmem:[#allocation6 + $0x480] ss:$36 sps:$4 sm:$0xff]   ;;  %v6925_v6 = vld [vmem:[#allocation6 + $0x488] ss:$36 sps:$4 sm:$0xff]   ;;  %v6932_v10 = vld [vmem:[#allocation6 + $0x4d0] ss:$36 sps:$4 sm:$0xff]  }
  0x62   :  { %v6931_v7 = vld [vmem:[#allocation6 + $0x4cc] ss:$36 sps:$4 sm:$0xff]   ;;  %v6937_v11 = vld [vmem:[#allocation6 + $0x514] ss:$36 sps:$4 sm:$0xff]   ;;  %v6940_v12 = vld [vmem:[#allocation6 + $0x51c] ss:$36 sps:$4 sm:$0xff]  }
  0x63   :  { %v6929_v9 = vld [vmem:[#allocation6 + $0x4c8] ss:$36 sps:$4 sm:$0xff]   ;;  %v6935_v13 = vld [vmem:[#allocation6 + $0x510] ss:$36 sps:$4 sm:$0xff]   ;;  %v6938_v14 = vld [vmem:[#allocation6 + $0x518] ss:$36 sps:$4 sm:$0xff]  }
  0x64   :  { %4654 = vmatpush1.bf16.msra.mxu0 %v6865_v26  ;;  %4859 = vmatpush1.bf16.msra.mxu1 %v6866_v27  ;;  %v6943_v15 = vld [vmem:[#allocation6 + $0x55c] ss:$36 sps:$4 sm:$0xff]   ;;  %v6946_v16 = vld [vmem:[#allocation6 + $0x564] ss:$36 sps:$4 sm:$0xff]   ;;  %v6952_v20 = vld [vmem:[#allocation6 + $0x5ac] ss:$36 sps:$4 sm:$0xff]  }
  0x65   :  { %4655 = vmatprep.subr.bf16.mxu0 %v6867_v28  ;;  %4860 = vmatprep.subr.bf16.mxu1 %v6869_v29  ;;  %v6941_v17 = vld [vmem:[#allocation6 + $0x558] ss:$36 sps:$4 sm:$0xff]   ;;  %v6944_v18 = vld [vmem:[#allocation6 + $0x560] ss:$36 sps:$4 sm:$0xff]   ;;  %v6950_v22 = vld [vmem:[#allocation6 + $0x5a8] ss:$36 sps:$4 sm:$0xff]  }
  0x66   :  { %v6949_v19 = vld [vmem:[#allocation6 + $0x5a4] ss:$36 sps:$4 sm:$0xff]   ;;  %v6955_v23 = vld [vmem:[#allocation6 + $0x5ec] ss:$36 sps:$4 sm:$0xff]   ;;  %v6958_v24 = vld [vmem:[#allocation6 + $0x5f4] ss:$36 sps:$4 sm:$0xff]  }
  0x67   :  { %v6947_v21 = vld [vmem:[#allocation6 + $0x5a0] ss:$36 sps:$4 sm:$0xff]   ;;  %v6953_v25 = vld [vmem:[#allocation6 + $0x5e8] ss:$36 sps:$4 sm:$0xff]   ;;  %v6956_v26 = vld [vmem:[#allocation6 + $0x5f0] ss:$36 sps:$4 sm:$0xff]  }
  0x68   :  { %4656 = vmatpush1.bf16.msra.mxu0 %v6871_v30  ;;  %4861 = vmatpush1.bf16.msra.mxu1 %v6872_v31  ;;  %v6961_v27 = vld [vmem:[#allocation6 + $0x634] ss:$36 sps:$4 sm:$0xff]   ;;  %v6964_v28 = vld [vmem:[#allocation6 + $0x63c] ss:$36 sps:$4 sm:$0xff]   ;;  %s5894_s1 = sshll.u32 %s8047_s17, 4  ;;  %s5895_s1 = int_to_ptr.vmem [resolvable:$true] %s5894_s1 }
  0x69   :  { %4657 = vmatprep.subr.bf16.mxu0 %v6873_v32  ;;  %4862 = vmatprep.subr.bf16.mxu1 %v6875_v33  ;;  %v8134_v29 = vld [vmem:[#allocation3 + $0x8] sm:$0xff]  ;;  %v6959_v31 = vld [vmem:[#allocation6 + $0x630] ss:$36 sps:$4 sm:$0xff]   ;;  %v6962_v32 = vld [vmem:[#allocation6 + $0x638] ss:$36 sps:$4 sm:$0xff]   ;;  %s8011_s18 = scalar_lea.vmem %s5895_s1, 128  ;;  %p8016_p5 = scmp.lt.s32.totalorder %s5895_s1, %s5895_s1 }
  0x6a   :  { %v8138_v30 = vcombine.high %v8134_v29, %v8134_v29  ;;  %v6967_v33 = vld [vmem:[#allocation6 + $0x67c] ss:$36 sps:$4 sm:$0xff]   ;;  %p8012_p4 = scmp.ne.s32.totalorder %s5895_s1, %s8011_s18  ;;  %p8017_p6 = scmp.lt.s32.totalorder %s8011_s18, %s8011_s18 }
  0x6b   :  { %v6988_v46 = vld [vmem:[#allocation6 + $0x75c] ss:$36 sps:$4 sm:$0xff]  }
  0x6c   :  { %4658 = vmatpush1.bf16.msra.mxu0 %v6877_v34  ;;  %4863 = vmatpush1.bf16.msra.mxu1 %v6878_v35  ;;  %v6970_v34 = vld [vmem:[#allocation6 + $0x684] ss:$36 sps:$4 sm:$0xff]   ;;  %v6965_v35 = vld [vmem:[#allocation6 + $0x678] ss:$36 sps:$4 sm:$0xff]   ;;  %p8018_p7 = por %p8017_p6, %p8016_p5 }
  0x6d   :  { %4659 = vmatprep.subr.bf16.mxu0 %v6879_v36  ;;  %4864 = vmatprep.subr.bf16.mxu1 %v6881_v37  ;;  %v6968_v36 = vld [vmem:[#allocation6 + $0x680] ss:$36 sps:$4 sm:$0xff]  }
  0x6e   :  { %v6973_v37 = vld [vmem:[#allocation6 + $0x6c4] ss:$36 sps:$4 sm:$0xff]   ;;  %p8019_p8 = pnand %p8018_p7, %p8012_p4 }
  0x70   :  { %4660 = vmatpush1.bf16.msra.mxu0 %v6883_v38  ;;  %4865 = vmatpush1.bf16.msra.mxu1 %v6884_v39  ;;  %v6976_v38 = vld [vmem:[#allocation6 + $0x6cc] ss:$36 sps:$4 sm:$0xff]   ;;  %v6971_v39 = vld [vmem:[#allocation6 + $0x6c0] ss:$36 sps:$4 sm:$0xff]  }
  0x71   :  { %4661 = vmatprep.subr.bf16.mxu0 %v6885_v40  ;;  %4866 = vmatprep.subr.bf16.mxu1 %v6887_v41  ;;  %v6974_v40 = vld [vmem:[#allocation6 + $0x6c8] ss:$36 sps:$4 sm:$0xff]  }
  0x72   :  { %v6979_v41 = vld [vmem:[#allocation6 + $0x70c] ss:$36 sps:$4 sm:$0xff]  }
  0x74   :  { %4662 = vmatpush1.bf16.msra.mxu0 %v6889_v42  ;;  %4867 = vmatpush1.bf16.msra.mxu1 %v6890_v43  ;;  %v6982_v42 = vld [vmem:[#allocation6 + $0x714] ss:$36 sps:$4 sm:$0xff]   ;;  %v6977_v43 = vld [vmem:[#allocation6 + $0x708] ss:$36 sps:$4 sm:$0xff]  }
  0x75   :  { %4663 = vmatprep.subr.bf16.mxu0 %v6891_v44  ;;  %4868 = vmatprep.subr.bf16.mxu1 %v6893_v45  ;;  %v6980_v44 = vld [vmem:[#allocation6 + $0x710] ss:$36 sps:$4 sm:$0xff]  }
  0x76   :  { %v6985_v45 = vld [vmem:[#allocation6 + $0x754] ss:$36 sps:$4 sm:$0xff]  }
  0x78   :  { %4664 = vmatpush1.bf16.msra.mxu0 %v6895_v47  ;;  %4869 = vmatpush1.bf16.msra.mxu1 %v6896_v49  ;;  %v6983_v47 = vld [vmem:[#allocation6 + $0x750] ss:$36 sps:$4 sm:$0xff]   ;;  %v6986_v49 = vld [vmem:[#allocation6 + $0x758] ss:$36 sps:$4 sm:$0xff]  }
  0x79   :  { %4665 = vmatprep.subr.bf16.mxu0 %v6897_v50  ;;  %4870 = vmatprep.subr.bf16.mxu1 %v6899_v51  ;;  %v6991_v50 = vld [vmem:[#allocation6 + $0x79c] ss:$36 sps:$4 sm:$0xff]   ;;  %v6994_v51 = vld [vmem:[#allocation6 + $0x7a4] ss:$36 sps:$4 sm:$0xff]  }
  0x7c   :  { %4666 = vmatpush1.bf16.msra.mxu0 %v6901_v52  ;;  %4871 = vmatpush1.bf16.msra.mxu1 %v6902_v53  ;;  %v6989_v52 = vld [vmem:[#allocation6 + $0x798] ss:$36 sps:$4 sm:$0xff]   ;;  %v6992_v53 = vld [vmem:[#allocation6 + $0x7a0] ss:$36 sps:$4 sm:$0xff]  }
  0x7d   :  { %4667 = vmatprep.subr.bf16.mxu0 %v6903_v54  ;;  %4872 = vmatprep.subr.bf16.mxu1 %v6905_v55  ;;  %v6997_v54 = vld [vmem:[#allocation6 + $0x7e4] ss:$36 sps:$4 sm:$0xff]   ;;  %v7000_v55 = vld [vmem:[#allocation6 + $0x7ec] ss:$36 sps:$4 sm:$0xff]  }
  0x80   :  { %4668 = vmatpush1.bf16.msra.mxu0 %v6907_v56  ;;  %4873 = vmatpush1.bf16.msra.mxu1 %v6908_v57  ;;  %v6995_v56 = vld [vmem:[#allocation6 + $0x7e0] ss:$36 sps:$4 sm:$0xff]   ;;  %v6998_v57 = vld [vmem:[#allocation6 + $0x7e8] ss:$36 sps:$4 sm:$0xff]  }
  0x81   :  { %4669 = vmatprep.subr.bf16.mxu0 %v6909_v58  ;;  %4874 = vmatprep.subr.bf16.mxu1 %v6911_v59  ;;  %v7003_v58 = vld [vmem:[#allocation6 + $0x82c] ss:$36 sps:$4 sm:$0xff]   ;;  %v7006_v59 = vld [vmem:[#allocation6 + $0x834] ss:$36 sps:$4 sm:$0xff]  }
  0x84   :  { %4670 = vmatpush1.bf16.msra.mxu0 %v6913_v60  ;;  %4875 = vmatpush1.bf16.msra.mxu1 %v6914_v61  ;;  %v7001_v60 = vld [vmem:[#allocation6 + $0x828] ss:$36 sps:$4 sm:$0xff]   ;;  %v7004_v61 = vld [vmem:[#allocation6 + $0x830] ss:$36 sps:$4 sm:$0xff]  }
  0x85   :  { %4671 = vmatprep.subr.bf16.mxu0 %v6915_v62  ;;  %4876 = vmatprep.subr.bf16.mxu1 %v6917_v63  ;;  %v7009_v62 = vld [vmem:[#allocation6 + $0x874] ss:$36 sps:$4 sm:$0xff]   ;;  %v7012_v63 = vld [vmem:[#allocation6 + $0x87c] ss:$36 sps:$4 sm:$0xff]  }
  0x88   :  { %4672 = vmatpush1.bf16.msra.mxu0 %v6919_v0  ;;  %4877 = vmatpush1.bf16.msra.mxu1 %v6920_v1  ;;  %v7007_v0 = vld [vmem:[#allocation6 + $0x870] ss:$36 sps:$4 sm:$0xff]   ;;  %v7010_v1 = vld [vmem:[#allocation6 + $0x878] ss:$36 sps:$4 sm:$0xff]  }
  0x89   :  { %4682 = vmatprep.subr.bf16.mxu0 %v6924_v2  ;;  %4887 = vmatprep.subr.bf16.mxu1 %v6927_v3  ;;  %v7015_v2 = vld [vmem:[#allocation6 + $0x8bc] ss:$36 sps:$4 sm:$0xff]   ;;  %v7018_v3 = vld [vmem:[#allocation6 + $0x8c4] ss:$36 sps:$4 sm:$0xff]  }
  0x8b   :  { %4674 = vmatmul.mubr.bf16.vlgmr.msra.gmra.mrb[0].mxu0 %v8130_v5  ;;  %4879 = vmatmul.mubr.bf16.vlgmr.msra.gmra.mrb[0].mxu1 %v8130_v5 }
  0x8c   :  { %4683 = vmatpush1.bf16.msra.mxu0 %v6922_v4  ;;  %4888 = vmatpush1.bf16.msra.mxu1 %v6925_v6  ;;  %v7013_v4 = vld [vmem:[#allocation6 + $0x8b8] ss:$36 sps:$4 sm:$0xff]   ;;  %v7016_v6 = vld [vmem:[#allocation6 + $0x8c0] ss:$36 sps:$4 sm:$0xff]  }
  0x8d   :  { %4684 = vmatprep.subr.bf16.mxu0 %v6931_v7  ;;  %4889 = vmatprep.subr.bf16.mxu1 %v6934_v8  ;;  %v7022_v7 = vld [vmem:[#allocation6 + $0x904] ss:$36 sps:$4 sm:$0xff]   ;;  %v7025_v8 = vld [vmem:[#allocation6 + $0x90c] ss:$36 sps:$4 sm:$0xff]  }
  0x8e   :  { %4714 = vmatprep.mubr.bf16.mxu0 %v8138_v30  ;;  %4919 = vmatprep.mubr.bf16.mxu1 %v8138_v30 }
  0x90   :  { %4685 = vmatpush1.bf16.msra.mxu0 %v6929_v9  ;;  %4890 = vmatpush1.bf16.msra.mxu1 %v6932_v10  ;;  %v7020_v9 = vld [vmem:[#allocation6 + $0x900] ss:$36 sps:$4 sm:$0xff]   ;;  %v8144_v10 = vcombine.low %v8134_v29, %v8134_v29  ;;  %v7048_v29 = vld [vmem:[#allocation6 + $0xa28] ss:$36 sps:$4 sm:$0xff]  }
  0x91   :  { %4686 = vmatprep.subr.bf16.mxu0 %v6937_v11  ;;  %4891 = vmatprep.subr.bf16.mxu1 %v6940_v12  ;;  %v7023_v11 = vld [vmem:[#allocation6 + $0x908] ss:$36 sps:$4 sm:$0xff]  }
  0x92   :  { %v7029_v12 = vld [vmem:[#allocation6 + $0x94c] ss:$36 sps:$4 sm:$0xff]  }
  0x94   :  { %4687 = vmatpush1.bf16.msra.mxu0 %v6935_v13  ;;  %4892 = vmatpush1.bf16.msra.mxu1 %v6938_v14  ;;  %v8146_v13 = vld [vmem:[#allocation3 + $0x10] sm:$0xff]  ;;  %v7032_v14 = vld [vmem:[#allocation6 + $0x954] ss:$36 sps:$4 sm:$0xff]  }
  0x95   :  { %4688 = vmatprep.subr.bf16.mxu0 %v6943_v15  ;;  %4893 = vmatprep.subr.bf16.mxu1 %v6946_v16  ;;  %v8150_v15 = vcombine.high %v8146_v13, %v8146_v13  ;;  %v7027_v16 = vld [vmem:[#allocation6 + $0x948] ss:$36 sps:$4 sm:$0xff]  }
  0x98   :  { %4689 = vmatpush1.bf16.msra.mxu0 %v6941_v17  ;;  %4894 = vmatpush1.bf16.msra.mxu1 %v6944_v18  ;;  %v7030_v17 = vld [vmem:[#allocation6 + $0x950] ss:$36 sps:$4 sm:$0xff]  }
  0x99   :  { %4690 = vmatprep.subr.bf16.mxu0 %v6949_v19  ;;  %4895 = vmatprep.subr.bf16.mxu1 %v6952_v20  ;;  %v7035_v18 = vld [vmem:[#allocation6 + $0x994] ss:$36 sps:$4 sm:$0xff]   ;;  %v7038_v19 = vld [vmem:[#allocation6 + $0x99c] ss:$36 sps:$4 sm:$0xff]  }
  0x9a   :  { %v7033_v20 = vld [vmem:[#allocation6 + $0x990] ss:$36 sps:$4 sm:$0xff]  }
  0x9c   :  { %4691 = vmatpush1.bf16.msra.mxu0 %v6947_v21  ;;  %4896 = vmatpush1.bf16.msra.mxu1 %v6950_v22  ;;  %v7036_v21 = vld [vmem:[#allocation6 + $0x998] ss:$36 sps:$4 sm:$0xff]  }
  0x9d   :  { %4692 = vmatprep.subr.bf16.mxu0 %v6955_v23  ;;  %4897 = vmatprep.subr.bf16.mxu1 %v6958_v24  ;;  %v7041_v22 = vld [vmem:[#allocation6 + $0x9dc] ss:$36 sps:$4 sm:$0xff]   ;;  %v7044_v23 = vld [vmem:[#allocation6 + $0x9e4] ss:$36 sps:$4 sm:$0xff]  }
  0x9e   :  { %v7039_v24 = vld [vmem:[#allocation6 + $0x9d8] ss:$36 sps:$4 sm:$0xff]  }
  0xa0   :  { %4693 = vmatpush1.bf16.msra.mxu0 %v6953_v25  ;;  %4898 = vmatpush1.bf16.msra.mxu1 %v6956_v26  ;;  %v7042_v25 = vld [vmem:[#allocation6 + $0x9e0] ss:$36 sps:$4 sm:$0xff]  }
  0xa1   :  { %4694 = vmatprep.subr.bf16.mxu0 %v6961_v27  ;;  %4899 = vmatprep.subr.bf16.mxu1 %v6964_v28  ;;  %v7047_v26 = vld [vmem:[#allocation6 + $0xa24] ss:$36 sps:$4 sm:$0xff]   ;;  %v7050_v27 = vld [vmem:[#allocation6 + $0xa2c] ss:$36 sps:$4 sm:$0xff]  }
  0xa2   :  { %v7045_v28 = vld [vmem:[#allocation6 + $0xa20] ss:$36 sps:$4 sm:$0xff]  }
  0xa4   :  { %4695 = vmatpush1.bf16.msra.mxu0 %v6959_v31  ;;  %4900 = vmatpush1.bf16.msra.mxu1 %v6962_v32  ;;  %v7053_v31 = vld [vmem:[#allocation6 + $0xa6c] ss:$36 sps:$4 sm:$0xff]   ;;  %v7056_v32 = vld [vmem:[#allocation6 + $0xa74] ss:$36 sps:$4 sm:$0xff]  }
  0xa5   :  { %4696 = vmatprep.subr.bf16.mxu0 %v6967_v33  ;;  %4901 = vmatprep.subr.bf16.mxu1 %v6970_v34  ;;  %v7051_v33 = vld [vmem:[#allocation6 + $0xa68] ss:$36 sps:$4 sm:$0xff]   ;;  %v7054_v34 = vld [vmem:[#allocation6 + $0xa70] ss:$36 sps:$4 sm:$0xff]  }
  0xa8   :  { %4697 = vmatpush1.bf16.msra.mxu0 %v6965_v35  ;;  %4902 = vmatpush1.bf16.msra.mxu1 %v6968_v36  ;;  %v7059_v35 = vld [vmem:[#allocation6 + $0xab4] ss:$36 sps:$4 sm:$0xff]   ;;  %v7062_v36 = vld [vmem:[#allocation6 + $0xabc] ss:$36 sps:$4 sm:$0xff]  }
  0xa9   :  { %4698 = vmatprep.subr.bf16.mxu0 %v6973_v37  ;;  %4903 = vmatprep.subr.bf16.mxu1 %v6976_v38  ;;  %v7057_v37 = vld [vmem:[#allocation6 + $0xab0] ss:$36 sps:$4 sm:$0xff]   ;;  %v7060_v38 = vld [vmem:[#allocation6 + $0xab8] ss:$36 sps:$4 sm:$0xff]  }
  0xac   :  { %4699 = vmatpush1.bf16.msra.mxu0 %v6971_v39  ;;  %4904 = vmatpush1.bf16.msra.mxu1 %v6974_v40  ;;  %v7065_v39 = vld [vmem:[#allocation6 + $0xafc] ss:$36 sps:$4 sm:$0xff]   ;;  %v7068_v40 = vld [vmem:[#allocation6 + $0xb04] ss:$36 sps:$4 sm:$0xff]  }
  0xad   :  { %4700 = vmatprep.subr.bf16.mxu0 %v6979_v41  ;;  %4905 = vmatprep.subr.bf16.mxu1 %v6982_v42  ;;  %v7063_v41 = vld [vmem:[#allocation6 + $0xaf8] ss:$36 sps:$4 sm:$0xff]   ;;  %v7066_v42 = vld [vmem:[#allocation6 + $0xb00] ss:$36 sps:$4 sm:$0xff]  }
  0xb0   :  { %4701 = vmatpush1.bf16.msra.mxu0 %v6977_v43  ;;  %4906 = vmatpush1.bf16.msra.mxu1 %v6980_v44  ;;  %v7071_v43 = vld [vmem:[#allocation6 + $0xb44] ss:$36 sps:$4 sm:$0xff]   ;;  %v7074_v44 = vld [vmem:[#allocation6 + $0xb4c] ss:$36 sps:$4 sm:$0xff]  }
  0xb1   :  { %4702 = vmatprep.subr.bf16.mxu0 %v6985_v45  ;;  %4907 = vmatprep.subr.bf16.mxu1 %v6988_v46  ;;  %v7069_v45 = vld [vmem:[#allocation6 + $0xb40] ss:$36 sps:$4 sm:$0xff]   ;;  %v7072_v46 = vld [vmem:[#allocation6 + $0xb48] ss:$36 sps:$4 sm:$0xff]  }
  0xb4   :  { %4703 = vmatpush1.bf16.msra.mxu0 %v6983_v47  ;;  %4908 = vmatpush1.bf16.msra.mxu1 %v6986_v49  ;;  %v7077_v47 = vld [vmem:[#allocation6 + $0xb8c] ss:$36 sps:$4 sm:$0xff]   ;;  %v7080_v49 = vld [vmem:[#allocation6 + $0xb94] ss:$36 sps:$4 sm:$0xff]  }
  0xb5   :  { %4704 = vmatprep.subr.bf16.mxu0 %v6991_v50  ;;  %4909 = vmatprep.subr.bf16.mxu1 %v6994_v51  ;;  %v7075_v50 = vld [vmem:[#allocation6 + $0xb88] ss:$36 sps:$4 sm:$0xff]   ;;  %v7078_v51 = vld [vmem:[#allocation6 + $0xb90] ss:$36 sps:$4 sm:$0xff]  }
  0xb8   :  { %4705 = vmatpush1.bf16.msra.mxu0 %v6989_v52  ;;  %4910 = vmatpush1.bf16.msra.mxu1 %v6992_v53  ;;  %v7083_v52 = vld [vmem:[#allocation6 + $0xbd4] ss:$36 sps:$4 sm:$0xff]   ;;  %v7086_v53 = vld [vmem:[#allocation6 + $0xbdc] ss:$36 sps:$4 sm:$0xff]  }
  0xb9   :  { %4706 = vmatprep.subr.bf16.mxu0 %v6997_v54  ;;  %4911 = vmatprep.subr.bf16.mxu1 %v7000_v55  ;;  %v7081_v54 = vld [vmem:[#allocation6 + $0xbd0] ss:$36 sps:$4 sm:$0xff]   ;;  %v7084_v55 = vld [vmem:[#allocation6 + $0xbd8] ss:$36 sps:$4 sm:$0xff]  }
  0xbc   :  { %4707 = vmatpush1.bf16.msra.mxu0 %v6995_v56  ;;  %4912 = vmatpush1.bf16.msra.mxu1 %v6998_v57  ;;  %v7089_v56 = vld [vmem:[#allocation6 + $0xc1c] ss:$36 sps:$4 sm:$0xff]   ;;  %v7092_v57 = vld [vmem:[#allocation6 + $0xc24] ss:$36 sps:$4 sm:$0xff]  }
  0xbd   :  { %4708 = vmatprep.subr.bf16.mxu0 %v7003_v58  ;;  %4913 = vmatprep.subr.bf16.mxu1 %v7006_v59  ;;  %v7087_v58 = vld [vmem:[#allocation6 + $0xc18] ss:$36 sps:$4 sm:$0xff]   ;;  %v7090_v59 = vld [vmem:[#allocation6 + $0xc20] ss:$36 sps:$4 sm:$0xff]  }
  0xc0   :  { %4709 = vmatpush1.bf16.msra.mxu0 %v7001_v60  ;;  %4914 = vmatpush1.bf16.msra.mxu1 %v7004_v61  ;;  %v7095_v60 = vld [vmem:[#allocation6 + $0xc64] ss:$36 sps:$4 sm:$0xff]   ;;  %v7098_v61 = vld [vmem:[#allocation6 + $0xc6c] ss:$36 sps:$4 sm:$0xff]  }
  0xc1   :  { %4710 = vmatprep.subr.bf16.mxu0 %v7009_v62  ;;  %4915 = vmatprep.subr.bf16.mxu1 %v7012_v63  ;;  %v7093_v62 = vld [vmem:[#allocation6 + $0xc60] ss:$36 sps:$4 sm:$0xff]   ;;  %v7096_v63 = vld [vmem:[#allocation6 + $0xc68] ss:$36 sps:$4 sm:$0xff]  }
  0xc4   :  { %4711 = vmatpush1.bf16.msra.mxu0 %v7007_v0  ;;  %4916 = vmatpush1.bf16.msra.mxu1 %v7010_v1  ;;  %v7101_v0 = vld [vmem:[#allocation6 + $0xcac] ss:$36 sps:$4 sm:$0xff]   ;;  %v7104_v1 = vld [vmem:[#allocation6 + $0xcb4] ss:$36 sps:$4 sm:$0xff]  }
  0xc5   :  { %4712 = vmatprep.subr.bf16.mxu0 %v7015_v2  ;;  %4917 = vmatprep.subr.bf16.mxu1 %v7018_v3  ;;  %v7099_v2 = vld [vmem:[#allocation6 + $0xca8] ss:$36 sps:$4 sm:$0xff]   ;;  %v7102_v3 = vld [vmem:[#allocation6 + $0xcb0] ss:$36 sps:$4 sm:$0xff]  }
  0xc8   :  { %4713 = vmatpush1.bf16.msra.mxu0 %v7013_v4  ;;  %4918 = vmatpush1.bf16.msra.mxu1 %v7016_v6  ;;  %v7107_v4 = vld [vmem:[#allocation6 + $0xcf4] ss:$36 sps:$4 sm:$0xff]   ;;  %v7110_v6 = vld [vmem:[#allocation6 + $0xcfc] ss:$36 sps:$4 sm:$0xff]  }
  0xc9   :  { %4723 = vmatprep.subr.bf16.mxu0 %v7022_v7  ;;  %4928 = vmatprep.subr.bf16.mxu1 %v7025_v8  ;;  %v7105_v7 = vld [vmem:[#allocation6 + $0xcf0] ss:$36 sps:$4 sm:$0xff]   ;;  %v7108_v8 = vld [vmem:[#allocation6 + $0xcf8] ss:$36 sps:$4 sm:$0xff]  }
  0xcb   :  { %4715 = vmatmul.mubr.bf16.vlgmr.msra.gmra.mrb[0].mxu0 %v8144_v10  ;;  %4920 = vmatmul.mubr.bf16.vlgmr.msra.gmra.mrb[0].mxu1 %v8144_v10 }
  0xcc   :  { %4724 = vmatpush1.bf16.msra.mxu0 %v7020_v9  ;;  %4929 = vmatpush1.bf16.msra.mxu1 %v7023_v11  ;;  %v7113_v9 = vld [vmem:[#allocation6 + $0xd3c] ss:$36 sps:$4 sm:$0xff]   ;;  %v7116_v11 = vld [vmem:[#allocation6 + $0xd44] ss:$36 sps:$4 sm:$0xff]  }
  0xcd   :  { %4725 = vmatprep.subr.bf16.mxu0 %v7029_v12  ;;  %4930 = vmatprep.subr.bf16.mxu1 %v7032_v14  ;;  %v7111_v12 = vld [vmem:[#allocation6 + $0xd38] ss:$36 sps:$4 sm:$0xff]   ;;  %v7114_v14 = vld [vmem:[#allocation6 + $0xd40] ss:$36 sps:$4 sm:$0xff]  }
  0xce   :  { %4755 = vmatprep.mubr.bf16.mxu0 %v8150_v15  ;;  %4960 = vmatprep.mubr.bf16.mxu1 %v8150_v15 }
  0xd0   :  { %4726 = vmatpush1.bf16.msra.mxu0 %v7027_v16  ;;  %4931 = vmatpush1.bf16.msra.mxu1 %v7030_v17  ;;  %v7120_v16 = vld [vmem:[#allocation6 + $0xd84] ss:$36 sps:$4 sm:$0xff]   ;;  %v7123_v17 = vld [vmem:[#allocation6 + $0xd8c] ss:$36 sps:$4 sm:$0xff]  }
  0xd1   :  { %4727 = vmatprep.subr.bf16.mxu0 %v7035_v18  ;;  %4932 = vmatprep.subr.bf16.mxu1 %v7038_v19  ;;  %v7118_v18 = vld [vmem:[#allocation6 + $0xd80] ss:$36 sps:$4 sm:$0xff]   ;;  %v7121_v19 = vld [vmem:[#allocation6 + $0xd88] ss:$36 sps:$4 sm:$0xff]  }
  0xd4   :  { %4728 = vmatpush1.bf16.msra.mxu0 %v7033_v20  ;;  %4933 = vmatpush1.bf16.msra.mxu1 %v7036_v21  ;;  %v8158_v20 = vcombine.low %v8146_v13, %v8146_v13  ;;  %v8160_v21 = vld [vmem:[#allocation3 + $0x18] sm:$0xff] }
  0xd5   :  { %4729 = vmatprep.subr.bf16.mxu0 %v7041_v22  ;;  %4934 = vmatprep.subr.bf16.mxu1 %v7044_v23  ;;  %v7127_v22 = vld [vmem:[#allocation6 + $0xdcc] ss:$36 sps:$4 sm:$0xff]   ;;  %v7130_v23 = vld [vmem:[#allocation6 + $0xdd4] ss:$36 sps:$4 sm:$0xff]  }
  0xd6   :  { %v7133_v13 = vld [vmem:[#allocation6 + $0xe14] ss:$36 sps:$4 sm:$0xff]  }
  0xd8   :  { %4730 = vmatpush1.bf16.msra.mxu0 %v7039_v24  ;;  %4935 = vmatpush1.bf16.msra.mxu1 %v7042_v25  ;;  %v8164_v24 = vcombine.high %v8160_v21, %v8160_v21  ;;  %v7125_v25 = vld [vmem:[#allocation6 + $0xdc8] ss:$36 sps:$4 sm:$0xff]  }
  0xd9   :  { %4731 = vmatprep.subr.bf16.mxu0 %v7047_v26  ;;  %4936 = vmatprep.subr.bf16.mxu1 %v7050_v27  ;;  %v7128_v26 = vld [vmem:[#allocation6 + $0xdd0] ss:$36 sps:$4 sm:$0xff]   ;;  %v7136_v27 = vld [vmem:[#allocation6 + $0xe1c] ss:$36 sps:$4 sm:$0xff]  }
  0xdc   :  { %4732 = vmatpush1.bf16.msra.mxu0 %v7045_v28  ;;  %4937 = vmatpush1.bf16.msra.mxu1 %v7048_v29  ;;  %v7131_v28 = vld [vmem:[#allocation6 + $0xe10] ss:$36 sps:$4 sm:$0xff]   ;;  %v7134_v29 = vld [vmem:[#allocation6 + $0xe18] ss:$36 sps:$4 sm:$0xff]  }
  0xdd   :  { %4733 = vmatprep.subr.bf16.mxu0 %v7053_v31  ;;  %4938 = vmatprep.subr.bf16.mxu1 %v7056_v32  ;;  %v7139_v31 = vld [vmem:[#allocation6 + $0xe5c] ss:$36 sps:$4 sm:$0xff]   ;;  %v7142_v32 = vld [vmem:[#allocation6 + $0xe64] ss:$36 sps:$4 sm:$0xff]  }
  0xe0   :  { %4734 = vmatpush1.bf16.msra.mxu0 %v7051_v33  ;;  %4939 = vmatpush1.bf16.msra.mxu1 %v7054_v34  ;;  %v7137_v33 = vld [vmem:[#allocation6 + $0xe58] ss:$36 sps:$4 sm:$0xff]   ;;  %v7140_v34 = vld [vmem:[#allocation6 + $0xe60] ss:$36 sps:$4 sm:$0xff]  }
  0xe1   :  { %4735 = vmatprep.subr.bf16.mxu0 %v7059_v35  ;;  %4940 = vmatprep.subr.bf16.mxu1 %v7062_v36  ;;  %v7145_v35 = vld [vmem:[#allocation6 + $0xea4] ss:$36 sps:$4 sm:$0xff]   ;;  %v7148_v36 = vld [vmem:[#allocation6 + $0xeac] ss:$36 sps:$4 sm:$0xff]  }
  0xe4   :  { %4736 = vmatpush1.bf16.msra.mxu0 %v7057_v37  ;;  %4941 = vmatpush1.bf16.msra.mxu1 %v7060_v38  ;;  %v7143_v37 = vld [vmem:[#allocation6 + $0xea0] ss:$36 sps:$4 sm:$0xff]   ;;  %v7146_v38 = vld [vmem:[#allocation6 + $0xea8] ss:$36 sps:$4 sm:$0xff]  }
  0xe5   :  { %4737 = vmatprep.subr.bf16.mxu0 %v7065_v39  ;;  %4942 = vmatprep.subr.bf16.mxu1 %v7068_v40  ;;  %v7151_v39 = vld [vmem:[#allocation6 + $0xeec] ss:$36 sps:$4 sm:$0xff]   ;;  %v7154_v40 = vld [vmem:[#allocation6 + $0xef4] ss:$36 sps:$4 sm:$0xff]  }
  0xe8   :  { %4738 = vmatpush1.bf16.msra.mxu0 %v7063_v41  ;;  %4943 = vmatpush1.bf16.msra.mxu1 %v7066_v42  ;;  %v7149_v41 = vld [vmem:[#allocation6 + $0xee8] ss:$36 sps:$4 sm:$0xff]   ;;  %v7152_v42 = vld [vmem:[#allocation6 + $0xef0] ss:$36 sps:$4 sm:$0xff]  }
  0xe9   :  { %4739 = vmatprep.subr.bf16.mxu0 %v7071_v43  ;;  %4944 = vmatprep.subr.bf16.mxu1 %v7074_v44  ;;  %v7157_v43 = vld [vmem:[#allocation6 + $0xf34] ss:$36 sps:$4 sm:$0xff]   ;;  %v7160_v44 = vld [vmem:[#allocation6 + $0xf3c] ss:$36 sps:$4 sm:$0xff]  }
  0xec   :  { %4740 = vmatpush1.bf16.msra.mxu0 %v7069_v45  ;;  %4945 = vmatpush1.bf16.msra.mxu1 %v7072_v46  ;;  %v7155_v45 = vld [vmem:[#allocation6 + $0xf30] ss:$36 sps:$4 sm:$0xff]   ;;  %v7158_v46 = vld [vmem:[#allocation6 + $0xf38] ss:$36 sps:$4 sm:$0xff]  }
  0xed   :  { %4741 = vmatprep.subr.bf16.mxu0 %v7077_v47  ;;  %4946 = vmatprep.subr.bf16.mxu1 %v7080_v49  ;;  %v7163_v47 = vld [vmem:[#allocation6 + $0xf7c] ss:$36 sps:$4 sm:$0xff]   ;;  %v7166_v49 = vld [vmem:[#allocation6 + $0xf84] ss:$36 sps:$4 sm:$0xff]  }
  0xf0   :  { %4742 = vmatpush1.bf16.msra.mxu0 %v7075_v50  ;;  %4947 = vmatpush1.bf16.msra.mxu1 %v7078_v51  ;;  %v7161_v50 = vld [vmem:[#allocation6 + $0xf78] ss:$36 sps:$4 sm:$0xff]   ;;  %v7164_v51 = vld [vmem:[#allocation6 + $0xf80] ss:$36 sps:$4 sm:$0xff]  }
  0xf1   :  { %4743 = vmatprep.subr.bf16.mxu0 %v7083_v52  ;;  %4948 = vmatprep.subr.bf16.mxu1 %v7086_v53  ;;  %v7169_v52 = vld [vmem:[#allocation6 + $0xfc4] ss:$36 sps:$4 sm:$0xff]   ;;  %v7172_v53 = vld [vmem:[#allocation6 + $0xfcc] ss:$36 sps:$4 sm:$0xff]  }
  0xf4   :  { %4744 = vmatpush1.bf16.msra.mxu0 %v7081_v54  ;;  %4949 = vmatpush1.bf16.msra.mxu1 %v7084_v55  ;;  %v7167_v54 = vld [vmem:[#allocation6 + $0xfc0] ss:$36 sps:$4 sm:$0xff]   ;;  %v7170_v55 = vld [vmem:[#allocation6 + $0xfc8] ss:$36 sps:$4 sm:$0xff]  }
  0xf5   :  { %4745 = vmatprep.subr.bf16.mxu0 %v7089_v56  ;;  %4950 = vmatprep.subr.bf16.mxu1 %v7092_v57  ;;  %v7175_v56 = vld [vmem:[#allocation6 + $0x100c] ss:$36 sps:$4 sm:$0xff]   ;;  %v7178_v57 = vld [vmem:[#allocation6 + $0x1014] ss:$36 sps:$4 sm:$0xff]  }
  0xf8   :  { %4746 = vmatpush1.bf16.msra.mxu0 %v7087_v58  ;;  %4951 = vmatpush1.bf16.msra.mxu1 %v7090_v59  ;;  %v7173_v58 = vld [vmem:[#allocation6 + $0x1008] ss:$36 sps:$4 sm:$0xff]   ;;  %v7176_v59 = vld [vmem:[#allocation6 + $0x1010] ss:$36 sps:$4 sm:$0xff]  }
  0xf9   :  { %4747 = vmatprep.subr.bf16.mxu0 %v7095_v60  ;;  %4952 = vmatprep.subr.bf16.mxu1 %v7098_v61  ;;  %v7181_v60 = vld [vmem:[#allocation6 + $0x1054] ss:$36 sps:$4 sm:$0xff]   ;;  %v7184_v61 = vld [vmem:[#allocation6 + $0x105c] ss:$36 sps:$4 sm:$0xff]  }
  0xfc   :  { %4748 = vmatpush1.bf16.msra.mxu0 %v7093_v62  ;;  %4953 = vmatpush1.bf16.msra.mxu1 %v7096_v63  ;;  %v7179_v62 = vld [vmem:[#allocation6 + $0x1050] ss:$36 sps:$4 sm:$0xff]   ;;  %v7182_v63 = vld [vmem:[#allocation6 + $0x1058] ss:$36 sps:$4 sm:$0xff]  }
  0xfd   :  { %4749 = vmatprep.subr.bf16.mxu0 %v7101_v0  ;;  %4954 = vmatprep.subr.bf16.mxu1 %v7104_v1  ;;  %v7187_v0 = vld [vmem:[#allocation6 + $0x109c] ss:$36 sps:$4 sm:$0xff]   ;;  %v7190_v1 = vld [vmem:[#allocation6 + $0x10a4] ss:$36 sps:$4 sm:$0xff]  }
 0x100   :  { %4750 = vmatpush1.bf16.msra.mxu0 %v7099_v2  ;;  %4955 = vmatpush1.bf16.msra.mxu1 %v7102_v3  ;;  %v7185_v2 = vld [vmem:[#allocation6 + $0x1098] ss:$36 sps:$4 sm:$0xff]   ;;  %v7188_v3 = vld [vmem:[#allocation6 + $0x10a0] ss:$36 sps:$4 sm:$0xff]  }
 0x101   :  { %4751 = vmatprep.subr.bf16.mxu0 %v7107_v4  ;;  %4956 = vmatprep.subr.bf16.mxu1 %v7110_v6  ;;  %v7193_v4 = vld [vmem:[#allocation6 + $0x10e4] ss:$36 sps:$4 sm:$0xff]   ;;  %v7196_v6 = vld [vmem:[#allocation6 + $0x10ec] ss:$36 sps:$4 sm:$0xff]  }
 0x104   :  { %4752 = vmatpush1.bf16.msra.mxu0 %v7105_v7  ;;  %4957 = vmatpush1.bf16.msra.mxu1 %v7108_v8  ;;  %v7191_v7 = vld [vmem:[#allocation6 + $0x10e0] ss:$36 sps:$4 sm:$0xff]   ;;  %v7194_v8 = vld [vmem:[#allocation6 + $0x10e8] ss:$36 sps:$4 sm:$0xff]  }
 0x105   :  { %4753 = vmatprep.subr.bf16.mxu0 %v7113_v9  ;;  %4958 = vmatprep.subr.bf16.mxu1 %v7116_v11  ;;  %v7199_v9 = vld [vmem:[#allocation6 + $0x112c] ss:$36 sps:$4 sm:$0xff]   ;;  %v7202_v11 = vld [vmem:[#allocation6 + $0x1134] ss:$36 sps:$4 sm:$0xff]  }
 0x108   :  { %4754 = vmatpush1.bf16.msra.mxu0 %v7111_v12  ;;  %4959 = vmatpush1.bf16.msra.mxu1 %v7114_v14  ;;  %v7197_v12 = vld [vmem:[#allocation6 + $0x1128] ss:$36 sps:$4 sm:$0xff]   ;;  %v7200_v14 = vld [vmem:[#allocation6 + $0x1130] ss:$36 sps:$4 sm:$0xff]  }
 0x109   :  { %4764 = vmatprep.subr.bf16.mxu0 %v7120_v16  ;;  %4969 = vmatprep.subr.bf16.mxu1 %v7123_v17  ;;  %v7205_v16 = vld [vmem:[#allocation6 + $0x1174] ss:$36 sps:$4 sm:$0xff]   ;;  %v7208_v17 = vld [vmem:[#allocation6 + $0x117c] ss:$36 sps:$4 sm:$0xff]  }
 0x10b   :  { %4756 = vmatmul.mubr.bf16.vlgmr.msra.gmra.mrb[0].mxu0 %v8158_v20  ;;  %4961 = vmatmul.mubr.bf16.vlgmr.msra.gmra.mrb[0].mxu1 %v8158_v20 }
 0x10c   :  { %4765 = vmatpush1.bf16.msra.mxu0 %v7118_v18  ;;  %4970 = vmatpush1.bf16.msra.mxu1 %v7121_v19  ;;  %v7203_v18 = vld [vmem:[#allocation6 + $0x1170] ss:$36 sps:$4 sm:$0xff]   ;;  %v7206_v19 = vld [vmem:[#allocation6 + $0x1178] ss:$36 sps:$4 sm:$0xff]  }
 0x10d   :  { %4766 = vmatprep.subr.bf16.mxu0 %v7127_v22  ;;  %4971 = vmatprep.subr.bf16.mxu1 %v7130_v23  ;;  %v7211_v22 = vld [vmem:[#allocation6 + $0x11bc] ss:$36 sps:$4 sm:$0xff]   ;;  %v7214_v23 = vld [vmem:[#allocation6 + $0x11c4] ss:$36 sps:$4 sm:$0xff]  }
 0x10e   :  { %4796 = vmatprep.mubr.bf16.mxu0 %v8164_v24  ;;  %5001 = vmatprep.mubr.bf16.mxu1 %v8164_v24 }
 0x110   :  { %4767 = vmatpush1.bf16.msra.mxu0 %v7125_v25  ;;  %4972 = vmatpush1.bf16.msra.mxu1 %v7128_v26  ;;  %v7209_v25 = vld [vmem:[#allocation6 + $0x11b8] ss:$36 sps:$4 sm:$0xff]   ;;  %v7212_v26 = vld [vmem:[#allocation6 + $0x11c0] ss:$36 sps:$4 sm:$0xff]  }
 0x111   :  { %4768 = vmatprep.subr.bf16.mxu0 %v7133_v13  ;;  %4973 = vmatprep.subr.bf16.mxu1 %v7136_v27  ;;  %v7218_v13 = vld [vmem:[#allocation6 + $0x1204] ss:$36 sps:$4 sm:$0xff]   ;;  %v7221_v27 = vld [vmem:[#allocation6 + $0x120c] ss:$36 sps:$4 sm:$0xff]  }
 0x114   :  { %4769 = vmatpush1.bf16.msra.mxu0 %v7131_v28  ;;  %4974 = vmatpush1.bf16.msra.mxu1 %v7134_v29  ;;  %v7216_v28 = vld [vmem:[#allocation6 + $0x1200] ss:$36 sps:$4 sm:$0xff]   ;;  %v8172_v29 = vcombine.low %v8160_v21, %v8160_v21  ;;  %v7226_v21 = vld [vmem:[#allocation6 + $0x1250] ss:$36 sps:$4 sm:$0xff]  }
 0x115   :  { %4770 = vmatprep.subr.bf16.mxu0 %v7139_v31  ;;  %4975 = vmatprep.subr.bf16.mxu1 %v7142_v32  ;;  %v8174_v31 = vld [vmem:[#allocation3 + $0x20] sm:$0xff]  ;;  %v7219_v32 = vld [vmem:[#allocation6 + $0x1208] ss:$36 sps:$4 sm:$0xff]  }
 0x118   :  { %4771 = vmatpush1.bf16.msra.mxu0 %v7137_v33  ;;  %4976 = vmatpush1.bf16.msra.mxu1 %v7140_v34  ;;  %v7225_v33 = vld [vmem:[#allocation6 + $0x124c] ss:$36 sps:$4 sm:$0xff]   ;;  %v7228_v34 = vld [vmem:[#allocation6 + $0x1254] ss:$36 sps:$4 sm:$0xff]  }
 0x119   :  { %4772 = vmatprep.subr.bf16.mxu0 %v7145_v35  ;;  %4977 = vmatprep.subr.bf16.mxu1 %v7148_v36  ;;  %v8178_v35 = vcombine.high %v8174_v31, %v8174_v31  ;;  %v7223_v36 = vld [vmem:[#allocation6 + $0x1248] ss:$36 sps:$4 sm:$0xff]  }
 0x11c   :  { %4773 = vmatpush1.bf16.msra.mxu0 %v7143_v37  ;;  %4978 = vmatpush1.bf16.msra.mxu1 %v7146_v38  ;;  %v7231_v37 = vld [vmem:[#allocation6 + $0x1294] ss:$36 sps:$4 sm:$0xff]   ;;  %v7234_v38 = vld [vmem:[#allocation6 + $0x129c] ss:$36 sps:$4 sm:$0xff]  }
 0x11d   :  { %4774 = vmatprep.subr.bf16.mxu0 %v7151_v39  ;;  %4979 = vmatprep.subr.bf16.mxu1 %v7154_v40  ;;  %v7229_v39 = vld [vmem:[#allocation6 + $0x1290] ss:$36 sps:$4 sm:$0xff]   ;;  %v7232_v40 = vld [vmem:[#allocation6 + $0x1298] ss:$36 sps:$4 sm:$0xff]  }
 0x120   :  { %4775 = vmatpush1.bf16.msra.mxu0 %v7149_v41  ;;  %4980 = vmatpush1.bf16.msra.mxu1 %v7152_v42  ;;  %v7237_v41 = vld [vmem:[#allocation6 + $0x12dc] ss:$36 sps:$4 sm:$0xff]   ;;  %v7240_v42 = vld [vmem:[#allocation6 + $0x12e4] ss:$36 sps:$4 sm:$0xff]  }
 0x121   :  { %4776 = vmatprep.subr.bf16.mxu0 %v7157_v43  ;;  %4981 = vmatprep.subr.bf16.mxu1 %v7160_v44  ;;  %v7235_v43 = vld [vmem:[#allocation6 + $0x12d8] ss:$36 sps:$4 sm:$0xff]   ;;  %v7238_v44 = vld [vmem:[#allocation6 + $0x12e0] ss:$36 sps:$4 sm:$0xff]  }
 0x124   :  { %4777 = vmatpush1.bf16.msra.mxu0 %v7155_v45  ;;  %4982 = vmatpush1.bf16.msra.mxu1 %v7158_v46  ;;  %v7243_v45 = vld [vmem:[#allocation6 + $0x1324] ss:$36 sps:$4 sm:$0xff]   ;;  %v7246_v46 = vld [vmem:[#allocation6 + $0x132c] ss:$36 sps:$4 sm:$0xff]  }
 0x125   :  { %4778 = vmatprep.subr.bf16.mxu0 %v7163_v47  ;;  %4983 = vmatprep.subr.bf16.mxu1 %v7166_v49  ;;  %v7241_v47 = vld [vmem:[#allocation6 + $0x1320] ss:$36 sps:$4 sm:$0xff]   ;;  %v7244_v49 = vld [vmem:[#allocation6 + $0x1328] ss:$36 sps:$4 sm:$0xff]  }
 0x128   :  { %4779 = vmatpush1.bf16.msra.mxu0 %v7161_v50  ;;  %4984 = vmatpush1.bf16.msra.mxu1 %v7164_v51  ;;  %v7249_v50 = vld [vmem:[#allocation6 + $0x136c] ss:$36 sps:$4 sm:$0xff]   ;;  %v7252_v51 = vld [vmem:[#allocation6 + $0x1374] ss:$36 sps:$4 sm:$0xff]  }
 0x129   :  { %4780 = vmatprep.subr.bf16.mxu0 %v7169_v52  ;;  %4985 = vmatprep.subr.bf16.mxu1 %v7172_v53  ;;  %v7247_v52 = vld [vmem:[#allocation6 + $0x1368] ss:$36 sps:$4 sm:$0xff]   ;;  %v7250_v53 = vld [vmem:[#allocation6 + $0x1370] ss:$36 sps:$4 sm:$0xff]  }
 0x12c   :  { %4781 = vmatpush1.bf16.msra.mxu0 %v7167_v54  ;;  %4986 = vmatpush1.bf16.msra.mxu1 %v7170_v55  ;;  %v7255_v54 = vld [vmem:[#allocation6 + $0x13b4] ss:$36 sps:$4 sm:$0xff]   ;;  %v7258_v55 = vld [vmem:[#allocation6 + $0x13bc] ss:$36 sps:$4 sm:$0xff]  }
 0x12d   :  { %4782 = vmatprep.subr.bf16.mxu0 %v7175_v56  ;;  %4987 = vmatprep.subr.bf16.mxu1 %v7178_v57  ;;  %v7253_v56 = vld [vmem:[#allocation6 + $0x13b0] ss:$36 sps:$4 sm:$0xff]   ;;  %v7256_v57 = vld [vmem:[#allocation6 + $0x13b8] ss:$36 sps:$4 sm:$0xff]  }
 0x130   :  { %4783 = vmatpush1.bf16.msra.mxu0 %v7173_v58  ;;  %4988 = vmatpush1.bf16.msra.mxu1 %v7176_v59  ;;  %v7261_v58 = vld [vmem:[#allocation6 + $0x13fc] ss:$36 sps:$4 sm:$0xff]   ;;  %v7264_v59 = vld [vmem:[#allocation6 + $0x1404] ss:$36 sps:$4 sm:$0xff]  }
 0x131   :  { %4784 = vmatprep.subr.bf16.mxu0 %v7181_v60  ;;  %4989 = vmatprep.subr.bf16.mxu1 %v7184_v61  ;;  %v7259_v60 = vld [vmem:[#allocation6 + $0x13f8] ss:$36 sps:$4 sm:$0xff]   ;;  %v7262_v61 = vld [vmem:[#allocation6 + $0x1400] ss:$36 sps:$4 sm:$0xff]  }
 0x134   :  { %4785 = vmatpush1.bf16.msra.mxu0 %v7179_v62  ;;  %4990 = vmatpush1.bf16.msra.mxu1 %v7182_v63  ;;  %v7267_v62 = vld [vmem:[#allocation6 + $0x1444] ss:$36 sps:$4 sm:$0xff]   ;;  %v7270_v63 = vld [vmem:[#allocation6 + $0x144c] ss:$36 sps:$4 sm:$0xff]  }
 0x135   :  { %4786 = vmatprep.subr.bf16.mxu0 %v7187_v0  ;;  %4991 = vmatprep.subr.bf16.mxu1 %v7190_v1  ;;  %v7265_v0 = vld [vmem:[#allocation6 + $0x1440] ss:$36 sps:$4 sm:$0xff]   ;;  %v7268_v1 = vld [vmem:[#allocation6 + $0x1448] ss:$36 sps:$4 sm:$0xff]  }
 0x138   :  { %4787 = vmatpush1.bf16.msra.mxu0 %v7185_v2  ;;  %4992 = vmatpush1.bf16.msra.mxu1 %v7188_v3  ;;  %v7273_v2 = vld [vmem:[#allocation6 + $0x148c] ss:$36 sps:$4 sm:$0xff]   ;;  %v7276_v3 = vld [vmem:[#allocation6 + $0x1494] ss:$36 sps:$4 sm:$0xff]  }
 0x139   :  { %4788 = vmatprep.subr.bf16.mxu0 %v7193_v4  ;;  %4993 = vmatprep.subr.bf16.mxu1 %v7196_v6  ;;  %v7271_v4 = vld [vmem:[#allocation6 + $0x1488] ss:$36 sps:$4 sm:$0xff]   ;;  %v7274_v6 = vld [vmem:[#allocation6 + $0x1490] ss:$36 sps:$4 sm:$0xff]  }
 0x13c   :  { %4789 = vmatpush1.bf16.msra.mxu0 %v7191_v7  ;;  %4994 = vmatpush1.bf16.msra.mxu1 %v7194_v8  ;;  %v7279_v7 = vld [vmem:[#allocation6 + $0x14d4] ss:$36 sps:$4 sm:$0xff]   ;;  %v7282_v8 = vld [vmem:[#allocation6 + $0x14dc] ss:$36 sps:$4 sm:$0xff]  }
 0x13d   :  { %4790 = vmatprep.subr.bf16.mxu0 %v7199_v9  ;;  %4995 = vmatprep.subr.bf16.mxu1 %v7202_v11  ;;  %v7277_v9 = vld [vmem:[#allocation6 + $0x14d0] ss:$36 sps:$4 sm:$0xff]   ;;  %v7280_v11 = vld [vmem:[#allocation6 + $0x14d8] ss:$36 sps:$4 sm:$0xff]  }
 0x140   :  { %4791 = vmatpush1.bf16.msra.mxu0 %v7197_v12  ;;  %4996 = vmatpush1.bf16.msra.mxu1 %v7200_v14  ;;  %v7285_v12 = vld [vmem:[#allocation6 + $0x151c] ss:$36 sps:$4 sm:$0xff]   ;;  %v7288_v14 = vld [vmem:[#allocation6 + $0x1524] ss:$36 sps:$4 sm:$0xff]  }
 0x141   :  { %4792 = vmatprep.subr.bf16.mxu0 %v7205_v16  ;;  %4997 = vmatprep.subr.bf16.mxu1 %v7208_v17  ;;  %v7283_v16 = vld [vmem:[#allocation6 + $0x1518] ss:$36 sps:$4 sm:$0xff]   ;;  %v7286_v17 = vld [vmem:[#allocation6 + $0x1520] ss:$36 sps:$4 sm:$0xff]  }
 0x144   :  { %4793 = vmatpush1.bf16.msra.mxu0 %v7203_v18  ;;  %4998 = vmatpush1.bf16.msra.mxu1 %v7206_v19  ;;  %v7291_v18 = vld [vmem:[#allocation6 + $0x1564] ss:$36 sps:$4 sm:$0xff]   ;;  %v7294_v19 = vld [vmem:[#allocation6 + $0x156c] ss:$36 sps:$4 sm:$0xff]  }
 0x145   :  { %4794 = vmatprep.subr.bf16.mxu0 %v7211_v22  ;;  %4999 = vmatprep.subr.bf16.mxu1 %v7214_v23  ;;  %v7289_v22 = vld [vmem:[#allocation6 + $0x1560] ss:$36 sps:$4 sm:$0xff]   ;;  %v7292_v23 = vld [vmem:[#allocation6 + $0x1568] ss:$36 sps:$4 sm:$0xff]  }
 0x148   :  { %4795 = vmatpush1.bf16.msra.mxu0 %v7209_v25  ;;  %5000 = vmatpush1.bf16.msra.mxu1 %v7212_v26  ;;  %v7297_v25 = vld [vmem:[#allocation6 + $0x15ac] ss:$36 sps:$4 sm:$0xff]   ;;  %v7300_v26 = vld [vmem:[#allocation6 + $0x15b4] ss:$36 sps:$4 sm:$0xff]  }
 0x149   :  { %4805 = vmatprep.subr.bf16.mxu0 %v7218_v13  ;;  %5010 = vmatprep.subr.bf16.mxu1 %v7221_v27  ;;  %v7295_v13 = vld [vmem:[#allocation6 + $0x15a8] ss:$36 sps:$4 sm:$0xff]   ;;  %v7298_v27 = vld [vmem:[#allocation6 + $0x15b0] ss:$36 sps:$4 sm:$0xff]  }
 0x14b   :  { %4797 = vmatmul.mubr.bf16.vlgmr.msra.gmra.mrb[0].mxu0 %v8172_v29  ;;  %5002 = vmatmul.mubr.bf16.vlgmr.msra.gmra.mrb[0].mxu1 %v8172_v29 }
 0x14c   :  { %4806 = vmatpush1.bf16.msra.mxu0 %v7216_v28  ;;  %5011 = vmatpush1.bf16.msra.mxu1 %v7219_v32  ;;  %v7303_v28 = vld [vmem:[#allocation6 + $0x15f4] ss:$36 sps:$4 sm:$0xff]   ;;  %v7306_v32 = vld [vmem:[#allocation6 + $0x15fc] ss:$36 sps:$4 sm:$0xff]  }
 0x14d   :  { %4807 = vmatprep.subr.bf16.mxu0 %v7225_v33  ;;  %5012 = vmatprep.subr.bf16.mxu1 %v7228_v34  ;;  %v7301_v33 = vld [vmem:[#allocation6 + $0x15f0] ss:$36 sps:$4 sm:$0xff]   ;;  %v7304_v34 = vld [vmem:[#allocation6 + $0x15f8] ss:$36 sps:$4 sm:$0xff]  }
 0x14e   :  { %4837 = vmatprep.mubr.bf16.mxu0 %v8178_v35  ;;  %5042 = vmatprep.mubr.bf16.mxu1 %v8178_v35 }
 0x150   :  { %4808 = vmatpush1.bf16.msra.mxu0 %v7223_v36  ;;  %5013 = vmatpush1.bf16.msra.mxu1 %v7226_v21  ;;  %v7309_v36 = vld [vmem:[#allocation6 + $0x163c] ss:$36 sps:$4 sm:$0xff]   ;;  %v7312_v21 = vld [vmem:[#allocation6 + $0x1644] ss:$36 sps:$4 sm:$0xff]  }
 0x151   :  { %4809 = vmatprep.subr.bf16.mxu0 %v7231_v37  ;;  %5014 = vmatprep.subr.bf16.mxu1 %v7234_v38  ;;  %v7307_v37 = vld [vmem:[#allocation6 + $0x1638] ss:$36 sps:$4 sm:$0xff]   ;;  %v7310_v38 = vld [vmem:[#allocation6 + $0x1640] ss:$36 sps:$4 sm:$0xff]  }
 0x154   :  { %4810 = vmatpush1.bf16.msra.mxu0 %v7229_v39  ;;  %5015 = vmatpush1.bf16.msra.mxu1 %v7232_v40  ;;  %v7317_v39 = vld [vmem:[#allocation6 + $0x14] ss:$36 sps:$4 sm:$0xff]   ;;  %v7320_v40 = vld [vmem:[#allocation6 + $0x1c] ss:$36 sps:$4 sm:$0xff]  }
 0x155   :  { %4811 = vmatprep.subr.bf16.mxu0 %v7237_v41  ;;  %5016 = vmatprep.subr.bf16.mxu1 %v7240_v42  ;;  %v8186_v41 = vcombine.low %v8174_v31, %v8174_v31  ;;  %v7315_v42 = vld [vmem:[#allocation6 + $0x10] ss:$36 sps:$4 sm:$0xff]   ;;  %v7329_v31 = vld [vmem:[#allocation6 + $0xa4] ss:$36 sps:$4 sm:$0xff]  }
 0x158   :  { %4812 = vmatpush1.bf16.msra.mxu0 %v7235_v43  ;;  %5017 = vmatpush1.bf16.msra.mxu1 %v7238_v44  ;;  %v7318_v43 = vld [vmem:[#allocation6 + $0x18] ss:$36 sps:$4 sm:$0xff]  }
 0x159   :  { %4813 = vmatprep.subr.bf16.mxu0 %v7243_v45  ;;  %5018 = vmatprep.subr.bf16.mxu1 %v7246_v46  ;;  %v7323_v44 = vld [vmem:[#allocation6 + $0x5c] ss:$36 sps:$4 sm:$0xff]   ;;  %v7326_v45 = vld [vmem:[#allocation6 + $0x64] ss:$36 sps:$4 sm:$0xff]  }
 0x15a   :  { %v7321_v46 = vld [vmem:[#allocation6 + $0x58] ss:$36 sps:$4 sm:$0xff]  }
 0x15c   :  { %4814 = vmatpush1.bf16.msra.mxu0 %v7241_v47  ;;  %5019 = vmatpush1.bf16.msra.mxu1 %v7244_v49  ;;  %v7324_v47 = vld [vmem:[#allocation6 + $0x60] ss:$36 sps:$4 sm:$0xff]   ;;  %v7332_v49 = vld [vmem:[#allocation6 + $0xac] ss:$36 sps:$4 sm:$0xff]  }
 0x15d   :  { %4815 = vmatprep.subr.bf16.mxu0 %v7249_v50  ;;  %5020 = vmatprep.subr.bf16.mxu1 %v7252_v51  ;;  %v7327_v50 = vld [vmem:[#allocation6 + $0xa0] ss:$36 sps:$4 sm:$0xff]   ;;  %v7330_v51 = vld [vmem:[#allocation6 + $0xa8] ss:$36 sps:$4 sm:$0xff]  }
 0x160   :  { %4816 = vmatpush1.bf16.msra.mxu0 %v7247_v52  ;;  %5021 = vmatpush1.bf16.msra.mxu1 %v7250_v53  ;;  %v7335_v52 = vld [vmem:[#allocation6 + $0xec] ss:$36 sps:$4 sm:$0xff]   ;;  %v7338_v53 = vld [vmem:[#allocation6 + $0xf4] ss:$36 sps:$4 sm:$0xff]  }
 0x161   :  { %4817 = vmatprep.subr.bf16.mxu0 %v7255_v54  ;;  %5022 = vmatprep.subr.bf16.mxu1 %v7258_v55  ;;  %v7333_v54 = vld [vmem:[#allocation6 + $0xe8] ss:$36 sps:$4 sm:$0xff]   ;;  %v7336_v55 = vld [vmem:[#allocation6 + $0xf0] ss:$36 sps:$4 sm:$0xff]  }
 0x164   :  { %4818 = vmatpush1.bf16.msra.mxu0 %v7253_v56  ;;  %5023 = vmatpush1.bf16.msra.mxu1 %v7256_v57  ;;  %v7341_v56 = vld [vmem:[#allocation6 + $0x134] ss:$36 sps:$4 sm:$0xff]   ;;  %v7344_v57 = vld [vmem:[#allocation6 + $0x13c] ss:$36 sps:$4 sm:$0xff]  }
 0x165   :  { %4819 = vmatprep.subr.bf16.mxu0 %v7261_v58  ;;  %5024 = vmatprep.subr.bf16.mxu1 %v7264_v59  ;;  %v7339_v58 = vld [vmem:[#allocation6 + $0x130] ss:$36 sps:$4 sm:$0xff]   ;;  %v7342_v59 = vld [vmem:[#allocation6 + $0x138] ss:$36 sps:$4 sm:$0xff]  }
 0x168   :  { %4820 = vmatpush1.bf16.msra.mxu0 %v7259_v60  ;;  %5025 = vmatpush1.bf16.msra.mxu1 %v7262_v61  ;;  %v7347_v60 = vld [vmem:[#allocation6 + $0x17c] ss:$36 sps:$4 sm:$0xff]   ;;  %v7350_v61 = vld [vmem:[#allocation6 + $0x184] ss:$36 sps:$4 sm:$0xff]  }
 0x169   :  { %4821 = vmatprep.subr.bf16.mxu0 %v7267_v62  ;;  %5026 = vmatprep.subr.bf16.mxu1 %v7270_v63  ;;  %v7345_v62 = vld [vmem:[#allocation6 + $0x178] ss:$36 sps:$4 sm:$0xff]   ;;  %v7348_v63 = vld [vmem:[#allocation6 + $0x180] ss:$36 sps:$4 sm:$0xff]  }
 0x16c   :  { %4822 = vmatpush1.bf16.msra.mxu0 %v7265_v0  ;;  %5027 = vmatpush1.bf16.msra.mxu1 %v7268_v1  ;;  %v7353_v0 = vld [vmem:[#allocation6 + $0x1c4] ss:$36 sps:$4 sm:$0xff]   ;;  %v7356_v1 = vld [vmem:[#allocation6 + $0x1cc] ss:$36 sps:$4 sm:$0xff]  }
 0x16d   :  { %4823 = vmatprep.subr.bf16.mxu0 %v7273_v2  ;;  %5028 = vmatprep.subr.bf16.mxu1 %v7276_v3  ;;  %v7351_v2 = vld [vmem:[#allocation6 + $0x1c0] ss:$36 sps:$4 sm:$0xff]   ;;  %v7354_v3 = vld [vmem:[#allocation6 + $0x1c8] ss:$36 sps:$4 sm:$0xff]  }
 0x170   :  { %4824 = vmatpush1.bf16.msra.mxu0 %v7271_v4  ;;  %5029 = vmatpush1.bf16.msra.mxu1 %v7274_v6  ;;  %v7359_v4 = vld [vmem:[#allocation6 + $0x20c] ss:$36 sps:$4 sm:$0xff]   ;;  %v7362_v6 = vld [vmem:[#allocation6 + $0x214] ss:$36 sps:$4 sm:$0xff]  }
 0x171   :  { %4825 = vmatprep.subr.bf16.mxu0 %v7279_v7  ;;  %5030 = vmatprep.subr.bf16.mxu1 %v7282_v8  ;;  %v7357_v7 = vld [vmem:[#allocation6 + $0x208] ss:$36 sps:$4 sm:$0xff]   ;;  %v7360_v8 = vld [vmem:[#allocation6 + $0x210] ss:$36 sps:$4 sm:$0xff]  }
 0x174   :  { %4826 = vmatpush1.bf16.msra.mxu0 %v7277_v9  ;;  %5031 = vmatpush1.bf16.msra.mxu1 %v7280_v11  ;;  %v7365_v9 = vld [vmem:[#allocation6 + $0x254] ss:$36 sps:$4 sm:$0xff]   ;;  %v7368_v11 = vld [vmem:[#allocation6 + $0x25c] ss:$36 sps:$4 sm:$0xff]  }
 0x175   :  { %4827 = vmatprep.subr.bf16.mxu0 %v7285_v12  ;;  %5032 = vmatprep.subr.bf16.mxu1 %v7288_v14  ;;  %v7363_v12 = vld [vmem:[#allocation6 + $0x250] ss:$36 sps:$4 sm:$0xff]   ;;  %v7366_v14 = vld [vmem:[#allocation6 + $0x258] ss:$36 sps:$4 sm:$0xff]  }
 0x178   :  { %4828 = vmatpush1.bf16.msra.mxu0 %v7283_v16  ;;  %5033 = vmatpush1.bf16.msra.mxu1 %v7286_v17  ;;  %v7371_v16 = vld [vmem:[#allocation6 + $0x29c] ss:$36 sps:$4 sm:$0xff]   ;;  %v7374_v17 = vld [vmem:[#allocation6 + $0x2a4] ss:$36 sps:$4 sm:$0xff]  }
 0x179   :  { %4829 = vmatprep.subr.bf16.mxu0 %v7291_v18  ;;  %5034 = vmatprep.subr.bf16.mxu1 %v7294_v19  ;;  %v7369_v18 = vld [vmem:[#allocation6 + $0x298] ss:$36 sps:$4 sm:$0xff]   ;;  %v7372_v19 = vld [vmem:[#allocation6 + $0x2a0] ss:$36 sps:$4 sm:$0xff]  }
 0x17c   :  { %4830 = vmatpush1.bf16.msra.mxu0 %v7289_v22  ;;  %5035 = vmatpush1.bf16.msra.mxu1 %v7292_v23  ;;  %v7377_v22 = vld [vmem:[#allocation6 + $0x2e4] ss:$36 sps:$4 sm:$0xff]   ;;  %v7380_v23 = vld [vmem:[#allocation6 + $0x2ec] ss:$36 sps:$4 sm:$0xff]  }
 0x17d   :  { %4831 = vmatprep.subr.bf16.mxu0 %v7297_v25  ;;  %5036 = vmatprep.subr.bf16.mxu1 %v7300_v26  ;;  %v7375_v25 = vld [vmem:[#allocation6 + $0x2e0] ss:$36 sps:$4 sm:$0xff]   ;;  %v7378_v26 = vld [vmem:[#allocation6 + $0x2e8] ss:$36 sps:$4 sm:$0xff]  }
 0x180   :  { %4832 = vmatpush1.bf16.msra.mxu0 %v7295_v13  ;;  %5037 = vmatpush1.bf16.msra.mxu1 %v7298_v27  ;;  %v7383_v13 = vld [vmem:[#allocation6 + $0x32c] ss:$36 sps:$4 sm:$0xff]   ;;  %v7386_v27 = vld [vmem:[#allocation6 + $0x334] ss:$36 sps:$4 sm:$0xff]  }
 0x181   :  { %4833 = vmatprep.subr.bf16.mxu0 %v7303_v28  ;;  %5038 = vmatprep.subr.bf16.mxu1 %v7306_v32  ;;  %v7381_v28 = vld [vmem:[#allocation6 + $0x328] ss:$36 sps:$4 sm:$0xff]   ;;  %v7384_v32 = vld [vmem:[#allocation6 + $0x330] ss:$36 sps:$4 sm:$0xff]  }
 0x184   :  { %4834 = vmatpush1.bf16.msra.mxu0 %v7301_v33  ;;  %5039 = vmatpush1.bf16.msra.mxu1 %v7304_v34  ;;  %v7389_v33 = vld [vmem:[#allocation6 + $0x374] ss:$36 sps:$4 sm:$0xff]   ;;  %v7392_v34 = vld [vmem:[#allocation6 + $0x37c] ss:$36 sps:$4 sm:$0xff]  }
 0x185   :  { %4835 = vmatprep.subr.bf16.mxu0 %v7309_v36  ;;  %5040 = vmatprep.subr.bf16.mxu1 %v7312_v21  ;;  %v7387_v36 = vld [vmem:[#allocation6 + $0x370] ss:$36 sps:$4 sm:$0xff]   ;;  %v7390_v21 = vld [vmem:[#allocation6 + $0x378] ss:$36 sps:$4 sm:$0xff]  }
 0x188   :  { %4836 = vmatpush1.bf16.msra.mxu0 %v7307_v37  ;;  %5041 = vmatpush1.bf16.msra.mxu1 %v7310_v38  ;;  %v7395_v37 = vld [vmem:[#allocation6 + $0x3bc] ss:$36 sps:$4 sm:$0xff]   ;;  %v7398_v38 = vld [vmem:[#allocation6 + $0x3c4] ss:$36 sps:$4 sm:$0xff]  }
 0x189   :  { %5051 = vmatprep.subr.bf16.mxu0 %v7317_v39  ;;  %5256 = vmatprep.subr.bf16.mxu1 %v7320_v40  ;;  %v7393_v39 = vld [vmem:[#allocation6 + $0x3b8] ss:$36 sps:$4 sm:$0xff]   ;;  %v7396_v40 = vld [vmem:[#allocation6 + $0x3c0] ss:$36 sps:$4 sm:$0xff]  }
 0x18b   :  { %4838 = vmatmul.mubr.bf16.vlgmr.msra.gmra.mrb[0].mxu0 %v8186_v41  ;;  %5043 = vmatmul.mubr.bf16.vlgmr.msra.gmra.mrb[0].mxu1 %v8186_v41 }
 0x18c   :  { %5052 = vmatpush1.bf16.msra.mxu0 %v7315_v42  ;;  %5257 = vmatpush1.bf16.msra.mxu1 %v7318_v43  ;;  %v7401_v42 = vld [vmem:[#allocation6 + $0x404] ss:$36 sps:$4 sm:$0xff]   ;;  %v7404_v43 = vld [vmem:[#allocation6 + $0x40c] ss:$36 sps:$4 sm:$0xff]  }
 0x18d   :  { %5053 = vmatprep.subr.bf16.mxu0 %v7323_v44  ;;  %5258 = vmatprep.subr.bf16.mxu1 %v7326_v45  ;;  %v7399_v44 = vld [vmem:[#allocation6 + $0x400] ss:$36 sps:$4 sm:$0xff]   ;;  %v7402_v45 = vld [vmem:[#allocation6 + $0x408] ss:$36 sps:$4 sm:$0xff]  }
 0x18e   :  { %5083 = vmatprep.mubr.bf16.mxu0 %v8126_v48  ;;  %5288 = vmatprep.mubr.bf16.mxu1 %v8126_v48 }
 0x190   :  { %5054 = vmatpush1.bf16.msra.mxu0 %v7321_v46  ;;  %5259 = vmatpush1.bf16.msra.mxu1 %v7324_v47  ;;  %v7407_v46 = vld [vmem:[#allocation6 + $0x44c] ss:$36 sps:$4 sm:$0xff]   ;;  %v7410_v47 = vld [vmem:[#allocation6 + $0x454] ss:$36 sps:$4 sm:$0xff]  }
 0x191   :  { %5055 = vmatprep.subr.bf16.mxu0 %v7329_v31  ;;  %5260 = vmatprep.subr.bf16.mxu1 %v7332_v49  ;;  %v7405_v31 = vld [vmem:[#allocation6 + $0x448] ss:$36 sps:$4 sm:$0xff]   ;;  %v7408_v49 = vld [vmem:[#allocation6 + $0x450] ss:$36 sps:$4 sm:$0xff]  }
 0x194   :  { %5056 = vmatpush1.bf16.msra.mxu0 %v7327_v50  ;;  %5261 = vmatpush1.bf16.msra.mxu1 %v7330_v51  ;;  %v7413_v50 = vld [vmem:[#allocation6 + $0x494] ss:$36 sps:$4 sm:$0xff]   ;;  %v7416_v51 = vld [vmem:[#allocation6 + $0x49c] ss:$36 sps:$4 sm:$0xff]  }
 0x195   :  { %5057 = vmatprep.subr.bf16.mxu0 %v7335_v52  ;;  %5262 = vmatprep.subr.bf16.mxu1 %v7338_v53  ;;  %v7411_v52 = vld [vmem:[#allocation6 + $0x490] ss:$36 sps:$4 sm:$0xff]   ;;  %v7414_v53 = vld [vmem:[#allocation6 + $0x498] ss:$36 sps:$4 sm:$0xff]  }
 0x198   :  { %5058 = vmatpush1.bf16.msra.mxu0 %v7333_v54  ;;  %5263 = vmatpush1.bf16.msra.mxu1 %v7336_v55  ;;  %v7419_v54 = vld [vmem:[#allocation6 + $0x4dc] ss:$36 sps:$4 sm:$0xff]   ;;  %v7422_v55 = vld [vmem:[#allocation6 + $0x4e4] ss:$36 sps:$4 sm:$0xff]  }
 0x199   :  { %5059 = vmatprep.subr.bf16.mxu0 %v7341_v56  ;;  %5264 = vmatprep.subr.bf16.mxu1 %v7344_v57  ;;  %v7417_v56 = vld [vmem:[#allocation6 + $0x4d8] ss:$36 sps:$4 sm:$0xff]   ;;  %v7420_v57 = vld [vmem:[#allocation6 + $0x4e0] ss:$36 sps:$4 sm:$0xff]  }
 0x19c   :  { %5060 = vmatpush1.bf16.msra.mxu0 %v7339_v58  ;;  %5265 = vmatpush1.bf16.msra.mxu1 %v7342_v59  ;;  %v7425_v58 = vld [vmem:[#allocation6 + $0x524] ss:$36 sps:$4 sm:$0xff]   ;;  %v7428_v59 = vld [vmem:[#allocation6 + $0x52c] ss:$36 sps:$4 sm:$0xff]  }
 0x19d   :  { %5061 = vmatprep.subr.bf16.mxu0 %v7347_v60  ;;  %5266 = vmatprep.subr.bf16.mxu1 %v7350_v61  ;;  %v7423_v60 = vld [vmem:[#allocation6 + $0x520] ss:$36 sps:$4 sm:$0xff]   ;;  %v7426_v61 = vld [vmem:[#allocation6 + $0x528] ss:$36 sps:$4 sm:$0xff]  }
 0x1a0   :  { %5062 = vmatpush1.bf16.msra.mxu0 %v7345_v62  ;;  %5267 = vmatpush1.bf16.msra.mxu1 %v7348_v63  ;;  %v7431_v62 = vld [vmem:[#allocation6 + $0x56c] ss:$36 sps:$4 sm:$0xff]   ;;  %v7434_v63 = vld [vmem:[#allocation6 + $0x574] ss:$36 sps:$4 sm:$0xff]  }
 0x1a1   :  { %5063 = vmatprep.subr.bf16.mxu0 %v7353_v0  ;;  %5268 = vmatprep.subr.bf16.mxu1 %v7356_v1  ;;  %v7429_v0 = vld [vmem:[#allocation6 + $0x568] ss:$36 sps:$4 sm:$0xff]   ;;  %v7432_v1 = vld [vmem:[#allocation6 + $0x570] ss:$36 sps:$4 sm:$0xff]  }
 0x1a4   :  { %5064 = vmatpush1.bf16.msra.mxu0 %v7351_v2  ;;  %5269 = vmatpush1.bf16.msra.mxu1 %v7354_v3  ;;  %v7437_v2 = vld [vmem:[#allocation6 + $0x5b4] ss:$36 sps:$4 sm:$0xff]   ;;  %v7440_v3 = vld [vmem:[#allocation6 + $0x5bc] ss:$36 sps:$4 sm:$0xff]  }
 0x1a5   :  { %5065 = vmatprep.subr.bf16.mxu0 %v7359_v4  ;;  %5270 = vmatprep.subr.bf16.mxu1 %v7362_v6  ;;  %v7435_v4 = vld [vmem:[#allocation6 + $0x5b0] ss:$36 sps:$4 sm:$0xff]   ;;  %v7438_v6 = vld [vmem:[#allocation6 + $0x5b8] ss:$36 sps:$4 sm:$0xff]  }
 0x1a8   :  { %5066 = vmatpush1.bf16.msra.mxu0 %v7357_v7  ;;  %5271 = vmatpush1.bf16.msra.mxu1 %v7360_v8  ;;  %v7443_v7 = vld [vmem:[#allocation6 + $0x5fc] ss:$36 sps:$4 sm:$0xff]   ;;  %v7446_v8 = vld [vmem:[#allocation6 + $0x604] ss:$36 sps:$4 sm:$0xff]  }
 0x1a9   :  { %5067 = vmatprep.subr.bf16.mxu0 %v7365_v9  ;;  %5272 = vmatprep.subr.bf16.mxu1 %v7368_v11  ;;  %v7441_v9 = vld [vmem:[#allocation6 + $0x5f8] ss:$36 sps:$4 sm:$0xff]   ;;  %v7444_v11 = vld [vmem:[#allocation6 + $0x600] ss:$36 sps:$4 sm:$0xff]  }
 0x1ac   :  { %5068 = vmatpush1.bf16.msra.mxu0 %v7363_v12  ;;  %5273 = vmatpush1.bf16.msra.mxu1 %v7366_v14  ;;  %v7449_v12 = vld [vmem:[#allocation6 + $0x644] ss:$36 sps:$4 sm:$0xff]   ;;  %v7452_v14 = vld [vmem:[#allocation6 + $0x64c] ss:$36 sps:$4 sm:$0xff]  }
 0x1ad   :  { %5069 = vmatprep.subr.bf16.mxu0 %v7371_v16  ;;  %5274 = vmatprep.subr.bf16.mxu1 %v7374_v17  ;;  %v7447_v16 = vld [vmem:[#allocation6 + $0x640] ss:$36 sps:$4 sm:$0xff]   ;;  %v7450_v17 = vld [vmem:[#allocation6 + $0x648] ss:$36 sps:$4 sm:$0xff]  }
 0x1b0   :  { %5070 = vmatpush1.bf16.msra.mxu0 %v7369_v18  ;;  %5275 = vmatpush1.bf16.msra.mxu1 %v7372_v19  ;;  %v7455_v18 = vld [vmem:[#allocation6 + $0x68c] ss:$36 sps:$4 sm:$0xff]   ;;  %v7458_v19 = vld [vmem:[#allocation6 + $0x694] ss:$36 sps:$4 sm:$0xff]  }
 0x1b1   :  { %5071 = vmatprep.subr.bf16.mxu0 %v7377_v22  ;;  %5276 = vmatprep.subr.bf16.mxu1 %v7380_v23  ;;  %v7453_v22 = vld [vmem:[#allocation6 + $0x688] ss:$36 sps:$4 sm:$0xff]   ;;  %v7456_v23 = vld [vmem:[#allocation6 + $0x690] ss:$36 sps:$4 sm:$0xff]  }
 0x1b4   :  { %5072 = vmatpush1.bf16.msra.mxu0 %v7375_v25  ;;  %5277 = vmatpush1.bf16.msra.mxu1 %v7378_v26  ;;  %v7461_v25 = vld [vmem:[#allocation6 + $0x6d4] ss:$36 sps:$4 sm:$0xff]   ;;  %v7464_v26 = vld [vmem:[#allocation6 + $0x6dc] ss:$36 sps:$4 sm:$0xff]  }
 0x1b5   :  { %5073 = vmatprep.subr.bf16.mxu0 %v7383_v13  ;;  %5278 = vmatprep.subr.bf16.mxu1 %v7386_v27  ;;  %v7459_v13 = vld [vmem:[#allocation6 + $0x6d0] ss:$36 sps:$4 sm:$0xff]   ;;  %v7462_v27 = vld [vmem:[#allocation6 + $0x6d8] ss:$36 sps:$4 sm:$0xff]  }
 0x1b8   :  { %5074 = vmatpush1.bf16.msra.mxu0 %v7381_v28  ;;  %5279 = vmatpush1.bf16.msra.mxu1 %v7384_v32  ;;  %v7467_v28 = vld [vmem:[#allocation6 + $0x71c] ss:$36 sps:$4 sm:$0xff]   ;;  %v7470_v32 = vld [vmem:[#allocation6 + $0x724] ss:$36 sps:$4 sm:$0xff]  }
 0x1b9   :  { %5075 = vmatprep.subr.bf16.mxu0 %v7389_v33  ;;  %5280 = vmatprep.subr.bf16.mxu1 %v7392_v34  ;;  %v7465_v33 = vld [vmem:[#allocation6 + $0x718] ss:$36 sps:$4 sm:$0xff]   ;;  %v7468_v34 = vld [vmem:[#allocation6 + $0x720] ss:$36 sps:$4 sm:$0xff]  }
 0x1bc   :  { %5076 = vmatpush1.bf16.msra.mxu0 %v7387_v36  ;;  %5281 = vmatpush1.bf16.msra.mxu1 %v7390_v21  ;;  %v7473_v36 = vld [vmem:[#allocation6 + $0x764] ss:$36 sps:$4 sm:$0xff]   ;;  %v7476_v21 = vld [vmem:[#allocation6 + $0x76c] ss:$36 sps:$4 sm:$0xff]  }
 0x1bd   :  { %5077 = vmatprep.subr.bf16.mxu0 %v7395_v37  ;;  %5282 = vmatprep.subr.bf16.mxu1 %v7398_v38  ;;  %v7471_v37 = vld [vmem:[#allocation6 + $0x760] ss:$36 sps:$4 sm:$0xff]   ;;  %v7474_v38 = vld [vmem:[#allocation6 + $0x768] ss:$36 sps:$4 sm:$0xff]  }
 0x1c0   :  { %5078 = vmatpush1.bf16.msra.mxu0 %v7393_v39  ;;  %5283 = vmatpush1.bf16.msra.mxu1 %v7396_v40  ;;  %v7479_v39 = vld [vmem:[#allocation6 + $0x7ac] ss:$36 sps:$4 sm:$0xff]   ;;  %v7482_v40 = vld [vmem:[#allocation6 + $0x7b4] ss:$36 sps:$4 sm:$0xff]  }
 0x1c1   :  { %5079 = vmatprep.subr.bf16.mxu0 %v7401_v42  ;;  %5284 = vmatprep.subr.bf16.mxu1 %v7404_v43  ;;  %v7477_v42 = vld [vmem:[#allocation6 + $0x7a8] ss:$36 sps:$4 sm:$0xff]   ;;  %v7480_v43 = vld [vmem:[#allocation6 + $0x7b0] ss:$36 sps:$4 sm:$0xff]  }
 0x1c4   :  { %5080 = vmatpush1.bf16.msra.mxu0 %v7399_v44  ;;  %5285 = vmatpush1.bf16.msra.mxu1 %v7402_v45  ;;  %v7485_v44 = vld [vmem:[#allocation6 + $0x7f4] ss:$36 sps:$4 sm:$0xff]   ;;  %v7488_v45 = vld [vmem:[#allocation6 + $0x7fc] ss:$36 sps:$4 sm:$0xff]  }
 0x1c5   :  { %5081 = vmatprep.subr.bf16.mxu0 %v7407_v46  ;;  %5286 = vmatprep.subr.bf16.mxu1 %v7410_v47  ;;  %v7483_v46 = vld [vmem:[#allocation6 + $0x7f0] ss:$36 sps:$4 sm:$0xff]   ;;  %v7486_v47 = vld [vmem:[#allocation6 + $0x7f8] ss:$36 sps:$4 sm:$0xff]  }
 0x1c8   :  { %5082 = vmatpush1.bf16.msra.mxu0 %v7405_v31  ;;  %5287 = vmatpush1.bf16.msra.mxu1 %v7408_v49  ;;  %v7491_v31 = vld [vmem:[#allocation6 + $0x83c] ss:$36 sps:$4 sm:$0xff]   ;;  %v7494_v49 = vld [vmem:[#allocation6 + $0x844] ss:$36 sps:$4 sm:$0xff]  }
 0x1c9   :  { %5092 = vmatprep.subr.bf16.mxu0 %v7413_v50  ;;  %5297 = vmatprep.subr.bf16.mxu1 %v7416_v51  ;;  %v7489_v50 = vld [vmem:[#allocation6 + $0x838] ss:$36 sps:$4 sm:$0xff]   ;;  %v7492_v51 = vld [vmem:[#allocation6 + $0x840] ss:$36 sps:$4 sm:$0xff]  }
 0x1cb   :  { %5084 = vmatmul.mubr.bf16.vlgmr.msra.gmra.mrb[4].mxu0 %v8130_v5  ;;  %5289 = vmatmul.mubr.bf16.vlgmr.msra.gmra.mrb[4].mxu1 %v8130_v5 }
 0x1cc   :  { %5093 = vmatpush1.bf16.msra.mxu0 %v7411_v52  ;;  %5298 = vmatpush1.bf16.msra.mxu1 %v7414_v53  ;;  %v7497_v52 = vld [vmem:[#allocation6 + $0x884] ss:$36 sps:$4 sm:$0xff]   ;;  %v7500_v53 = vld [vmem:[#allocation6 + $0x88c] ss:$36 sps:$4 sm:$0xff]  }
 0x1cd   :  { %5094 = vmatprep.subr.bf16.mxu0 %v7419_v54  ;;  %5299 = vmatprep.subr.bf16.mxu1 %v7422_v55  ;;  %v7495_v54 = vld [vmem:[#allocation6 + $0x880] ss:$36 sps:$4 sm:$0xff]   ;;  %v7498_v55 = vld [vmem:[#allocation6 + $0x888] ss:$36 sps:$4 sm:$0xff]  }
 0x1ce   :  { %5124 = vmatprep.mubr.bf16.mxu0 %v8138_v30  ;;  %5329 = vmatprep.mubr.bf16.mxu1 %v8138_v30 }
 0x1d0   :  { %5095 = vmatpush1.bf16.msra.mxu0 %v7417_v56  ;;  %5300 = vmatpush1.bf16.msra.mxu1 %v7420_v57  ;;  %v7503_v56 = vld [vmem:[#allocation6 + $0x8cc] ss:$36 sps:$4 sm:$0xff]   ;;  %v7506_v57 = vld [vmem:[#allocation6 + $0x8d4] ss:$36 sps:$4 sm:$0xff]  }
 0x1d1   :  { %5096 = vmatprep.subr.bf16.mxu0 %v7425_v58  ;;  %5301 = vmatprep.subr.bf16.mxu1 %v7428_v59  ;;  %v7501_v58 = vld [vmem:[#allocation6 + $0x8c8] ss:$36 sps:$4 sm:$0xff]   ;;  %v7504_v59 = vld [vmem:[#allocation6 + $0x8d0] ss:$36 sps:$4 sm:$0xff]  }
 0x1d4   :  { %5097 = vmatpush1.bf16.msra.mxu0 %v7423_v60  ;;  %5302 = vmatpush1.bf16.msra.mxu1 %v7426_v61  ;;  %v7509_v60 = vld [vmem:[#allocation6 + $0x914] ss:$36 sps:$4 sm:$0xff]   ;;  %v7512_v61 = vld [vmem:[#allocation6 + $0x91c] ss:$36 sps:$4 sm:$0xff]  }
 0x1d5   :  { %5098 = vmatprep.subr.bf16.mxu0 %v7431_v62  ;;  %5303 = vmatprep.subr.bf16.mxu1 %v7434_v63  ;;  %v7507_v62 = vld [vmem:[#allocation6 + $0x910] ss:$36 sps:$4 sm:$0xff]   ;;  %v7510_v63 = vld [vmem:[#allocation6 + $0x918] ss:$36 sps:$4 sm:$0xff]  }
 0x1d8   :  { %5099 = vmatpush1.bf16.msra.mxu0 %v7429_v0  ;;  %5304 = vmatpush1.bf16.msra.mxu1 %v7432_v1  ;;  %v7515_v0 = vld [vmem:[#allocation6 + $0x95c] ss:$36 sps:$4 sm:$0xff]   ;;  %v7518_v1 = vld [vmem:[#allocation6 + $0x964] ss:$36 sps:$4 sm:$0xff]  }
 0x1d9   :  { %5100 = vmatprep.subr.bf16.mxu0 %v7437_v2  ;;  %5305 = vmatprep.subr.bf16.mxu1 %v7440_v3  ;;  %v7513_v2 = vld [vmem:[#allocation6 + $0x958] ss:$36 sps:$4 sm:$0xff]   ;;  %v7516_v3 = vld [vmem:[#allocation6 + $0x960] ss:$36 sps:$4 sm:$0xff]  }
 0x1dc   :  { %5101 = vmatpush1.bf16.msra.mxu0 %v7435_v4  ;;  %5306 = vmatpush1.bf16.msra.mxu1 %v7438_v6  ;;  %v7521_v4 = vld [vmem:[#allocation6 + $0x9a4] ss:$36 sps:$4 sm:$0xff]   ;;  %v7524_v6 = vld [vmem:[#allocation6 + $0x9ac] ss:$36 sps:$4 sm:$0xff]  }
 0x1dd   :  { %5102 = vmatprep.subr.bf16.mxu0 %v7443_v7  ;;  %5307 = vmatprep.subr.bf16.mxu1 %v7446_v8  ;;  %v7519_v7 = vld [vmem:[#allocation6 + $0x9a0] ss:$36 sps:$4 sm:$0xff]   ;;  %v7522_v8 = vld [vmem:[#allocation6 + $0x9a8] ss:$36 sps:$4 sm:$0xff]  }
 0x1e0   :  { %5103 = vmatpush1.bf16.msra.mxu0 %v7441_v9  ;;  %5308 = vmatpush1.bf16.msra.mxu1 %v7444_v11  ;;  %v7527_v9 = vld [vmem:[#allocation6 + $0x9ec] ss:$36 sps:$4 sm:$0xff]   ;;  %v7530_v11 = vld [vmem:[#allocation6 + $0x9f4] ss:$36 sps:$4 sm:$0xff]  }
 0x1e1   :  { %5104 = vmatprep.subr.bf16.mxu0 %v7449_v12  ;;  %5309 = vmatprep.subr.bf16.mxu1 %v7452_v14  ;;  %v7525_v12 = vld [vmem:[#allocation6 + $0x9e8] ss:$36 sps:$4 sm:$0xff]   ;;  %v7528_v14 = vld [vmem:[#allocation6 + $0x9f0] ss:$36 sps:$4 sm:$0xff]  }
 0x1e4   :  { %5105 = vmatpush1.bf16.msra.mxu0 %v7447_v16  ;;  %5310 = vmatpush1.bf16.msra.mxu1 %v7450_v17  ;;  %v7533_v16 = vld [vmem:[#allocation6 + $0xa34] ss:$36 sps:$4 sm:$0xff]   ;;  %v7536_v17 = vld [vmem:[#allocation6 + $0xa3c] ss:$36 sps:$4 sm:$0xff]  }
 0x1e5   :  { %5106 = vmatprep.subr.bf16.mxu0 %v7455_v18  ;;  %5311 = vmatprep.subr.bf16.mxu1 %v7458_v19  ;;  %v7531_v18 = vld [vmem:[#allocation6 + $0xa30] ss:$36 sps:$4 sm:$0xff]   ;;  %v7534_v19 = vld [vmem:[#allocation6 + $0xa38] ss:$36 sps:$4 sm:$0xff]  }
 0x1e8   :  { %5107 = vmatpush1.bf16.msra.mxu0 %v7453_v22  ;;  %5312 = vmatpush1.bf16.msra.mxu1 %v7456_v23  ;;  %v7539_v22 = vld [vmem:[#allocation6 + $0xa7c] ss:$36 sps:$4 sm:$0xff]   ;;  %v7542_v23 = vld [vmem:[#allocation6 + $0xa84] ss:$36 sps:$4 sm:$0xff]  }
 0x1e9   :  { %5108 = vmatprep.subr.bf16.mxu0 %v7461_v25  ;;  %5313 = vmatprep.subr.bf16.mxu1 %v7464_v26  ;;  %v7537_v25 = vld [vmem:[#allocation6 + $0xa78] ss:$36 sps:$4 sm:$0xff]   ;;  %v7540_v26 = vld [vmem:[#allocation6 + $0xa80] ss:$36 sps:$4 sm:$0xff]  }
 0x1ec   :  { %5109 = vmatpush1.bf16.msra.mxu0 %v7459_v13  ;;  %5314 = vmatpush1.bf16.msra.mxu1 %v7462_v27  ;;  %v7545_v13 = vld [vmem:[#allocation6 + $0xac4] ss:$36 sps:$4 sm:$0xff]   ;;  %v7548_v27 = vld [vmem:[#allocation6 + $0xacc] ss:$36 sps:$4 sm:$0xff]  }
 0x1ed   :  { %5110 = vmatprep.subr.bf16.mxu0 %v7467_v28  ;;  %5315 = vmatprep.subr.bf16.mxu1 %v7470_v32  ;;  %v7543_v28 = vld [vmem:[#allocation6 + $0xac0] ss:$36 sps:$4 sm:$0xff]   ;;  %v7546_v32 = vld [vmem:[#allocation6 + $0xac8] ss:$36 sps:$4 sm:$0xff]  }
 0x1f0   :  { %5111 = vmatpush1.bf16.msra.mxu0 %v7465_v33  ;;  %5316 = vmatpush1.bf16.msra.mxu1 %v7468_v34  ;;  %v7551_v33 = vld [vmem:[#allocation6 + $0xb0c] ss:$36 sps:$4 sm:$0xff]   ;;  %v7554_v34 = vld [vmem:[#allocation6 + $0xb14] ss:$36 sps:$4 sm:$0xff]  }
 0x1f1   :  { %5112 = vmatprep.subr.bf16.mxu0 %v7473_v36  ;;  %5317 = vmatprep.subr.bf16.mxu1 %v7476_v21  ;;  %v7549_v36 = vld [vmem:[#allocation6 + $0xb08] ss:$36 sps:$4 sm:$0xff]   ;;  %v7552_v21 = vld [vmem:[#allocation6 + $0xb10] ss:$36 sps:$4 sm:$0xff]  }
 0x1f4   :  { %5113 = vmatpush1.bf16.msra.mxu0 %v7471_v37  ;;  %5318 = vmatpush1.bf16.msra.mxu1 %v7474_v38  ;;  %v7557_v37 = vld [vmem:[#allocation6 + $0xb54] ss:$36 sps:$4 sm:$0xff]   ;;  %v7560_v38 = vld [vmem:[#allocation6 + $0xb5c] ss:$36 sps:$4 sm:$0xff]  }
 0x1f5   :  { %5114 = vmatprep.subr.bf16.mxu0 %v7479_v39  ;;  %5319 = vmatprep.subr.bf16.mxu1 %v7482_v40  ;;  %v7555_v39 = vld [vmem:[#allocation6 + $0xb50] ss:$36 sps:$4 sm:$0xff]   ;;  %v7558_v40 = vld [vmem:[#allocation6 + $0xb58] ss:$36 sps:$4 sm:$0xff]  }
 0x1f8   :  { %5115 = vmatpush1.bf16.msra.mxu0 %v7477_v42  ;;  %5320 = vmatpush1.bf16.msra.mxu1 %v7480_v43  ;;  %v7563_v42 = vld [vmem:[#allocation6 + $0xb9c] ss:$36 sps:$4 sm:$0xff]   ;;  %v7566_v43 = vld [vmem:[#allocation6 + $0xba4] ss:$36 sps:$4 sm:$0xff]  }
 0x1f9   :  { %5116 = vmatprep.subr.bf16.mxu0 %v7485_v44  ;;  %5321 = vmatprep.subr.bf16.mxu1 %v7488_v45  ;;  %v7561_v44 = vld [vmem:[#allocation6 + $0xb98] ss:$36 sps:$4 sm:$0xff]   ;;  %v7564_v45 = vld [vmem:[#allocation6 + $0xba0] ss:$36 sps:$4 sm:$0xff]  }
 0x1fc   :  { %5117 = vmatpush1.bf16.msra.mxu0 %v7483_v46  ;;  %5322 = vmatpush1.bf16.msra.mxu1 %v7486_v47  ;;  %v7569_v46 = vld [vmem:[#allocation6 + $0xbe4] ss:$36 sps:$4 sm:$0xff]   ;;  %v7572_v47 = vld [vmem:[#allocation6 + $0xbec] ss:$36 sps:$4 sm:$0xff]  }
 0x1fd   :  { %5118 = vmatprep.subr.bf16.mxu0 %v7491_v31  ;;  %5323 = vmatprep.subr.bf16.mxu1 %v7494_v49  ;;  %v7567_v31 = vld [vmem:[#allocation6 + $0xbe0] ss:$36 sps:$4 sm:$0xff]   ;;  %v7570_v49 = vld [vmem:[#allocation6 + $0xbe8] ss:$36 sps:$4 sm:$0xff]  }
 0x200   :  { %5119 = vmatpush1.bf16.msra.mxu0 %v7489_v50  ;;  %5324 = vmatpush1.bf16.msra.mxu1 %v7492_v51  ;;  %v7575_v50 = vld [vmem:[#allocation6 + $0xc2c] ss:$36 sps:$4 sm:$0xff]   ;;  %v7578_v51 = vld [vmem:[#allocation6 + $0xc34] ss:$36 sps:$4 sm:$0xff]  }
 0x201   :  { %5120 = vmatprep.subr.bf16.mxu0 %v7497_v52  ;;  %5325 = vmatprep.subr.bf16.mxu1 %v7500_v53  ;;  %v7573_v52 = vld [vmem:[#allocation6 + $0xc28] ss:$36 sps:$4 sm:$0xff]   ;;  %v7576_v53 = vld [vmem:[#allocation6 + $0xc30] ss:$36 sps:$4 sm:$0xff]  }
 0x204   :  { %5121 = vmatpush1.bf16.msra.mxu0 %v7495_v54  ;;  %5326 = vmatpush1.bf16.msra.mxu1 %v7498_v55  ;;  %v7581_v54 = vld [vmem:[#allocation6 + $0xc74] ss:$36 sps:$4 sm:$0xff]   ;;  %v7584_v55 = vld [vmem:[#allocation6 + $0xc7c] ss:$36 sps:$4 sm:$0xff]  }
 0x205   :  { %5122 = vmatprep.subr.bf16.mxu0 %v7503_v56  ;;  %5327 = vmatprep.subr.bf16.mxu1 %v7506_v57  ;;  %v7579_v56 = vld [vmem:[#allocation6 + $0xc70] ss:$36 sps:$4 sm:$0xff]   ;;  %v7582_v57 = vld [vmem:[#allocation6 + $0xc78] ss:$36 sps:$4 sm:$0xff]  }
 0x208   :  { %5123 = vmatpush1.bf16.msra.mxu0 %v7501_v58  ;;  %5328 = vmatpush1.bf16.msra.mxu1 %v7504_v59  ;;  %v7587_v58 = vld [vmem:[#allocation6 + $0xcbc] ss:$36 sps:$4 sm:$0xff]   ;;  %v7590_v59 = vld [vmem:[#allocation6 + $0xcc4] ss:$36 sps:$4 sm:$0xff]  }
 0x209   :  { %5133 = vmatprep.subr.bf16.mxu0 %v7509_v60  ;;  %5338 = vmatprep.subr.bf16.mxu1 %v7512_v61  ;;  %v7585_v60 = vld [vmem:[#allocation6 + $0xcb8] ss:$36 sps:$4 sm:$0xff]   ;;  %v7588_v61 = vld [vmem:[#allocation6 + $0xcc0] ss:$36 sps:$4 sm:$0xff]  }
 0x20b   :  { %5125 = vmatmul.mubr.bf16.vlgmr.msra.gmra.mrb[4].mxu0 %v8144_v10  ;;  %5330 = vmatmul.mubr.bf16.vlgmr.msra.gmra.mrb[4].mxu1 %v8144_v10 }
 0x20c   :  { %5134 = vmatpush1.bf16.msra.mxu0 %v7507_v62  ;;  %5339 = vmatpush1.bf16.msra.mxu1 %v7510_v63  ;;  %v7593_v62 = vld [vmem:[#allocation6 + $0xd04] ss:$36 sps:$4 sm:$0xff]   ;;  %v7596_v63 = vld [vmem:[#allocation6 + $0xd0c] ss:$36 sps:$4 sm:$0xff]  }
 0x20d   :  { %5135 = vmatprep.subr.bf16.mxu0 %v7515_v0  ;;  %5340 = vmatprep.subr.bf16.mxu1 %v7518_v1  ;;  %v7591_v0 = vld [vmem:[#allocation6 + $0xd00] ss:$36 sps:$4 sm:$0xff]   ;;  %v7594_v1 = vld [vmem:[#allocation6 + $0xd08] ss:$36 sps:$4 sm:$0xff]  }
 0x20e   :  { %5165 = vmatprep.mubr.bf16.mxu0 %v8150_v15  ;;  %5370 = vmatprep.mubr.bf16.mxu1 %v8150_v15 }
 0x210   :  { %5136 = vmatpush1.bf16.msra.mxu0 %v7513_v2  ;;  %5341 = vmatpush1.bf16.msra.mxu1 %v7516_v3  ;;  %v7599_v2 = vld [vmem:[#allocation6 + $0xd4c] ss:$36 sps:$4 sm:$0xff]   ;;  %v7602_v3 = vld [vmem:[#allocation6 + $0xd54] ss:$36 sps:$4 sm:$0xff]  }
 0x211   :  { %5137 = vmatprep.subr.bf16.mxu0 %v7521_v4  ;;  %5342 = vmatprep.subr.bf16.mxu1 %v7524_v6  ;;  %v7597_v4 = vld [vmem:[#allocation6 + $0xd48] ss:$36 sps:$4 sm:$0xff]   ;;  %v7600_v6 = vld [vmem:[#allocation6 + $0xd50] ss:$36 sps:$4 sm:$0xff]  }
 0x214   :  { %5138 = vmatpush1.bf16.msra.mxu0 %v7519_v7  ;;  %5343 = vmatpush1.bf16.msra.mxu1 %v7522_v8  ;;  %v7605_v7 = vld [vmem:[#allocation6 + $0xd94] ss:$36 sps:$4 sm:$0xff]   ;;  %v7608_v8 = vld [vmem:[#allocation6 + $0xd9c] ss:$36 sps:$4 sm:$0xff]  }
 0x215   :  { %5139 = vmatprep.subr.bf16.mxu0 %v7527_v9  ;;  %5344 = vmatprep.subr.bf16.mxu1 %v7530_v11  ;;  %v7603_v9 = vld [vmem:[#allocation6 + $0xd90] ss:$36 sps:$4 sm:$0xff]   ;;  %v7606_v11 = vld [vmem:[#allocation6 + $0xd98] ss:$36 sps:$4 sm:$0xff]  }
 0x218   :  { %5140 = vmatpush1.bf16.msra.mxu0 %v7525_v12  ;;  %5345 = vmatpush1.bf16.msra.mxu1 %v7528_v14  ;;  %v7611_v12 = vld [vmem:[#allocation6 + $0xddc] ss:$36 sps:$4 sm:$0xff]   ;;  %v7614_v14 = vld [vmem:[#allocation6 + $0xde4] ss:$36 sps:$4 sm:$0xff]  }
 0x219   :  { %5141 = vmatprep.subr.bf16.mxu0 %v7533_v16  ;;  %5346 = vmatprep.subr.bf16.mxu1 %v7536_v17  ;;  %v7609_v16 = vld [vmem:[#allocation6 + $0xdd8] ss:$36 sps:$4 sm:$0xff]   ;;  %v7612_v17 = vld [vmem:[#allocation6 + $0xde0] ss:$36 sps:$4 sm:$0xff]  }
 0x21c   :  { %5142 = vmatpush1.bf16.msra.mxu0 %v7531_v18  ;;  %5347 = vmatpush1.bf16.msra.mxu1 %v7534_v19  ;;  %v7617_v18 = vld [vmem:[#allocation6 + $0xe24] ss:$36 sps:$4 sm:$0xff]   ;;  %v7620_v19 = vld [vmem:[#allocation6 + $0xe2c] ss:$36 sps:$4 sm:$0xff]  }
 0x21d   :  { %5143 = vmatprep.subr.bf16.mxu0 %v7539_v22  ;;  %5348 = vmatprep.subr.bf16.mxu1 %v7542_v23  ;;  %v881_v22 = vlaneseq  ;;  %v7615_v23 = vld [vmem:[#allocation6 + $0xe20] ss:$36 sps:$4 sm:$0xff]  }
 0x220   :  { %5144 = vmatpush1.bf16.msra.mxu0 %v7537_v25  ;;  %5349 = vmatpush1.bf16.msra.mxu1 %v7540_v26  ;;  %v7618_v25 = vld [vmem:[#allocation6 + $0xe28] ss:$36 sps:$4 sm:$0xff]  }
 0x221   :  { %5145 = vmatprep.subr.bf16.mxu0 %v7545_v13  ;;  %5350 = vmatprep.subr.bf16.mxu1 %v7548_v27  ;;  %v7623_v26 = vld [vmem:[#allocation6 + $0xe6c] ss:$36 sps:$4 sm:$0xff]   ;;  %v7626_v13 = vld [vmem:[#allocation6 + $0xe74] ss:$36 sps:$4 sm:$0xff]   ;;  %v8205_v27 = vshrl.u32 %v881_v22, 7 }
 0x224   :  { %5146 = vmatpush1.bf16.msra.mxu0 %v7543_v28  ;;  %5351 = vmatpush1.bf16.msra.mxu1 %v7546_v32  ;;  %v7621_v28 = vld [vmem:[#allocation6 + $0xe68] ss:$36 sps:$4 sm:$0xff]   ;;  %v7624_v32 = vld [vmem:[#allocation6 + $0xe70] ss:$36 sps:$4 sm:$0xff]  }
 0x225   :  { %5147 = vmatprep.subr.bf16.mxu0 %v7551_v33  ;;  %5352 = vmatprep.subr.bf16.mxu1 %v7554_v34  ;;  %v7629_v33 = vld [vmem:[#allocation6 + $0xeb4] ss:$36 sps:$4 sm:$0xff]   ;;  %v7632_v34 = vld [vmem:[#allocation6 + $0xebc] ss:$36 sps:$4 sm:$0xff]  }
 0x228   :  { %5148 = vmatpush1.bf16.msra.mxu0 %v7549_v36  ;;  %5353 = vmatpush1.bf16.msra.mxu1 %v7552_v21  ;;  %v7627_v36 = vld [vmem:[#allocation6 + $0xeb0] ss:$36 sps:$4 sm:$0xff]   ;;  %v883_v21 = vsub.s32 0, %v8205_v27 }
 0x229   :  { %5149 = vmatprep.subr.bf16.mxu0 %v7557_v37  ;;  %5354 = vmatprep.subr.bf16.mxu1 %v7560_v38  ;;  %v891_v37 = vsub.s32 2, %v8205_v27  ;;  %v7630_v38 = vld [vmem:[#allocation6 + $0xeb8] ss:$36 sps:$4 sm:$0xff]  }
 0x22c   :  { %5150 = vmatpush1.bf16.msra.mxu0 %v7555_v39  ;;  %5355 = vmatpush1.bf16.msra.mxu1 %v7558_v40  ;;  %v8209_v39 = vld [vmem:[#allocation8] sm:$0xff]  ;;  %v887_v40 = vsub.s32 1, %v8205_v27 }
 0x22d   :  { %5151 = vmatprep.subr.bf16.mxu0 %v7563_v42  ;;  %5356 = vmatprep.subr.bf16.mxu1 %v7566_v43  ;;  %v895_v42 = vsub.s32 3, %v8205_v27  ;;  %v7635_v43 = vld [vmem:[#allocation6 + $0xefc] ss:$36 sps:$4 sm:$0xff]  }
 0x230   :  { %5152 = vmatpush1.bf16.msra.mxu0 %v7561_v44  ;;  %5357 = vmatpush1.bf16.msra.mxu1 %v7564_v45  ;;  %v7638_v44 = vld [vmem:[#allocation6 + $0xf04] ss:$36 sps:$4 sm:$0xff]   ;;  %v884_v45 = vrot.slane %v8209_v39, %v883_v21 }
 0x231   :  { %5153 = vmatprep.subr.bf16.mxu0 %v7569_v46  ;;  %5358 = vmatprep.subr.bf16.mxu1 %v7572_v47  ;;  %v892_v46 = vrot.slane %v8209_v39, %v891_v37  ;;  %v888_v47 = vrot.slane %v8209_v39, %v887_v40 }
 0x234   :  { %5154 = vmatpush1.bf16.msra.mxu0 %v7567_v31  ;;  %5359 = vmatpush1.bf16.msra.mxu1 %v7570_v49  ;;  %v896_v31 = vrot.slane %v8209_v39, %v895_v42  ;;  %v7633_v49 = vld [vmem:[#allocation6 + $0xef8] ss:$36 sps:$4 sm:$0xff]  }
 0x235   :  { %5155 = vmatprep.subr.bf16.mxu0 %v7575_v50  ;;  %5360 = vmatprep.subr.bf16.mxu1 %v7578_v51  ;;  %v7636_v50 = vld [vmem:[#allocation6 + $0xf00] ss:$36 sps:$4 sm:$0xff]  }
 0x236   :  { %v7641_v51 = vld [vmem:[#allocation6 + $0xf44] ss:$36 sps:$4 sm:$0xff]  }
 0x238   :  { %5156 = vmatpush1.bf16.msra.mxu0 %v7573_v52  ;;  %5361 = vmatpush1.bf16.msra.mxu1 %v7576_v53  ;;  %v7644_v52 = vld [vmem:[#allocation6 + $0xf4c] ss:$36 sps:$4 sm:$0xff]  }
 0x239   :  { %5157 = vmatprep.subr.bf16.mxu0 %v7581_v54  ;;  %5362 = vmatprep.subr.bf16.mxu1 %v7584_v55 }
 0x23c   :  { %5158 = vmatpush1.bf16.msra.mxu0 %v7579_v56  ;;  %5363 = vmatpush1.bf16.msra.mxu1 %v7582_v57 }
 0x23d   :  { %5159 = vmatprep.subr.bf16.mxu0 %v7587_v58  ;;  %5364 = vmatprep.subr.bf16.mxu1 %v7590_v59  ;;  %v7639_v59 = vld [vmem:[#allocation6 + $0xf40] ss:$36 sps:$4 sm:$0xff]  }
 0x240   :  { %5160 = vmatpush1.bf16.msra.mxu0 %v7585_v60  ;;  %5365 = vmatpush1.bf16.msra.mxu1 %v7588_v61 }
 0x241   :  { %5161 = vmatprep.subr.bf16.mxu0 %v7593_v62  ;;  %5366 = vmatprep.subr.bf16.mxu1 %v7596_v63 }
 0x244   :  { %5162 = vmatpush1.bf16.msra.mxu0 %v7591_v0  ;;  %5367 = vmatpush1.bf16.msra.mxu1 %v7594_v1  ;;  %v7642_v0 = vld [vmem:[#allocation6 + $0xf48] ss:$36 sps:$4 sm:$0xff]  }
 0x245   :  { %5163 = vmatprep.subr.bf16.mxu0 %v7599_v2  ;;  %5368 = vmatprep.subr.bf16.mxu1 %v7602_v3  ;;  %v7647_v1 = vld [vmem:[#allocation6 + $0xf8c] ss:$36 sps:$4 sm:$0xff]  }
 0x248   :  { %5164 = vmatpush1.bf16.msra.mxu0 %v7597_v4  ;;  %5369 = vmatpush1.bf16.msra.mxu1 %v7600_v6  ;;  %v7650_v6 = vld [vmem:[#allocation6 + $0xf94] ss:$36 sps:$4 sm:$0xff]  }
 0x249   :  { %5174 = vmatprep.subr.bf16.mxu0 %v7605_v7  ;;  %5379 = vmatprep.subr.bf16.mxu1 %v7608_v8 }
 0x24b   :  { %5166 = vmatmul.mubr.bf16.vlgmr.msra.gmra.mrb[4].mxu0 %v8158_v20  ;;  %5371 = vmatmul.mubr.bf16.vlgmr.msra.gmra.mrb[4].mxu1 %v8158_v20 }
 0x24c   :  { %5175 = vmatpush1.bf16.msra.mxu0 %v7603_v9  ;;  %5380 = vmatpush1.bf16.msra.mxu1 %v7606_v11  ;;  %v7645_v11 = vld [vmem:[#allocation6 + $0xf88] ss:$36 sps:$4 sm:$0xff]  }
 0x24d   :  { %5176 = vmatprep.subr.bf16.mxu0 %v7611_v12  ;;  %5381 = vmatprep.subr.bf16.mxu1 %v7614_v14  ;;  %v7648_v14 = vld [vmem:[#allocation6 + $0xf90] ss:$36 sps:$4 sm:$0xff]  }
 0x24e   :  { %5206 = vmatprep.mubr.bf16.mxu0 %v8164_v24  ;;  %5411 = vmatprep.mubr.bf16.mxu1 %v8164_v24 }
 0x250   :  { %5177 = vmatpush1.bf16.msra.mxu0 %v7609_v16  ;;  %5382 = vmatpush1.bf16.msra.mxu1 %v7612_v17  ;;  %v7653_v16 = vld [vmem:[#allocation6 + $0xfd4] ss:$36 sps:$4 sm:$0xff]  }
 0x251   :  { %5178 = vmatprep.subr.bf16.mxu0 %v7617_v18  ;;  %5383 = vmatprep.subr.bf16.mxu1 %v7620_v19  ;;  %v7656_v19 = vld [vmem:[#allocation6 + $0xfdc] ss:$36 sps:$4 sm:$0xff]  }
 0x254   :  { %5179 = vmatpush1.bf16.msra.mxu0 %v7615_v23  ;;  %5384 = vmatpush1.bf16.msra.mxu1 %v7618_v25 }
 0x255   :  { %5180 = vmatprep.subr.bf16.mxu0 %v7623_v26  ;;  %5385 = vmatprep.subr.bf16.mxu1 %v7626_v13  ;;  %v7651_v26 = vld [vmem:[#allocation6 + $0xfd0] ss:$36 sps:$4 sm:$0xff]   ;;  %v7654_v13 = vld [vmem:[#allocation6 + $0xfd8] ss:$36 sps:$4 sm:$0xff]  }
 0x258   :  { %5181 = vmatpush1.bf16.msra.mxu0 %v7621_v28  ;;  %5386 = vmatpush1.bf16.msra.mxu1 %v7624_v32  ;;  %v7659_v28 = vld [vmem:[#allocation6 + $0x101c] ss:$36 sps:$4 sm:$0xff]   ;;  %v7662_v32 = vld [vmem:[#allocation6 + $0x1024] ss:$36 sps:$4 sm:$0xff]  }
 0x259   :  { %5182 = vmatprep.subr.bf16.mxu0 %v7629_v33  ;;  %5387 = vmatprep.subr.bf16.mxu1 %v7632_v34  ;;  %v7657_v33 = vld [vmem:[#allocation6 + $0x1018] ss:$36 sps:$4 sm:$0xff]   ;;  %v7660_v34 = vld [vmem:[#allocation6 + $0x1020] ss:$36 sps:$4 sm:$0xff]  }
 0x25c   :  { %5183 = vmatpush1.bf16.msra.mxu0 %v7627_v36  ;;  %5388 = vmatpush1.bf16.msra.mxu1 %v7630_v38  ;;  %v7665_v36 = vld [vmem:[#allocation6 + $0x1064] ss:$36 sps:$4 sm:$0xff]   ;;  %v7668_v38 = vld [vmem:[#allocation6 + $0x106c] ss:$36 sps:$4 sm:$0xff]  }
 0x25d   :  { %5184 = vmatprep.subr.bf16.mxu0 %v7635_v43  ;;  %5389 = vmatprep.subr.bf16.mxu1 %v7638_v44  ;;  %v7663_v43 = vld [vmem:[#allocation6 + $0x1060] ss:$36 sps:$4 sm:$0xff]   ;;  %v7666_v44 = vld [vmem:[#allocation6 + $0x1068] ss:$36 sps:$4 sm:$0xff]  }
 0x25e   :  { %v4839_v53 = vpop.f32.mrb[0].mxu0  ;;  %v5044_v54 = vpop.f32.mrb[0].mxu1 }
 0x25f   :  { %v8225_v55 = vadd.f32 %v4839_v53, %v884_v45  ;;  %v8227_v56 = vadd.f32 %v5044_v54, %v892_v46  ;;  %v4841_v57 = vpop.f32.mrb[1].mxu0  ;;  %v5046_v58 = vpop.f32.mrb[1].mxu1  ;;  %v7671_v46 = vld [vmem:[#allocation6 + $0x10ac] ss:$36 sps:$4 sm:$0xff]  }
 0x260   :  { %v8229_v60 = vadd.f32 %v4841_v57, %v888_v47  ;;  %v8231_v61 = vadd.f32 %v5046_v58, %v896_v31  ;;  %v4843_v62 = vpop.f32.mrb[2].mxu0  ;;  %v5048_v63 = vpop.f32.mrb[2].mxu1  ;;  %5185 = vmatpush1.bf16.msra.mxu0 %v7633_v49  ;;  %5390 = vmatpush1.bf16.msra.mxu1 %v7636_v50  ;;  %v7674_v47 = vld [vmem:[#allocation6 + $0x10b4] ss:$36 sps:$4 sm:$0xff]   ;;  %v7669_v53 = vld [vmem:[#allocation6 + $0x10a8] ss:$36 sps:$4 sm:$0xff]  }
 0x261   :  { %v5686_v2 = vand.u32 2147483647, %v8227_v56  ;;  %v4844_v3 = vpop.f32.mrb[3].mxu0  ;;  %v5049_v4 = vpop.f32.mrb[3].mxu1  ;;  %5186 = vmatprep.subr.bf16.mxu0 %v7641_v51  ;;  %5391 = vmatprep.subr.bf16.mxu1 %v7644_v52  ;;  %v7672_v54 = vld [vmem:[#allocation6 + $0x10b0] ss:$36 sps:$4 sm:$0xff]   ;;  %vm5670_vm3 = vcmp.ne.f32.partialorder %v8227_v56, %v8227_v56 }
 0x262   :  { %v5685_v7 = vand.u32 2147483647, %v8229_v60  ;;  %v5687_v9 = vand.u32 2147483647, %v8231_v61  ;;  %v7677_v57 = vld [vmem:[#allocation6 + $0x10f4] ss:$36 sps:$4 sm:$0xff]   ;;  %vm5669_vm4 = vcmp.ne.f32.partialorder %v8229_v60, %v8229_v60  ;;  %vm5671_vm5 = vcmp.ne.f32.partialorder %v8231_v61, %v8231_v61 }
 0x263   :  { %v5694_v8 = vsub.f32 0.0, %v5686_v2  ;;  %v7680_v58 = vld [vmem:[#allocation6 + $0x10fc] ss:$36 sps:$4 sm:$0xff]   ;;  %v7675_v63 = vld [vmem:[#allocation6 + $0x10f0] ss:$36 sps:$4 sm:$0xff]  }
 0x264   :  { %v5693_v12 = vsub.f32 0.0, %v5685_v7  ;;  %5187 = vmatpush1.bf16.msra.mxu0 %v7639_v59  ;;  %5392 = vmatpush1.bf16.msra.mxu1 %v7642_v0  ;;  %v5695_v18 = vsub.f32 0.0, %v5687_v9  ;;  %v7678_v0 = vld [vmem:[#allocation6 + $0x10f8] ss:$36 sps:$4 sm:$0xff]   ;;  %v7686_v3 = vld [vmem:[#allocation6 + $0x1144] ss:$36 sps:$4 sm:$0xff]  }
 0x265   :  { %v5703_v17 = vmul.f32 1.442695, %v5694_v8  ;;  %5188 = vmatprep.subr.bf16.mxu0 %v7647_v1  ;;  %5393 = vmatprep.subr.bf16.mxu1 %v7650_v6  ;;  %v7683_v2 = vld [vmem:[#allocation6 + $0x113c] ss:$36 sps:$4 sm:$0xff]  }
 0x266   :  { %v5701_v23 = vmul.f32 1.442695, %v5693_v12  ;;  %v5705_v25 = vmul.f32 1.442695, %v5695_v18  ;;  %v7681_v6 = vld [vmem:[#allocation6 + $0x1138] ss:$36 sps:$4 sm:$0xff]  }
 0x267   :  { %7875 = vpow2.f32 %v5703_v17  ;;  %v7684_v7 = vld [vmem:[#allocation6 + $0x1140] ss:$36 sps:$4 sm:$0xff]  }
 0x268   :  { %7877 = vpow2.f32 %v5701_v23  ;;  %5189 = vmatpush1.bf16.msra.mxu0 %v7645_v11  ;;  %5394 = vmatpush1.bf16.msra.mxu1 %v7648_v14  ;;  %v7689_v11 = vld [vmem:[#allocation6 + $0x1184] ss:$36 sps:$4 sm:$0xff]  }
 0x269   :  { %7879 = vpow2.f32 %v5705_v25  ;;  %5190 = vmatprep.subr.bf16.mxu0 %v7653_v16  ;;  %5395 = vmatprep.subr.bf16.mxu1 %v7656_v19  ;;  %v7692_v16 = vld [vmem:[#allocation6 + $0x118c] ss:$36 sps:$4 sm:$0xff]   ;;  %v7687_v19 = vld [vmem:[#allocation6 + $0x1180] ss:$36 sps:$4 sm:$0xff]  }
 0x26a   :  { %v7690_v23 = vld [vmem:[#allocation6 + $0x1188] ss:$36 sps:$4 sm:$0xff]  }
 0x26c   :  { %5191 = vmatpush1.bf16.msra.mxu0 %v7651_v26  ;;  %5396 = vmatpush1.bf16.msra.mxu1 %v7654_v13  ;;  %v5662_v26 = vmax.f32 %v8227_v56, 0.0 }
 0x26d   :  { %5192 = vmatprep.subr.bf16.mxu0 %v7659_v28  ;;  %5397 = vmatprep.subr.bf16.mxu1 %v7662_v32  ;;  %v7695_v32 = vld [vmem:[#allocation6 + $0x11cc] ss:$36 sps:$4 sm:$0xff]  }
 0x270   :  { %5193 = vmatpush1.bf16.msra.mxu0 %v7657_v33  ;;  %5398 = vmatpush1.bf16.msra.mxu1 %v7660_v34  ;;  %v5661_v34 = vmax.f32 %v8229_v60, 0.0 }
 0x271   :  { %v7876_v45 = vpop.eup %7875  ;;  %5194 = vmatprep.subr.bf16.mxu0 %v7665_v36  ;;  %5399 = vmatprep.subr.bf16.mxu1 %v7668_v38 }
 0x272   :  { %v7878_v31 = vpop.eup %7877  ;;  %v5726_v49 = vadd.f32 1.0, %v7876_v45  ;;  %v5729_v59 = vmul.f32 -0.5, %v7876_v45  ;;  %v5732_v8 = vand.u32 2147483647, %v7876_v45 }
 0x273   :  { %v8236_v50 = vpop.eup %7879  ;;  %v5717_v51 = vadd.f32 1.0, %v7878_v31  ;;  %v5720_v62 = vmul.f32 -0.5, %v7878_v31  ;;  %v5723_v12 = vand.u32 2147483647, %v7878_v31 }
 0x274   :  { %7881 = vlog2.f32 %v5726_v49  ;;  %v5735_v52 = vadd.f32 1.0, %v8236_v50  ;;  %5195 = vmatpush1.bf16.msra.mxu0 %v7663_v43  ;;  %5400 = vmatpush1.bf16.msra.mxu1 %v7666_v44  ;;  %v5738_v1 = vmul.f32 -0.5, %v8236_v50  ;;  %v5730_v4 = vadd.f32 1.0, %v5729_v59  ;;  %v7701_v59 = vld [vmem:[#allocation6 + $0x1214] ss:$36 sps:$4 sm:$0xff]  }
 0x275   :  { %7883 = vlog2.f32 %v5717_v51  ;;  %5196 = vmatprep.subr.bf16.mxu0 %v7671_v46  ;;  %5401 = vmatprep.subr.bf16.mxu1 %v7674_v47  ;;  %v5721_v9 = vadd.f32 1.0, %v5720_v62  ;;  %v5741_v18 = vand.u32 2147483647, %v8236_v50  ;;  %vm5733_vm0 = vcmp.lt.f32.partialorder %v5732_v8, 0.0004427343 }
 0x276   :  { %7885 = vlog2.f32 %v5735_v52  ;;  %v5739_v14 = vadd.f32 1.0, %v5738_v1  ;;  %v5731_v28 = vmul.f32 %v7876_v45, %v5730_v4  ;;  %vm5724_vm1 = vcmp.lt.f32.partialorder %v5723_v12, 0.0004427343  ;;  %v7698_v47 = vld [vmem:[#allocation6 + $0x11d4] ss:$36 sps:$4 sm:$0xff]   ;;  %v8254_v4 = vld [vmem:[#allocation9] sm:$0xff] }
 0x277   :  { %v5722_v38 = vmul.f32 %v7878_v31, %v5721_v9  ;;  %v5663_v45 = vmax.f32 %v8231_v61, 0.0  ;;  %vm5742_vm2 = vcmp.lt.f32.partialorder %v5741_v18, 0.0004427343  ;;  %v7704_v62 = vld [vmem:[#allocation6 + $0x121c] ss:$36 sps:$4 sm:$0xff]  }
 0x278   :  { %5197 = vmatpush1.bf16.msra.mxu0 %v7669_v53  ;;  %5402 = vmatpush1.bf16.msra.mxu1 %v7672_v54  ;;  %v5740_v46 = vmul.f32 %v8236_v50, %v5739_v14  ;;  %v7693_v50 = vld [vmem:[#allocation6 + $0x11c8] ss:$36 sps:$4 sm:$0xff]   ;;  %v7702_v1 = vld [vmem:[#allocation6 + $0x1218] ss:$36 sps:$4 sm:$0xff]   ;;  %v5826_v14 = vrot.slane %v8254_v4, %v883_v21  ;;  %v7711_v18 = vld [vmem:[#allocation6 + $0x12a0] ss:$36 sps:$4 sm:$0xff]  }
 0x279   :  { %5198 = vmatprep.subr.bf16.mxu0 %v7677_v57  ;;  %5403 = vmatprep.subr.bf16.mxu1 %v7680_v58  ;;  %v7696_v57 = vld [vmem:[#allocation6 + $0x11d0] ss:$36 sps:$4 sm:$0xff]   ;;  %v7713_v8 = vld [vmem:[#allocation6 + $0x12a4] ss:$36 sps:$4 sm:$0xff]  }
 0x27a   :  { %v7716_v9 = vld [vmem:[#allocation6 + $0x12ac] ss:$36 sps:$4 sm:$0xff]  }
 0x27c   :  { %5199 = vmatpush1.bf16.msra.mxu0 %v7675_v63  ;;  %5404 = vmatpush1.bf16.msra.mxu1 %v7678_v0  ;;  %v7699_v0 = vld [vmem:[#allocation6 + $0x1210] ss:$36 sps:$4 sm:$0xff]  }
 0x27d   :  { %5200 = vmatprep.subr.bf16.mxu0 %v7683_v2  ;;  %5405 = vmatprep.subr.bf16.mxu1 %v7686_v3  ;;  %v7707_v2 = vld [vmem:[#allocation6 + $0x125c] ss:$36 sps:$4 sm:$0xff]   ;;  %v7710_v3 = vld [vmem:[#allocation6 + $0x1264] ss:$36 sps:$4 sm:$0xff]  }
 0x27e   :  { %v7882_v17 = vpop.eup %7881 }
 0x27f   :  { %v7884_v25 = vpop.eup %7883  ;;  %v5728_v13 = vmul.f32 0.6931472, %v7882_v17 }
 0x280   :  { %v7886_v33 = vpop.eup %7885  ;;  %v5719_v36 = vmul.f32 0.6931472, %v7884_v25  ;;  %5201 = vmatpush1.bf16.msra.mxu0 %v7681_v6  ;;  %5406 = vmatpush1.bf16.msra.mxu1 %v7684_v7  ;;  %v7705_v6 = vld [vmem:[#allocation6 + $0x1258] ss:$36 sps:$4 sm:$0xff]   ;;  %v7708_v7 = vld [vmem:[#allocation6 + $0x1260] ss:$36 sps:$4 sm:$0xff]  }
 0x281   :  { %v5734_v43 = vsel %vm5733_vm0, %v5731_v28, %v5728_v13  ;;  %v5737_v44 = vmul.f32 0.6931472, %v7886_v33  ;;  %5202 = vmatprep.subr.bf16.mxu0 %v7689_v11  ;;  %5407 = vmatprep.subr.bf16.mxu1 %v7692_v16  ;;  %v5830_v11 = vrot.slane %v8254_v4, %v887_v40  ;;  %v5834_v40 = vrot.slane %v8254_v4, %v891_v37  ;;  %v7722_v13 = vld [vmem:[#allocation6 + $0x12f4] ss:$36 sps:$4 sm:$0xff]  }
 0x282   :  { %v5790_v49 = vadd.f32 %v5734_v43, %v5662_v26  ;;  %v5725_v51 = vsel %vm5724_vm1, %v5722_v38, %v5719_v36  ;;  %v7719_v26 = vld [vmem:[#allocation6 + $0x12ec] ss:$36 sps:$4 sm:$0xff]   ;;  %v7725_v36 = vld [vmem:[#allocation6 + $0x1334] ss:$36 sps:$4 sm:$0xff]   ;;  %v7728_v38 = vld [vmem:[#allocation6 + $0x133c] ss:$36 sps:$4 sm:$0xff]  }
 0x283   :  { %v5789_v52 = vadd.f32 %v5725_v51, %v5661_v34  ;;  %v5743_v31 = vsel %vm5742_vm2, %v5740_v46, %v5737_v44  ;;  %v7720_v33 = vld [vmem:[#allocation6 + $0x12f0] ss:$36 sps:$4 sm:$0xff]   ;;  %v7726_v44 = vld [vmem:[#allocation6 + $0x1338] ss:$36 sps:$4 sm:$0xff]   ;;  %v7734_v46 = vld [vmem:[#allocation6 + $0x1384] ss:$36 sps:$4 sm:$0xff]  }
 0x284   :  { %v5798_v53 = vsel %vm5670_vm3, %v8227_v56, %v5790_v49  ;;  %v5791_v54 = vadd.f32 %v5743_v31, %v5663_v45  ;;  %5203 = vmatpush1.bf16.msra.mxu0 %v7687_v19  ;;  %5408 = vmatpush1.bf16.msra.mxu1 %v7690_v23  ;;  %v7714_v19 = vld [vmem:[#allocation6 + $0x12a8] ss:$36 sps:$4 sm:$0xff]   ;;  %v7732_v49 = vld [vmem:[#allocation6 + $0x1380] ss:$36 sps:$4 sm:$0xff]  }
 0x285   :  { %7887 = vtanh.f32 %v5798_v53  ;;  %v5797_v58 = vsel %vm5669_vm4, %v8229_v60, %v5789_v52  ;;  %5204 = vmatprep.subr.bf16.mxu0 %v7695_v32  ;;  %5409 = vmatprep.subr.bf16.mxu1 %v7698_v47  ;;  %v7729_v47 = vld [vmem:[#allocation6 + $0x1378] ss:$36 sps:$4 sm:$0xff]   ;;  %v7737_v51 = vld [vmem:[#allocation6 + $0x13c4] ss:$36 sps:$4 sm:$0xff]   ;;  %v7740_v45 = vld [vmem:[#allocation6 + $0x13cc] ss:$36 sps:$4 sm:$0xff]  }
 0x286   :  { %7889 = vtanh.f32 %v5797_v58  ;;  %v5799_v63 = vsel %vm5671_vm5, %v8231_v61, %v5791_v54  ;;  %v7735_v52 = vld [vmem:[#allocation6 + $0x13c0] ss:$36 sps:$4 sm:$0xff]   ;;  %v7738_v31 = vld [vmem:[#allocation6 + $0x13c8] ss:$36 sps:$4 sm:$0xff]   ;;  %v7746_v54 = vld [vmem:[#allocation6 + $0x1414] ss:$36 sps:$4 sm:$0xff]  }
 0x287   :  { %7891 = vtanh.f32 %v5799_v63  ;;  %v7743_v53 = vld [vmem:[#allocation6 + $0x140c] ss:$36 sps:$4 sm:$0xff]   ;;  %v7749_v58 = vld [vmem:[#allocation6 + $0x1454] ss:$36 sps:$4 sm:$0xff]  }
 0x288   :  { %5205 = vmatpush1.bf16.msra.mxu0 %v7693_v50  ;;  %5410 = vmatpush1.bf16.msra.mxu1 %v7696_v57  ;;  %v7741_v50 = vld [vmem:[#allocation6 + $0x1408] ss:$36 sps:$4 sm:$0xff]   ;;  %v7744_v57 = vld [vmem:[#allocation6 + $0x1410] ss:$36 sps:$4 sm:$0xff]   ;;  %v7750_v63 = vld [vmem:[#allocation6 + $0x1458] ss:$36 sps:$4 sm:$0xff]  }
 0x289   :  { %5215 = vmatprep.subr.bf16.mxu0 %v7701_v59  ;;  %5420 = vmatprep.subr.bf16.mxu1 %v7704_v62  ;;  %v7752_v59 = vld [vmem:[#allocation6 + $0x145c] ss:$36 sps:$4 sm:$0xff]   ;;  %v7747_v62 = vld [vmem:[#allocation6 + $0x1450] ss:$36 sps:$4 sm:$0xff]  }
 0x28b   :  { %5207 = vmatmul.mubr.bf16.vlgmr.msra.gmra.mrb[4].mxu0 %v8172_v29  ;;  %5412 = vmatmul.mubr.bf16.vlgmr.msra.gmra.mrb[4].mxu1 %v8172_v29 }
 0x28c   :  { %5216 = vmatpush1.bf16.msra.mxu0 %v7699_v0  ;;  %5421 = vmatpush1.bf16.msra.mxu1 %v7702_v1  ;;  %v7755_v0 = vld [vmem:[#allocation6 + $0x149c] ss:$36 sps:$4 sm:$0xff]   ;;  %v7758_v1 = vld [vmem:[#allocation6 + $0x14a4] ss:$36 sps:$4 sm:$0xff]  }
 0x28d   :  { %5217 = vmatprep.subr.bf16.mxu0 %v7707_v2  ;;  %5422 = vmatprep.subr.bf16.mxu1 %v7710_v3  ;;  %v7753_v2 = vld [vmem:[#allocation6 + $0x1498] ss:$36 sps:$4 sm:$0xff]   ;;  %v7756_v3 = vld [vmem:[#allocation6 + $0x14a0] ss:$36 sps:$4 sm:$0xff]  }
 0x28e   :  { %5247 = vmatprep.mubr.bf16.mxu0 %v8178_v35  ;;  %5452 = vmatprep.mubr.bf16.mxu1 %v8178_v35 }
 0x28f   :  { %v7888_v12 = vpop.eup %7887 }
 0x290   :  { %v7890_v16 = vpop.eup %7889  ;;  %v5814_v17 = vmul.f32 %v7888_v12, %v8227_v56  ;;  %5218 = vmatpush1.bf16.msra.mxu0 %v7705_v6  ;;  %5423 = vmatpush1.bf16.msra.mxu1 %v7708_v7  ;;  %v7717_v56 = vld [vmem:[#allocation6 + $0x12e8] ss:$36 sps:$4 sm:$0xff]   ;;  %v7770_v12 = vld [vmem:[#allocation6 + $0x1534] ss:$36 sps:$4 sm:$0xff]  }
 0x291   :  { %v7892_v23 = vpop.eup %7891  ;;  %v5813_v25 = vmul.f32 %v7890_v16, %v8229_v60  ;;  %5219 = vmatprep.subr.bf16.mxu0 %v7713_v8  ;;  %5424 = vmatprep.subr.bf16.mxu1 %v7716_v9  ;;  %v7723_v60 = vld [vmem:[#allocation6 + $0x1330] ss:$36 sps:$4 sm:$0xff]   ;;  %v7761_v6 = vld [vmem:[#allocation6 + $0x14e4] ss:$36 sps:$4 sm:$0xff]  }
 0x292   :  { %v5864_v28 = vmul.f32 %v5830_v11, %v5814_v17  ;;  %v5815_v21 = vmul.f32 %v7892_v23, %v8231_v61  ;;  %v7731_v61 = vld [vmem:[#allocation6 + $0x137c] ss:$36 sps:$4 sm:$0xff]   ;;  %v7764_v7 = vld [vmem:[#allocation6 + $0x14ec] ss:$36 sps:$4 sm:$0xff]   ;;  %v7773_v17 = vld [vmem:[#allocation6 + $0x1574] ss:$36 sps:$4 sm:$0xff]  }
 0x293   :  { %v5863_v32 = vmul.f32 %v5826_v14, %v5813_v25  ;;  %v7759_v8 = vld [vmem:[#allocation6 + $0x14e0] ss:$36 sps:$4 sm:$0xff]   ;;  %v7762_v9 = vld [vmem:[#allocation6 + $0x14e8] ss:$36 sps:$4 sm:$0xff]   ;;  %v7768_v16 = vld [vmem:[#allocation6 + $0x1530] ss:$36 sps:$4 sm:$0xff]  }
 0x294   :  { %5220 = vmatpush1.bf16.msra.mxu0 %v7711_v18  ;;  %5425 = vmatpush1.bf16.msra.mxu1 %v7714_v19  ;;  %v5865_v37 = vmul.f32 %v5834_v40, %v5815_v21  ;;  %v7767_v11 = vld [vmem:[#allocation6 + $0x152c] ss:$36 sps:$4 sm:$0xff]   ;;  %v7776_v18 = vld [vmem:[#allocation6 + $0x157c] ss:$36 sps:$4 sm:$0xff]   ;;  %v7782_v25 = vld [vmem:[#allocation6 + $0x15c4] ss:$36 sps:$4 sm:$0xff]  }
 0x295   :  { %v5871_v34 = vadd.f32 %v5864_v28, %v5863_v32  ;;  %5221 = vmatprep.subr.bf16.mxu0 %v7719_v26  ;;  %5426 = vmatprep.subr.bf16.mxu1 %v7722_v13  ;;  %v7765_v14 = vld [vmem:[#allocation6 + $0x1528] ss:$36 sps:$4 sm:$0xff]   ;;  %v7771_v19 = vld [vmem:[#allocation6 + $0x1570] ss:$36 sps:$4 sm:$0xff]   ;;  %v7774_v23 = vld [vmem:[#allocation6 + $0x1578] ss:$36 sps:$4 sm:$0xff]  }
 0x296   :  { %v7779_v40 = vld [vmem:[#allocation6 + $0x15bc] ss:$36 sps:$4 sm:$0xff]   ;;  %v7785_v28 = vld [vmem:[#allocation6 + $0x1604] ss:$36 sps:$4 sm:$0xff]   ;;  %v7788_v21 = vld [vmem:[#allocation6 + $0x160c] ss:$36 sps:$4 sm:$0xff]  }
 0x297   :  { %v8272_v43 = vadd.f32 %v5871_v34, %v5865_v37  ;;  %v7777_v26 = vld [vmem:[#allocation6 + $0x15b8] ss:$36 sps:$4 sm:$0xff]   ;;  %v7780_v13 = vld [vmem:[#allocation6 + $0x15c0] ss:$36 sps:$4 sm:$0xff]  }
 0x298   :  { %5222 = vmatpush1.bf16.msra.mxu0 %v7717_v56  ;;  %5427 = vmatpush1.bf16.msra.mxu1 %v7720_v33  ;;  %v7783_v32 = vld [vmem:[#allocation6 + $0x1600] ss:$36 sps:$4 sm:$0xff]   ;;  %v7786_v56 = vld [vmem:[#allocation6 + $0x1608] ss:$36 sps:$4 sm:$0xff]   ;;  %v7794_v34 = vld [vmem:[#allocation6 + $0x1654] ss:$36 sps:$4 sm:$0xff]  }
 0x299   :  { %5223 = vmatprep.subr.bf16.mxu0 %v7725_v36  ;;  %5428 = vmatprep.subr.bf16.mxu1 %v7728_v38  ;;  %v7791_v33 = vld [vmem:[#allocation6 + $0x164c] ss:$36 sps:$4 sm:$0xff]   ;;  %v7795_v37 = vld [vmem:[#allocation6 + $0x260] ss:$36 sps:$4 sm:$0xff]  }
 0x29a   :  { %v7789_v36 = vld [vmem:[#allocation6 + $0x1648] ss:$36 sps:$4 sm:$0xff]   ;;  %v7792_v38 = vld [vmem:[#allocation6 + $0x1650] ss:$36 sps:$4 sm:$0xff]  }
 0x29c   :  { %5224 = vmatpush1.bf16.msra.mxu0 %v7723_v60  ;;  %5429 = vmatpush1.bf16.msra.mxu1 %v7726_v44  ;;  %v7797_v60 = vld [vmem:[#allocation6 + $0x6e0] ss:$36 sps:$4 sm:$0xff]  }
 0x29d   :  { %5225 = vmatprep.subr.bf16.mxu0 %v7731_v61  ;;  %5430 = vmatprep.subr.bf16.mxu1 %v7734_v46  ;;  %v7796_v44 = vld [vmem:[#allocation6 + $0x20] ss:$36 sps:$4 sm:$0xff]   ;;  %v7799_v46 = vld [vmem:[#allocation6 + $0x2a8] ss:$36 sps:$4 sm:$0xff]  }
 0x29e   :  { %v7798_v61 = vld [vmem:[#allocation6 + $0x4a0] ss:$36 sps:$4 sm:$0xff]  }
 0x2a0   :  { %5226 = vmatpush1.bf16.msra.mxu0 %v7729_v47  ;;  %5431 = vmatpush1.bf16.msra.mxu1 %v7732_v49  ;;  %v7801_v47 = vld [vmem:[#allocation6 + $0x728] ss:$36 sps:$4 sm:$0xff]  }
 0x2a1   :  { %5227 = vmatprep.subr.bf16.mxu0 %v7737_v51  ;;  %5432 = vmatprep.subr.bf16.mxu1 %v7740_v45  ;;  %v7800_v49 = vld [vmem:[#allocation6 + $0x68] ss:$36 sps:$4 sm:$0xff]   ;;  %v7803_v45 = vld [vmem:[#allocation6 + $0x2f0] ss:$36 sps:$4 sm:$0xff]  }
 0x2a2   :  { %v7802_v51 = vld [vmem:[#allocation6 + $0x4e8] ss:$36 sps:$4 sm:$0xff]  }
 0x2a4   :  { %5228 = vmatpush1.bf16.msra.mxu0 %v7735_v52  ;;  %5433 = vmatpush1.bf16.msra.mxu1 %v7738_v31  ;;  %v7805_v52 = vld [vmem:[#allocation6 + $0x770] ss:$36 sps:$4 sm:$0xff]  }
 0x2a5   :  { %5229 = vmatprep.subr.bf16.mxu0 %v7743_v53  ;;  %5434 = vmatprep.subr.bf16.mxu1 %v7746_v54  ;;  %v7804_v31 = vld [vmem:[#allocation6 + $0xb0] ss:$36 sps:$4 sm:$0xff]   ;;  %v7807_v54 = vld [vmem:[#allocation6 + $0x338] ss:$36 sps:$4 sm:$0xff]  }
 0x2a6   :  { %v7806_v53 = vld [vmem:[#allocation6 + $0x530] ss:$36 sps:$4 sm:$0xff]  }
 0x2a8   :  { %5230 = vmatpush1.bf16.msra.mxu0 %v7741_v50  ;;  %5435 = vmatpush1.bf16.msra.mxu1 %v7744_v57  ;;  %v7809_v50 = vld [vmem:[#allocation6 + $0x7b8] ss:$36 sps:$4 sm:$0xff]  }
 0x2a9   :  { %5231 = vmatprep.subr.bf16.mxu0 %v7749_v58  ;;  %5436 = vmatprep.subr.bf16.mxu1 %v7752_v59  ;;  %v7808_v57 = vld [vmem:[#allocation6 + $0xf8] ss:$36 sps:$4 sm:$0xff]   ;;  %v7811_v59 = vld [vmem:[#allocation6 + $0x380] ss:$36 sps:$4 sm:$0xff]  }
 0x2aa   :  { %v7810_v58 = vld [vmem:[#allocation6 + $0x578] ss:$36 sps:$4 sm:$0xff]  }
 0x2ac   :  { %5232 = vmatpush1.bf16.msra.mxu0 %v7747_v62  ;;  %5437 = vmatpush1.bf16.msra.mxu1 %v7750_v63  ;;  %v7813_v62 = vld [vmem:[#allocation6 + $0x800] ss:$36 sps:$4 sm:$0xff]   ;;  %v7815_v63 = vld [vmem:[#allocation6 + $0x3c8] ss:$36 sps:$4 sm:$0xff]  }
 0x2ad   :  { %5233 = vmatprep.subr.bf16.mxu0 %v7755_v0  ;;  %5438 = vmatprep.subr.bf16.mxu1 %v7758_v1  ;;  %v7817_v0 = vld [vmem:[#allocation6 + $0x848] ss:$36 sps:$4 sm:$0xff]  }
 0x2ae   :  { %v7816_v1 = vld [vmem:[#allocation6 + $0x188] ss:$36 sps:$4 sm:$0xff]  }
 0x2b0   :  { %5234 = vmatpush1.bf16.msra.mxu0 %v7753_v2  ;;  %5439 = vmatpush1.bf16.msra.mxu1 %v7756_v3  ;;  %v7818_v2 = vld [vmem:[#allocation6 + $0x608] ss:$36 sps:$4 sm:$0xff]   ;;  %v7819_v3 = vld [vmem:[#allocation6 + $0x410] ss:$36 sps:$4 sm:$0xff]  }
 0x2b1   :  { %5235 = vmatprep.subr.bf16.mxu0 %v7761_v6  ;;  %5440 = vmatprep.subr.bf16.mxu1 %v7764_v7  ;;  %v7821_v6 = vld [vmem:[#allocation6 + $0x890] ss:$36 sps:$4 sm:$0xff]  }
 0x2b2   :  { %v7820_v7 = vld [vmem:[#allocation6 + $0x1d0] ss:$36 sps:$4 sm:$0xff]  }
 0x2b4   :  { %5236 = vmatpush1.bf16.msra.mxu0 %v7759_v8  ;;  %5441 = vmatpush1.bf16.msra.mxu1 %v7762_v9  ;;  %v7822_v8 = vld [vmem:[#allocation6 + $0x650] ss:$36 sps:$4 sm:$0xff]   ;;  %v7823_v9 = vld [vmem:[#allocation6 + $0x458] ss:$36 sps:$4 sm:$0xff]  }
 0x2b5   :  { %5237 = vmatprep.subr.bf16.mxu0 %v7767_v11  ;;  %5442 = vmatprep.subr.bf16.mxu1 %v7770_v12  ;;  %v7825_v11 = vld [vmem:[#allocation6 + $0x8d8] ss:$36 sps:$4 sm:$0xff]  }
 0x2b6   :  { %v7824_v12 = vld [vmem:[#allocation6 + $0x218] ss:$36 sps:$4 sm:$0xff]  }
 0x2b8   :  { %5238 = vmatpush1.bf16.msra.mxu0 %v7765_v14  ;;  %5443 = vmatpush1.bf16.msra.mxu1 %v7768_v16  ;;  %v7826_v14 = vld [vmem:[#allocation6 + $0x698] ss:$36 sps:$4 sm:$0xff]   ;;  %v7827_v16 = vld [vmem:[#allocation6 + $0xb60] ss:$36 sps:$4 sm:$0xff]  }
 0x2b9   :  { %5239 = vmatprep.subr.bf16.mxu0 %v7773_v17  ;;  %5444 = vmatprep.subr.bf16.mxu1 %v7776_v18  ;;  %v7829_v17 = vld [vmem:[#allocation6 + $0xfe0] ss:$36 sps:$4 sm:$0xff]  }
 0x2ba   :  { %v7828_v18 = vld [vmem:[#allocation6 + $0x920] ss:$36 sps:$4 sm:$0xff]  }
 0x2bc   :  { %5240 = vmatpush1.bf16.msra.mxu0 %v7771_v19  ;;  %5445 = vmatpush1.bf16.msra.mxu1 %v7774_v23  ;;  %v7830_v19 = vld [vmem:[#allocation6 + $0xda0] ss:$36 sps:$4 sm:$0xff]   ;;  %v7831_v23 = vld [vmem:[#allocation6 + $0xba8] ss:$36 sps:$4 sm:$0xff]  }
 0x2bd   :  { %5241 = vmatprep.subr.bf16.mxu0 %v7779_v40  ;;  %5446 = vmatprep.subr.bf16.mxu1 %v7782_v25  ;;  %v7833_v40 = vld [vmem:[#allocation6 + $0x1028] ss:$36 sps:$4 sm:$0xff]  }
 0x2be   :  { %v7832_v25 = vld [vmem:[#allocation6 + $0x968] ss:$36 sps:$4 sm:$0xff]  }
 0x2c0   :  { %5242 = vmatpush1.bf16.msra.mxu0 %v7777_v26  ;;  %5447 = vmatpush1.bf16.msra.mxu1 %v7780_v13  ;;  %v7834_v26 = vld [vmem:[#allocation6 + $0xde8] ss:$36 sps:$4 sm:$0xff]   ;;  %v7835_v13 = vld [vmem:[#allocation6 + $0xbf0] ss:$36 sps:$4 sm:$0xff]  }
 0x2c1   :  { %5243 = vmatprep.subr.bf16.mxu0 %v7785_v28  ;;  %5448 = vmatprep.subr.bf16.mxu1 %v7788_v21  ;;  %v7837_v28 = vld [vmem:[#allocation6 + $0x1070] ss:$36 sps:$4 sm:$0xff]  }
 0x2c2   :  { %v7836_v21 = vld [vmem:[#allocation6 + $0x9b0] ss:$36 sps:$4 sm:$0xff]  }
 0x2c4   :  { %5244 = vmatpush1.bf16.msra.mxu0 %v7783_v32  ;;  %5449 = vmatpush1.bf16.msra.mxu1 %v7786_v56  ;;  %v7838_v32 = vld [vmem:[#allocation6 + $0xe30] ss:$36 sps:$4 sm:$0xff]   ;;  %v7840_v56 = vld [vmem:[#allocation6 + $0x9f8] ss:$36 sps:$4 sm:$0xff]  }
 0x2c5   :  { %5245 = vmatprep.subr.bf16.mxu0 %v7791_v33  ;;  %5450 = vmatprep.subr.bf16.mxu1 %v7794_v34  ;;  %v7842_v33 = vld [vmem:[#allocation6 + $0xe78] ss:$36 sps:$4 sm:$0xff]   ;;  %v7843_v34 = vld [vmem:[#allocation6 + $0xc80] ss:$36 sps:$4 sm:$0xff]  }
 0x2c8   :  { %5246 = vmatpush1.bf16.msra.mxu0 %v7789_v36  ;;  %5451 = vmatpush1.bf16.msra.mxu1 %v7792_v38  ;;  %v7845_v36 = vld [vmem:[#allocation6 + $0x1100] ss:$36 sps:$4 sm:$0xff]   ;;  %v7847_v38 = vld [vmem:[#allocation6 + $0xcc8] ss:$36 sps:$4 sm:$0xff]  }
 0x2c9   :  { %6636 = vmatprep.subr.bf16.mxu0 %v7795_v37  ;;  %6658 = vmatprep.subr.bf16.mxu1 %v7797_v60  ;;  %v7849_v37 = vld [vmem:[#allocation6 + $0x1148] ss:$36 sps:$4 sm:$0xff]  }
 0x2ca   :  { %v7848_v60 = vld [vmem:[#allocation6 + $0xa88] ss:$36 sps:$4 sm:$0xff]  }
 0x2cb   :  { %5248 = vmatmul.mubr.bf16.vlgmr.msra.gmra.mrb[4].mxu0 %v8186_v41  ;;  %5453 = vmatmul.mubr.bf16.vlgmr.msra.gmra.mrb[4].mxu1 %v8186_v41 }
 0x2cc   :  { %6637 = vmatpush3.bf16.msra.mxu0 %v7796_v44  ;;  %6659 = vmatpush3.bf16.msra.mxu1 %v7798_v61  ;;  %v7850_v44 = vld [vmem:[#allocation6 + $0xf08] ss:$36 sps:$4 sm:$0xff]   ;;  %v7851_v61 = vld [vmem:[#allocation6 + $0xd10] ss:$36 sps:$4 sm:$0xff]  }
 0x2cd   :  { %6638 = vmatprep.subr.bf16.mxu0 %v7799_v46  ;;  %6660 = vmatprep.subr.bf16.mxu1 %v7801_v47  ;;  %v7853_v46 = vld [vmem:[#allocation6 + $0x1190] ss:$36 sps:$4 sm:$0xff]  }
 0x2ce   :  { %5493 = vmatprep.mubr.bf16.mxu0 %v8126_v48  ;;  %5533 = vmatprep.mubr.bf16.mxu1 %v8138_v30  ;;  %v7812_v48 = vld [vmem:[#allocation6 + $0x140] ss:$36 sps:$4 sm:$0xff]   ;;  %v7852_v47 = vld [vmem:[#allocation6 + $0xad0] ss:$36 sps:$4 sm:$0xff]  }
 0x2cf   :  { %v7814_v30 = vld [vmem:[#allocation6 + $0x5c0] ss:$36 sps:$4 sm:$0xff]  }
 0x2d0   :  { %6639 = vmatpush3.bf16.msra.mxu0 %v7800_v49  ;;  %6661 = vmatpush3.bf16.msra.mxu1 %v7802_v51  ;;  %v7854_v49 = vld [vmem:[#allocation6 + $0xf50] ss:$36 sps:$4 sm:$0xff]   ;;  %v7855_v51 = vld [vmem:[#allocation6 + $0xd58] ss:$36 sps:$4 sm:$0xff]  }
 0x2d1   :  { %6640 = vmatprep.subr.bf16.mxu0 %v7803_v45  ;;  %6662 = vmatprep.subr.bf16.mxu1 %v7805_v52  ;;  %v7857_v45 = vld [vmem:[#allocation6 + $0x11d8] ss:$36 sps:$4 sm:$0xff]  }
 0x2d2   :  { %v7856_v52 = vld [vmem:[#allocation6 + $0xb18] ss:$36 sps:$4 sm:$0xff]  }
 0x2d4   :  { %6641 = vmatpush3.bf16.msra.mxu0 %v7804_v31  ;;  %6663 = vmatpush3.bf16.msra.mxu1 %v7806_v53  ;;  %v7858_v31 = vld [vmem:[#allocation6 + $0xf98] ss:$36 sps:$4 sm:$0xff]   ;;  %v7859_v53 = vld [vmem:[#allocation6 + $0x1460] ss:$36 sps:$4 sm:$0xff]  }
 0x2d5   :  { %6642 = vmatprep.subr.bf16.mxu0 %v7807_v54  ;;  %6664 = vmatprep.subr.bf16.mxu1 %v7809_v50  ;;  %v7860_v54 = vld [vmem:[#allocation6 + $0x1220] ss:$36 sps:$4 sm:$0xff]   ;;  %v7861_v50 = vld [vmem:[#allocation6 + $0x14a8] ss:$36 sps:$4 sm:$0xff]  }
 0x2d8   :  { %6643 = vmatpush3.bf16.msra.mxu0 %v7808_v57  ;;  %6665 = vmatpush3.bf16.msra.mxu1 %v7810_v58  ;;  %v7862_v57 = vld [vmem:[#allocation6 + $0x1268] ss:$36 sps:$4 sm:$0xff]   ;;  %v7863_v58 = vld [vmem:[#allocation6 + $0x14f0] ss:$36 sps:$4 sm:$0xff]  }
 0x2d9   :  { %6644 = vmatprep.subr.bf16.mxu0 %v7811_v59  ;;  %6666 = vmatprep.subr.bf16.mxu1 %v7813_v62  ;;  %v7864_v59 = vld [vmem:[#allocation6 + $0x12b0] ss:$36 sps:$4 sm:$0xff]   ;;  %v7865_v62 = vld [vmem:[#allocation6 + $0x1538] ss:$36 sps:$4 sm:$0xff]  }
 0x2dc   :  { %6645 = vmatpush3.bf16.msra.mxu0 %v7812_v48  ;;  %6667 = vmatpush3.bf16.msra.mxu1 %v7814_v30  ;;  %v7866_v48 = vld [vmem:[#allocation6 + $0x12f8] ss:$36 sps:$4 sm:$0xff]   ;;  %v7867_v30 = vld [vmem:[#allocation6 + $0x1580] ss:$36 sps:$4 sm:$0xff]  }
 0x2dd   :  { %6646 = vmatprep.subr.bf16.mxu0 %v7815_v63  ;;  %6668 = vmatprep.subr.bf16.mxu1 %v7817_v0  ;;  %v7868_v63 = vld [vmem:[#allocation6 + $0x1340] ss:$36 sps:$4 sm:$0xff]   ;;  %v7871_v0 = vld [vmem:[#allocation6 + $0x1610] ss:$36 sps:$4 sm:$0xff]  }
 0x2e0   :  { %6647 = vmatpush3.bf16.msra.mxu0 %v7816_v1  ;;  %6669 = vmatpush3.bf16.msra.mxu1 %v7818_v2  ;;  %v7873_v1 = vld [vmem:[#allocation6 + $0x1658] ss:$36 sps:$4 sm:$0xff]  }
 0x2e1   :  { %6648 = vmatprep.subr.bf16.mxu0 %v7819_v3  ;;  %6670 = vmatprep.subr.bf16.mxu1 %v7821_v6  ;;  %v7874_v2 = vld [vmem:[#allocation6 + $0x1418] ss:$36 sps:$4 sm:$0xff]   ;;  %v899_v3 = vsub.s32 4, %v8205_v27  ;;  %v907_v6 = vsub.s32 6, %v8205_v27 }
 0x2e4   :  { %6649 = vmatpush3.bf16.msra.mxu0 %v7820_v7  ;;  %6671 = vmatpush3.bf16.msra.mxu1 %v7822_v8  ;;  %v903_v7 = vsub.s32 5, %v8205_v27  ;;  %v911_v8 = vsub.s32 7, %v8205_v27 }
 0x2e5   :  { %6650 = vmatprep.subr.bf16.mxu0 %v7823_v9  ;;  %6672 = vmatprep.subr.bf16.mxu1 %v7825_v11  ;;  %v900_v9 = vrot.slane %v8209_v39, %v899_v3  ;;  %v908_v11 = vrot.slane %v8209_v39, %v907_v6 }
 0x2e8   :  { %6651 = vmatpush3.bf16.msra.mxu0 %v7824_v12  ;;  %6673 = vmatpush3.bf16.msra.mxu1 %v7826_v14  ;;  %v912_v12 = vrot.slane %v8209_v39, %v911_v8 }
 0x2e9   :  { %6680 = vmatprep.subr.bf16.mxu0 %v7827_v16  ;;  %6702 = vmatprep.subr.bf16.mxu1 %v7829_v17 }
 0x2eb   :  { %5494 = vmatmul.mubr.bf16.vlgmr.msra.gmra.mrb[8].mxu0 %v8130_v5  ;;  %5534 = vmatmul.mubr.bf16.vlgmr.msra.gmra.mrb[8].mxu1 %v8144_v10  ;;  %v7839_v5 = vld [vmem:[#allocation6 + $0xc38] ss:$36 sps:$4 sm:$0xff]  }
 0x2ec   :  { %6681 = vmatpush3.bf16.msra.mxu0 %v7828_v18  ;;  %6703 = vmatpush3.bf16.msra.mxu1 %v7830_v19  ;;  %v7841_v10 = vld [vmem:[#allocation6 + $0x10b8] ss:$36 sps:$4 sm:$0xff]  }
 0x2ed   :  { %6682 = vmatprep.subr.bf16.mxu0 %v7831_v23  ;;  %6704 = vmatprep.subr.bf16.mxu1 %v7833_v40 }
 0x2ee   :  { %5573 = vmatprep.mubr.bf16.mxu0 %v8150_v15  ;;  %5613 = vmatprep.mubr.bf16.mxu1 %v8164_v24  ;;  %v7844_v15 = vld [vmem:[#allocation6 + $0xa40] ss:$36 sps:$4 sm:$0xff]  }
 0x2ef   :  { %v7846_v24 = vld [vmem:[#allocation6 + $0xec0] ss:$36 sps:$4 sm:$0xff]  }
 0x2f0   :  { %6683 = vmatpush3.bf16.msra.mxu0 %v7832_v25  ;;  %6705 = vmatpush3.bf16.msra.mxu1 %v7834_v26 }
 0x2f1   :  { %6684 = vmatprep.subr.bf16.mxu0 %v7835_v13  ;;  %6706 = vmatprep.subr.bf16.mxu1 %v7837_v28 }
 0x2f4   :  { %6685 = vmatpush3.bf16.msra.mxu0 %v7836_v21  ;;  %6707 = vmatpush3.bf16.msra.mxu1 %v7838_v32 }
 0x2f5   :  { %6686 = vmatprep.subr.bf16.mxu0 %v7839_v5  ;;  %6708 = vmatprep.subr.bf16.mxu1 %v7841_v10 }
 0x2f8   :  { %6687 = vmatpush3.bf16.msra.mxu0 %v7840_v56  ;;  %6709 = vmatpush3.bf16.msra.mxu1 %v7842_v33 }
 0x2f9   :  { %6688 = vmatprep.subr.bf16.mxu0 %v7843_v34  ;;  %6710 = vmatprep.subr.bf16.mxu1 %v7845_v36 }
 0x2fc   :  { %6689 = vmatpush3.bf16.msra.mxu0 %v7844_v15  ;;  %6711 = vmatpush3.bf16.msra.mxu1 %v7846_v24 }
 0x2fd   :  { %6690 = vmatprep.subr.bf16.mxu0 %v7847_v38  ;;  %6712 = vmatprep.subr.bf16.mxu1 %v7849_v37 }
 0x300   :  { %6691 = vmatpush3.bf16.msra.mxu0 %v7848_v60  ;;  %6713 = vmatpush3.bf16.msra.mxu1 %v7850_v44 }
 0x301   :  { %6692 = vmatprep.subr.bf16.mxu0 %v7851_v61  ;;  %6714 = vmatprep.subr.bf16.mxu1 %v7853_v46 }
 0x304   :  { %6693 = vmatpush3.bf16.msra.mxu0 %v7852_v47  ;;  %6715 = vmatpush3.bf16.msra.mxu1 %v7854_v49 }
 0x305   :  { %6694 = vmatprep.subr.bf16.mxu0 %v7855_v51  ;;  %6716 = vmatprep.subr.bf16.mxu1 %v7857_v45 }
 0x308   :  { %6695 = vmatpush3.bf16.msra.mxu0 %v7856_v52  ;;  %6717 = vmatpush3.bf16.msra.mxu1 %v7858_v31 }
 0x309   :  { %6724 = vmatprep.subr.bf16.mxu0 %v7859_v53 }
 0x30b   :  { %5574 = vmatmul.mubr.bf16.vlgmr.msra.gmra.mrb[12].mxu0 %v8158_v20  ;;  %5614 = vmatmul.mubr.bf16.vlgmr.msra.gmra.mrb[12].mxu1 %v8172_v29  ;;  %v7869_v20 = vld [vmem:[#allocation6 + $0x15c8] ss:$36 sps:$4 sm:$0xff]  }
 0x30c   :  { %6725 = vmatpush3.bf16.msra.mxu0 %v7860_v54  ;;  %5653 = vmatprep.mubr.bf16.mxu0 %v8178_v35  ;;  %v7870_v29 = vld [vmem:[#allocation6 + $0x1388] ss:$36 sps:$4 sm:$0xff]   ;;  %v7872_v35 = vld [vmem:[#allocation6 + $0x13d0] ss:$36 sps:$4 sm:$0xff]  }
 0x30d   :  { %6726 = vmatprep.subr.bf16.mxu0 %v7861_v50 }
 0x310   :  { %6727 = vmatpush3.bf16.msra.mxu0 %v7862_v57 }
 0x311   :  { %6728 = vmatprep.subr.bf16.mxu0 %v7863_v58 }
 0x314   :  { %6729 = vmatpush3.bf16.msra.mxu0 %v7864_v59 }
 0x315   :  { %6730 = vmatprep.subr.bf16.mxu0 %v7865_v62 }
 0x318   :  { %6731 = vmatpush3.bf16.msra.mxu0 %v7866_v48 }
 0x319   :  { %6732 = vmatprep.subr.bf16.mxu0 %v7867_v30 }
 0x31c   :  { %6733 = vmatpush3.bf16.msra.mxu0 %v7868_v63 }
 0x31d   :  { %6734 = vmatprep.subr.bf16.mxu0 %v7869_v20 }
 0x320   :  { %6735 = vmatpush3.bf16.msra.mxu0 %v7870_v29  ;;  %v5905_v29 = vld [vmem:[#allocation8 + $0x8] ss:$0 sm:$0xff] }
 0x321   :  { %6736 = vmatprep.subr.bf16.mxu0 %v7871_v0 }
 0x324   :  { %6737 = vmatpush3.bf16.msra.mxu0 %v7872_v35  ;;  %v5850_v35 = vrot.slane %v8254_v4, %v907_v6 }
 0x325   :  { %6738 = vmatprep.subr.bf16.mxu0 %v7873_v1 }
 0x328   :  { %6739 = vmatpush3.bf16.msra.mxu0 %v7874_v2 }
 0x32b   :  { %5654 = vmatmul.mubr.bf16.vlgmr.msra.gmra.mrb[16].mxu0 %v8186_v41  ;;  %v904_v41 = vrot.slane %v8209_v39, %v903_v7 }
 0x39e   :  { %v5249_v14 = vpop.f32.mrb[4].mxu0  ;;  %v5454_v16 = vpop.f32.mrb[4].mxu1 }
 0x39f   :  { %v8302_v17 = vadd.f32 %v5249_v14, %v900_v9  ;;  %v8304_v18 = vadd.f32 %v5454_v16, %v908_v11  ;;  %v5251_v19 = vpop.f32.mrb[5].mxu0  ;;  %v5456_v23 = vpop.f32.mrb[5].mxu1 }
 0x3a0   :  { %v8306_v40 = vadd.f32 %v5251_v19, %v904_v41  ;;  %v8308_v25 = vadd.f32 %v5456_v23, %v912_v12  ;;  %v5253_v26 = vpop.f32.mrb[6].mxu0  ;;  %v5458_v13 = vpop.f32.mrb[6].mxu1 }
 0x3a1   :  { %v5688_v28 = vand.u32 2147483647, %v8302_v17  ;;  %v5254_v21 = vpop.f32.mrb[7].mxu0  ;;  %v5459_v32 = vpop.f32.mrb[7].mxu1  ;;  %v5690_v39 = vand.u32 2147483647, %v8304_v18  ;;  %vm5672_vm6 = vcmp.ne.f32.partialorder %v8302_v17, %v8302_v17  ;;  %vm5674_vm8 = vcmp.ne.f32.partialorder %v8304_v18, %v8304_v18 }
 0x3a2   :  { %v5689_v10 = vand.u32 2147483647, %v8306_v40  ;;  %v5691_v33 = vand.u32 2147483647, %v8308_v25  ;;  %v5664_v59 = vmax.f32 %v8302_v17, 0.0  ;;  %v5666_v62 = vmax.f32 %v8304_v18, 0.0 }
 0x3a3   :  { %v5696_v5 = vsub.f32 0.0, %v5688_v28  ;;  %v5698_v56 = vsub.f32 0.0, %v5690_v39  ;;  %v5665_v30 = vmax.f32 %v8306_v40, 0.0  ;;  %v5667_v20 = vmax.f32 %v8308_v25, 0.0 }
 0x3a4   :  { %v5697_v36 = vsub.f32 0.0, %v5689_v10  ;;  %v5699_v24 = vsub.f32 0.0, %v5691_v33  ;;  %vm5673_vm12 = vcmp.ne.f32.partialorder %v8306_v40, %v8306_v40  ;;  %vm5675_vm13 = vcmp.ne.f32.partialorder %v8308_v25, %v8308_v25 }
 0x3a5   :  { %v5707_v34 = vmul.f32 1.442695, %v5696_v5  ;;  %v5711_v15 = vmul.f32 1.442695, %v5698_v56 }
 0x3a6   :  { %v5709_v38 = vmul.f32 1.442695, %v5697_v36  ;;  %v5713_v37 = vmul.f32 1.442695, %v5699_v24 }
 0x3a7   :  { %7893 = vpow2.f32 %v5707_v34 }
 0x3a8   :  { %7895 = vpow2.f32 %v5711_v15 }
 0x3a9   :  { %7897 = vpow2.f32 %v5709_v38 }
 0x3aa   :  { %7899 = vpow2.f32 %v5713_v37 }
 0x3b1   :  { %v7894_v60 = vpop.eup %7893 }
 0x3b2   :  { %v7896_v44 = vpop.eup %7895  ;;  %v5744_v61 = vadd.f32 1.0, %v7894_v60  ;;  %v5747_v52 = vmul.f32 -0.5, %v7894_v60  ;;  %v5750_v54 = vand.u32 2147483647, %v7894_v60 }
 0x3b3   :  { %v7898_v46 = vpop.eup %7897  ;;  %v5762_v47 = vadd.f32 1.0, %v7896_v44  ;;  %v5765_v31 = vmul.f32 -0.5, %v7896_v44  ;;  %v5768_v48 = vand.u32 2147483647, %v7896_v44 }
 0x3b4   :  { %v7900_v49 = vpop.eup %7899  ;;  %7901 = vlog2.f32 %v5744_v61  ;;  %v5753_v51 = vadd.f32 1.0, %v7898_v46  ;;  %v5756_v53 = vmul.f32 -0.5, %v7898_v46  ;;  %v5748_v50 = vadd.f32 1.0, %v5747_v52 }
 0x3b5   :  { %7903 = vlog2.f32 %v5762_v47  ;;  %v5771_v45 = vadd.f32 1.0, %v7900_v49  ;;  %v5766_v57 = vadd.f32 1.0, %v5765_v31  ;;  %v5774_v58 = vmul.f32 -0.5, %v7900_v49 }
 0x3b6   :  { %7905 = vlog2.f32 %v5753_v51  ;;  %v5757_v63 = vadd.f32 1.0, %v5756_v53  ;;  %vm8320_vm7 = vcmp.lt.f32.partialorder %v5750_v54, 0.0004427343  ;;  %v5759_v1 = vand.u32 2147483647, %v7898_v46 }
 0x3b7   :  { %7907 = vlog2.f32 %v5771_v45  ;;  %v5749_v12 = vmul.f32 %v7894_v60, %v5748_v50  ;;  %v5767_v14 = vmul.f32 %v7896_v44, %v5766_v57  ;;  %v5775_v16 = vadd.f32 1.0, %v5774_v58 }
 0x3b8   :  { %v5777_v28 = vand.u32 2147483647, %v7900_v49  ;;  %vm5769_vm9 = vcmp.lt.f32.partialorder %v5768_v48, 0.0004427343  ;;  %v5758_v33 = vmul.f32 %v7898_v46, %v5757_v63  ;;  %vm5760_vm10 = vcmp.lt.f32.partialorder %v5759_v1, 0.0004427343 }
 0x3b9   :  { %v5776_v47 = vmul.f32 %v7900_v49, %v5775_v16  ;;  %v5838_v50 = vrot.slane %v8254_v4, %v895_v42 }
 0x3ba   :  { %vm5778_vm11 = vcmp.lt.f32.partialorder %v5777_v28, 0.0004427343 }
 0x3be   :  { %v7902_v0 = vpop.eup %7901  ;;  %v6652_v2 = vpop.f32.mrb[8].mxu0 }
 0x3bf   :  { %v6674_v9 = vpop.f32.mrb[8].mxu1  ;;  %v7904_v11 = vpop.eup %7903  ;;  %v5746_v41 = vmul.f32 0.6931472, %v7902_v0 }
 0x3c0   :  { %v6653_v19 = vpop.f32.mrb[9].mxu0  ;;  %v6675_v23 = vpop.f32.mrb[9].mxu1  ;;  %v5764_v13 = vmul.f32 0.6931472, %v7904_v11 }
 0x3c1   :  { %v7906_v26 = vpop.eup %7905  ;;  %v6654_v21 = vadd.f32 %v6653_v19, %v6652_v2  ;;  %v6655_v32 = vpop.f32.mrb[10].mxu0  ;;  %v6676_v39 = vadd.f32 %v6675_v23, %v6674_v9  ;;  %v5752_v10 = vsel %vm8320_vm7, %v5749_v12, %v5746_v41 }
 0x3c2   :  { %v6677_v5 = vpop.f32.mrb[10].mxu1  ;;  %v5755_v56 = vmul.f32 0.6931472, %v7906_v26  ;;  %v6656_v34 = vpop.f32.mrb[11].mxu0  ;;  %v5792_v24 = vadd.f32 %v5752_v10, %v5664_v59  ;;  %v5770_v38 = vsel %vm5769_vm9, %v5767_v14, %v5764_v13  ;;  %v5842_v59 = vrot.slane %v8254_v4, %v899_v3 }
 0x3c3   :  { %v6678_v36 = vpop.f32.mrb[11].mxu1  ;;  %v7908_v15 = vpop.eup %7907  ;;  %v5496_v37 = vadd.f32 %v6654_v21, %v5905_v29  ;;  %v5794_v60 = vadd.f32 %v5770_v38, %v5666_v62 }
 0x3c4   :  { %v5761_v44 = vsel %vm5760_vm10, %v5758_v33, %v5755_v56  ;;  %v5773_v61 = vmul.f32 0.6931472, %v7908_v15  ;;  %v5800_v51 = vsel %vm5672_vm6, %v8302_v17, %v5792_v24 }
 0x3c5   :  { %v5793_v45 = vadd.f32 %v5761_v44, %v5665_v30  ;;  %v5536_v52 = vadd.f32 %v6676_v39, %v5496_v37  ;;  %7909 = vtanh.f32 %v5800_v51  ;;  %v5802_v46 = vsel %vm5674_vm8, %v8304_v18, %v5794_v60 }
 0x3c6   :  { %v5779_v31 = vsel %vm5778_vm11, %v5776_v47, %v5773_v61  ;;  %7911 = vtanh.f32 %v5802_v46  ;;  %v5846_v30 = vrot.slane %v8254_v4, %v903_v7 }
 0x3c7   :  { %v5801_v49 = vsel %vm5673_vm12, %v8306_v40, %v5793_v45  ;;  %v5795_v53 = vadd.f32 %v5779_v31, %v5667_v20 }
 0x3c8   :  { %7913 = vtanh.f32 %v5801_v49 }
 0x3c9   :  { %v5803_v54 = vsel %vm5675_vm13, %v8308_v25, %v5795_v53 }
 0x3ca   :  { %7915 = vtanh.f32 %v5803_v54  ;;  %v5884_v54 = vand.u32 127, %v881_v22 }
 0x3cc   :  { %vm5885_vm0 = vcmp.eq.s32.totalorder %v5884_v54, 127 }
 0x3cf   :  { %v7910_v57 = vpop.eup %7909 }
 0x3d0   :  { %v7912_v58 = vpop.eup %7911  ;;  %v5816_v62 = vmul.f32 %v7910_v57, %v8302_v17 }
 0x3d1   :  { %v5818_v20 = vmul.f32 %v7912_v58, %v8304_v18 }
 0x3d2   :  { %v7914_v48 = vpop.eup %7913  ;;  %v5866_v29 = vmul.f32 %v5838_v50, %v5816_v62  ;;  %v5881_v50 = vstv %s8383_s4 }
 0x3d3   :  { %v5817_v63 = vmul.f32 %v7914_v48, %v8306_v40  ;;  %v5868_v1 = vmul.f32 %v5846_v30, %v5818_v20 }
 0x3d4   :  { %v7916_v0 = vpop.eup %7915  ;;  %v5873_v17 = vadd.f32 %v8272_v43, %v5866_v29 }
 0x3d5   :  { %v5819_v42 = vmul.f32 %v7916_v0, %v8308_v25  ;;  %v5867_v3 = vmul.f32 %v5842_v59, %v5817_v63 }
 0x3d7   :  { %v5874_v2 = vadd.f32 %v5873_v17, %v5867_v3  ;;  %v5869_v9 = vmul.f32 %v5850_v35, %v5819_v42 }
 0x3d9   :  { %v5875_v11 = vadd.f32 %v5874_v2, %v5868_v1 }
 0x3db   :  { %v5876_v7 = vadd.f32 %v5875_v11, %v5869_v9 }
 0x3de   :  { %v6696_v41 = vpop.f32.mrb[12].mxu0  ;;  %v6718_v40 = vpop.f32.mrb[12].mxu1 }
 0x3df   :  { %v6697_v12 = vpop.f32.mrb[13].mxu0  ;;  %v6719_v18 = vpop.f32.mrb[13].mxu1 }
 0x3e0   :  { %v6698_v14 = vadd.f32 %v6697_v12, %v6696_v41  ;;  %v6699_v16 = vpop.f32.mrb[14].mxu0  ;;  %v6720_v19 = vadd.f32 %v6719_v18, %v6718_v40  ;;  %v6721_v25 = vpop.f32.mrb[14].mxu1 }
 0x3e1   :  { %v6700_v23 = vpop.f32.mrb[15].mxu0  ;;  %v6722_v26 = vpop.f32.mrb[15].mxu1 }
 0x3e2   :  { %v5576_v13 = vadd.f32 %v6698_v14, %v5536_v52  ;;  %v5854_v52 = vrot.slane %v8254_v4, %v911_v8 }
 0x3e4   :  { %v5616_v6 = vadd.f32 %v6720_v19, %v5576_v13 }
 0x3fe   :  { %v6740_v28 = vpop.f32.mrb[16].mxu0 }
 0x3ff   :  { %v6741_v21 = vpop.f32.mrb[17].mxu0 }
 0x400   :  { %v6742_v43 = vadd.f32 %v6741_v21, %v6740_v28  ;;  %v6743_v32 = vpop.f32.mrb[18].mxu0 }
 0x401   :  { %v6744_v39 = vpop.f32.mrb[19].mxu0 }
 0x402   :  { %v5656_v5 = vadd.f32 %v6742_v43, %v5616_v6 }
 0x404   :  { %v5692_v10 = vand.u32 2147483647, %v5656_v5  ;;  %v5668_v61 = vmax.f32 %v5656_v5, 0.0  ;;  %vm5676_vm15 = vcmp.ne.f32.partialorder %v5656_v5, %v5656_v5 }
 0x406   :  { %v5700_v56 = vsub.f32 0.0, %v5692_v10 }
 0x408   :  { %v5715_v33 = vmul.f32 1.442695, %v5700_v56 }
 0x40a   :  { %7917 = vpow2.f32 %v5715_v33 }
 0x414   :  { %v7918_v34 = vpop.eup %7917 }
 0x415   :  { %v5780_v36 = vadd.f32 1.0, %v7918_v34  ;;  %v5783_v15 = vmul.f32 -0.5, %v7918_v34  ;;  %v5786_v38 = vand.u32 2147483647, %v7918_v34 }
 0x417   :  { %7919 = vlog2.f32 %v5780_v36  ;;  %v5784_v24 = vadd.f32 1.0, %v5783_v15  ;;  %vm5787_vm14 = vcmp.lt.f32.partialorder %v5786_v38, 0.0004427343 }
 0x419   :  { %v5785_v44 = vmul.f32 %v7918_v34, %v5784_v24 }
 0x421   :  { %v7920_v37 = vpop.eup %7919 }
 0x422   :  { %v5782_v60 = vmul.f32 0.6931472, %v7920_v37 }
 0x424   :  { %v5788_v47 = vsel %vm5787_vm14, %v5785_v44, %v5782_v60 }
 0x425   :  { %v5796_v51 = vadd.f32 %v5788_v47, %v5668_v61 }
 0x427   :  { %v5804_v45 = vsel %vm5676_vm15, %v5656_v5, %v5796_v51 }
 0x428   :  { %7921 = vtanh.f32 %v5804_v45 }
 0x432   :  { %v7922_v46 = vpop.eup %7921 }
 0x433   :  { %v5820_v31 = vmul.f32 %v7922_v46, %v5656_v5 }
 0x435   :  { %v5870_v49 = vmul.f32 %v5854_v52, %v5820_v31 }
 0x437   :  { %v5877_v53 = vadd.f32 %v5876_v7, %v5870_v49 }
 0x439   :  { %5878 = vadd.xlane.f32.xlu0 %v5877_v53 }
 0x4c6   :  { %v5879_v57 = vpop.xlane.xlu0 %5878 }
 0x4c7   :  { %v5882_v58 = vadd.f32 %v5881_v50, %v5879_v57 }
 0x4c9   :  { %v5886_v27 = vsel %vm5885_vm0, %v5882_v58, %v8225_v55 }
 0x4ca   :  { %5887 = vst [vmem:[#allocation11] sm:$0xff] %v5886_v27 }
 0x4cb   :  { %8022 = shalt.err (!%p8019_p8)
}
 0x4cc   :  { %s8023_s4 = scalar_lea.hbm %s8384_s5, 128 }
 0x4cd   :  { %p8024_p9 = scmp.ne.s32.totalorder %s8384_s5, %s8023_s4  ;;  %p8027_p10 = scmp.lt.u32.totalorder %s8023_s4, %s8384_s5 }
 0x4cf   :  { %p8029_p11 = pnand %p8027_p10, %p8024_p9 }
 0x4d1   :  { %8032 = shalt.err (!%p8029_p11)
}
 0x4d2   :  { %5897 = dma.vmem_to_hbm [thread:$0]  %s5895_s1, 128, %s8384_s5, [#allocation5]  }
 0x4d3   :  { %8039 = dma.done.wait [#allocation5], 128  }
 0x4d4   :  { %8040 = vsyncadd [#allocation5], 4294967168 }
 0x4d5   :  { %5901 = vsyncpa [#allocation4], 1 }
 0x4d6   :  { %5902 = vsyncpa [#allocation7], 1 }
 0x4d7   :  { %5903 = vsyncpa [#allocation10], 1 }
 0x4d8   :  { %5904 = vsyncpa [#allocation5], 1 }

// kernel: tpu_custom_call.1
= control target key start
LH: loop header
LB: loop body
LE: loop exit
PB: predicated region body
PF: predicated region fallthrough
CT: control target
= control target key end

     0   :  { %11 = vsyncpa [#allocation4], 0  ;;  %s8379_s0 = inlined_call_operand.hbm [shape: bf16[8,1280], index: 0, kind: input, shape index: {}]   ;;  %s8380_s1 = inlined_call_operand.hbm [shape: bf16[1280,1152], index: 1, kind: input, shape index: {}]   ;;  %s8381_s2 = inlined_call_operand.hbm [shape: f32[1,1152], index: 2, kind: input, shape index: {}]   ;;  %s8382_s3 = inlined_call_operand.hbm [shape: f32[1,1024], index: 3, kind: input, shape index: {}]   ;;  %s8383_s4 = inlined_call_operand.<no memory space> [shape: f32[1,1], index: 4, kind: input, shape index: {}]   ;;  %s8384_s5 = inlined_call_operand.hbm [shape: f32[8,128], index: 5, kind: output, shape index: {}]  }
   0x1   :  { %12 = vsyncpa [#allocation7], 0 }
   0x2   :  { %13 = vsyncpa [#allocation10], 0 }
   0x3   :  { %14 = vsyncpa [#allocation5], 0  ;;  %s8041_s18 = smov [#allocation6]   ;;  %s7923_s22 = scalar_lea.hbm %s8380_s1, 92160 }
   0x4   :  { %s30_s19 = sshll.u32 %s8041_s18, 4  ;;  %p7924_p0 = scmp.ne.s32.totalorder %s8380_s1, %s7923_s22  ;;  %s31_s19 = int_to_ptr.vmem [resolvable:$true] %s30_s19 }
   0x5   :  { %p7927_p1 = scmp.lt.u32.totalorder %s7923_s22, %s8380_s1 }
   0x7   :  { %p7929_p2 = pnand %p7927_p1, %p7924_p0 }
   0x9   :  { %7932 = shalt.err (!%p7929_p2)
}
   0xa   :  { %s7933_s27 = scalar_lea.vmem %s31_s19, 92160  ;;  %p7938_p4 = scmp.lt.s32.totalorder %s31_s19, %s31_s19 }
   0xb   :  { %p7934_p3 = scmp.ne.s32.totalorder %s31_s19, %s7933_s27  ;;  %p7939_p5 = scmp.lt.s32.totalorder %s7933_s27, %s7933_s27 }
   0xd   :  { %p7940_p6 = por %p7939_p5, %p7938_p4 }
   0xf   :  { %p7941_p7 = pnand %p7940_p6, %p7934_p3 }
  0x11   :  { %7944 = shalt.err (!%p7941_p7)
}
  0x12   :  { %s8042_s28 = smov 576   ;;  %s8043_s29 = smov 36  }
  0x13   :  { %36 = dma.hbm_to_vmem [thread:$0]  %s8380_s1, 92160, %s31_s19, [#allocation7], %s8042_s28, %s8042_s28, %s8043_s29  }
  0x14   :  { %s8044_s7 = smov [#allocation3]   ;;  %s8045_s9 = smov [#allocation8]  }
  0x15   :  { %s21_s8 = sshll.u32 %s8044_s7, 4  ;;  %s43_s10 = sshll.u32 %s8045_s9, 4  ;;  %s22_s8 = int_to_ptr.vmem [resolvable:$true] %s21_s8  ;;  %s44_s10 = int_to_ptr.vmem [resolvable:$true] %s43_s10 }
  0x16   :  { %s7945_s13 = scalar_lea.hbm %s8379_s0, 640 }
  0x17   :  { %p7946_p8 = scmp.ne.s32.totalorder %s8379_s0, %s7945_s13  ;;  %p7949_p9 = scmp.lt.u32.totalorder %s7945_s13, %s8379_s0 }
  0x19   :  { %p7951_p10 = pnand %p7949_p9, %p7946_p8 }
  0x1b   :  { %7954 = shalt.err (!%p7951_p10)
}
  0x1c   :  { %s7955_s1 = scalar_lea.vmem %s22_s8, 640  ;;  %p7960_p12 = scmp.lt.s32.totalorder %s22_s8, %s22_s8 }
  0x1d   :  { %p7956_p11 = scmp.ne.s32.totalorder %s22_s8, %s7955_s1  ;;  %p7961_p13 = scmp.lt.s32.totalorder %s7955_s1, %s7955_s1 }
  0x1f   :  { %p7962_p0 = por %p7961_p13, %p7960_p12 }
  0x21   :  { %p7963_p1 = pnand %p7962_p0, %p7956_p11 }
  0x23   :  { %7966 = shalt.err (!%p7963_p1)
}
  0x24   :  { %24 = dma.hbm_to_vmem [thread:$0]  %s8379_s0, 640, %s22_s8, [#allocation4]  }
  0x25   :  { %s7967_s22 = scalar_lea.hbm %s8381_s2, 144 }
  0x26   :  { %p7968_p2 = scmp.ne.s32.totalorder %s8381_s2, %s7967_s22  ;;  %p7971_p3 = scmp.lt.u32.totalorder %s7967_s22, %s8381_s2 }
  0x28   :  { %p7973_p4 = pnand %p7971_p3, %p7968_p2 }
  0x2a   :  { %7976 = shalt.err (!%p7973_p4)
}
  0x2b   :  { %s7977_s27 = scalar_lea.vmem %s44_s10, 144  ;;  %s7981_s28 = scalar_lea.vmem %s44_s10, 160 }
  0x2c   :  { %p7978_p5 = scmp.ne.s32.totalorder %s44_s10, %s7977_s27  ;;  %p7982_p6 = scmp.lt.s32.totalorder %s44_s10, %s44_s10 }
  0x2d   :  { %p7983_p7 = scmp.lt.s32.totalorder %s7981_s28, %s7977_s27 }
  0x2f   :  { %p7984_p8 = por %p7983_p7, %p7982_p6 }
  0x31   :  { %p7985_p9 = pnand %p7984_p8, %p7978_p5 }
  0x33   :  { %7988 = shalt.err (!%p7985_p9)
}
  0x34   :  { %46 = dma.hbm_to_vmem [thread:$0]  %s8381_s2, 144, %s44_s10, [#allocation7]  }
  0x35   :  { %s8046_s30 = smov [#allocation9]   ;;  %s7989_s9 = scalar_lea.hbm %s8382_s3, 128 }
  0x36   :  { %s53_s6 = sshll.u32 %s8046_s30, 4  ;;  %p7990_p10 = scmp.ne.s32.totalorder %s8382_s3, %s7989_s9  ;;  %s54_s6 = int_to_ptr.vmem [resolvable:$true] %s53_s6 }
  0x37   :  { %p7993_p11 = scmp.lt.u32.totalorder %s7989_s9, %s8382_s3 }
  0x39   :  { %p7995_p12 = pnand %p7993_p11, %p7990_p10 }
  0x3b   :  { %7998 = shalt.err (!%p7995_p12)
}
  0x3c   :  { %s7999_s15 = scalar_lea.vmem %s54_s6, 128  ;;  %p8004_p0 = scmp.lt.s32.totalorder %s54_s6, %s54_s6 }
  0x3d   :  { %p8000_p13 = scmp.ne.s32.totalorder %s54_s6, %s7999_s15  ;;  %p8005_p1 = scmp.lt.s32.totalorder %s7999_s15, %s7999_s15 }
  0x3f   :  { %p8006_p2 = por %p8005_p1, %p8004_p0 }
  0x41   :  { %p8007_p3 = pnand %p8006_p2, %p8000_p13 }
  0x43   :  { %8010 = shalt.err (!%p8007_p3)
}
  0x44   :  { %56 = dma.hbm_to_vmem [thread:$0]  %s8382_s3, 128, %s54_s6, [#allocation10]  }
  0x45   :  { %8033 = dma.done.wait [#allocation4], 640  }
  0x46   :  { %8034 = vsyncadd [#allocation4], 4294966656 }
  0x47   :  { %8035 = dma.done.wait [#allocation7], 92304  }
  0x48   :  { %8036 = vsyncadd [#allocation7], 4294874992 }
  0x49   :  { %8037 = dma.done.wait [#allocation10], 128  }
  0x4a   :  { %8038 = vsyncadd [#allocation10], 4294967168  ;;  %v6825_v0 = vld [vmem:[#allocation6 + $0x4] ss:$36 sps:$4 sm:$0xff]   ;;  %v6827_v1 = vld [vmem:[#allocation6 + $0xc] ss:$36 sps:$4 sm:$0xff]  }
  0x4b   :  { %4641 = vmatprep.subr.bf16.mxu0 %v6825_v0  ;;  %v6829_v2 = vld [vmem:[#allocation6] ss:$36 sps:$4 sm:$0xff]   ;;  %v6830_v3 = vld [vmem:[#allocation6 + $0x8] ss:$36 sps:$4 sm:$0xff]   ;;  %4846 = vmatprep.subr.bf16.mxu1 %v6827_v1  ;;  %v6833_v5 = vld [vmem:[#allocation6 + $0x54] ss:$36 sps:$4 sm:$0xff]  }
  0x4c   :  { %v6831_v4 = vld [vmem:[#allocation6 + $0x4c] ss:$36 sps:$4 sm:$0xff]   ;;  %4642 = vmatpush1.bf16.msra.mxu0 %v6829_v2  ;;  %4847 = vmatpush1.bf16.msra.mxu1 %v6830_v3  ;;  %v6837_v8 = vld [vmem:[#allocation6 + $0x94] ss:$36 sps:$4 sm:$0xff]   ;;  %v6839_v9 = vld [vmem:[#allocation6 + $0x9c] ss:$36 sps:$4 sm:$0xff]  }
  0x4d   :  { %v6835_v6 = vld [vmem:[#allocation6 + $0x48] ss:$36 sps:$4 sm:$0xff]   ;;  %4643 = vmatprep.subr.bf16.mxu0 %v6831_v4  ;;  %v6836_v7 = vld [vmem:[#allocation6 + $0x50] ss:$36 sps:$4 sm:$0xff]   ;;  %4848 = vmatprep.subr.bf16.mxu1 %v6833_v5  ;;  %v6842_v11 = vld [vmem:[#allocation6 + $0x98] ss:$36 sps:$4 sm:$0xff]  }
  0x4e   :  { %v6841_v10 = vld [vmem:[#allocation6 + $0x90] ss:$36 sps:$4 sm:$0xff]   ;;  %v6843_v12 = vld [vmem:[#allocation6 + $0xdc] ss:$36 sps:$4 sm:$0xff]   ;;  %v6845_v13 = vld [vmem:[#allocation6 + $0xe4] ss:$36 sps:$4 sm:$0xff]  }
  0x4f   :  { %v6847_v14 = vld [vmem:[#allocation6 + $0xd8] ss:$36 sps:$4 sm:$0xff]   ;;  %v6848_v15 = vld [vmem:[#allocation6 + $0xe0] ss:$36 sps:$4 sm:$0xff]   ;;  %v6851_v17 = vld [vmem:[#allocation6 + $0x12c] ss:$36 sps:$4 sm:$0xff]  }
  0x50   :  { %4644 = vmatpush1.bf16.msra.mxu0 %v6835_v6  ;;  %4849 = vmatpush1.bf16.msra.mxu1 %v6836_v7  ;;  %v6849_v16 = vld [vmem:[#allocation6 + $0x124] ss:$36 sps:$4 sm:$0xff]   ;;  %v6855_v20 = vld [vmem:[#allocation6 + $0x16c] ss:$36 sps:$4 sm:$0xff]   ;;  %v6857_v21 = vld [vmem:[#allocation6 + $0x174] ss:$36 sps:$4 sm:$0xff]  }
  0x51   :  { %4645 = vmatprep.subr.bf16.mxu0 %v6837_v8  ;;  %4850 = vmatprep.subr.bf16.mxu1 %v6839_v9  ;;  %v6853_v18 = vld [vmem:[#allocation6 + $0x120] ss:$36 sps:$4 sm:$0xff]   ;;  %v6854_v19 = vld [vmem:[#allocation6 + $0x128] ss:$36 sps:$4 sm:$0xff]   ;;  %v6860_v23 = vld [vmem:[#allocation6 + $0x170] ss:$36 sps:$4 sm:$0xff]  }
  0x52   :  { %v6859_v22 = vld [vmem:[#allocation6 + $0x168] ss:$36 sps:$4 sm:$0xff]   ;;  %v6861_v24 = vld [vmem:[#allocation6 + $0x1b4] ss:$36 sps:$4 sm:$0xff]   ;;  %v6863_v25 = vld [vmem:[#allocation6 + $0x1bc] ss:$36 sps:$4 sm:$0xff]  }
  0x53   :  { %v6865_v26 = vld [vmem:[#allocation6 + $0x1b0] ss:$36 sps:$4 sm:$0xff]   ;;  %v6866_v27 = vld [vmem:[#allocation6 + $0x1b8] ss:$36 sps:$4 sm:$0xff]   ;;  %v6869_v29 = vld [vmem:[#allocation6 + $0x204] ss:$36 sps:$4 sm:$0xff]  }
  0x54   :  { %4646 = vmatpush1.bf16.msra.mxu0 %v6841_v10  ;;  %4851 = vmatpush1.bf16.msra.mxu1 %v6842_v11  ;;  %v6867_v28 = vld [vmem:[#allocation6 + $0x1fc] ss:$36 sps:$4 sm:$0xff]   ;;  %v6873_v32 = vld [vmem:[#allocation6 + $0x244] ss:$36 sps:$4 sm:$0xff]   ;;  %v6875_v33 = vld [vmem:[#allocation6 + $0x24c] ss:$36 sps:$4 sm:$0xff]  }
  0x55   :  { %4647 = vmatprep.subr.bf16.mxu0 %v6843_v12  ;;  %4852 = vmatprep.subr.bf16.mxu1 %v6845_v13  ;;  %v6871_v30 = vld [vmem:[#allocation6 + $0x1f8] ss:$36 sps:$4 sm:$0xff]   ;;  %v6872_v31 = vld [vmem:[#allocation6 + $0x200] ss:$36 sps:$4 sm:$0xff]   ;;  %v6878_v35 = vld [vmem:[#allocation6 + $0x248] ss:$36 sps:$4 sm:$0xff]  }
  0x56   :  { %v6877_v34 = vld [vmem:[#allocation6 + $0x240] ss:$36 sps:$4 sm:$0xff]   ;;  %v6879_v36 = vld [vmem:[#allocation6 + $0x28c] ss:$36 sps:$4 sm:$0xff]   ;;  %v6881_v37 = vld [vmem:[#allocation6 + $0x294] ss:$36 sps:$4 sm:$0xff]  }
  0x57   :  { %v6883_v38 = vld [vmem:[#allocation6 + $0x288] ss:$36 sps:$4 sm:$0xff]   ;;  %v6884_v39 = vld [vmem:[#allocation6 + $0x290] ss:$36 sps:$4 sm:$0xff]   ;;  %v6887_v41 = vld [vmem:[#allocation6 + $0x2dc] ss:$36 sps:$4 sm:$0xff]  }
  0x58   :  { %4648 = vmatpush1.bf16.msra.mxu0 %v6847_v14  ;;  %4853 = vmatpush1.bf16.msra.mxu1 %v6848_v15  ;;  %v6885_v40 = vld [vmem:[#allocation6 + $0x2d4] ss:$36 sps:$4 sm:$0xff]   ;;  %v6891_v44 = vld [vmem:[#allocation6 + $0x31c] ss:$36 sps:$4 sm:$0xff]   ;;  %v6893_v45 = vld [vmem:[#allocation6 + $0x324] ss:$36 sps:$4 sm:$0xff]  }
  0x59   :  { %4649 = vmatprep.subr.bf16.mxu0 %v6849_v16  ;;  %4854 = vmatprep.subr.bf16.mxu1 %v6851_v17  ;;  %v6889_v42 = vld [vmem:[#allocation6 + $0x2d0] ss:$36 sps:$4 sm:$0xff]   ;;  %v6890_v43 = vld [vmem:[#allocation6 + $0x2d8] ss:$36 sps:$4 sm:$0xff]   ;;  %v6896_v49 = vld [vmem:[#allocation6 + $0x320] ss:$36 sps:$4 sm:$0xff]  }
  0x5a   :  { %v72_v46 = vld [vmem:[#allocation3] sm:$0xff]  ;;  %v6897_v50 = vld [vmem:[#allocation6 + $0x364] ss:$36 sps:$4 sm:$0xff]   ;;  %v6899_v51 = vld [vmem:[#allocation6 + $0x36c] ss:$36 sps:$4 sm:$0xff]   ;;  %s8047_s17 = smov [#allocation11]  }
  0x5b   :  { %v6895_v47 = vld [vmem:[#allocation6 + $0x318] ss:$36 sps:$4 sm:$0xff]   ;;  %v8126_v48 = vcombine.high %v72_v46, %v72_v46  ;;  %v6901_v52 = vld [vmem:[#allocation6 + $0x360] ss:$36 sps:$4 sm:$0xff]   ;;  %v6902_v53 = vld [vmem:[#allocation6 + $0x368] ss:$36 sps:$4 sm:$0xff]   ;;  %v8130_v5 = vcombine.low %v72_v46, %v72_v46 }
  0x5c   :  { %4650 = vmatpush1.bf16.msra.mxu0 %v6853_v18  ;;  %4855 = vmatpush1.bf16.msra.mxu1 %v6854_v19  ;;  %v6903_v54 = vld [vmem:[#allocation6 + $0x3ac] ss:$36 sps:$4 sm:$0xff]   ;;  %v6905_v55 = vld [vmem:[#allocation6 + $0x3b4] ss:$36 sps:$4 sm:$0xff]   ;;  %v6911_v59 = vld [vmem:[#allocation6 + $0x3fc] ss:$36 sps:$4 sm:$0xff]  }
  0x5d   :  { %4651 = vmatprep.subr.bf16.mxu0 %v6855_v20  ;;  %4856 = vmatprep.subr.bf16.mxu1 %v6857_v21  ;;  %v6907_v56 = vld [vmem:[#allocation6 + $0x3a8] ss:$36 sps:$4 sm:$0xff]   ;;  %v6908_v57 = vld [vmem:[#allocation6 + $0x3b0] ss:$36 sps:$4 sm:$0xff]   ;;  %v6914_v61 = vld [vmem:[#allocation6 + $0x3f8] ss:$36 sps:$4 sm:$0xff]  }
  0x5e   :  { %4673 = vmatprep.mubr.bf16.mxu0 %v8126_v48  ;;  %4878 = vmatprep.mubr.bf16.mxu1 %v8126_v48  ;;  %v6909_v58 = vld [vmem:[#allocation6 + $0x3f4] ss:$36 sps:$4 sm:$0xff]   ;;  %v6915_v62 = vld [vmem:[#allocation6 + $0x43c] ss:$36 sps:$4 sm:$0xff]   ;;  %v6917_v63 = vld [vmem:[#allocation6 + $0x444] ss:$36 sps:$4 sm:$0xff]  }
  0x5f   :  { %v6913_v60 = vld [vmem:[#allocation6 + $0x3f0] ss:$36 sps:$4 sm:$0xff]   ;;  %v6919_v0 = vld [vmem:[#allocation6 + $0x438] ss:$36 sps:$4 sm:$0xff]   ;;  %v6920_v1 = vld [vmem:[#allocation6 + $0x440] ss:$36 sps:$4 sm:$0xff]  }
  0x60   :  { %4652 = vmatpush1.bf16.msra.mxu0 %v6859_v22  ;;  %4857 = vmatpush1.bf16.msra.mxu1 %v6860_v23  ;;  %v6924_v2 = vld [vmem:[#allocation6 + $0x484] ss:$36 sps:$4 sm:$0xff]   ;;  %v6927_v3 = vld [vmem:[#allocation6 + $0x48c] ss:$36 sps:$4 sm:$0xff]   ;;  %v6934_v8 = vld [vmem:[#allocation6 + $0x4d4] ss:$36 sps:$4 sm:$0xff]  }
  0x61   :  { %4653 = vmatprep.subr.bf16.mxu0 %v6861_v24  ;;  %4858 = vmatprep.subr.bf16.mxu1 %v6863_v25  ;;  %v6922_v4 = vld [vmem:[#allocation6 + $0x480] ss:$36 sps:$4 sm:$0xff]   ;;  %v6925_v6 = vld [vmem:[#allocation6 + $0x488] ss:$36 sps:$4 sm:$0xff]   ;;  %v6932_v10 = vld [vmem:[#allocation6 + $0x4d0] ss:$36 sps:$4 sm:$0xff]  }
  0x62   :  { %v6931_v7 = vld [vmem:[#allocation6 + $0x4cc] ss:$36 sps:$4 sm:$0xff]   ;;  %v6937_v11 = vld [vmem:[#allocation6 + $0x514] ss:$36 sps:$4 sm:$0xff]   ;;  %v6940_v12 = vld [vmem:[#allocation6 + $0x51c] ss:$36 sps:$4 sm:$0xff]  }
  0x63   :  { %v6929_v9 = vld [vmem:[#allocation6 + $0x4c8] ss:$36 sps:$4 sm:$0xff]   ;;  %v6935_v13 = vld [vmem:[#allocation6 + $0x510] ss:$36 sps:$4 sm:$0xff]   ;;  %v6938_v14 = vld [vmem:[#allocation6 + $0x518] ss:$36 sps:$4 sm:$0xff]  }
  0x64   :  { %4654 = vmatpush1.bf16.msra.mxu0 %v6865_v26  ;;  %4859 = vmatpush1.bf16.msra.mxu1 %v6866_v27  ;;  %v6943_v15 = vld [vmem:[#allocation6 + $0x55c] ss:$36 sps:$4 sm:$0xff]   ;;  %v6946_v16 = vld [vmem:[#allocation6 + $0x564] ss:$36 sps:$4 sm:$0xff]   ;;  %v6952_v20 = vld [vmem:[#allocation6 + $0x5ac] ss:$36 sps:$4 sm:$0xff]  }
  0x65   :  { %4655 = vmatprep.subr.bf16.mxu0 %v6867_v28  ;;  %4860 = vmatprep.subr.bf16.mxu1 %v6869_v29  ;;  %v6941_v17 = vld [vmem:[#allocation6 + $0x558] ss:$36 sps:$4 sm:$0xff]   ;;  %v6944_v18 = vld [vmem:[#allocation6 + $0x560] ss:$36 sps:$4 sm:$0xff]   ;;  %v6950_v22 = vld [vmem:[#allocation6 + $0x5a8] ss:$36 sps:$4 sm:$0xff]  }
  0x66   :  { %v6949_v19 = vld [vmem:[#allocation6 + $0x5a4] ss:$36 sps:$4 sm:$0xff]   ;;  %v6955_v23 = vld [vmem:[#allocation6 + $0x5ec] ss:$36 sps:$4 sm:$0xff]   ;;  %v6958_v24 = vld [vmem:[#allocation6 + $0x5f4] ss:$36 sps:$4 sm:$0xff]  }
  0x67   :  { %v6947_v21 = vld [vmem:[#allocation6 + $0x5a0] ss:$36 sps:$4 sm:$0xff]   ;;  %v6953_v25 = vld [vmem:[#allocation6 + $0x5e8] ss:$36 sps:$4 sm:$0xff]   ;;  %v6956_v26 = vld [vmem:[#allocation6 + $0x5f0] ss:$36 sps:$4 sm:$0xff]  }
  0x68   :  { %4656 = vmatpush1.bf16.msra.mxu0 %v6871_v30  ;;  %4861 = vmatpush1.bf16.msra.mxu1 %v6872_v31  ;;  %v6961_v27 = vld [vmem:[#allocation6 + $0x634] ss:$36 sps:$4 sm:$0xff]   ;;  %v6964_v28 = vld [vmem:[#allocation6 + $0x63c] ss:$36 sps:$4 sm:$0xff]   ;;  %s5894_s1 = sshll.u32 %s8047_s17, 4  ;;  %s5895_s1 = int_to_ptr.vmem [resolvable:$true] %s5894_s1 }
  0x69   :  { %4657 = vmatprep.subr.bf16.mxu0 %v6873_v32  ;;  %4862 = vmatprep.subr.bf16.mxu1 %v6875_v33  ;;  %v8134_v29 = vld [vmem:[#allocation3 + $0x8] sm:$0xff]  ;;  %v6959_v31 = vld [vmem:[#allocation6 + $0x630] ss:$36 sps:$4 sm:$0xff]   ;;  %v6962_v32 = vld [vmem:[#allocation6 + $0x638] ss:$36 sps:$4 sm:$0xff]   ;;  %s8011_s18 = scalar_lea.vmem %s5895_s1, 128  ;;  %p8016_p5 = scmp.lt.s32.totalorder %s5895_s1, %s5895_s1 }
  0x6a   :  { %v8138_v30 = vcombine.high %v8134_v29, %v8134_v29  ;;  %v6967_v33 = vld [vmem:[#allocation6 + $0x67c] ss:$36 sps:$4 sm:$0xff]   ;;  %p8012_p4 = scmp.ne.s32.totalorder %s5895_s1, %s8011_s18  ;;  %p8017_p6 = scmp.lt.s32.totalorder %s8011_s18, %s8011_s18 }
  0x6b   :  { %v6988_v46 = vld [vmem:[#allocation6 + $0x75c] ss:$36 sps:$4 sm:$0xff]  }
  0x6c   :  { %4658 = vmatpush1.bf16.msra.mxu0 %v6877_v34  ;;  %4863 = vmatpush1.bf16.msra.mxu1 %v6878_v35  ;;  %v6970_v34 = vld [vmem:[#allocation6 + $0x684] ss:$36 sps:$4 sm:$0xff]   ;;  %v6965_v35 = vld [vmem:[#allocation6 + $0x678] ss:$36 sps:$4 sm:$0xff]   ;;  %p8018_p7 = por %p8017_p6, %p8016_p5 }
  0x6d   :  { %4659 = vmatprep.subr.bf16.mxu0 %v6879_v36  ;;  %4864 = vmatprep.subr.bf16.mxu1 %v6881_v37  ;;  %v6968_v36 = vld [vmem:[#allocation6 + $0x680] ss:$36 sps:$4 sm:$0xff]  }
  0x6e   :  { %v6973_v37 = vld [vmem:[#allocation6 + $0x6c4] ss:$36 sps:$4 sm:$0xff]   ;;  %p8019_p8 = pnand %p8018_p7, %p8012_p4 }
  0x70   :  { %4660 = vmatpush1.bf16.msra.mxu0 %v6883_v38  ;;  %4865 = vmatpush1.bf16.msra.mxu1 %v6884_v39  ;;  %v6976_v38 = vld [vmem:[#allocation6 + $0x6cc] ss:$36 sps:$4 sm:$0xff]   ;;  %v6971_v39 = vld [vmem:[#allocation6 + $0x6c0] ss:$36 sps:$4 sm:$0xff]  }
  0x71   :  { %4661 = vmatprep.subr.bf16.mxu0 %v6885_v40  ;;  %4866 = vmatprep.subr.bf16.mxu1 %v6887_v41  ;;  %v6974_v40 = vld [vmem:[#allocation6 + $0x6c8] ss:$36 sps:$4 sm:$0xff]  }
  0x72   :  { %v6979_v41 = vld [vmem:[#allocation6 + $0x70c] ss:$36 sps:$4 sm:$0xff]  }
  0x74   :  { %4662 = vmatpush1.bf16.msra.mxu0 %v6889_v42  ;;  %4867 = vmatpush1.bf16.msra.mxu1 %v6890_v43  ;;  %v6982_v42 = vld [vmem:[#allocation6 + $0x714] ss:$36 sps:$4 sm:$0xff]   ;;  %v6977_v43 = vld [vmem:[#allocation6 + $0x708] ss:$36 sps:$4 sm:$0xff]  }
  0x75   :  { %4663 = vmatprep.subr.bf16.mxu0 %v6891_v44  ;;  %4868 = vmatprep.subr.bf16.mxu1 %v6893_v45  ;;  %v6980_v44 = vld [vmem:[#allocation6 + $0x710] ss:$36 sps:$4 sm:$0xff]  }
  0x76   :  { %v6985_v45 = vld [vmem:[#allocation6 + $0x754] ss:$36 sps:$4 sm:$0xff]  }
  0x78   :  { %4664 = vmatpush1.bf16.msra.mxu0 %v6895_v47  ;;  %4869 = vmatpush1.bf16.msra.mxu1 %v6896_v49  ;;  %v6983_v47 = vld [vmem:[#allocation6 + $0x750] ss:$36 sps:$4 sm:$0xff]   ;;  %v6986_v49 = vld [vmem:[#allocation6 + $0x758] ss:$36 sps:$4 sm:$0xff]  }
  0x79   :  { %4665 = vmatprep.subr.bf16.mxu0 %v6897_v50  ;;  %4870 = vmatprep.subr.bf16.mxu1 %v6899_v51  ;;  %v6991_v50 = vld [vmem:[#allocation6 + $0x79c] ss:$36 sps:$4 sm:$0xff]   ;;  %v6994_v51 = vld [vmem:[#allocation6 + $0x7a4] ss:$36 sps:$4 sm:$0xff]  }
  0x7c   :  { %4666 = vmatpush1.bf16.msra.mxu0 %v6901_v52  ;;  %4871 = vmatpush1.bf16.msra.mxu1 %v6902_v53  ;;  %v6989_v52 = vld [vmem:[#allocation6 + $0x798] ss:$36 sps:$4 sm:$0xff]   ;;  %v6992_v53 = vld [vmem:[#allocation6 + $0x7a0] ss:$36 sps:$4 sm:$0xff]  }
  0x7d   :  { %4667 = vmatprep.subr.bf16.mxu0 %v6903_v54  ;;  %4872 = vmatprep.subr.bf16.mxu1 %v6905_v55  ;;  %v6997_v54 = vld [vmem:[#allocation6 + $0x7e4] ss:$36 sps:$4 sm:$0xff]   ;;  %v7000_v55 = vld [vmem:[#allocation6 + $0x7ec] ss:$36 sps:$4 sm:$0xff]  }
  0x80   :  { %4668 = vmatpush1.bf16.msra.mxu0 %v6907_v56  ;;  %4873 = vmatpush1.bf16.msra.mxu1 %v6908_v57  ;;  %v6995_v56 = vld [vmem:[#allocation6 + $0x7e0] ss:$36 sps:$4 sm:$0xff]   ;;  %v6998_v57 = vld [vmem:[#allocation6 + $0x7e8] ss:$36 sps:$4 sm:$0xff]  }
  0x81   :  { %4669 = vmatprep.subr.bf16.mxu0 %v6909_v58  ;;  %4874 = vmatprep.subr.bf16.mxu1 %v6911_v59  ;;  %v7003_v58 = vld [vmem:[#allocation6 + $0x82c] ss:$36 sps:$4 sm:$0xff]   ;;  %v7006_v59 = vld [vmem:[#allocation6 + $0x834] ss:$36 sps:$4 sm:$0xff]  }
  0x84   :  { %4670 = vmatpush1.bf16.msra.mxu0 %v6913_v60  ;;  %4875 = vmatpush1.bf16.msra.mxu1 %v6914_v61  ;;  %v7001_v60 = vld [vmem:[#allocation6 + $0x828] ss:$36 sps:$4 sm:$0xff]   ;;  %v7004_v61 = vld [vmem:[#allocation6 + $0x830] ss:$36 sps:$4 sm:$0xff]  }
  0x85   :  { %4671 = vmatprep.subr.bf16.mxu0 %v6915_v62  ;;  %4876 = vmatprep.subr.bf16.mxu1 %v6917_v63  ;;  %v7009_v62 = vld [vmem:[#allocation6 + $0x874] ss:$36 sps:$4 sm:$0xff]   ;;  %v7012_v63 = vld [vmem:[#allocation6 + $0x87c] ss:$36 sps:$4 sm:$0xff]  }
  0x88   :  { %4672 = vmatpush1.bf16.msra.mxu0 %v6919_v0  ;;  %4877 = vmatpush1.bf16.msra.mxu1 %v6920_v1  ;;  %v7007_v0 = vld [vmem:[#allocation6 + $0x870] ss:$36 sps:$4 sm:$0xff]   ;;  %v7010_v1 = vld [vmem:[#allocation6 + $0x878] ss:$36 sps:$4 sm:$0xff]  }
  0x89   :  { %4682 = vmatprep.subr.bf16.mxu0 %v6924_v2  ;;  %4887 = vmatprep.subr.bf16.mxu1 %v6927_v3  ;;  %v7015_v2 = vld [vmem:[#allocation6 + $0x8bc] ss:$36 sps:$4 sm:$0xff]   ;;  %v7018_v3 = vld [vmem:[#allocation6 + $0x8c4] ss:$36 sps:$4 sm:$0xff]  }
  0x8b   :  { %4674 = vmatmul.mubr.bf16.vlgmr.msra.gmra.mrb[0].mxu0 %v8130_v5  ;;  %4879 = vmatmul.mubr.bf16.vlgmr.msra.gmra.mrb[0].mxu1 %v8130_v5 }
  0x8c   :  { %4683 = vmatpush1.bf16.msra.mxu0 %v6922_v4  ;;  %4888 = vmatpush1.bf16.msra.mxu1 %v6925_v6  ;;  %v7013_v4 = vld [vmem:[#allocation6 + $0x8b8] ss:$36 sps:$4 sm:$0xff]   ;;  %v7016_v6 = vld [vmem:[#allocation6 + $0x8c0] ss:$36 sps:$4 sm:$0xff]  }
  0x8d   :  { %4684 = vmatprep.subr.bf16.mxu0 %v6931_v7  ;;  %4889 = vmatprep.subr.bf16.mxu1 %v6934_v8  ;;  %v7022_v7 = vld [vmem:[#allocation6 + $0x904] ss:$36 sps:$4 sm:$0xff]   ;;  %v7025_v8 = vld [vmem:[#allocation6 + $0x90c] ss:$36 sps:$4 sm:$0xff]  }
  0x8e   :  { %4714 = vmatprep.mubr.bf16.mxu0 %v8138_v30  ;;  %4919 = vmatprep.mubr.bf16.mxu1 %v8138_v30 }
  0x90   :  { %4685 = vmatpush1.bf16.msra.mxu0 %v6929_v9  ;;  %4890 = vmatpush1.bf16.msra.mxu1 %v6932_v10  ;;  %v7020_v9 = vld [vmem:[#allocation6 + $0x900] ss:$36 sps:$4 sm:$0xff]   ;;  %v8144_v10 = vcombine.low %v8134_v29, %v8134_v29  ;;  %v7048_v29 = vld [vmem:[#allocation6 + $0xa28] ss:$36 sps:$4 sm:$0xff]  }
  0x91   :  { %4686 = vmatprep.subr.bf16.mxu0 %v6937_v11  ;;  %4891 = vmatprep.subr.bf16.mxu1 %v6940_v12  ;;  %v7023_v11 = vld [vmem:[#allocation6 + $0x908] ss:$36 sps:$4 sm:$0xff]  }
  0x92   :  { %v7029_v12 = vld [vmem:[#allocation6 + $0x94c] ss:$36 sps:$4 sm:$0xff]  }
  0x94   :  { %4687 = vmatpush1.bf16.msra.mxu0 %v6935_v13  ;;  %4892 = vmatpush1.bf16.msra.mxu1 %v6938_v14  ;;  %v8146_v13 = vld [vmem:[#allocation3 + $0x10] sm:$0xff]  ;;  %v7032_v14 = vld [vmem:[#allocation6 + $0x954] ss:$36 sps:$4 sm:$0xff]  }
  0x95   :  { %4688 = vmatprep.subr.bf16.mxu0 %v6943_v15  ;;  %4893 = vmatprep.subr.bf16.mxu1 %v6946_v16  ;;  %v8150_v15 = vcombine.high %v8146_v13, %v8146_v13  ;;  %v7027_v16 = vld [vmem:[#allocation6 + $0x948] ss:$36 sps:$4 sm:$0xff]  }
  0x98   :  { %4689 = vmatpush1.bf16.msra.mxu0 %v6941_v17  ;;  %4894 = vmatpush1.bf16.msra.mxu1 %v6944_v18  ;;  %v7030_v17 = vld [vmem:[#allocation6 + $0x950] ss:$36 sps:$4 sm:$0xff]  }
  0x99   :  { %4690 = vmatprep.subr.bf16.mxu0 %v6949_v19  ;;  %4895 = vmatprep.subr.bf16.mxu1 %v6952_v20  ;;  %v7035_v18 = vld [vmem:[#allocation6 + $0x994] ss:$36 sps:$4 sm:$0xff]   ;;  %v7038_v19 = vld [vmem:[#allocation6 + $0x99c] ss:$36 sps:$4 sm:$0xff]  }
  0x9a   :  { %v7033_v20 = vld [vmem:[#allocation6 + $0x990] ss:$36 sps:$4 sm:$0xff]  }
  0x9c   :  { %4691 = vmatpush1.bf16.msra.mxu0 %v6947_v21  ;;  %4896 = vmatpush1.bf16.msra.mxu1 %v6950_v22  ;;  %v7036_v21 = vld [vmem:[#allocation6 + $0x998] ss:$36 sps:$4 sm:$0xff]  }
  0x9d   :  { %4692 = vmatprep.subr.bf16.mxu0 %v6955_v23  ;;  %4897 = vmatprep.subr.bf16.mxu1 %v6958_v24  ;;  %v7041_v22 = vld [vmem:[#allocation6 + $0x9dc] ss:$36 sps:$4 sm:$0xff]   ;;  %v7044_v23 = vld [vmem:[#allocation6 + $0x9e4] ss:$36 sps:$4 sm:$0xff]  }
  0x9e   :  { %v7039_v24 = vld [vmem:[#allocation6 + $0x9d8] ss:$36 sps:$4 sm:$0xff]  }
  0xa0   :  { %4693 = vmatpush1.bf16.msra.mxu0 %v6953_v25  ;;  %4898 = vmatpush1.bf16.msra.mxu1 %v6956_v26  ;;  %v7042_v25 = vld [vmem:[#allocation6 + $0x9e0] ss:$36 sps:$4 sm:$0xff]  }
  0xa1   :  { %4694 = vmatprep.subr.bf16.mxu0 %v6961_v27  ;;  %4899 = vmatprep.subr.bf16.mxu1 %v6964_v28  ;;  %v7047_v26 = vld [vmem:[#allocation6 + $0xa24] ss:$36 sps:$4 sm:$0xff]   ;;  %v7050_v27 = vld [vmem:[#allocation6 + $0xa2c] ss:$36 sps:$4 sm:$0xff]  }
  0xa2   :  { %v7045_v28 = vld [vmem:[#allocation6 + $0xa20] ss:$36 sps:$4 sm:$0xff]  }
  0xa4   :  { %4695 = vmatpush1.bf16.msra.mxu0 %v6959_v31  ;;  %4900 = vmatpush1.bf16.msra.mxu1 %v6962_v32  ;;  %v7053_v31 = vld [vmem:[#allocation6 + $0xa6c] ss:$36 sps:$4 sm:$0xff]   ;;  %v7056_v32 = vld [vmem:[#allocation6 + $0xa74] ss:$36 sps:$4 sm:$0xff]  }
  0xa5   :  { %4696 = vmatprep.subr.bf16.mxu0 %v6967_v33  ;;  %4901 = vmatprep.subr.bf16.mxu1 %v6970_v34  ;;  %v7051_v33 = vld [vmem:[#allocation6 + $0xa68] ss:$36 sps:$4 sm:$0xff]   ;;  %v7054_v34 = vld [vmem:[#allocation6 + $0xa70] ss:$36 sps:$4 sm:$0xff]  }
  0xa8   :  { %4697 = vmatpush1.bf16.msra.mxu0 %v6965_v35  ;;  %4902 = vmatpush1.bf16.msra.mxu1 %v6968_v36  ;;  %v7059_v35 = vld [vmem:[#allocation6 + $0xab4] ss:$36 sps:$4 sm:$0xff]   ;;  %v7062_v36 = vld [vmem:[#allocation6 + $0xabc] ss:$36 sps:$4 sm:$0xff]  }
  0xa9   :  { %4698 = vmatprep.subr.bf16.mxu0 %v6973_v37  ;;  %4903 = vmatprep.subr.bf16.mxu1 %v6976_v38  ;;  %v7057_v37 = vld [vmem:[#allocation6 + $0xab0] ss:$36 sps:$4 sm:$0xff]   ;;  %v7060_v38 = vld [vmem:[#allocation6 + $0xab8] ss:$36 sps:$4 sm:$0xff]  }
  0xac   :  { %4699 = vmatpush1.bf16.msra.mxu0 %v6971_v39  ;;  %4904 = vmatpush1.bf16.msra.mxu1 %v6974_v40  ;;  %v7065_v39 = vld [vmem:[#allocation6 + $0xafc] ss:$36 sps:$4 sm:$0xff]   ;;  %v7068_v40 = vld [vmem:[#allocation6 + $0xb04] ss:$36 sps:$4 sm:$0xff]  }
  0xad   :  { %4700 = vmatprep.subr.bf16.mxu0 %v6979_v41  ;;  %4905 = vmatprep.subr.bf16.mxu1 %v6982_v42  ;;  %v7063_v41 = vld [vmem:[#allocation6 + $0xaf8] ss:$36 sps:$4 sm:$0xff]   ;;  %v7066_v42 = vld [vmem:[#allocation6 + $0xb00] ss:$36 sps:$4 sm:$0xff]  }
  0xb0   :  { %4701 = vmatpush1.bf16.msra.mxu0 %v6977_v43  ;;  %4906 = vmatpush1.bf16.msra.mxu1 %v6980_v44  ;;  %v7071_v43 = vld [vmem:[#allocation6 + $0xb44] ss:$36 sps:$4 sm:$0xff]   ;;  %v7074_v44 = vld [vmem:[#allocation6 + $0xb4c] ss:$36 sps:$4 sm:$0xff]  }
  0xb1   :  { %4702 = vmatprep.subr.bf16.mxu0 %v6985_v45  ;;  %4907 = vmatprep.subr.bf16.mxu1 %v6988_v46  ;;  %v7069_v45 = vld [vmem:[#allocation6 + $0xb40] ss:$36 sps:$4 sm:$0xff]   ;;  %v7072_v46 = vld [vmem:[#allocation6 + $0xb48] ss:$36 sps:$4 sm:$0xff]  }
  0xb4   :  { %4703 = vmatpush1.bf16.msra.mxu0 %v6983_v47  ;;  %4908 = vmatpush1.bf16.msra.mxu1 %v6986_v49  ;;  %v7077_v47 = vld [vmem:[#allocation6 + $0xb8c] ss:$36 sps:$4 sm:$0xff]   ;;  %v7080_v49 = vld [vmem:[#allocation6 + $0xb94] ss:$36 sps:$4 sm:$0xff]  }
  0xb5   :  { %4704 = vmatprep.subr.bf16.mxu0 %v6991_v50  ;;  %4909 = vmatprep.subr.bf16.mxu1 %v6994_v51  ;;  %v7075_v50 = vld [vmem:[#allocation6 + $0xb88] ss:$36 sps:$4 sm:$0xff]   ;;  %v7078_v51 = vld [vmem:[#allocation6 + $0xb90] ss:$36 sps:$4 sm:$0xff]  }
  0xb8   :  { %4705 = vmatpush1.bf16.msra.mxu0 %v6989_v52  ;;  %4910 = vmatpush1.bf16.msra.mxu1 %v6992_v53  ;;  %v7083_v52 = vld [vmem:[#allocation6 + $0xbd4] ss:$36 sps:$4 sm:$0xff]   ;;  %v7086_v53 = vld [vmem:[#allocation6 + $0xbdc] ss:$36 sps:$4 sm:$0xff]  }
  0xb9   :  { %4706 = vmatprep.subr.bf16.mxu0 %v6997_v54  ;;  %4911 = vmatprep.subr.bf16.mxu1 %v7000_v55  ;;  %v7081_v54 = vld [vmem:[#allocation6 + $0xbd0] ss:$36 sps:$4 sm:$0xff]   ;;  %v7084_v55 = vld [vmem:[#allocation6 + $0xbd8] ss:$36 sps:$4 sm:$0xff]  }
  0xbc   :  { %4707 = vmatpush1.bf16.msra.mxu0 %v6995_v56  ;;  %4912 = vmatpush1.bf16.msra.mxu1 %v6998_v57  ;;  %v7089_v56 = vld [vmem:[#allocation6 + $0xc1c] ss:$36 sps:$4 sm:$0xff]   ;;  %v7092_v57 = vld [vmem:[#allocation6 + $0xc24] ss:$36 sps:$4 sm:$0xff]  }
  0xbd   :  { %4708 = vmatprep.subr.bf16.mxu0 %v7003_v58  ;;  %4913 = vmatprep.subr.bf16.mxu1 %v7006_v59  ;;  %v7087_v58 = vld [vmem:[#allocation6 + $0xc18] ss:$36 sps:$4 sm:$0xff]   ;;  %v7090_v59 = vld [vmem:[#allocation6 + $0xc20] ss:$36 sps:$4 sm:$0xff]  }
  0xc0   :  { %4709 = vmatpush1.bf16.msra.mxu0 %v7001_v60  ;;  %4914 = vmatpush1.bf16.msra.mxu1 %v7004_v61  ;;  %v7095_v60 = vld [vmem:[#allocation6 + $0xc64] ss:$36 sps:$4 sm:$0xff]   ;;  %v7098_v61 = vld [vmem:[#allocation6 + $0xc6c] ss:$36 sps:$4 sm:$0xff]  }
  0xc1   :  { %4710 = vmatprep.subr.bf16.mxu0 %v7009_v62  ;;  %4915 = vmatprep.subr.bf16.mxu1 %v7012_v63  ;;  %v7093_v62 = vld [vmem:[#allocation6 + $0xc60] ss:$36 sps:$4 sm:$0xff]   ;;  %v7096_v63 = vld [vmem:[#allocation6 + $0xc68] ss:$36 sps:$4 sm:$0xff]  }
  0xc4   :  { %4711 = vmatpush1.bf16.msra.mxu0 %v7007_v0  ;;  %4916 = vmatpush1.bf16.msra.mxu1 %v7010_v1  ;;  %v7101_v0 = vld [vmem:[#allocation6 + $0xcac] ss:$36 sps:$4 sm:$0xff]   ;;  %v7104_v1 = vld [vmem:[#allocation6 + $0xcb4] ss:$36 sps:$4 sm:$0xff]  }
  0xc5   :  { %4712 = vmatprep.subr.bf16.mxu0 %v7015_v2  ;;  %4917 = vmatprep.subr.bf16.mxu1 %v7018_v3  ;;  %v7099_v2 = vld [vmem:[#allocation6 + $0xca8] ss:$36 sps:$4 sm:$0xff]   ;;  %v7102_v3 = vld [vmem:[#allocation6 + $0xcb0] ss:$36 sps:$4 sm:$0xff]  }
  0xc8   :  { %4713 = vmatpush1.bf16.msra.mxu0 %v7013_v4  ;;  %4918 = vmatpush1.bf16.msra.mxu1 %v7016_v6  ;;  %v7107_v4 = vld [vmem:[#allocation6 + $0xcf4] ss:$36 sps:$4 sm:$0xff]   ;;  %v7110_v6 = vld [vmem:[#allocation6 + $0xcfc] ss:$36 sps:$4 sm:$0xff]  }
  0xc9   :  { %4723 = vmatprep.subr.bf16.mxu0 %v7022_v7  ;;  %4928 = vmatprep.subr.bf16.mxu1 %v7025_v8  ;;  %v7105_v7 = vld [vmem:[#allocation6 + $0xcf0] ss:$36 sps:$4 sm:$0xff]   ;;  %v7108_v8 = vld [vmem:[#allocation6 + $0xcf8] ss:$36 sps:$4 sm:$0xff]  }
  0xcb   :  { %4715 = vmatmul.mubr.bf16.vlgmr.msra.gmra.mrb[0].mxu0 %v8144_v10  ;;  %4920 = vmatmul.mubr.bf16.vlgmr.msra.gmra.mrb[0].mxu1 %v8144_v10 }
  0xcc   :  { %4724 = vmatpush1.bf16.msra.mxu0 %v7020_v9  ;;  %4929 = vmatpush1.bf16.msra.mxu1 %v7023_v11  ;;  %v7113_v9 = vld [vmem:[#allocation6 + $0xd3c] ss:$36 sps:$4 sm:$0xff]   ;;  %v7116_v11 = vld [vmem:[#allocation6 + $0xd44] ss:$36 sps:$4 sm:$0xff]  }
  0xcd   :  { %4725 = vmatprep.subr.bf16.mxu0 %v7029_v12  ;;  %4930 = vmatprep.subr.bf16.mxu1 %v7032_v14  ;;  %v7111_v12 = vld [vmem:[#allocation6 + $0xd38] ss:$36 sps:$4 sm:$0xff]   ;;  %v7114_v14 = vld [vmem:[#allocation6 + $0xd40] ss:$36 sps:$4 sm:$0xff]  }
  0xce   :  { %4755 = vmatprep.mubr.bf16.mxu0 %v8150_v15  ;;  %4960 = vmatprep.mubr.bf16.mxu1 %v8150_v15 }
  0xd0   :  { %4726 = vmatpush1.bf16.msra.mxu0 %v7027_v16  ;;  %4931 = vmatpush1.bf16.msra.mxu1 %v7030_v17  ;;  %v7120_v16 = vld [vmem:[#allocation6 + $0xd84] ss:$36 sps:$4 sm:$0xff]   ;;  %v7123_v17 = vld [vmem:[#allocation6 + $0xd8c] ss:$36 sps:$4 sm:$0xff]  }
  0xd1   :  { %4727 = vmatprep.subr.bf16.mxu0 %v7035_v18  ;;  %4932 = vmatprep.subr.bf16.mxu1 %v7038_v19  ;;  %v7118_v18 = vld [vmem:[#allocation6 + $0xd80] ss:$36 sps:$4 sm:$0xff]   ;;  %v7121_v19 = vld [vmem:[#allocation6 + $0xd88] ss:$36 sps:$4 sm:$0xff]  }
  0xd4   :  { %4728 = vmatpush1.bf16.msra.mxu0 %v7033_v20  ;;  %4933 = vmatpush1.bf16.msra.mxu1 %v7036_v21  ;;  %v8158_v20 = vcombine.low %v8146_v13, %v8146_v13  ;;  %v8160_v21 = vld [vmem:[#allocation3 + $0x18] sm:$0xff] }
  0xd5   :  { %4729 = vmatprep.subr.bf16.mxu0 %v7041_v22  ;;  %4934 = vmatprep.subr.bf16.mxu1 %v7044_v23  ;;  %v7127_v22 = vld [vmem:[#allocation6 + $0xdcc] ss:$36 sps:$4 sm:$0xff]   ;;  %v7130_v23 = vld [vmem:[#allocation6 + $0xdd4] ss:$36 sps:$4 sm:$0xff]  }
  0xd6   :  { %v7133_v13 = vld [vmem:[#allocation6 + $0xe14] ss:$36 sps:$4 sm:$0xff]  }
  0xd8   :  { %4730 = vmatpush1.bf16.msra.mxu0 %v7039_v24  ;;  %4935 = vmatpush1.bf16.msra.mxu1 %v7042_v25  ;;  %v8164_v24 = vcombine.high %v8160_v21, %v8160_v21  ;;  %v7125_v25 = vld [vmem:[#allocation6 + $0xdc8] ss:$36 sps:$4 sm:$0xff]  }
  0xd9   :  { %4731 = vmatprep.subr.bf16.mxu0 %v7047_v26  ;;  %4936 = vmatprep.subr.bf16.mxu1 %v7050_v27  ;;  %v7128_v26 = vld [vmem:[#allocation6 + $0xdd0] ss:$36 sps:$4 sm:$0xff]   ;;  %v7136_v27 = vld [vmem:[#allocation6 + $0xe1c] ss:$36 sps:$4 sm:$0xff]  }
  0xdc   :  { %4732 = vmatpush1.bf16.msra.mxu0 %v7045_v28  ;;  %4937 = vmatpush1.bf16.msra.mxu1 %v7048_v29  ;;  %v7131_v28 = vld [vmem:[#allocation6 + $0xe10] ss:$36 sps:$4 sm:$0xff]   ;;  %v7134_v29 = vld [vmem:[#allocation6 + $0xe18] ss:$36 sps:$4 sm:$0xff]  }
  0xdd   :  { %4733 = vmatprep.subr.bf16.mxu0 %v7053_v31  ;;  %4938 = vmatprep.subr.bf16.mxu1 %v7056_v32  ;;  %v7139_v31 = vld [vmem:[#allocation6 + $0xe5c] ss:$36 sps:$4 sm:$0xff]   ;;  %v7142_v32 = vld [vmem:[#allocation6 + $0xe64] ss:$36 sps:$4 sm:$0xff]  }
  0xe0   :  { %4734 = vmatpush1.bf16.msra.mxu0 %v7051_v33  ;;  %4939 = vmatpush1.bf16.msra.mxu1 %v7054_v34  ;;  %v7137_v33 = vld [vmem:[#allocation6 + $0xe58] ss:$36 sps:$4 sm:$0xff]   ;;  %v7140_v34 = vld [vmem:[#allocation6 + $0xe60] ss:$36 sps:$4 sm:$0xff]  }
  0xe1   :  { %4735 = vmatprep.subr.bf16.mxu0 %v7059_v35  ;;  %4940 = vmatprep.subr.bf16.mxu1 %v7062_v36  ;;  %v7145_v35 = vld [vmem:[#allocation6 + $0xea4] ss:$36 sps:$4 sm:$0xff]   ;;  %v7148_v36 = vld [vmem:[#allocation6 + $0xeac] ss:$36 sps:$4 sm:$0xff]  }
  0xe4   :  { %4736 = vmatpush1.bf16.msra.mxu0 %v7057_v37  ;;  %4941 = vmatpush1.bf16.msra.mxu1 %v7060_v38  ;;  %v7143_v37 = vld [vmem:[#allocation6 + $0xea0] ss:$36 sps:$4 sm:$0xff]   ;;  %v7146_v38 = vld [vmem:[#allocation6 + $0xea8] ss:$36 sps:$4 sm:$0xff]  }
  0xe5   :  { %4737 = vmatprep.subr.bf16.mxu0 %v7065_v39  ;;  %4942 = vmatprep.subr.bf16.mxu1 %v7068_v40  ;;  %v7151_v39 = vld [vmem:[#allocation6 + $0xeec] ss:$36 sps:$4 sm:$0xff]   ;;  %v7154_v40 = vld [vmem:[#allocation6 + $0xef4] ss:$36 sps:$4 sm:$0xff]  }
  0xe8   :  { %4738 = vmatpush1.bf16.msra.mxu0 %v7063_v41  ;;  %4943 = vmatpush1.bf16.msra.mxu1 %v7066_v42  ;;  %v7149_v41 = vld [vmem:[#allocation6 + $0xee8] ss:$36 sps:$4 sm:$0xff]   ;;  %v7152_v42 = vld [vmem:[#allocation6 + $0xef0] ss:$36 sps:$4 sm:$0xff]  }
  0xe9   :  { %4739 = vmatprep.subr.bf16.mxu0 %v7071_v43  ;;  %4944 = vmatprep.subr.bf16.mxu1 %v7074_v44  ;;  %v7157_v43 = vld [vmem:[#allocation6 + $0xf34] ss:$36 sps:$4 sm:$0xff]   ;;  %v7160_v44 = vld [vmem:[#allocation6 + $0xf3c] ss:$36 sps:$4 sm:$0xff]  }
  0xec   :  { %4740 = vmatpush1.bf16.msra.mxu0 %v7069_v45  ;;  %4945 = vmatpush1.bf16.msra.mxu1 %v7072_v46  ;;  %v7155_v45 = vld [vmem:[#allocation6 + $0xf30] ss:$36 sps:$4 sm:$0xff]   ;;  %v7158_v46 = vld [vmem:[#allocation6 + $0xf38] ss:$36 sps:$4 sm:$0xff]  }
  0xed   :  { %4741 = vmatprep.subr.bf16.mxu0 %v7077_v47  ;;  %4946 = vmatprep.subr.bf16.mxu1 %v7080_v49  ;;  %v7163_v47 = vld [vmem:[#allocation6 + $0xf7c] ss:$36 sps:$4 sm:$0xff]   ;;  %v7166_v49 = vld [vmem:[#allocation6 + $0xf84] ss:$36 sps:$4 sm:$0xff]  }
  0xf0   :  { %4742 = vmatpush1.bf16.msra.mxu0 %v7075_v50  ;;  %4947 = vmatpush1.bf16.msra.mxu1 %v7078_v51  ;;  %v7161_v50 = vld [vmem:[#allocation6 + $0xf78] ss:$36 sps:$4 sm:$0xff]   ;;  %v7164_v51 = vld [vmem:[#allocation6 + $0xf80] ss:$36 sps:$4 sm:$0xff]  }
  0xf1   :  { %4743 = vmatprep.subr.bf16.mxu0 %v7083_v52  ;;  %4948 = vmatprep.subr.bf16.mxu1 %v7086_v53  ;;  %v7169_v52 = vld [vmem:[#allocation6 + $0xfc4] ss:$36 sps:$4 sm:$0xff]   ;;  %v7172_v53 = vld [vmem:[#allocation6 + $0xfcc] ss:$36 sps:$4 sm:$0xff]  }
  0xf4   :  { %4744 = vmatpush1.bf16.msra.mxu0 %v7081_v54  ;;  %4949 = vmatpush1.bf16.msra.mxu1 %v7084_v55  ;;  %v7167_v54 = vld [vmem:[#allocation6 + $0xfc0] ss:$36 sps:$4 sm:$0xff]   ;;  %v7170_v55 = vld [vmem:[#allocation6 + $0xfc8] ss:$36 sps:$4 sm:$0xff]  }
  0xf5   :  { %4745 = vmatprep.subr.bf16.mxu0 %v7089_v56  ;;  %4950 = vmatprep.subr.bf16.mxu1 %v7092_v57  ;;  %v7175_v56 = vld [vmem:[#allocation6 + $0x100c] ss:$36 sps:$4 sm:$0xff]   ;;  %v7178_v57 = vld [vmem:[#allocation6 + $0x1014] ss:$36 sps:$4 sm:$0xff]  }
  0xf8   :  { %4746 = vmatpush1.bf16.msra.mxu0 %v7087_v58  ;;  %4951 = vmatpush1.bf16.msra.mxu1 %v7090_v59  ;;  %v7173_v58 = vld [vmem:[#allocation6 + $0x1008] ss:$36 sps:$4 sm:$0xff]   ;;  %v7176_v59 = vld [vmem:[#allocation6 + $0x1010] ss:$36 sps:$4 sm:$0xff]  }
  0xf9   :  { %4747 = vmatprep.subr.bf16.mxu0 %v7095_v60  ;;  %4952 = vmatprep.subr.bf16.mxu1 %v7098_v61  ;;  %v7181_v60 = vld [vmem:[#allocation6 + $0x1054] ss:$36 sps:$4 sm:$0xff]   ;;  %v7184_v61 = vld [vmem:[#allocation6 + $0x105c] ss:$36 sps:$4 sm:$0xff]  }
  0xfc   :  { %4748 = vmatpush1.bf16.msra.mxu0 %v7093_v62  ;;  %4953 = vmatpush1.bf16.msra.mxu1 %v7096_v63  ;;  %v7179_v62 = vld [vmem:[#allocation6 + $0x1050] ss:$36 sps:$4 sm:$0xff]   ;;  %v7182_v63 = vld [vmem:[#allocation6 + $0x1058] ss:$36 sps:$4 sm:$0xff]  }
  0xfd   :  { %4749 = vmatprep.subr.bf16.mxu0 %v7101_v0  ;;  %4954 = vmatprep.subr.bf16.mxu1 %v7104_v1  ;;  %v7187_v0 = vld [vmem:[#allocation6 + $0x109c] ss:$36 sps:$4 sm:$0xff]   ;;  %v7190_v1 = vld [vmem:[#allocation6 + $0x10a4] ss:$36 sps:$4 sm:$0xff]  }
 0x100   :  { %4750 = vmatpush1.bf16.msra.mxu0 %v7099_v2  ;;  %4955 = vmatpush1.bf16.msra.mxu1 %v7102_v3  ;;  %v7185_v2 = vld [vmem:[#allocation6 + $0x1098] ss:$36 sps:$4 sm:$0xff]   ;;  %v7188_v3 = vld [vmem:[#allocation6 + $0x10a0] ss:$36 sps:$4 sm:$0xff]  }
 0x101   :  { %4751 = vmatprep.subr.bf16.mxu0 %v7107_v4  ;;  %4956 = vmatprep.subr.bf16.mxu1 %v7110_v6  ;;  %v7193_v4 = vld [vmem:[#allocation6 + $0x10e4] ss:$36 sps:$4 sm:$0xff]   ;;  %v7196_v6 = vld [vmem:[#allocation6 + $0x10ec] ss:$36 sps:$4 sm:$0xff]  }
 0x104   :  { %4752 = vmatpush1.bf16.msra.mxu0 %v7105_v7  ;;  %4957 = vmatpush1.bf16.msra.mxu1 %v7108_v8  ;;  %v7191_v7 = vld [vmem:[#allocation6 + $0x10e0] ss:$36 sps:$4 sm:$0xff]   ;;  %v7194_v8 = vld [vmem:[#allocation6 + $0x10e8] ss:$36 sps:$4 sm:$0xff]  }
 0x105   :  { %4753 = vmatprep.subr.bf16.mxu0 %v7113_v9  ;;  %4958 = vmatprep.subr.bf16.mxu1 %v7116_v11  ;;  %v7199_v9 = vld [vmem:[#allocation6 + $0x112c] ss:$36 sps:$4 sm:$0xff]   ;;  %v7202_v11 = vld [vmem:[#allocation6 + $0x1134] ss:$36 sps:$4 sm:$0xff]  }
 0x108   :  { %4754 = vmatpush1.bf16.msra.mxu0 %v7111_v12  ;;  %4959 = vmatpush1.bf16.msra.mxu1 %v7114_v14  ;;  %v7197_v12 = vld [vmem:[#allocation6 + $0x1128] ss:$36 sps:$4 sm:$0xff]   ;;  %v7200_v14 = vld [vmem:[#allocation6 + $0x1130] ss:$36 sps:$4 sm:$0xff]  }
 0x109   :  { %4764 = vmatprep.subr.bf16.mxu0 %v7120_v16  ;;  %4969 = vmatprep.subr.bf16.mxu1 %v7123_v17  ;;  %v7205_v16 = vld [vmem:[#allocation6 + $0x1174] ss:$36 sps:$4 sm:$0xff]   ;;  %v7208_v17 = vld [vmem:[#allocation6 + $0x117c] ss:$36 sps:$4 sm:$0xff]  }
 0x10b   :  { %4756 = vmatmul.mubr.bf16.vlgmr.msra.gmra.mrb[0].mxu0 %v8158_v20  ;;  %4961 = vmatmul.mubr.bf16.vlgmr.msra.gmra.mrb[0].mxu1 %v8158_v20 }
 0x10c   :  { %4765 = vmatpush1.bf16.msra.mxu0 %v7118_v18  ;;  %4970 = vmatpush1.bf16.msra.mxu1 %v7121_v19  ;;  %v7203_v18 = vld [vmem:[#allocation6 + $0x1170] ss:$36 sps:$4 sm:$0xff]   ;;  %v7206_v19 = vld [vmem:[#allocation6 + $0x1178] ss:$36 sps:$4 sm:$0xff]  }
 0x10d   :  { %4766 = vmatprep.subr.bf16.mxu0 %v7127_v22  ;;  %4971 = vmatprep.subr.bf16.mxu1 %v7130_v23  ;;  %v7211_v22 = vld [vmem:[#allocation6 + $0x11bc] ss:$36 sps:$4 sm:$0xff]   ;;  %v7214_v23 = vld [vmem:[#allocation6 + $0x11c4] ss:$36 sps:$4 sm:$0xff]  }
 0x10e   :  { %4796 = vmatprep.mubr.bf16.mxu0 %v8164_v24  ;;  %5001 = vmatprep.mubr.bf16.mxu1 %v8164_v24 }
 0x110   :  { %4767 = vmatpush1.bf16.msra.mxu0 %v7125_v25  ;;  %4972 = vmatpush1.bf16.msra.mxu1 %v7128_v26  ;;  %v7209_v25 = vld [vmem:[#allocation6 + $0x11b8] ss:$36 sps:$4 sm:$0xff]   ;;  %v7212_v26 = vld [vmem:[#allocation6 + $0x11c0] ss:$36 sps:$4 sm:$0xff]  }
 0x111   :  { %4768 = vmatprep.subr.bf16.mxu0 %v7133_v13  ;;  %4973 = vmatprep.subr.bf16.mxu1 %v7136_v27  ;;  %v7218_v13 = vld [vmem:[#allocation6 + $0x1204] ss:$36 sps:$4 sm:$0xff]   ;;  %v7221_v27 = vld [vmem:[#allocation6 + $0x120c] ss:$36 sps:$4 sm:$0xff]  }
 0x114   :  { %4769 = vmatpush1.bf16.msra.mxu0 %v7131_v28  ;;  %4974 = vmatpush1.bf16.msra.mxu1 %v7134_v29  ;;  %v7216_v28 = vld [vmem:[#allocation6 + $0x1200] ss:$36 sps:$4 sm:$0xff]   ;;  %v8172_v29 = vcombine.low %v8160_v21, %v8160_v21  ;;  %v7226_v21 = vld [vmem:[#allocation6 + $0x1250] ss:$36 sps:$4 sm:$0xff]  }
 0x115   :  { %4770 = vmatprep.subr.bf16.mxu0 %v7139_v31  ;;  %4975 = vmatprep.subr.bf16.mxu1 %v7142_v32  ;;  %v8174_v31 = vld [vmem:[#allocation3 + $0x20] sm:$0xff]  ;;  %v7219_v32 = vld [vmem:[#allocation6 + $0x1208] ss:$36 sps:$4 sm:$0xff]  }
 0x118   :  { %4771 = vmatpush1.bf16.msra.mxu0 %v7137_v33  ;;  %4976 = vmatpush1.bf16.msra.mxu1 %v7140_v34  ;;  %v7225_v33 = vld [vmem:[#allocation6 + $0x124c] ss:$36 sps:$4 sm:$0xff]   ;;  %v7228_v34 = vld [vmem:[#allocation6 + $0x1254] ss:$36 sps:$4 sm:$0xff]  }
 0x119   :  { %4772 = vmatprep.subr.bf16.mxu0 %v7145_v35  ;;  %4977 = vmatprep.subr.bf16.mxu1 %v7148_v36  ;;  %v8178_v35 = vcombine.high %v8174_v31, %v8174_v31  ;;  %v7223_v36 = vld [vmem:[#allocation6 + $0x1248] ss:$36 sps:$4 sm:$0xff]  }
 0x11c   :  { %4773 = vmatpush1.bf16.msra.mxu0 %v7143_v37  ;;  %4978 = vmatpush1.bf16.msra.mxu1 %v7146_v38  ;;  %v7231_v37 = vld [vmem:[#allocation6 + $0x1294] ss:$36 sps:$4 sm:$0xff]   ;;  %v7234_v38 = vld [vmem:[#allocation6 + $0x129c] ss:$36 sps:$4 sm:$0xff]  }
 0x11d   :  { %4774 = vmatprep.subr.bf16.mxu0 %v7151_v39  ;;  %4979 = vmatprep.subr.bf16.mxu1 %v7154_v40  ;;  %v7229_v39 = vld [vmem:[#allocation6 + $0x1290] ss:$36 sps:$4 sm:$0xff]   ;;  %v7232_v40 = vld [vmem:[#allocation6 + $0x1298] ss:$36 sps:$4 sm:$0xff]  }
 0x120   :  { %4775 = vmatpush1.bf16.msra.mxu0 %v7149_v41  ;;  %4980 = vmatpush1.bf16.msra.mxu1 %v7152_v42  ;;  %v7237_v41 = vld [vmem:[#allocation6 + $0x12dc] ss:$36 sps:$4 sm:$0xff]   ;;  %v7240_v42 = vld [vmem:[#allocation6 + $0x12e4] ss:$36 sps:$4 sm:$0xff]  }
 0x121   :  { %4776 = vmatprep.subr.bf16.mxu0 %v7157_v43  ;;  %4981 = vmatprep.subr.bf16.mxu1 %v7160_v44  ;;  %v7235_v43 = vld [vmem:[#allocation6 + $0x12d8] ss:$36 sps:$4 sm:$0xff]   ;;  %v7238_v44 = vld [vmem:[#allocation6 + $0x12e0] ss:$36 sps:$4 sm:$0xff]  }
 0x124   :  { %4777 = vmatpush1.bf16.msra.mxu0 %v7155_v45  ;;  %4982 = vmatpush1.bf16.msra.mxu1 %v7158_v46  ;;  %v7243_v45 = vld [vmem:[#allocation6 + $0x1324] ss:$36 sps:$4 sm:$0xff]   ;;  %v7246_v46 = vld [vmem:[#allocation6 + $0x132c] ss:$36 sps:$4 sm:$0xff]  }
 0x125   :  { %4778 = vmatprep.subr.bf16.mxu0 %v7163_v47  ;;  %4983 = vmatprep.subr.bf16.mxu1 %v7166_v49  ;;  %v7241_v47 = vld [vmem:[#allocation6 + $0x1320] ss:$36 sps:$4 sm:$0xff]   ;;  %v7244_v49 = vld [vmem:[#allocation6 + $0x1328] ss:$36 sps:$4 sm:$0xff]  }
 0x128   :  { %4779 = vmatpush1.bf16.msra.mxu0 %v7161_v50  ;;  %4984 = vmatpush1.bf16.msra.mxu1 %v7164_v51  ;;  %v7249_v50 = vld [vmem:[#allocation6 + $0x136c] ss:$36 sps:$4 sm:$0xff]   ;;  %v7252_v51 = vld [vmem:[#allocation6 + $0x1374] ss:$36 sps:$4 sm:$0xff]  }
 0x129   :  { %4780 = vmatprep.subr.bf16.mxu0 %v7169_v52  ;;  %4985 = vmatprep.subr.bf16.mxu1 %v7172_v53  ;;  %v7247_v52 = vld [vmem:[#allocation6 + $0x1368] ss:$36 sps:$4 sm:$0xff]   ;;  %v7250_v53 = vld [vmem:[#allocation6 + $0x1370] ss:$36 sps:$4 sm:$0xff]  }
 0x12c   :  { %4781 = vmatpush1.bf16.msra.mxu0 %v7167_v54  ;;  %4986 = vmatpush1.bf16.msra.mxu1 %v7170_v55  ;;  %v7255_v54 = vld [vmem:[#allocation6 + $0x13b4] ss:$36 sps:$4 sm:$0xff]   ;;  %v7258_v55 = vld [vmem:[#allocation6 + $0x13bc] ss:$36 sps:$4 sm:$0xff]  }
 0x12d   :  { %4782 = vmatprep.subr.bf16.mxu0 %v7175_v56  ;;  %4987 = vmatprep.subr.bf16.mxu1 %v7178_v57  ;;  %v7253_v56 = vld [vmem:[#allocation6 + $0x13b0] ss:$36 sps:$4 sm:$0xff]   ;;  %v7256_v57 = vld [vmem:[#allocation6 + $0x13b8] ss:$36 sps:$4 sm:$0xff]  }
 0x130   :  { %4783 = vmatpush1.bf16.msra.mxu0 %v7173_v58  ;;  %4988 = vmatpush1.bf16.msra.mxu1 %v7176_v59  ;;  %v7261_v58 = vld [vmem:[#allocation6 + $0x13fc] ss:$36 sps:$4 sm:$0xff]   ;;  %v7264_v59 = vld [vmem:[#allocation6 + $0x1404] ss:$36 sps:$4 sm:$0xff]  }
 0x131   :  { %4784 = vmatprep.subr.bf16.mxu0 %v7181_v60  ;;  %4989 = vmatprep.subr.bf16.mxu1 %v7184_v61  ;;  %v7259_v60 = vld [vmem:[#allocation6 + $0x13f8] ss:$36 sps:$4 sm:$0xff]   ;;  %v7262_v61 = vld [vmem:[#allocation6 + $0x1400] ss:$36 sps:$4 sm:$0xff]  }
 0x134   :  { %4785 = vmatpush1.bf16.msra.mxu0 %v7179_v62  ;;  %4990 = vmatpush1.bf16.msra.mxu1 %v7182_v63  ;;  %v7267_v62 = vld [vmem:[#allocation6 + $0x1444] ss:$36 sps:$4 sm:$0xff]   ;;  %v7270_v63 = vld [vmem:[#allocation6 + $0x144c] ss:$36 sps:$4 sm:$0xff]  }
 0x135   :  { %4786 = vmatprep.subr.bf16.mxu0 %v7187_v0  ;;  %4991 = vmatprep.subr.bf16.mxu1 %v7190_v1  ;;  %v7265_v0 = vld [vmem:[#allocation6 + $0x1440] ss:$36 sps:$4 sm:$0xff]   ;;  %v7268_v1 = vld [vmem:[#allocation6 + $0x1448] ss:$36 sps:$4 sm:$0xff]  }
 0x138   :  { %4787 = vmatpush1.bf16.msra.mxu0 %v7185_v2  ;;  %4992 = vmatpush1.bf16.msra.mxu1 %v7188_v3  ;;  %v7273_v2 = vld [vmem:[#allocation6 + $0x148c] ss:$36 sps:$4 sm:$0xff]   ;;  %v7276_v3 = vld [vmem:[#allocation6 + $0x1494] ss:$36 sps:$4 sm:$0xff]  }
 0x139   :  { %4788 = vmatprep.subr.bf16.mxu0 %v7193_v4  ;;  %4993 = vmatprep.subr.bf16.mxu1 %v7196_v6  ;;  %v7271_v4 = vld [vmem:[#allocation6 + $0x1488] ss:$36 sps:$4 sm:$0xff]   ;;  %v7274_v6 = vld [vmem:[#allocation6 + $0x1490] ss:$36 sps:$4 sm:$0xff]  }
 0x13c   :  { %4789 = vmatpush1.bf16.msra.mxu0 %v7191_v7  ;;  %4994 = vmatpush1.bf16.msra.mxu1 %v7194_v8  ;;  %v7279_v7 = vld [vmem:[#allocation6 + $0x14d4] ss:$36 sps:$4 sm:$0xff]   ;;  %v7282_v8 = vld [vmem:[#allocation6 + $0x14dc] ss:$36 sps:$4 sm:$0xff]  }
 0x13d   :  { %4790 = vmatprep.subr.bf16.mxu0 %v7199_v9  ;;  %4995 = vmatprep.subr.bf16.mxu1 %v7202_v11  ;;  %v7277_v9 = vld [vmem:[#allocation6 + $0x14d0] ss:$36 sps:$4 sm:$0xff]   ;;  %v7280_v11 = vld [vmem:[#allocation6 + $0x14d8] ss:$36 sps:$4 sm:$0xff]  }
 0x140   :  { %4791 = vmatpush1.bf16.msra.mxu0 %v7197_v12  ;;  %4996 = vmatpush1.bf16.msra.mxu1 %v7200_v14  ;;  %v7285_v12 = vld [vmem:[#allocation6 + $0x151c] ss:$36 sps:$4 sm:$0xff]   ;;  %v7288_v14 = vld [vmem:[#allocation6 + $0x1524] ss:$36 sps:$4 sm:$0xff]  }
 0x141   :  { %4792 = vmatprep.subr.bf16.mxu0 %v7205_v16  ;;  %4997 = vmatprep.subr.bf16.mxu1 %v7208_v17  ;;  %v7283_v16 = vld [vmem:[#allocation6 + $0x1518] ss:$36 sps:$4 sm:$0xff]   ;;  %v7286_v17 = vld [vmem:[#allocation6 + $0x1520] ss:$36 sps:$4 sm:$0xff]  }
 0x144   :  { %4793 = vmatpush1.bf16.msra.mxu0 %v7203_v18  ;;  %4998 = vmatpush1.bf16.msra.mxu1 %v7206_v19  ;;  %v7291_v18 = vld [vmem:[#allocation6 + $0x1564] ss:$36 sps:$4 sm:$0xff]   ;;  %v7294_v19 = vld [vmem:[#allocation6 + $0x156c] ss:$36 sps:$4 sm:$0xff]  }
 0x145   :  { %4794 = vmatprep.subr.bf16.mxu0 %v7211_v22  ;;  %4999 = vmatprep.subr.bf16.mxu1 %v7214_v23  ;;  %v7289_v22 = vld [vmem:[#allocation6 + $0x1560] ss:$36 sps:$4 sm:$0xff]   ;;  %v7292_v23 = vld [vmem:[#allocation6 + $0x1568] ss:$36 sps:$4 sm:$0xff]  }
 0x148   :  { %4795 = vmatpush1.bf16.msra.mxu0 %v7209_v25  ;;  %5000 = vmatpush1.bf16.msra.mxu1 %v7212_v26  ;;  %v7297_v25 = vld [vmem:[#allocation6 + $0x15ac] ss:$36 sps:$4 sm:$0xff]   ;;  %v7300_v26 = vld [vmem:[#allocation6 + $0x15b4] ss:$36 sps:$4 sm:$0xff]  }
 0x149   :  { %4805 = vmatprep.subr.bf16.mxu0 %v7218_v13  ;;  %5010 = vmatprep.subr.bf16.mxu1 %v7221_v27  ;;  %v7295_v13 = vld [vmem:[#allocation6 + $0x15a8] ss:$36 sps:$4 sm:$0xff]   ;;  %v7298_v27 = vld [vmem:[#allocation6 + $0x15b0] ss:$36 sps:$4 sm:$0xff]  }
 0x14b   :  { %4797 = vmatmul.mubr.bf16.vlgmr.msra.gmra.mrb[0].mxu0 %v8172_v29  ;;  %5002 = vmatmul.mubr.bf16.vlgmr.msra.gmra.mrb[0].mxu1 %v8172_v29 }
 0x14c   :  { %4806 = vmatpush1.bf16.msra.mxu0 %v7216_v28  ;;  %5011 = vmatpush1.bf16.msra.mxu1 %v7219_v32  ;;  %v7303_v28 = vld [vmem:[#allocation6 + $0x15f4] ss:$36 sps:$4 sm:$0xff]   ;;  %v7306_v32 = vld [vmem:[#allocation6 + $0x15fc] ss:$36 sps:$4 sm:$0xff]  }
 0x14d   :  { %4807 = vmatprep.subr.bf16.mxu0 %v7225_v33  ;;  %5012 = vmatprep.subr.bf16.mxu1 %v7228_v34  ;;  %v7301_v33 = vld [vmem:[#allocation6 + $0x15f0] ss:$36 sps:$4 sm:$0xff]   ;;  %v7304_v34 = vld [vmem:[#allocation6 + $0x15f8] ss:$36 sps:$4 sm:$0xff]  }
 0x14e   :  { %4837 = vmatprep.mubr.bf16.mxu0 %v8178_v35  ;;  %5042 = vmatprep.mubr.bf16.mxu1 %v8178_v35 }
 0x150   :  { %4808 = vmatpush1.bf16.msra.mxu0 %v7223_v36  ;;  %5013 = vmatpush1.bf16.msra.mxu1 %v7226_v21  ;;  %v7309_v36 = vld [vmem:[#allocation6 + $0x163c] ss:$36 sps:$4 sm:$0xff]   ;;  %v7312_v21 = vld [vmem:[#allocation6 + $0x1644] ss:$36 sps:$4 sm:$0xff]  }
 0x151   :  { %4809 = vmatprep.subr.bf16.mxu0 %v7231_v37  ;;  %5014 = vmatprep.subr.bf16.mxu1 %v7234_v38  ;;  %v7307_v37 = vld [vmem:[#allocation6 + $0x1638] ss:$36 sps:$4 sm:$0xff]   ;;  %v7310_v38 = vld [vmem:[#allocation6 + $0x1640] ss:$36 sps:$4 sm:$0xff]  }
 0x154   :  { %4810 = vmatpush1.bf16.msra.mxu0 %v7229_v39  ;;  %5015 = vmatpush1.bf16.msra.mxu1 %v7232_v40  ;;  %v7317_v39 = vld [vmem:[#allocation6 + $0x14] ss:$36 sps:$4 sm:$0xff]   ;;  %v7320_v40 = vld [vmem:[#allocation6 + $0x1c] ss:$36 sps:$4 sm:$0xff]  }
 0x155   :  { %4811 = vmatprep.subr.bf16.mxu0 %v7237_v41  ;;  %5016 = vmatprep.subr.bf16.mxu1 %v7240_v42  ;;  %v8186_v41 = vcombine.low %v8174_v31, %v8174_v31  ;;  %v7315_v42 = vld [vmem:[#allocation6 + $0x10] ss:$36 sps:$4 sm:$0xff]   ;;  %v7329_v31 = vld [vmem:[#allocation6 + $0xa4] ss:$36 sps:$4 sm:$0xff]  }
 0x158   :  { %4812 = vmatpush1.bf16.msra.mxu0 %v7235_v43  ;;  %5017 = vmatpush1.bf16.msra.mxu1 %v7238_v44  ;;  %v7318_v43 = vld [vmem:[#allocation6 + $0x18] ss:$36 sps:$4 sm:$0xff]  }
 0x159   :  { %4813 = vmatprep.subr.bf16.mxu0 %v7243_v45  ;;  %5018 = vmatprep.subr.bf16.mxu1 %v7246_v46  ;;  %v7323_v44 = vld [vmem:[#allocation6 + $0x5c] ss:$36 sps:$4 sm:$0xff]   ;;  %v7326_v45 = vld [vmem:[#allocation6 + $0x64] ss:$36 sps:$4 sm:$0xff]  }
 0x15a   :  { %v7321_v46 = vld [vmem:[#allocation6 + $0x58] ss:$36 sps:$4 sm:$0xff]  }
 0x15c   :  { %4814 = vmatpush1.bf16.msra.mxu0 %v7241_v47  ;;  %5019 = vmatpush1.bf16.msra.mxu1 %v7244_v49  ;;  %v7324_v47 = vld [vmem:[#allocation6 + $0x60] ss:$36 sps:$4 sm:$0xff]   ;;  %v7332_v49 = vld [vmem:[#allocation6 + $0xac] ss:$36 sps:$4 sm:$0xff]  }
 0x15d   :  { %4815 = vmatprep.subr.bf16.mxu0 %v7249_v50  ;;  %5020 = vmatprep.subr.bf16.mxu1 %v7252_v51  ;;  %v7327_v50 = vld [vmem:[#allocation6 + $0xa0] ss:$36 sps:$4 sm:$0xff]   ;;  %v7330_v51 = vld [vmem:[#allocation6 + $0xa8] ss:$36 sps:$4 sm:$0xff]  }
 0x160   :  { %4816 = vmatpush1.bf16.msra.mxu0 %v7247_v52  ;;  %5021 = vmatpush1.bf16.msra.mxu1 %v7250_v53  ;;  %v7335_v52 = vld [vmem:[#allocation6 + $0xec] ss:$36 sps:$4 sm:$0xff]   ;;  %v7338_v53 = vld [vmem:[#allocation6 + $0xf4] ss:$36 sps:$4 sm:$0xff]  }
 0x161   :  { %4817 = vmatprep.subr.bf16.mxu0 %v7255_v54  ;;  %5022 = vmatprep.subr.bf16.mxu1 %v7258_v55  ;;  %v7333_v54 = vld [vmem:[#allocation6 + $0xe8] ss:$36 sps:$4 sm:$0xff]   ;;  %v7336_v55 = vld [vmem:[#allocation6 + $0xf0] ss:$36 sps:$4 sm:$0xff]  }
 0x164   :  { %4818 = vmatpush1.bf16.msra.mxu0 %v7253_v56  ;;  %5023 = vmatpush1.bf16.msra.mxu1 %v7256_v57  ;;  %v7341_v56 = vld [vmem:[#allocation6 + $0x134] ss:$36 sps:$4 sm:$0xff]   ;;  %v7344_v57 = vld [vmem:[#allocation6 + $0x13c] ss:$36 sps:$4 sm:$0xff]  }
 0x165   :  { %4819 = vmatprep.subr.bf16.mxu0 %v7261_v58  ;;  %5024 = vmatprep.subr.bf16.mxu1 %v7264_v59  ;;  %v7339_v58 = vld [vmem:[#allocation6 + $0x130] ss:$36 sps:$4 sm:$0xff]   ;;  %v7342_v59 = vld [vmem:[#allocation6 + $0x138] ss:$36 sps:$4 sm:$0xff]  }
 0x168   :  { %4820 = vmatpush1.bf16.msra.mxu0 %v7259_v60  ;;  %5025 = vmatpush1.bf16.msra.mxu1 %v7262_v61  ;;  %v7347_v60 = vld [vmem:[#allocation6 + $0x17c] ss:$36 sps:$4 sm:$0xff]   ;;  %v7350_v61 = vld [vmem:[#allocation6 + $0x184] ss:$36 sps:$4 sm:$0xff]  }
 0x169   :  { %4821 = vmatprep.subr.bf16.mxu0 %v7267_v62  ;;  %5026 = vmatprep.subr.bf16.mxu1 %v7270_v63  ;;  %v7345_v62 = vld [vmem:[#allocation6 + $0x178] ss:$36 sps:$4 sm:$0xff]   ;;  %v7348_v63 = vld [vmem:[#allocation6 + $0x180] ss:$36 sps:$4 sm:$0xff]  }
 0x16c   :  { %4822 = vmatpush1.bf16.msra.mxu0 %v7265_v0  ;;  %5027 = vmatpush1.bf16.msra.mxu1 %v7268_v1  ;;  %v7353_v0 = vld [vmem:[#allocation6 + $0x1c4] ss:$36 sps:$4 sm:$0xff]   ;;  %v7356_v1 = vld [vmem:[#allocation6 + $0x1cc] ss:$36 sps:$4 sm:$0xff]  }
 0x16d   :  { %4823 = vmatprep.subr.bf16.mxu0 %v7273_v2  ;;  %5028 = vmatprep.subr.bf16.mxu1 %v7276_v3  ;;  %v7351_v2 = vld [vmem:[#allocation6 + $0x1c0] ss:$36 sps:$4 sm:$0xff]   ;;  %v7354_v3 = vld [vmem:[#allocation6 + $0x1c8] ss:$36 sps:$4 sm:$0xff]  }
 0x170   :  { %4824 = vmatpush1.bf16.msra.mxu0 %v7271_v4  ;;  %5029 = vmatpush1.bf16.msra.mxu1 %v7274_v6  ;;  %v7359_v4 = vld [vmem:[#allocation6 + $0x20c] ss:$36 sps:$4 sm:$0xff]   ;;  %v7362_v6 = vld [vmem:[#allocation6 + $0x214] ss:$36 sps:$4 sm:$0xff]  }
 0x171   :  { %4825 = vmatprep.subr.bf16.mxu0 %v7279_v7  ;;  %5030 = vmatprep.subr.bf16.mxu1 %v7282_v8  ;;  %v7357_v7 = vld [vmem:[#allocation6 + $0x208] ss:$36 sps:$4 sm:$0xff]   ;;  %v7360_v8 = vld [vmem:[#allocation6 + $0x210] ss:$36 sps:$4 sm:$0xff]  }
 0x174   :  { %4826 = vmatpush1.bf16.msra.mxu0 %v7277_v9  ;;  %5031 = vmatpush1.bf16.msra.mxu1 %v7280_v11  ;;  %v7365_v9 = vld [vmem:[#allocation6 + $0x254] ss:$36 sps:$4 sm:$0xff]   ;;  %v7368_v11 = vld [vmem:[#allocation6 + $0x25c] ss:$36 sps:$4 sm:$0xff]  }
 0x175   :  { %4827 = vmatprep.subr.bf16.mxu0 %v7285_v12  ;;  %5032 = vmatprep.subr.bf16.mxu1 %v7288_v14  ;;  %v7363_v12 = vld [vmem:[#allocation6 + $0x250] ss:$36 sps:$4 sm:$0xff]   ;;  %v7366_v14 = vld [vmem:[#allocation6 + $0x258] ss:$36 sps:$4 sm:$0xff]  }
 0x178   :  { %4828 = vmatpush1.bf16.msra.mxu0 %v7283_v16  ;;  %5033 = vmatpush1.bf16.msra.mxu1 %v7286_v17  ;;  %v7371_v16 = vld [vmem:[#allocation6 + $0x29c] ss:$36 sps:$4 sm:$0xff]   ;;  %v7374_v17 = vld [vmem:[#allocation6 + $0x2a4] ss:$36 sps:$4 sm:$0xff]  }
 0x179   :  { %4829 = vmatprep.subr.bf16.mxu0 %v7291_v18  ;;  %5034 = vmatprep.subr.bf16.mxu1 %v7294_v19  ;;  %v7369_v18 = vld [vmem:[#allocation6 + $0x298] ss:$36 sps:$4 sm:$0xff]   ;;  %v7372_v19 = vld [vmem:[#allocation6 + $0x2a0] ss:$36 sps:$4 sm:$0xff]  }
 0x17c   :  { %4830 = vmatpush1.bf16.msra.mxu0 %v7289_v22  ;;  %5035 = vmatpush1.bf16.msra.mxu1 %v7292_v23  ;;  %v7377_v22 = vld [vmem:[#allocation6 + $0x2e4] ss:$36 sps:$4 sm:$0xff]   ;;  %v7380_v23 = vld [vmem:[#allocation6 + $0x2ec] ss:$36 sps:$4 sm:$0xff]  }
 0x17d   :  { %4831 = vmatprep.subr.bf16.mxu0 %v7297_v25  ;;  %5036 = vmatprep.subr.bf16.mxu1 %v7300_v26  ;;  %v7375_v25 = vld [vmem:[#allocation6 + $0x2e0] ss:$36 sps:$4 sm:$0xff]   ;;  %v7378_v26 = vld [vmem:[#allocation6 + $0x2e8] ss:$36 sps:$4 sm:$0xff]  }
 0x180   :  { %4832 = vmatpush1.bf16.msra.mxu0 %v7295_v13  ;;  %5037 = vmatpush1.bf16.msra.mxu1 %v7298_v27  ;;  %v7383_v13 = vld [vmem:[#allocation6 + $0x32c] ss:$36 sps:$4 sm:$0xff]   ;;  %v7386_v27 = vld [vmem:[#allocation6 + $0x334] ss:$36 sps:$4 sm:$0xff]  }
 0x181   :  { %4833 = vmatprep.subr.bf16.mxu0 %v7303_v28  ;;  %5038 = vmatprep.subr.bf16.mxu1 %v7306_v32  ;;  %v7381_v28 = vld [vmem:[#allocation6 + $0x328] ss:$36 sps:$4 sm:$0xff]   ;;  %v7384_v32 = vld [vmem:[#allocation6 + $0x330] ss:$36 sps:$4 sm:$0xff]  }
 0x184   :  { %4834 = vmatpush1.bf16.msra.mxu0 %v7301_v33  ;;  %5039 = vmatpush1.bf16.msra.mxu1 %v7304_v34  ;;  %v7389_v33 = vld [vmem:[#allocation6 + $0x374] ss:$36 sps:$4 sm:$0xff]   ;;  %v7392_v34 = vld [vmem:[#allocation6 + $0x37c] ss:$36 sps:$4 sm:$0xff]  }
 0x185   :  { %4835 = vmatprep.subr.bf16.mxu0 %v7309_v36  ;;  %5040 = vmatprep.subr.bf16.mxu1 %v7312_v21  ;;  %v7387_v36 = vld [vmem:[#allocation6 + $0x370] ss:$36 sps:$4 sm:$0xff]   ;;  %v7390_v21 = vld [vmem:[#allocation6 + $0x378] ss:$36 sps:$4 sm:$0xff]  }
 0x188   :  { %4836 = vmatpush1.bf16.msra.mxu0 %v7307_v37  ;;  %5041 = vmatpush1.bf16.msra.mxu1 %v7310_v38  ;;  %v7395_v37 = vld [vmem:[#allocation6 + $0x3bc] ss:$36 sps:$4 sm:$0xff]   ;;  %v7398_v38 = vld [vmem:[#allocation6 + $0x3c4] ss:$36 sps:$4 sm:$0xff]  }
 0x189   :  { %5051 = vmatprep.subr.bf16.mxu0 %v7317_v39  ;;  %5256 = vmatprep.subr.bf16.mxu1 %v7320_v40  ;;  %v7393_v39 = vld [vmem:[#allocation6 + $0x3b8] ss:$36 sps:$4 sm:$0xff]   ;;  %v7396_v40 = vld [vmem:[#allocation6 + $0x3c0] ss:$36 sps:$4 sm:$0xff]  }
 0x18b   :  { %4838 = vmatmul.mubr.bf16.vlgmr.msra.gmra.mrb[0].mxu0 %v8186_v41  ;;  %5043 = vmatmul.mubr.bf16.vlgmr.msra.gmra.mrb[0].mxu1 %v8186_v41 }
 0x18c   :  { %5052 = vmatpush1.bf16.msra.mxu0 %v7315_v42  ;;  %5257 = vmatpush1.bf16.msra.mxu1 %v7318_v43  ;;  %v7401_v42 = vld [vmem:[#allocation6 + $0x404] ss:$36 sps:$4 sm:$0xff]   ;;  %v7404_v43 = vld [vmem:[#allocation6 + $0x40c] ss:$36 sps:$4 sm:$0xff]  }
 0x18d   :  { %5053 = vmatprep.subr.bf16.mxu0 %v7323_v44  ;;  %5258 = vmatprep.subr.bf16.mxu1 %v7326_v45  ;;  %v7399_v44 = vld [vmem:[#allocation6 + $0x400] ss:$36 sps:$4 sm:$0xff]   ;;  %v7402_v45 = vld [vmem:[#allocation6 + $0x408] ss:$36 sps:$4 sm:$0xff]  }
 0x18e   :  { %5083 = vmatprep.mubr.bf16.mxu0 %v8126_v48  ;;  %5288 = vmatprep.mubr.bf16.mxu1 %v8126_v48 }
 0x190   :  { %5054 = vmatpush1.bf16.msra.mxu0 %v7321_v46  ;;  %5259 = vmatpush1.bf16.msra.mxu1 %v7324_v47  ;;  %v7407_v46 = vld [vmem:[#allocation6 + $0x44c] ss:$36 sps:$4 sm:$0xff]   ;;  %v7410_v47 = vld [vmem:[#allocation6 + $0x454] ss:$36 sps:$4 sm:$0xff]  }
 0x191   :  { %5055 = vmatprep.subr.bf16.mxu0 %v7329_v31  ;;  %5260 = vmatprep.subr.bf16.mxu1 %v7332_v49  ;;  %v7405_v31 = vld [vmem:[#allocation6 + $0x448] ss:$36 sps:$4 sm:$0xff]   ;;  %v7408_v49 = vld [vmem:[#allocation6 + $0x450] ss:$36 sps:$4 sm:$0xff]  }
 0x194   :  { %5056 = vmatpush1.bf16.msra.mxu0 %v7327_v50  ;;  %5261 = vmatpush1.bf16.msra.mxu1 %v7330_v51  ;;  %v7413_v50 = vld [vmem:[#allocation6 + $0x494] ss:$36 sps:$4 sm:$0xff]   ;;  %v7416_v51 = vld [vmem:[#allocation6 + $0x49c] ss:$36 sps:$4 sm:$0xff]  }
 0x195   :  { %5057 = vmatprep.subr.bf16.mxu0 %v7335_v52  ;;  %5262 = vmatprep.subr.bf16.mxu1 %v7338_v53  ;;  %v7411_v52 = vld [vmem:[#allocation6 + $0x490] ss:$36 sps:$4 sm:$0xff]   ;;  %v7414_v53 = vld [vmem:[#allocation6 + $0x498] ss:$36 sps:$4 sm:$0xff]  }
 0x198   :  { %5058 = vmatpush1.bf16.msra.mxu0 %v7333_v54  ;;  %5263 = vmatpush1.bf16.msra.mxu1 %v7336_v55  ;;  %v7419_v54 = vld [vmem:[#allocation6 + $0x4dc] ss:$36 sps:$4 sm:$0xff]   ;;  %v7422_v55 = vld [vmem:[#allocation6 + $0x4e4] ss:$36 sps:$4 sm:$0xff]  }
 0x199   :  { %5059 = vmatprep.subr.bf16.mxu0 %v7341_v56  ;;  %5264 = vmatprep.subr.bf16.mxu1 %v7344_v57  ;;  %v7417_v56 = vld [vmem:[#allocation6 + $0x4d8] ss:$36 sps:$4 sm:$0xff]   ;;  %v7420_v57 = vld [vmem:[#allocation6 + $0x4e0] ss:$36 sps:$4 sm:$0xff]  }
 0x19c   :  { %5060 = vmatpush1.bf16.msra.mxu0 %v7339_v58  ;;  %5265 = vmatpush1.bf16.msra.mxu1 %v7342_v59  ;;  %v7425_v58 = vld [vmem:[#allocation6 + $0x524] ss:$36 sps:$4 sm:$0xff]   ;;  %v7428_v59 = vld [vmem:[#allocation6 + $0x52c] ss:$36 sps:$4 sm:$0xff]  }
 0x19d   :  { %5061 = vmatprep.subr.bf16.mxu0 %v7347_v60  ;;  %5266 = vmatprep.subr.bf16.mxu1 %v7350_v61  ;;  %v7423_v60 = vld [vmem:[#allocation6 + $0x520] ss:$36 sps:$4 sm:$0xff]   ;;  %v7426_v61 = vld [vmem:[#allocation6 + $0x528] ss:$36 sps:$4 sm:$0xff]  }
 0x1a0   :  { %5062 = vmatpush1.bf16.msra.mxu0 %v7345_v62  ;;  %5267 = vmatpush1.bf16.msra.mxu1 %v7348_v63  ;;  %v7431_v62 = vld [vmem:[#allocation6 + $0x56c] ss:$36 sps:$4 sm:$0xff]   ;;  %v7434_v63 = vld [vmem:[#allocation6 + $0x574] ss:$36 sps:$4 sm:$0xff]  }
 0x1a1   :  { %5063 = vmatprep.subr.bf16.mxu0 %v7353_v0  ;;  %5268 = vmatprep.subr.bf16.mxu1 %v7356_v1  ;;  %v7429_v0 = vld [vmem:[#allocation6 + $0x568] ss:$36 sps:$4 sm:$0xff]   ;;  %v7432_v1 = vld [vmem:[#allocation6 + $0x570] ss:$36 sps:$4 sm:$0xff]  }
 0x1a4   :  { %5064 = vmatpush1.bf16.msra.mxu0 %v7351_v2  ;;  %5269 = vmatpush1.bf16.msra.mxu1 %v7354_v3  ;;  %v7437_v2 = vld [vmem:[#allocation6 + $0x5b4] ss:$36 sps:$4 sm:$0xff]   ;;  %v7440_v3 = vld [vmem:[#allocation6 + $0x5bc] ss:$36 sps:$4 sm:$0xff]  }
 0x1a5   :  { %5065 = vmatprep.subr.bf16.mxu0 %v7359_v4  ;;  %5270 = vmatprep.subr.bf16.mxu1 %v7362_v6  ;;  %v7435_v4 = vld [vmem:[#allocation6 + $0x5b0] ss:$36 sps:$4 sm:$0xff]   ;;  %v7438_v6 = vld [vmem:[#allocation6 + $0x5b8] ss:$36 sps:$4 sm:$0xff]  }
 0x1a8   :  { %5066 = vmatpush1.bf16.msra.mxu0 %v7357_v7  ;;  %5271 = vmatpush1.bf16.msra.mxu1 %v7360_v8  ;;  %v7443_v7 = vld [vmem:[#allocation6 + $0x5fc] ss:$36 sps:$4 sm:$0xff]   ;;  %v7446_v8 = vld [vmem:[#allocation6 + $0x604] ss:$36 sps:$4 sm:$0xff]  }
 0x1a9   :  { %5067 = vmatprep.subr.bf16.mxu0 %v7365_v9  ;;  %5272 = vmatprep.subr.bf16.mxu1 %v7368_v11  ;;  %v7441_v9 = vld [vmem:[#allocation6 + $0x5f8] ss:$36 sps:$4 sm:$0xff]   ;;  %v7444_v11 = vld [vmem:[#allocation6 + $0x600] ss:$36 sps:$4 sm:$0xff]  }
 0x1ac   :  { %5068 = vmatpush1.bf16.msra.mxu0 %v7363_v12  ;;  %5273 = vmatpush1.bf16.msra.mxu1 %v7366_v14  ;;  %v7449_v12 = vld [vmem:[#allocation6 + $0x644] ss:$36 sps:$4 sm:$0xff]   ;;  %v7452_v14 = vld [vmem:[#allocation6 + $0x64c] ss:$36 sps:$4 sm:$0xff]  }
 0x1ad   :  { %5069 = vmatprep.subr.bf16.mxu0 %v7371_v16  ;;  %5274 = vmatprep.subr.bf16.mxu1 %v7374_v17  ;;  %v7447_v16 = vld [vmem:[#allocation6 + $0x640] ss:$36 sps:$4 sm:$0xff]   ;;  %v7450_v17 = vld [vmem:[#allocation6 + $0x648] ss:$36 sps:$4 sm:$0xff]  }
 0x1b0   :  { %5070 = vmatpush1.bf16.msra.mxu0 %v7369_v18  ;;  %5275 = vmatpush1.bf16.msra.mxu1 %v7372_v19  ;;  %v7455_v18 = vld [vmem:[#allocation6 + $0x68c] ss:$36 sps:$4 sm:$0xff]   ;;  %v7458_v19 = vld [vmem:[#allocation6 + $0x694] ss:$36 sps:$4 sm:$0xff]  }
 0x1b1   :  { %5071 = vmatprep.subr.bf16.mxu0 %v7377_v22  ;;  %5276 = vmatprep.subr.bf16.mxu1 %v7380_v23  ;;  %v7453_v22 = vld [vmem:[#allocation6 + $0x688] ss:$36 sps:$4 sm:$0xff]   ;;  %v7456_v23 = vld [vmem:[#allocation6 + $0x690] ss:$36 sps:$4 sm:$0xff]  }
 0x1b4   :  { %5072 = vmatpush1.bf16.msra.mxu0 %v7375_v25  ;;  %5277 = vmatpush1.bf16.msra.mxu1 %v7378_v26  ;;  %v7461_v25 = vld [vmem:[#allocation6 + $0x6d4] ss:$36 sps:$4 sm:$0xff]   ;;  %v7464_v26 = vld [vmem:[#allocation6 + $0x6dc] ss:$36 sps:$4 sm:$0xff]  }
 0x1b5   :  { %5073 = vmatprep.subr.bf16.mxu0 %v7383_v13  ;;  %5278 = vmatprep.subr.bf16.mxu1 %v7386_v27  ;;  %v7459_v13 = vld [vmem:[#allocation6 + $0x6d0] ss:$36 sps:$4 sm:$0xff]   ;;  %v7462_v27 = vld [vmem:[#allocation6 + $0x6d8] ss:$36 sps:$4 sm:$0xff]  }
 0x1b8   :  { %5074 = vmatpush1.bf16.msra.mxu0 %v7381_v28  ;;  %5279 = vmatpush1.bf16.msra.mxu1 %v7384_v32  ;;  %v7467_v28 = vld [vmem:[#allocation6 + $0x71c] ss:$36 sps:$4 sm:$0xff]   ;;  %v7470_v32 = vld [vmem:[#allocation6 + $0x724] ss:$36 sps:$4 sm:$0xff]  }
 0x1b9   :  { %5075 = vmatprep.subr.bf16.mxu0 %v7389_v33  ;;  %5280 = vmatprep.subr.bf16.mxu1 %v7392_v34  ;;  %v7465_v33 = vld [vmem:[#allocation6 + $0x718] ss:$36 sps:$4 sm:$0xff]   ;;  %v7468_v34 = vld [vmem:[#allocation6 + $0x720] ss:$36 sps:$4 sm:$0xff]  }
 0x1bc   :  { %5076 = vmatpush1.bf16.msra.mxu0 %v7387_v36  ;;  %5281 = vmatpush1.bf16.msra.mxu1 %v7390_v21  ;;  %v7473_v36 = vld [vmem:[#allocation6 + $0x764] ss:$36 sps:$4 sm:$0xff]   ;;  %v7476_v21 = vld [vmem:[#allocation6 + $0x76c] ss:$36 sps:$4 sm:$0xff]  }
 0x1bd   :  { %5077 = vmatprep.subr.bf16.mxu0 %v7395_v37  ;;  %5282 = vmatprep.subr.bf16.mxu1 %v7398_v38  ;;  %v7471_v37 = vld [vmem:[#allocation6 + $0x760] ss:$36 sps:$4 sm:$0xff]   ;;  %v7474_v38 = vld [vmem:[#allocation6 + $0x768] ss:$36 sps:$4 sm:$0xff]  }
 0x1c0   :  { %5078 = vmatpush1.bf16.msra.mxu0 %v7393_v39  ;;  %5283 = vmatpush1.bf16.msra.mxu1 %v7396_v40  ;;  %v7479_v39 = vld [vmem:[#allocation6 + $0x7ac] ss:$36 sps:$4 sm:$0xff]   ;;  %v7482_v40 = vld [vmem:[#allocation6 + $0x7b4] ss:$36 sps:$4 sm:$0xff]  }
 0x1c1   :  { %5079 = vmatprep.subr.bf16.mxu0 %v7401_v42  ;;  %5284 = vmatprep.subr.bf16.mxu1 %v7404_v43  ;;  %v7477_v42 = vld [vmem:[#allocation6 + $0x7a8] ss:$36 sps:$4 sm:$0xff]   ;;  %v7480_v43 = vld [vmem:[#allocation6 + $0x7b0] ss:$36 sps:$4 sm:$0xff]  }
 0x1c4   :  { %5080 = vmatpush1.bf16.msra.mxu0 %v7399_v44  ;;  %5285 = vmatpush1.bf16.msra.mxu1 %v7402_v45  ;;  %v7485_v44 = vld [vmem:[#allocation6 + $0x7f4] ss:$36 sps:$4 sm:$0xff]   ;;  %v7488_v45 = vld [vmem:[#allocation6 + $0x7fc] ss:$36 sps:$4 sm:$0xff]  }
 0x1c5   :  { %5081 = vmatprep.subr.bf16.mxu0 %v7407_v46  ;;  %5286 = vmatprep.subr.bf16.mxu1 %v7410_v47  ;;  %v7483_v46 = vld [vmem:[#allocation6 + $0x7f0] ss:$36 sps:$4 sm:$0xff]   ;;  %v7486_v47 = vld [vmem:[#allocation6 + $0x7f8] ss:$36 sps:$4 sm:$0xff]  }
 0x1c8   :  { %5082 = vmatpush1.bf16.msra.mxu0 %v7405_v31  ;;  %5287 = vmatpush1.bf16.msra.mxu1 %v7408_v49  ;;  %v7491_v31 = vld [vmem:[#allocation6 + $0x83c] ss:$36 sps:$4 sm:$0xff]   ;;  %v7494_v49 = vld [vmem:[#allocation6 + $0x844] ss:$36 sps:$4 sm:$0xff]  }
 0x1c9   :  { %5092 = vmatprep.subr.bf16.mxu0 %v7413_v50  ;;  %5297 = vmatprep.subr.bf16.mxu1 %v7416_v51  ;;  %v7489_v50 = vld [vmem:[#allocation6 + $0x838] ss:$36 sps:$4 sm:$0xff]   ;;  %v7492_v51 = vld [vmem:[#allocation6 + $0x840] ss:$36 sps:$4 sm:$0xff]  }
 0x1cb   :  { %5084 = vmatmul.mubr.bf16.vlgmr.msra.gmra.mrb[4].mxu0 %v8130_v5  ;;  %5289 = vmatmul.mubr.bf16.vlgmr.msra.gmra.mrb[4].mxu1 %v8130_v5 }
 0x1cc   :  { %5093 = vmatpush1.bf16.msra.mxu0 %v7411_v52  ;;  %5298 = vmatpush1.bf16.msra.mxu1 %v7414_v53  ;;  %v7497_v52 = vld [vmem:[#allocation6 + $0x884] ss:$36 sps:$4 sm:$0xff]   ;;  %v7500_v53 = vld [vmem:[#allocation6 + $0x88c] ss:$36 sps:$4 sm:$0xff]  }
 0x1cd   :  { %5094 = vmatprep.subr.bf16.mxu0 %v7419_v54  ;;  %5299 = vmatprep.subr.bf16.mxu1 %v7422_v55  ;;  %v7495_v54 = vld [vmem:[#allocation6 + $0x880] ss:$36 sps:$4 sm:$0xff]   ;;  %v7498_v55 = vld [vmem:[#allocation6 + $0x888] ss:$36 sps:$4 sm:$0xff]  }
 0x1ce   :  { %5124 = vmatprep.mubr.bf16.mxu0 %v8138_v30  ;;  %5329 = vmatprep.mubr.bf16.mxu1 %v8138_v30 }
 0x1d0   :  { %5095 = vmatpush1.bf16.msra.mxu0 %v7417_v56  ;;  %5300 = vmatpush1.bf16.msra.mxu1 %v7420_v57  ;;  %v7503_v56 = vld [vmem:[#allocation6 + $0x8cc] ss:$36 sps:$4 sm:$0xff]   ;;  %v7506_v57 = vld [vmem:[#allocation6 + $0x8d4] ss:$36 sps:$4 sm:$0xff]  }
 0x1d1   :  { %5096 = vmatprep.subr.bf16.mxu0 %v7425_v58  ;;  %5301 = vmatprep.subr.bf16.mxu1 %v7428_v59  ;;  %v7501_v58 = vld [vmem:[#allocation6 + $0x8c8] ss:$36 sps:$4 sm:$0xff]   ;;  %v7504_v59 = vld [vmem:[#allocation6 + $0x8d0] ss:$36 sps:$4 sm:$0xff]  }
 0x1d4   :  { %5097 = vmatpush1.bf16.msra.mxu0 %v7423_v60  ;;  %5302 = vmatpush1.bf16.msra.mxu1 %v7426_v61  ;;  %v7509_v60 = vld [vmem:[#allocation6 + $0x914] ss:$36 sps:$4 sm:$0xff]   ;;  %v7512_v61 = vld [vmem:[#allocation6 + $0x91c] ss:$36 sps:$4 sm:$0xff]  }
 0x1d5   :  { %5098 = vmatprep.subr.bf16.mxu0 %v7431_v62  ;;  %5303 = vmatprep.subr.bf16.mxu1 %v7434_v63  ;;  %v7507_v62 = vld [vmem:[#allocation6 + $0x910] ss:$36 sps:$4 sm:$0xff]   ;;  %v7510_v63 = vld [vmem:[#allocation6 + $0x918] ss:$36 sps:$4 sm:$0xff]  }
 0x1d8   :  { %5099 = vmatpush1.bf16.msra.mxu0 %v7429_v0  ;;  %5304 = vmatpush1.bf16.msra.mxu1 %v7432_v1  ;;  %v7515_v0 = vld [vmem:[#allocation6 + $0x95c] ss:$36 sps:$4 sm:$0xff]   ;;  %v7518_v1 = vld [vmem:[#allocation6 + $0x964] ss:$36 sps:$4 sm:$0xff]  }
 0x1d9   :  { %5100 = vmatprep.subr.bf16.mxu0 %v7437_v2  ;;  %5305 = vmatprep.subr.bf16.mxu1 %v7440_v3  ;;  %v7513_v2 = vld [vmem:[#allocation6 + $0x958] ss:$36 sps:$4 sm:$0xff]   ;;  %v7516_v3 = vld [vmem:[#allocation6 + $0x960] ss:$36 sps:$4 sm:$0xff]  }
 0x1dc   :  { %5101 = vmatpush1.bf16.msra.mxu0 %v7435_v4  ;;  %5306 = vmatpush1.bf16.msra.mxu1 %v7438_v6  ;;  %v7521_v4 = vld [vmem:[#allocation6 + $0x9a4] ss:$36 sps:$4 sm:$0xff]   ;;  %v7524_v6 = vld [vmem:[#allocation6 + $0x9ac] ss:$36 sps:$4 sm:$0xff]  }
 0x1dd   :  { %5102 = vmatprep.subr.bf16.mxu0 %v7443_v7  ;;  %5307 = vmatprep.subr.bf16.mxu1 %v7446_v8  ;;  %v7519_v7 = vld [vmem:[#allocation6 + $0x9a0] ss:$36 sps:$4 sm:$0xff]   ;;  %v7522_v8 = vld [vmem:[#allocation6 + $0x9a8] ss:$36 sps:$4 sm:$0xff]  }
 0x1e0   :  { %5103 = vmatpush1.bf16.msra.mxu0 %v7441_v9  ;;  %5308 = vmatpush1.bf16.msra.mxu1 %v7444_v11  ;;  %v7527_v9 = vld [vmem:[#allocation6 + $0x9ec] ss:$36 sps:$4 sm:$0xff]   ;;  %v7530_v11 = vld [vmem:[#allocation6 + $0x9f4] ss:$36 sps:$4 sm:$0xff]  }
 0x1e1   :  { %5104 = vmatprep.subr.bf16.mxu0 %v7449_v12  ;;  %5309 = vmatprep.subr.bf16.mxu1 %v7452_v14  ;;  %v7525_v12 = vld [vmem:[#allocation6 + $0x9e8] ss:$36 sps:$4 sm:$0xff]   ;;  %v7528_v14 = vld [vmem:[#allocation6 + $0x9f0] ss:$36 sps:$4 sm:$0xff]  }
 0x1e4   :  { %5105 = vmatpush1.bf16.msra.mxu0 %v7447_v16  ;;  %5310 = vmatpush1.bf16.msra.mxu1 %v7450_v17  ;;  %v7533_v16 = vld [vmem:[#allocation6 + $0xa34] ss:$36 sps:$4 sm:$0xff]   ;;  %v7536_v17 = vld [vmem:[#allocation6 + $0xa3c] ss:$36 sps:$4 sm:$0xff]  }
 0x1e5   :  { %5106 = vmatprep.subr.bf16.mxu0 %v7455_v18  ;;  %5311 = vmatprep.subr.bf16.mxu1 %v7458_v19  ;;  %v7531_v18 = vld [vmem:[#allocation6 + $0xa30] ss:$36 sps:$4 sm:$0xff]   ;;  %v7534_v19 = vld [vmem:[#allocation6 + $0xa38] ss:$36 sps:$4 sm:$0xff]  }
 0x1e8   :  { %5107 = vmatpush1.bf16.msra.mxu0 %v7453_v22  ;;  %5312 = vmatpush1.bf16.msra.mxu1 %v7456_v23  ;;  %v7539_v22 = vld [vmem:[#allocation6 + $0xa7c] ss:$36 sps:$4 sm:$0xff]   ;;  %v7542_v23 = vld [vmem:[#allocation6 + $0xa84] ss:$36 sps:$4 sm:$0xff]  }
 0x1e9   :  { %5108 = vmatprep.subr.bf16.mxu0 %v7461_v25  ;;  %5313 = vmatprep.subr.bf16.mxu1 %v7464_v26  ;;  %v7537_v25 = vld [vmem:[#allocation6 + $0xa78] ss:$36 sps:$4 sm:$0xff]   ;;  %v7540_v26 = vld [vmem:[#allocation6 + $0xa80] ss:$36 sps:$4 sm:$0xff]  }
 0x1ec   :  { %5109 = vmatpush1.bf16.msra.mxu0 %v7459_v13  ;;  %5314 = vmatpush1.bf16.msra.mxu1 %v7462_v27  ;;  %v7545_v13 = vld [vmem:[#allocation6 + $0xac4] ss:$36 sps:$4 sm:$0xff]   ;;  %v7548_v27 = vld [vmem:[#allocation6 + $0xacc] ss:$36 sps:$4 sm:$0xff]  }
 0x1ed   :  { %5110 = vmatprep.subr.bf16.mxu0 %v7467_v28  ;;  %5315 = vmatprep.subr.bf16.mxu1 %v7470_v32  ;;  %v7543_v28 = vld [vmem:[#allocation6 + $0xac0] ss:$36 sps:$4 sm:$0xff]   ;;  %v7546_v32 = vld [vmem:[#allocation6 + $0xac8] ss:$36 sps:$4 sm:$0xff]  }
 0x1f0   :  { %5111 = vmatpush1.bf16.msra.mxu0 %v7465_v33  ;;  %5316 = vmatpush1.bf16.msra.mxu1 %v7468_v34  ;;  %v7551_v33 = vld [vmem:[#allocation6 + $0xb0c] ss:$36 sps:$4 sm:$0xff]   ;;  %v7554_v34 = vld [vmem:[#allocation6 + $0xb14] ss:$36 sps:$4 sm:$0xff]  }
 0x1f1   :  { %5112 = vmatprep.subr.bf16.mxu0 %v7473_v36  ;;  %5317 = vmatprep.subr.bf16.mxu1 %v7476_v21  ;;  %v7549_v36 = vld [vmem:[#allocation6 + $0xb08] ss:$36 sps:$4 sm:$0xff]   ;;  %v7552_v21 = vld [vmem:[#allocation6 + $0xb10] ss:$36 sps:$4 sm:$0xff]  }
 0x1f4   :  { %5113 = vmatpush1.bf16.msra.mxu0 %v7471_v37  ;;  %5318 = vmatpush1.bf16.msra.mxu1 %v7474_v38  ;;  %v7557_v37 = vld [vmem:[#allocation6 + $0xb54] ss:$36 sps:$4 sm:$0xff]   ;;  %v7560_v38 = vld [vmem:[#allocation6 + $0xb5c] ss:$36 sps:$4 sm:$0xff]  }
 0x1f5   :  { %5114 = vmatprep.subr.bf16.mxu0 %v7479_v39  ;;  %5319 = vmatprep.subr.bf16.mxu1 %v7482_v40  ;;  %v7555_v39 = vld [vmem:[#allocation6 + $0xb50] ss:$36 sps:$4 sm:$0xff]   ;;  %v7558_v40 = vld [vmem:[#allocation6 + $0xb58] ss:$36 sps:$4 sm:$0xff]  }
 0x1f8   :  { %5115 = vmatpush1.bf16.msra.mxu0 %v7477_v42  ;;  %5320 = vmatpush1.bf16.msra.mxu1 %v7480_v43  ;;  %v7563_v42 = vld [vmem:[#allocation6 + $0xb9c] ss:$36 sps:$4 sm:$0xff]   ;;  %v7566_v43 = vld [vmem:[#allocation6 + $0xba4] ss:$36 sps:$4 sm:$0xff]  }
 0x1f9   :  { %5116 = vmatprep.subr.bf16.mxu0 %v7485_v44  ;;  %5321 = vmatprep.subr.bf16.mxu1 %v7488_v45  ;;  %v7561_v44 = vld [vmem:[#allocation6 + $0xb98] ss:$36 sps:$4 sm:$0xff]   ;;  %v7564_v45 = vld [vmem:[#allocation6 + $0xba0] ss:$36 sps:$4 sm:$0xff]  }
 0x1fc   :  { %5117 = vmatpush1.bf16.msra.mxu0 %v7483_v46  ;;  %5322 = vmatpush1.bf16.msra.mxu1 %v7486_v47  ;;  %v7569_v46 = vld [vmem:[#allocation6 + $0xbe4] ss:$36 sps:$4 sm:$0xff]   ;;  %v7572_v47 = vld [vmem:[#allocation6 + $0xbec] ss:$36 sps:$4 sm:$0xff]  }
 0x1fd   :  { %5118 = vmatprep.subr.bf16.mxu0 %v7491_v31  ;;  %5323 = vmatprep.subr.bf16.mxu1 %v7494_v49  ;;  %v7567_v31 = vld [vmem:[#allocation6 + $0xbe0] ss:$36 sps:$4 sm:$0xff]   ;;  %v7570_v49 = vld [vmem:[#allocation6 + $0xbe8] ss:$36 sps:$4 sm:$0xff]  }
 0x200   :  { %5119 = vmatpush1.bf16.msra.mxu0 %v7489_v50  ;;  %5324 = vmatpush1.bf16.msra.mxu1 %v7492_v51  ;;  %v7575_v50 = vld [vmem:[#allocation6 + $0xc2c] ss:$36 sps:$4 sm:$0xff]   ;;  %v7578_v51 = vld [vmem:[#allocation6 + $0xc34] ss:$36 sps:$4 sm:$0xff]  }
 0x201   :  { %5120 = vmatprep.subr.bf16.mxu0 %v7497_v52  ;;  %5325 = vmatprep.subr.bf16.mxu1 %v7500_v53  ;;  %v7573_v52 = vld [vmem:[#allocation6 + $0xc28] ss:$36 sps:$4 sm:$0xff]   ;;  %v7576_v53 = vld [vmem:[#allocation6 + $0xc30] ss:$36 sps:$4 sm:$0xff]  }
 0x204   :  { %5121 = vmatpush1.bf16.msra.mxu0 %v7495_v54  ;;  %5326 = vmatpush1.bf16.msra.mxu1 %v7498_v55  ;;  %v7581_v54 = vld [vmem:[#allocation6 + $0xc74] ss:$36 sps:$4 sm:$0xff]   ;;  %v7584_v55 = vld [vmem:[#allocation6 + $0xc7c] ss:$36 sps:$4 sm:$0xff]  }
 0x205   :  { %5122 = vmatprep.subr.bf16.mxu0 %v7503_v56  ;;  %5327 = vmatprep.subr.bf16.mxu1 %v7506_v57  ;;  %v7579_v56 = vld [vmem:[#allocation6 + $0xc70] ss:$36 sps:$4 sm:$0xff]   ;;  %v7582_v57 = vld [vmem:[#allocation6 + $0xc78] ss:$36 sps:$4 sm:$0xff]  }
 0x208   :  { %5123 = vmatpush1.bf16.msra.mxu0 %v7501_v58  ;;  %5328 = vmatpush1.bf16.msra.mxu1 %v7504_v59  ;;  %v7587_v58 = vld [vmem:[#allocation6 + $0xcbc] ss:$36 sps:$4 sm:$0xff]   ;;  %v7590_v59 = vld [vmem:[#allocation6 + $0xcc4] ss:$36 sps:$4 sm:$0xff]  }
 0x209   :  { %5133 = vmatprep.subr.bf16.mxu0 %v7509_v60  ;;  %5338 = vmatprep.subr.bf16.mxu1 %v7512_v61  ;;  %v7585_v60 = vld [vmem:[#allocation6 + $0xcb8] ss:$36 sps:$4 sm:$0xff]   ;;  %v7588_v61 = vld [vmem:[#allocation6 + $0xcc0] ss:$36 sps:$4 sm:$0xff]  }
 0x20b   :  { %5125 = vmatmul.mubr.bf16.vlgmr.msra.gmra.mrb[4].mxu0 %v8144_v10  ;;  %5330 = vmatmul.mubr.bf16.vlgmr.msra.gmra.mrb[4].mxu1 %v8144_v10 }
 0x20c   :  { %5134 = vmatpush1.bf16.msra.mxu0 %v7507_v62  ;;  %5339 = vmatpush1.bf16.msra.mxu1 %v7510_v63  ;;  %v7593_v62 = vld [vmem:[#allocation6 + $0xd04] ss:$36 sps:$4 sm:$0xff]   ;;  %v7596_v63 = vld [vmem:[#allocation6 + $0xd0c] ss:$36 sps:$4 sm:$0xff]  }
 0x20d   :  { %5135 = vmatprep.subr.bf16.mxu0 %v7515_v0  ;;  %5340 = vmatprep.subr.bf16.mxu1 %v7518_v1  ;;  %v7591_v0 = vld [vmem:[#allocation6 + $0xd00] ss:$36 sps:$4 sm:$0xff]   ;;  %v7594_v1 = vld [vmem:[#allocation6 + $0xd08] ss:$36 sps:$4 sm:$0xff]  }
 0x20e   :  { %5165 = vmatprep.mubr.bf16.mxu0 %v8150_v15  ;;  %5370 = vmatprep.mubr.bf16.mxu1 %v8150_v15 }
 0x210   :  { %5136 = vmatpush1.bf16.msra.mxu0 %v7513_v2  ;;  %5341 = vmatpush1.bf16.msra.mxu1 %v7516_v3  ;;  %v7599_v2 = vld [vmem:[#allocation6 + $0xd4c] ss:$36 sps:$4 sm:$0xff]   ;;  %v7602_v3 = vld [vmem:[#allocation6 + $0xd54] ss:$36 sps:$4 sm:$0xff]  }
 0x211   :  { %5137 = vmatprep.subr.bf16.mxu0 %v7521_v4  ;;  %5342 = vmatprep.subr.bf16.mxu1 %v7524_v6  ;;  %v7597_v4 = vld [vmem:[#allocation6 + $0xd48] ss:$36 sps:$4 sm:$0xff]   ;;  %v7600_v6 = vld [vmem:[#allocation6 + $0xd50] ss:$36 sps:$4 sm:$0xff]  }
 0x214   :  { %5138 = vmatpush1.bf16.msra.mxu0 %v7519_v7  ;;  %5343 = vmatpush1.bf16.msra.mxu1 %v7522_v8  ;;  %v7605_v7 = vld [vmem:[#allocation6 + $0xd94] ss:$36 sps:$4 sm:$0xff]   ;;  %v7608_v8 = vld [vmem:[#allocation6 + $0xd9c] ss:$36 sps:$4 sm:$0xff]  }
 0x215   :  { %5139 = vmatprep.subr.bf16.mxu0 %v7527_v9  ;;  %5344 = vmatprep.subr.bf16.mxu1 %v7530_v11  ;;  %v7603_v9 = vld [vmem:[#allocation6 + $0xd90] ss:$36 sps:$4 sm:$0xff]   ;;  %v7606_v11 = vld [vmem:[#allocation6 + $0xd98] ss:$36 sps:$4 sm:$0xff]  }
 0x218   :  { %5140 = vmatpush1.bf16.msra.mxu0 %v7525_v12  ;;  %5345 = vmatpush1.bf16.msra.mxu1 %v7528_v14  ;;  %v7611_v12 = vld [vmem:[#allocation6 + $0xddc] ss:$36 sps:$4 sm:$0xff]   ;;  %v7614_v14 = vld [vmem:[#allocation6 + $0xde4] ss:$36 sps:$4 sm:$0xff]  }
 0x219   :  { %5141 = vmatprep.subr.bf16.mxu0 %v7533_v16  ;;  %5346 = vmatprep.subr.bf16.mxu1 %v7536_v17  ;;  %v7609_v16 = vld [vmem:[#allocation6 + $0xdd8] ss:$36 sps:$4 sm:$0xff]   ;;  %v7612_v17 = vld [vmem:[#allocation6 + $0xde0] ss:$36 sps:$4 sm:$0xff]  }
 0x21c   :  { %5142 = vmatpush1.bf16.msra.mxu0 %v7531_v18  ;;  %5347 = vmatpush1.bf16.msra.mxu1 %v7534_v19  ;;  %v7617_v18 = vld [vmem:[#allocation6 + $0xe24] ss:$36 sps:$4 sm:$0xff]   ;;  %v7620_v19 = vld [vmem:[#allocation6 + $0xe2c] ss:$36 sps:$4 sm:$0xff]  }
 0x21d   :  { %5143 = vmatprep.subr.bf16.mxu0 %v7539_v22  ;;  %5348 = vmatprep.subr.bf16.mxu1 %v7542_v23  ;;  %v881_v22 = vlaneseq  ;;  %v7615_v23 = vld [vmem:[#allocation6 + $0xe20] ss:$36 sps:$4 sm:$0xff]  }
 0x220   :  { %5144 = vmatpush1.bf16.msra.mxu0 %v7537_v25  ;;  %5349 = vmatpush1.bf16.msra.mxu1 %v7540_v26  ;;  %v7618_v25 = vld [vmem:[#allocation6 + $0xe28] ss:$36 sps:$4 sm:$0xff]  }
 0x221   :  { %5145 = vmatprep.subr.bf16.mxu0 %v7545_v13  ;;  %5350 = vmatprep.subr.bf16.mxu1 %v7548_v27  ;;  %v7623_v26 = vld [vmem:[#allocation6 + $0xe6c] ss:$36 sps:$4 sm:$0xff]   ;;  %v7626_v13 = vld [vmem:[#allocation6 + $0xe74] ss:$36 sps:$4 sm:$0xff]   ;;  %v8205_v27 = vshrl.u32 %v881_v22, 7 }
 0x224   :  { %5146 = vmatpush1.bf16.msra.mxu0 %v7543_v28  ;;  %5351 = vmatpush1.bf16.msra.mxu1 %v7546_v32  ;;  %v7621_v28 = vld [vmem:[#allocation6 + $0xe68] ss:$36 sps:$4 sm:$0xff]   ;;  %v7624_v32 = vld [vmem:[#allocation6 + $0xe70] ss:$36 sps:$4 sm:$0xff]  }
 0x225   :  { %5147 = vmatprep.subr.bf16.mxu0 %v7551_v33  ;;  %5352 = vmatprep.subr.bf16.mxu1 %v7554_v34  ;;  %v7629_v33 = vld [vmem:[#allocation6 + $0xeb4] ss:$36 sps:$4 sm:$0xff]   ;;  %v7632_v34 = vld [vmem:[#allocation6 + $0xebc] ss:$36 sps:$4 sm:$0xff]  }
 0x228   :  { %5148 = vmatpush1.bf16.msra.mxu0 %v7549_v36  ;;  %5353 = vmatpush1.bf16.msra.mxu1 %v7552_v21  ;;  %v7627_v36 = vld [vmem:[#allocation6 + $0xeb0] ss:$36 sps:$4 sm:$0xff]   ;;  %v883_v21 = vsub.s32 0, %v8205_v27 }
 0x229   :  { %5149 = vmatprep.subr.bf16.mxu0 %v7557_v37  ;;  %5354 = vmatprep.subr.bf16.mxu1 %v7560_v38  ;;  %v891_v37 = vsub.s32 2, %v8205_v27  ;;  %v7630_v38 = vld [vmem:[#allocation6 + $0xeb8] ss:$36 sps:$4 sm:$0xff]  }
 0x22c   :  { %5150 = vmatpush1.bf16.msra.mxu0 %v7555_v39  ;;  %5355 = vmatpush1.bf16.msra.mxu1 %v7558_v40  ;;  %v8209_v39 = vld [vmem:[#allocation8] sm:$0xff]  ;;  %v887_v40 = vsub.s32 1, %v8205_v27 }
 0x22d   :  { %5151 = vmatprep.subr.bf16.mxu0 %v7563_v42  ;;  %5356 = vmatprep.subr.bf16.mxu1 %v7566_v43  ;;  %v895_v42 = vsub.s32 3, %v8205_v27  ;;  %v7635_v43 = vld [vmem:[#allocation6 + $0xefc] ss:$36 sps:$4 sm:$0xff]  }
 0x230   :  { %5152 = vmatpush1.bf16.msra.mxu0 %v7561_v44  ;;  %5357 = vmatpush1.bf16.msra.mxu1 %v7564_v45  ;;  %v7638_v44 = vld [vmem:[#allocation6 + $0xf04] ss:$36 sps:$4 sm:$0xff]   ;;  %v884_v45 = vrot.slane %v8209_v39, %v883_v21 }
 0x231   :  { %5153 = vmatprep.subr.bf16.mxu0 %v7569_v46  ;;  %5358 = vmatprep.subr.bf16.mxu1 %v7572_v47  ;;  %v892_v46 = vrot.slane %v8209_v39, %v891_v37  ;;  %v888_v47 = vrot.slane %v8209_v39, %v887_v40 }
 0x234   :  { %5154 = vmatpush1.bf16.msra.mxu0 %v7567_v31  ;;  %5359 = vmatpush1.bf16.msra.mxu1 %v7570_v49  ;;  %v896_v31 = vrot.slane %v8209_v39, %v895_v42  ;;  %v7633_v49 = vld [vmem:[#allocation6 + $0xef8] ss:$36 sps:$4 sm:$0xff]  }
 0x235   :  { %5155 = vmatprep.subr.bf16.mxu0 %v7575_v50  ;;  %5360 = vmatprep.subr.bf16.mxu1 %v7578_v51  ;;  %v7636_v50 = vld [vmem:[#allocation6 + $0xf00] ss:$36 sps:$4 sm:$0xff]  }
 0x236   :  { %v7641_v51 = vld [vmem:[#allocation6 + $0xf44] ss:$36 sps:$4 sm:$0xff]  }
 0x238   :  { %5156 = vmatpush1.bf16.msra.mxu0 %v7573_v52  ;;  %5361 = vmatpush1.bf16.msra.mxu1 %v7576_v53  ;;  %v7644_v52 = vld [vmem:[#allocation6 + $0xf4c] ss:$36 sps:$4 sm:$0xff]  }
 0x239   :  { %5157 = vmatprep.subr.bf16.mxu0 %v7581_v54  ;;  %5362 = vmatprep.subr.bf16.mxu1 %v7584_v55 }
 0x23c   :  { %5158 = vmatpush1.bf16.msra.mxu0 %v7579_v56  ;;  %5363 = vmatpush1.bf16.msra.mxu1 %v7582_v57 }
 0x23d   :  { %5159 = vmatprep.subr.bf16.mxu0 %v7587_v58  ;;  %5364 = vmatprep.subr.bf16.mxu1 %v7590_v59  ;;  %v7639_v59 = vld [vmem:[#allocation6 + $0xf40] ss:$36 sps:$4 sm:$0xff]  }
 0x240   :  { %5160 = vmatpush1.bf16.msra.mxu0 %v7585_v60  ;;  %5365 = vmatpush1.bf16.msra.mxu1 %v7588_v61 }
 0x241   :  { %5161 = vmatprep.subr.bf16.mxu0 %v7593_v62  ;;  %5366 = vmatprep.subr.bf16.mxu1 %v7596_v63 }
 0x244   :  { %5162 = vmatpush1.bf16.msra.mxu0 %v7591_v0  ;;  %5367 = vmatpush1.bf16.msra.mxu1 %v7594_v1  ;;  %v7642_v0 = vld [vmem:[#allocation6 + $0xf48] ss:$36 sps:$4 sm:$0xff]  }
 0x245   :  { %5163 = vmatprep.subr.bf16.mxu0 %v7599_v2  ;;  %5368 = vmatprep.subr.bf16.mxu1 %v7602_v3  ;;  %v7647_v1 = vld [vmem:[#allocation6 + $0xf8c] ss:$36 sps:$4 sm:$0xff]  }
 0x248   :  { %5164 = vmatpush1.bf16.msra.mxu0 %v7597_v4  ;;  %5369 = vmatpush1.bf16.msra.mxu1 %v7600_v6  ;;  %v7650_v6 = vld [vmem:[#allocation6 + $0xf94] ss:$36 sps:$4 sm:$0xff]  }
 0x249   :  { %5174 = vmatprep.subr.bf16.mxu0 %v7605_v7  ;;  %5379 = vmatprep.subr.bf16.mxu1 %v7608_v8 }
 0x24b   :  { %5166 = vmatmul.mubr.bf16.vlgmr.msra.gmra.mrb[4].mxu0 %v8158_v20  ;;  %5371 = vmatmul.mubr.bf16.vlgmr.msra.gmra.mrb[4].mxu1 %v8158_v20 }
 0x24c   :  { %5175 = vmatpush1.bf16.msra.mxu0 %v7603_v9  ;;  %5380 = vmatpush1.bf16.msra.mxu1 %v7606_v11  ;;  %v7645_v11 = vld [vmem:[#allocation6 + $0xf88] ss:$36 sps:$4 sm:$0xff]  }
 0x24d   :  { %5176 = vmatprep.subr.bf16.mxu0 %v7611_v12  ;;  %5381 = vmatprep.subr.bf16.mxu1 %v7614_v14  ;;  %v7648_v14 = vld [vmem:[#allocation6 + $0xf90] ss:$36 sps:$4 sm:$0xff]  }
 0x24e   :  { %5206 = vmatprep.mubr.bf16.mxu0 %v8164_v24  ;;  %5411 = vmatprep.mubr.bf16.mxu1 %v8164_v24 }
 0x250   :  { %5177 = vmatpush1.bf16.msra.mxu0 %v7609_v16  ;;  %5382 = vmatpush1.bf16.msra.mxu1 %v7612_v17  ;;  %v7653_v16 = vld [vmem:[#allocation6 + $0xfd4] ss:$36 sps:$4 sm:$0xff]  }
 0x251   :  { %5178 = vmatprep.subr.bf16.mxu0 %v7617_v18  ;;  %5383 = vmatprep.subr.bf16.mxu1 %v7620_v19  ;;  %v7656_v19 = vld [vmem:[#allocation6 + $0xfdc] ss:$36 sps:$4 sm:$0xff]  }
 0x254   :  { %5179 = vmatpush1.bf16.msra.mxu0 %v7615_v23  ;;  %5384 = vmatpush1.bf16.msra.mxu1 %v7618_v25 }
 0x255   :  { %5180 = vmatprep.subr.bf16.mxu0 %v7623_v26  ;;  %5385 = vmatprep.subr.bf16.mxu1 %v7626_v13  ;;  %v7651_v26 = vld [vmem:[#allocation6 + $0xfd0] ss:$36 sps:$4 sm:$0xff]   ;;  %v7654_v13 = vld [vmem:[#allocation6 + $0xfd8] ss:$36 sps:$4 sm:$0xff]  }
 0x258   :  { %5181 = vmatpush1.bf16.msra.mxu0 %v7621_v28  ;;  %5386 = vmatpush1.bf16.msra.mxu1 %v7624_v32  ;;  %v7659_v28 = vld [vmem:[#allocation6 + $0x101c] ss:$36 sps:$4 sm:$0xff]   ;;  %v7662_v32 = vld [vmem:[#allocation6 + $0x1024] ss:$36 sps:$4 sm:$0xff]  }
 0x259   :  { %5182 = vmatprep.subr.bf16.mxu0 %v7629_v33  ;;  %5387 = vmatprep.subr.bf16.mxu1 %v7632_v34  ;;  %v7657_v33 = vld [vmem:[#allocation6 + $0x1018] ss:$36 sps:$4 sm:$0xff]   ;;  %v7660_v34 = vld [vmem:[#allocation6 + $0x1020] ss:$36 sps:$4 sm:$0xff]  }
 0x25c   :  { %5183 = vmatpush1.bf16.msra.mxu0 %v7627_v36  ;;  %5388 = vmatpush1.bf16.msra.mxu1 %v7630_v38  ;;  %v7665_v36 = vld [vmem:[#allocation6 + $0x1064] ss:$36 sps:$4 sm:$0xff]   ;;  %v7668_v38 = vld [vmem:[#allocation6 + $0x106c] ss:$36 sps:$4 sm:$0xff]  }
 0x25d   :  { %5184 = vmatprep.subr.bf16.mxu0 %v7635_v43  ;;  %5389 = vmatprep.subr.bf16.mxu1 %v7638_v44  ;;  %v7663_v43 = vld [vmem:[#allocation6 + $0x1060] ss:$36 sps:$4 sm:$0xff]   ;;  %v7666_v44 = vld [vmem:[#allocation6 + $0x1068] ss:$36 sps:$4 sm:$0xff]  }
 0x25e   :  { %v4839_v53 = vpop.f32.mrb[0].mxu0  ;;  %v5044_v54 = vpop.f32.mrb[0].mxu1 }
 0x25f   :  { %v8225_v55 = vadd.f32 %v4839_v53, %v884_v45  ;;  %v8227_v56 = vadd.f32 %v5044_v54, %v892_v46  ;;  %v4841_v57 = vpop.f32.mrb[1].mxu0  ;;  %v5046_v58 = vpop.f32.mrb[1].mxu1  ;;  %v7671_v46 = vld [vmem:[#allocation6 + $0x10ac] ss:$36 sps:$4 sm:$0xff]  }
 0x260   :  { %v8229_v60 = vadd.f32 %v4841_v57, %v888_v47  ;;  %v8231_v61 = vadd.f32 %v5046_v58, %v896_v31  ;;  %v4843_v62 = vpop.f32.mrb[2].mxu0  ;;  %v5048_v63 = vpop.f32.mrb[2].mxu1  ;;  %5185 = vmatpush1.bf16.msra.mxu0 %v7633_v49  ;;  %5390 = vmatpush1.bf16.msra.mxu1 %v7636_v50  ;;  %v7674_v47 = vld [vmem:[#allocation6 + $0x10b4] ss:$36 sps:$4 sm:$0xff]   ;;  %v7669_v53 = vld [vmem:[#allocation6 + $0x10a8] ss:$36 sps:$4 sm:$0xff]  }
 0x261   :  { %v5686_v2 = vand.u32 2147483647, %v8227_v56  ;;  %v4844_v3 = vpop.f32.mrb[3].mxu0  ;;  %v5049_v4 = vpop.f32.mrb[3].mxu1  ;;  %5186 = vmatprep.subr.bf16.mxu0 %v7641_v51  ;;  %5391 = vmatprep.subr.bf16.mxu1 %v7644_v52  ;;  %v7672_v54 = vld [vmem:[#allocation6 + $0x10b0] ss:$36 sps:$4 sm:$0xff]   ;;  %vm5670_vm3 = vcmp.ne.f32.partialorder %v8227_v56, %v8227_v56 }
 0x262   :  { %v5685_v7 = vand.u32 2147483647, %v8229_v60  ;;  %v5687_v9 = vand.u32 2147483647, %v8231_v61  ;;  %v7677_v57 = vld [vmem:[#allocation6 + $0x10f4] ss:$36 sps:$4 sm:$0xff]   ;;  %vm5669_vm4 = vcmp.ne.f32.partialorder %v8229_v60, %v8229_v60  ;;  %vm5671_vm5 = vcmp.ne.f32.partialorder %v8231_v61, %v8231_v61 }
 0x263   :  { %v5694_v8 = vsub.f32 0.0, %v5686_v2  ;;  %v7680_v58 = vld [vmem:[#allocation6 + $0x10fc] ss:$36 sps:$4 sm:$0xff]   ;;  %v7675_v63 = vld [vmem:[#allocation6 + $0x10f0] ss:$36 sps:$4 sm:$0xff]  }
 0x264   :  { %v5693_v12 = vsub.f32 0.0, %v5685_v7  ;;  %5187 = vmatpush1.bf16.msra.mxu0 %v7639_v59  ;;  %5392 = vmatpush1.bf16.msra.mxu1 %v7642_v0  ;;  %v5695_v18 = vsub.f32 0.0, %v5687_v9  ;;  %v7678_v0 = vld [vmem:[#allocation6 + $0x10f8] ss:$36 sps:$4 sm:$0xff]   ;;  %v7686_v3 = vld [vmem:[#allocation6 + $0x1144] ss:$36 sps:$4 sm:$0xff]  }
 0x265   :  { %v5703_v17 = vmul.f32 1.442695, %v5694_v8  ;;  %5188 = vmatprep.subr.bf16.mxu0 %v7647_v1  ;;  %5393 = vmatprep.subr.bf16.mxu1 %v7650_v6  ;;  %v7683_v2 = vld [vmem:[#allocation6 + $0x113c] ss:$36 sps:$4 sm:$0xff]  }
 0x266   :  { %v5701_v23 = vmul.f32 1.442695, %v5693_v12  ;;  %v5705_v25 = vmul.f32 1.442695, %v5695_v18  ;;  %v7681_v6 = vld [vmem:[#allocation6 + $0x1138] ss:$36 sps:$4 sm:$0xff]  }
 0x267   :  { %7875 = vpow2.f32 %v5703_v17  ;;  %v7684_v7 = vld [vmem:[#allocation6 + $0x1140] ss:$36 sps:$4 sm:$0xff]  }
 0x268   :  { %7877 = vpow2.f32 %v5701_v23  ;;  %5189 = vmatpush1.bf16.msra.mxu0 %v7645_v11  ;;  %5394 = vmatpush1.bf16.msra.mxu1 %v7648_v14  ;;  %v7689_v11 = vld [vmem:[#allocation6 + $0x1184] ss:$36 sps:$4 sm:$0xff]  }
 0x269   :  { %7879 = vpow2.f32 %v5705_v25  ;;  %5190 = vmatprep.subr.bf16.mxu0 %v7653_v16  ;;  %5395 = vmatprep.subr.bf16.mxu1 %v7656_v19  ;;  %v7692_v16 = vld [vmem:[#allocation6 + $0x118c] ss:$36 sps:$4 sm:$0xff]   ;;  %v7687_v19 = vld [vmem:[#allocation6 + $0x1180] ss:$36 sps:$4 sm:$0xff]  }
 0x26a   :  { %v7690_v23 = vld [vmem:[#allocation6 + $0x1188] ss:$36 sps:$4 sm:$0xff]  }
 0x26c   :  { %5191 = vmatpush1.bf16.msra.mxu0 %v7651_v26  ;;  %5396 = vmatpush1.bf16.msra.mxu1 %v7654_v13  ;;  %v5662_v26 = vmax.f32 %v8227_v56, 0.0 }
 0x26d   :  { %5192 = vmatprep.subr.bf16.mxu0 %v7659_v28  ;;  %5397 = vmatprep.subr.bf16.mxu1 %v7662_v32  ;;  %v7695_v32 = vld [vmem:[#allocation6 + $0x11cc] ss:$36 sps:$4 sm:$0xff]  }
 0x270   :  { %5193 = vmatpush1.bf16.msra.mxu0 %v7657_v33  ;;  %5398 = vmatpush1.bf16.msra.mxu1 %v7660_v34  ;;  %v5661_v34 = vmax.f32 %v8229_v60, 0.0 }
 0x271   :  { %v7876_v45 = vpop.eup %7875  ;;  %5194 = vmatprep.subr.bf16.mxu0 %v7665_v36  ;;  %5399 = vmatprep.subr.bf16.mxu1 %v7668_v38 }
 0x272   :  { %v7878_v31 = vpop.eup %7877  ;;  %v5726_v49 = vadd.f32 1.0, %v7876_v45  ;;  %v5729_v59 = vmul.f32 -0.5, %v7876_v45  ;;  %v5732_v8 = vand.u32 2147483647, %v7876_v45 }
 0x273   :  { %v8236_v50 = vpop.eup %7879  ;;  %v5717_v51 = vadd.f32 1.0, %v7878_v31  ;;  %v5720_v62 = vmul.f32 -0.5, %v7878_v31  ;;  %v5723_v12 = vand.u32 2147483647, %v7878_v31 }
 0x274   :  { %7881 = vlog2.f32 %v5726_v49  ;;  %v5735_v52 = vadd.f32 1.0, %v8236_v50  ;;  %5195 = vmatpush1.bf16.msra.mxu0 %v7663_v43  ;;  %5400 = vmatpush1.bf16.msra.mxu1 %v7666_v44  ;;  %v5738_v1 = vmul.f32 -0.5, %v8236_v50  ;;  %v5730_v4 = vadd.f32 1.0, %v5729_v59  ;;  %v7701_v59 = vld [vmem:[#allocation6 + $0x1214] ss:$36 sps:$4 sm:$0xff]  }
 0x275   :  { %7883 = vlog2.f32 %v5717_v51  ;;  %5196 = vmatprep.subr.bf16.mxu0 %v7671_v46  ;;  %5401 = vmatprep.subr.bf16.mxu1 %v7674_v47  ;;  %v5721_v9 = vadd.f32 1.0, %v5720_v62  ;;  %v5741_v18 = vand.u32 2147483647, %v8236_v50  ;;  %vm5733_vm0 = vcmp.lt.f32.partialorder %v5732_v8, 0.0004427343 }
 0x276   :  { %7885 = vlog2.f32 %v5735_v52  ;;  %v5739_v14 = vadd.f32 1.0, %v5738_v1  ;;  %v5731_v28 = vmul.f32 %v7876_v45, %v5730_v4  ;;  %vm5724_vm1 = vcmp.lt.f32.partialorder %v5723_v12, 0.0004427343  ;;  %v7698_v47 = vld [vmem:[#allocation6 + $0x11d4] ss:$36 sps:$4 sm:$0xff]   ;;  %v8254_v4 = vld [vmem:[#allocation9] sm:$0xff] }
 0x277   :  { %v5722_v38 = vmul.f32 %v7878_v31, %v5721_v9  ;;  %v5663_v45 = vmax.f32 %v8231_v61, 0.0  ;;  %vm5742_vm2 = vcmp.lt.f32.partialorder %v5741_v18, 0.0004427343  ;;  %v7704_v62 = vld [vmem:[#allocation6 + $0x121c] ss:$36 sps:$4 sm:$0xff]  }
 0x278   :  { %5197 = vmatpush1.bf16.msra.mxu0 %v7669_v53  ;;  %5402 = vmatpush1.bf16.msra.mxu1 %v7672_v54  ;;  %v5740_v46 = vmul.f32 %v8236_v50, %v5739_v14  ;;  %v7693_v50 = vld [vmem:[#allocation6 + $0x11c8] ss:$36 sps:$4 sm:$0xff]   ;;  %v7702_v1 = vld [vmem:[#allocation6 + $0x1218] ss:$36 sps:$4 sm:$0xff]   ;;  %v5826_v14 = vrot.slane %v8254_v4, %v883_v21  ;;  %v7711_v18 = vld [vmem:[#allocation6 + $0x12a0] ss:$36 sps:$4 sm:$0xff]  }
 0x279   :  { %5198 = vmatprep.subr.bf16.mxu0 %v7677_v57  ;;  %5403 = vmatprep.subr.bf16.mxu1 %v7680_v58  ;;  %v7696_v57 = vld [vmem:[#allocation6 + $0x11d0] ss:$36 sps:$4 sm:$0xff]   ;;  %v7713_v8 = vld [vmem:[#allocation6 + $0x12a4] ss:$36 sps:$4 sm:$0xff]  }
 0x27a   :  { %v7716_v9 = vld [vmem:[#allocation6 + $0x12ac] ss:$36 sps:$4 sm:$0xff]  }
 0x27c   :  { %5199 = vmatpush1.bf16.msra.mxu0 %v7675_v63  ;;  %5404 = vmatpush1.bf16.msra.mxu1 %v7678_v0  ;;  %v7699_v0 = vld [vmem:[#allocation6 + $0x1210] ss:$36 sps:$4 sm:$0xff]  }
 0x27d   :  { %5200 = vmatprep.subr.bf16.mxu0 %v7683_v2  ;;  %5405 = vmatprep.subr.bf16.mxu1 %v7686_v3  ;;  %v7707_v2 = vld [vmem:[#allocation6 + $0x125c] ss:$36 sps:$4 sm:$0xff]   ;;  %v7710_v3 = vld [vmem:[#allocation6 + $0x1264] ss:$36 sps:$4 sm:$0xff]  }
 0x27e   :  { %v7882_v17 = vpop.eup %7881 }
 0x27f   :  { %v7884_v25 = vpop.eup %7883  ;;  %v5728_v13 = vmul.f32 0.6931472, %v7882_v17 }
 0x280   :  { %v7886_v33 = vpop.eup %7885  ;;  %v5719_v36 = vmul.f32 0.6931472, %v7884_v25  ;;  %5201 = vmatpush1.bf16.msra.mxu0 %v7681_v6  ;;  %5406 = vmatpush1.bf16.msra.mxu1 %v7684_v7  ;;  %v7705_v6 = vld [vmem:[#allocation6 + $0x1258] ss:$36 sps:$4 sm:$0xff]   ;;  %v7708_v7 = vld [vmem:[#allocation6 + $0x1260] ss:$36 sps:$4 sm:$0xff]  }
 0x281   :  { %v5734_v43 = vsel %vm5733_vm0, %v5731_v28, %v5728_v13  ;;  %v5737_v44 = vmul.f32 0.6931472, %v7886_v33  ;;  %5202 = vmatprep.subr.bf16.mxu0 %v7689_v11  ;;  %5407 = vmatprep.subr.bf16.mxu1 %v7692_v16  ;;  %v5830_v11 = vrot.slane %v8254_v4, %v887_v40  ;;  %v5834_v40 = vrot.slane %v8254_v4, %v891_v37  ;;  %v7722_v13 = vld [vmem:[#allocation6 + $0x12f4] ss:$36 sps:$4 sm:$0xff]  }
 0x282   :  { %v5790_v49 = vadd.f32 %v5734_v43, %v5662_v26  ;;  %v5725_v51 = vsel %vm5724_vm1, %v5722_v38, %v5719_v36  ;;  %v7719_v26 = vld [vmem:[#allocation6 + $0x12ec] ss:$36 sps:$4 sm:$0xff]   ;;  %v7725_v36 = vld [vmem:[#allocation6 + $0x1334] ss:$36 sps:$4 sm:$0xff]   ;;  %v7728_v38 = vld [vmem:[#allocation6 + $0x133c] ss:$36 sps:$4 sm:$0xff]  }
 0x283   :  { %v5789_v52 = vadd.f32 %v5725_v51, %v5661_v34  ;;  %v5743_v31 = vsel %vm5742_vm2, %v5740_v46, %v5737_v44  ;;  %v7720_v33 = vld [vmem:[#allocation6 + $0x12f0] ss:$36 sps:$4 sm:$0xff]   ;;  %v7726_v44 = vld [vmem:[#allocation6 + $0x1338] ss:$36 sps:$4 sm:$0xff]   ;;  %v7734_v46 = vld [vmem:[#allocation6 + $0x1384] ss:$36 sps:$4 sm:$0xff]  }
 0x284   :  { %v5798_v53 = vsel %vm5670_vm3, %v8227_v56, %v5790_v49  ;;  %v5791_v54 = vadd.f32 %v5743_v31, %v5663_v45  ;;  %5203 = vmatpush1.bf16.msra.mxu0 %v7687_v19  ;;  %5408 = vmatpush1.bf16.msra.mxu1 %v7690_v23  ;;  %v7714_v19 = vld [vmem:[#allocation6 + $0x12a8] ss:$36 sps:$4 sm:$0xff]   ;;  %v7732_v49 = vld [vmem:[#allocation6 + $0x1380] ss:$36 sps:$4 sm:$0xff]  }
 0x285   :  { %7887 = vtanh.f32 %v5798_v53  ;;  %v5797_v58 = vsel %vm5669_vm4, %v8229_v60, %v5789_v52  ;;  %5204 = vmatprep.subr.bf16.mxu0 %v7695_v32  ;;  %5409 = vmatprep.subr.bf16.mxu1 %v7698_v47  ;;  %v7729_v47 = vld [vmem:[#allocation6 + $0x1378] ss:$36 sps:$4 sm:$0xff]   ;;  %v7737_v51 = vld [vmem:[#allocation6 + $0x13c4] ss:$36 sps:$4 sm:$0xff]   ;;  %v7740_v45 = vld [vmem:[#allocation6 + $0x13cc] ss:$36 sps:$4 sm:$0xff]  }
 0x286   :  { %7889 = vtanh.f32 %v5797_v58  ;;  %v5799_v63 = vsel %vm5671_vm5, %v8231_v61, %v5791_v54  ;;  %v7735_v52 = vld [vmem:[#allocation6 + $0x13c0] ss:$36 sps:$4 sm:$0xff]   ;;  %v7738_v31 = vld [vmem:[#allocation6 + $0x13c8] ss:$36 sps:$4 sm:$0xff]   ;;  %v7746_v54 = vld [vmem:[#allocation6 + $0x1414] ss:$36 sps:$4 sm:$0xff]  }
 0x287   :  { %7891 = vtanh.f32 %v5799_v63  ;;  %v7743_v53 = vld [vmem:[#allocation6 + $0x140c] ss:$36 sps:$4 sm:$0xff]   ;;  %v7749_v58 = vld [vmem:[#allocation6 + $0x1454] ss:$36 sps:$4 sm:$0xff]  }
 0x288   :  { %5205 = vmatpush1.bf16.msra.mxu0 %v7693_v50  ;;  %5410 = vmatpush1.bf16.msra.mxu1 %v7696_v57  ;;  %v7741_v50 = vld [vmem:[#allocation6 + $0x1408] ss:$36 sps:$4 sm:$0xff]   ;;  %v7744_v57 = vld [vmem:[#allocation6 + $0x1410] ss:$36 sps:$4 sm:$0xff]   ;;  %v7750_v63 = vld [vmem:[#allocation6 + $0x1458] ss:$36 sps:$4 sm:$0xff]  }
 0x289   :  { %5215 = vmatprep.subr.bf16.mxu0 %v7701_v59  ;;  %5420 = vmatprep.subr.bf16.mxu1 %v7704_v62  ;;  %v7752_v59 = vld [vmem:[#allocation6 + $0x145c] ss:$36 sps:$4 sm:$0xff]   ;;  %v7747_v62 = vld [vmem:[#allocation6 + $0x1450] ss:$36 sps:$4 sm:$0xff]  }
 0x28b   :  { %5207 = vmatmul.mubr.bf16.vlgmr.msra.gmra.mrb[4].mxu0 %v8172_v29  ;;  %5412 = vmatmul.mubr.bf16.vlgmr.msra.gmra.mrb[4].mxu1 %v8172_v29 }
 0x28c   :  { %5216 = vmatpush1.bf16.msra.mxu0 %v7699_v0  ;;  %5421 = vmatpush1.bf16.msra.mxu1 %v7702_v1  ;;  %v7755_v0 = vld [vmem:[#allocation6 + $0x149c] ss:$36 sps:$4 sm:$0xff]   ;;  %v7758_v1 = vld [vmem:[#allocation6 + $0x14a4] ss:$36 sps:$4 sm:$0xff]  }
 0x28d   :  { %5217 = vmatprep.subr.bf16.mxu0 %v7707_v2  ;;  %5422 = vmatprep.subr.bf16.mxu1 %v7710_v3  ;;  %v7753_v2 = vld [vmem:[#allocation6 + $0x1498] ss:$36 sps:$4 sm:$0xff]   ;;  %v7756_v3 = vld [vmem:[#allocation6 + $0x14a0] ss:$36 sps:$4 sm:$0xff]  }
 0x28e   :  { %5247 = vmatprep.mubr.bf16.mxu0 %v8178_v35  ;;  %5452 = vmatprep.mubr.bf16.mxu1 %v8178_v35 }
 0x28f   :  { %v7888_v12 = vpop.eup %7887 }
 0x290   :  { %v7890_v16 = vpop.eup %7889  ;;  %v5814_v17 = vmul.f32 %v7888_v12, %v8227_v56  ;;  %5218 = vmatpush1.bf16.msra.mxu0 %v7705_v6  ;;  %5423 = vmatpush1.bf16.msra.mxu1 %v7708_v7  ;;  %v7717_v56 = vld [vmem:[#allocation6 + $0x12e8] ss:$36 sps:$4 sm:$0xff]   ;;  %v7770_v12 = vld [vmem:[#allocation6 + $0x1534] ss:$36 sps:$4 sm:$0xff]  }
 0x291   :  { %v7892_v23 = vpop.eup %7891  ;;  %v5813_v25 = vmul.f32 %v7890_v16, %v8229_v60  ;;  %5219 = vmatprep.subr.bf16.mxu0 %v7713_v8  ;;  %5424 = vmatprep.subr.bf16.mxu1 %v7716_v9  ;;  %v7723_v60 = vld [vmem:[#allocation6 + $0x1330] ss:$36 sps:$4 sm:$0xff]   ;;  %v7761_v6 = vld [vmem:[#allocation6 + $0x14e4] ss:$36 sps:$4 sm:$0xff]  }
 0x292   :  { %v5864_v28 = vmul.f32 %v5830_v11, %v5814_v17  ;;  %v5815_v21 = vmul.f32 %v7892_v23, %v8231_v61  ;;  %v7731_v61 = vld [vmem:[#allocation6 + $0x137c] ss:$36 sps:$4 sm:$0xff]   ;;  %v7764_v7 = vld [vmem:[#allocation6 + $0x14ec] ss:$36 sps:$4 sm:$0xff]   ;;  %v7773_v17 = vld [vmem:[#allocation6 + $0x1574] ss:$36 sps:$4 sm:$0xff]  }
 0x293   :  { %v5863_v32 = vmul.f32 %v5826_v14, %v5813_v25  ;;  %v7759_v8 = vld [vmem:[#allocation6 + $0x14e0] ss:$36 sps:$4 sm:$0xff]   ;;  %v7762_v9 = vld [vmem:[#allocation6 + $0x14e8] ss:$36 sps:$4 sm:$0xff]   ;;  %v7768_v16 = vld [vmem:[#allocation6 + $0x1530] ss:$36 sps:$4 sm:$0xff]  }
 0x294   :  { %5220 = vmatpush1.bf16.msra.mxu0 %v7711_v18  ;;  %5425 = vmatpush1.bf16.msra.mxu1 %v7714_v19  ;;  %v5865_v37 = vmul.f32 %v5834_v40, %v5815_v21  ;;  %v7767_v11 = vld [vmem:[#allocation6 + $0x152c] ss:$36 sps:$4 sm:$0xff]   ;;  %v7776_v18 = vld [vmem:[#allocation6 + $0x157c] ss:$36 sps:$4 sm:$0xff]   ;;  %v7782_v25 = vld [vmem:[#allocation6 + $0x15c4] ss:$36 sps:$4 sm:$0xff]  }
 0x295   :  { %v5871_v34 = vadd.f32 %v5864_v28, %v5863_v32  ;;  %5221 = vmatprep.subr.bf16.mxu0 %v7719_v26  ;;  %5426 = vmatprep.subr.bf16.mxu1 %v7722_v13  ;;  %v7765_v14 = vld [vmem:[#allocation6 + $0x1528] ss:$36 sps:$4 sm:$0xff]   ;;  %v7771_v19 = vld [vmem:[#allocation6 + $0x1570] ss:$36 sps:$4 sm:$0xff]   ;;  %v7774_v23 = vld [vmem:[#allocation6 + $0x1578] ss:$36 sps:$4 sm:$0xff]  }
 0x296   :  { %v7779_v40 = vld [vmem:[#allocation6 + $0x15bc] ss:$36 sps:$4 sm:$0xff]   ;;  %v7785_v28 = vld [vmem:[#allocation6 + $0x1604] ss:$36 sps:$4 sm:$0xff]   ;;  %v7788_v21 = vld [vmem:[#allocation6 + $0x160c] ss:$36 sps:$4 sm:$0xff]  }
 0x297   :  { %v8272_v43 = vadd.f32 %v5871_v34, %v5865_v37  ;;  %v7777_v26 = vld [vmem:[#allocation6 + $0x15b8] ss:$36 sps:$4 sm:$0xff]   ;;  %v7780_v13 = vld [vmem:[#allocation6 + $0x15c0] ss:$36 sps:$4 sm:$0xff]  }
 0x298   :  { %5222 = vmatpush1.bf16.msra.mxu0 %v7717_v56  ;;  %5427 = vmatpush1.bf16.msra.mxu1 %v7720_v33  ;;  %v7783_v32 = vld [vmem:[#allocation6 + $0x1600] ss:$36 sps:$4 sm:$0xff]   ;;  %v7786_v56 = vld [vmem:[#allocation6 + $0x1608] ss:$36 sps:$4 sm:$0xff]   ;;  %v7794_v34 = vld [vmem:[#allocation6 + $0x1654] ss:$36 sps:$4 sm:$0xff]  }
 0x299   :  { %5223 = vmatprep.subr.bf16.mxu0 %v7725_v36  ;;  %5428 = vmatprep.subr.bf16.mxu1 %v7728_v38  ;;  %v7791_v33 = vld [vmem:[#allocation6 + $0x164c] ss:$36 sps:$4 sm:$0xff]   ;;  %v7795_v37 = vld [vmem:[#allocation6 + $0x260] ss:$36 sps:$4 sm:$0xff]  }
 0x29a   :  { %v7789_v36 = vld [vmem:[#allocation6 + $0x1648] ss:$36 sps:$4 sm:$0xff]   ;;  %v7792_v38 = vld [vmem:[#allocation6 + $0x1650] ss:$36 sps:$4 sm:$0xff]  }
 0x29c   :  { %5224 = vmatpush1.bf16.msra.mxu0 %v7723_v60  ;;  %5429 = vmatpush1.bf16.msra.mxu1 %v7726_v44  ;;  %v7797_v60 = vld [vmem:[#allocation6 + $0x6e0] ss:$36 sps:$4 sm:$0xff]  }
 0x29d   :  { %5225 = vmatprep.subr.bf16.mxu0 %v7731_v61  ;;  %5430 = vmatprep.subr.bf16.mxu1 %v7734_v46  ;;  %v7796_v44 = vld [vmem:[#allocation6 + $0x20] ss:$36 sps:$4 sm:$0xff]   ;;  %v7799_v46 = vld [vmem:[#allocation6 + $0x2a8] ss:$36 sps:$4 sm:$0xff]  }
 0x29e   :  { %v7798_v61 = vld [vmem:[#allocation6 + $0x4a0] ss:$36 sps:$4 sm:$0xff]  }
 0x2a0   :  { %5226 = vmatpush1.bf16.msra.mxu0 %v7729_v47  ;;  %5431 = vmatpush1.bf16.msra.mxu1 %v7732_v49  ;;  %v7801_v47 = vld [vmem:[#allocation6 + $0x728] ss:$36 sps:$4 sm:$0xff]  }
 0x2a1   :  { %5227 = vmatprep.subr.bf16.mxu0 %v7737_v51  ;;  %5432 = vmatprep.subr.bf16.mxu1 %v7740_v45  ;;  %v7800_v49 = vld [vmem:[#allocation6 + $0x68] ss:$36 sps:$4 sm:$0xff]   ;;  %v7803_v45 = vld [vmem:[#allocation6 + $0x2f0] ss:$36 sps:$4 sm:$0xff]  }
 0x2a2   :  { %v7802_v51 = vld [vmem:[#allocation6 + $0x4e8] ss:$36 sps:$4 sm:$0xff]  }
 0x2a4   :  { %5228 = vmatpush1.bf16.msra.mxu0 %v7735_v52  ;;  %5433 = vmatpush1.bf16.msra.mxu1 %v7738_v31  ;;  %v7805_v52 = vld [vmem:[#allocation6 + $0x770] ss:$36 sps:$4 sm:$0xff]  }
 0x2a5   :  { %5229 = vmatprep.subr.bf16.mxu0 %v7743_v53  ;;  %5434 = vmatprep.subr.bf16.mxu1 %v7746_v54  ;;  %v7804_v31 = vld [vmem:[#allocation6 + $0xb0] ss:$36 sps:$4 sm:$0xff]   ;;  %v7807_v54 = vld [vmem:[#allocation6 + $0x338] ss:$36 sps:$4 sm:$0xff]  }
 0x2a6   :  { %v7806_v53 = vld [vmem:[#allocation6 + $0x530] ss:$36 sps:$4 sm:$0xff]  }
 0x2a8   :  { %5230 = vmatpush1.bf16.msra.mxu0 %v7741_v50  ;;  %5435 = vmatpush1.bf16.msra.mxu1 %v7744_v57  ;;  %v7809_v50 = vld [vmem:[#allocation6 + $0x7b8] ss:$36 sps:$4 sm:$0xff]  }
 0x2a9   :  { %5231 = vmatprep.subr.bf16.mxu0 %v7749_v58  ;;  %5436 = vmatprep.subr.bf16.mxu1 %v7752_v59  ;;  %v7808_v57 = vld [vmem:[#allocation6 + $0xf8] ss:$36 sps:$4 sm:$0xff]   ;;  %v7811_v59 = vld [vmem:[#allocation6 + $0x380] ss:$36 sps:$4 sm:$0xff]  }
 0x2aa   :  { %v7810_v58 = vld [vmem:[#allocation6 + $0x578] ss:$36 sps:$4 sm:$0xff]  }
 0x2ac   :  { %5232 = vmatpush1.bf16.msra.mxu0 %v7747_v62  ;;  %5437 = vmatpush1.bf16.msra.mxu1 %v7750_v63  ;;  %v7813_v62 = vld [vmem:[#allocation6 + $0x800] ss:$36 sps:$4 sm:$0xff]   ;;  %v7815_v63 = vld [vmem:[#allocation6 + $0x3c8] ss:$36 sps:$4 sm:$0xff]  }
 0x2ad   :  { %5233 = vmatprep.subr.bf16.mxu0 %v7755_v0  ;;  %5438 = vmatprep.subr.bf16.mxu1 %v7758_v1  ;;  %v7817_v0 = vld [vmem:[#allocation6 + $0x848] ss:$36 sps:$4 sm:$0xff]  }
 0x2ae   :  { %v7816_v1 = vld [vmem:[#allocation6 + $0x188] ss:$36 sps:$4 sm:$0xff]  }
 0x2b0   :  { %5234 = vmatpush1.bf16.msra.mxu0 %v7753_v2  ;;  %5439 = vmatpush1.bf16.msra.mxu1 %v7756_v3  ;;  %v7818_v2 = vld [vmem:[#allocation6 + $0x608] ss:$36 sps:$4 sm:$0xff]   ;;  %v7819_v3 = vld [vmem:[#allocation6 + $0x410] ss:$36 sps:$4 sm:$0xff]  }
 0x2b1   :  { %5235 = vmatprep.subr.bf16.mxu0 %v7761_v6  ;;  %5440 = vmatprep.subr.bf16.mxu1 %v7764_v7  ;;  %v7821_v6 = vld [vmem:[#allocation6 + $0x890] ss:$36 sps:$4 sm:$0xff]  }
 0x2b2   :  { %v7820_v7 = vld [vmem:[#allocation6 + $0x1d0] ss:$36 sps:$4 sm:$0xff]  }
 0x2b4   :  { %5236 = vmatpush1.bf16.msra.mxu0 %v7759_v8  ;;  %5441 = vmatpush1.bf16.msra.mxu1 %v7762_v9  ;;  %v7822_v8 = vld [vmem:[#allocation6 + $0x650] ss:$36 sps:$4 sm:$0xff]   ;;  %v7823_v9 = vld [vmem:[#allocation6 + $0x458] ss:$36 sps:$4 sm:$0xff]  }
 0x2b5   :  { %5237 = vmatprep.subr.bf16.mxu0 %v7767_v11  ;;  %5442 = vmatprep.subr.bf16.mxu1 %v7770_v12  ;;  %v7825_v11 = vld [vmem:[#allocation6 + $0x8d8] ss:$36 sps:$4 sm:$0xff]  }
 0x2b6   :  { %v7824_v12 = vld [vmem:[#allocation6 + $0x218] ss:$36 sps:$4 sm:$0xff]  }
 0x2b8   :  { %5238 = vmatpush1.bf16.msra.mxu0 %v7765_v14  ;;  %5443 = vmatpush1.bf16.msra.mxu1 %v7768_v16  ;;  %v7826_v14 = vld [vmem:[#allocation6 + $0x698] ss:$36 sps:$4 sm:$0xff]   ;;  %v7827_v16 = vld [vmem:[#allocation6 + $0xb60] ss:$36 sps:$4 sm:$0xff]  }
 0x2b9   :  { %5239 = vmatprep.subr.bf16.mxu0 %v7773_v17  ;;  %5444 = vmatprep.subr.bf16.mxu1 %v7776_v18  ;;  %v7829_v17 = vld [vmem:[#allocation6 + $0xfe0] ss:$36 sps:$4 sm:$0xff]  }
 0x2ba   :  { %v7828_v18 = vld [vmem:[#allocation6 + $0x920] ss:$36 sps:$4 sm:$0xff]  }
 0x2bc   :  { %5240 = vmatpush1.bf16.msra.mxu0 %v7771_v19  ;;  %5445 = vmatpush1.bf16.msra.mxu1 %v7774_v23  ;;  %v7830_v19 = vld [vmem:[#allocation6 + $0xda0] ss:$36 sps:$4 sm:$0xff]   ;;  %v7831_v23 = vld [vmem:[#allocation6 + $0xba8] ss:$36 sps:$4 sm:$0xff]  }
 0x2bd   :  { %5241 = vmatprep.subr.bf16.mxu0 %v7779_v40  ;;  %5446 = vmatprep.subr.bf16.mxu1 %v7782_v25  ;;  %v7833_v40 = vld [vmem:[#allocation6 + $0x1028] ss:$36 sps:$4 sm:$0xff]  }
 0x2be   :  { %v7832_v25 = vld [vmem:[#allocation6 + $0x968] ss:$36 sps:$4 sm:$0xff]  }
 0x2c0   :  { %5242 = vmatpush1.bf16.msra.mxu0 %v7777_v26  ;;  %5447 = vmatpush1.bf16.msra.mxu1 %v7780_v13  ;;  %v7834_v26 = vld [vmem:[#allocation6 + $0xde8] ss:$36 sps:$4 sm:$0xff]   ;;  %v7835_v13 = vld [vmem:[#allocation6 + $0xbf0] ss:$36 sps:$4 sm:$0xff]  }
 0x2c1   :  { %5243 = vmatprep.subr.bf16.mxu0 %v7785_v28  ;;  %5448 = vmatprep.subr.bf16.mxu1 %v7788_v21  ;;  %v7837_v28 = vld [vmem:[#allocation6 + $0x1070] ss:$36 sps:$4 sm:$0xff]  }
 0x2c2   :  { %v7836_v21 = vld [vmem:[#allocation6 + $0x9b0] ss:$36 sps:$4 sm:$0xff]  }
 0x2c4   :  { %5244 = vmatpush1.bf16.msra.mxu0 %v7783_v32  ;;  %5449 = vmatpush1.bf16.msra.mxu1 %v7786_v56  ;;  %v7838_v32 = vld [vmem:[#allocation6 + $0xe30] ss:$36 sps:$4 sm:$0xff]   ;;  %v7840_v56 = vld [vmem:[#allocation6 + $0x9f8] ss:$36 sps:$4 sm:$0xff]  }
 0x2c5   :  { %5245 = vmatprep.subr.bf16.mxu0 %v7791_v33  ;;  %5450 = vmatprep.subr.bf16.mxu1 %v7794_v34  ;;  %v7842_v33 = vld [vmem:[#allocation6 + $0xe78] ss:$36 sps:$4 sm:$0xff]   ;;  %v7843_v34 = vld [vmem:[#allocation6 + $0xc80] ss:$36 sps:$4 sm:$0xff]  }
 0x2c8   :  { %5246 = vmatpush1.bf16.msra.mxu0 %v7789_v36  ;;  %5451 = vmatpush1.bf16.msra.mxu1 %v7792_v38  ;;  %v7845_v36 = vld [vmem:[#allocation6 + $0x1100] ss:$36 sps:$4 sm:$0xff]   ;;  %v7847_v38 = vld [vmem:[#allocation6 + $0xcc8] ss:$36 sps:$4 sm:$0xff]  }
 0x2c9   :  { %6636 = vmatprep.subr.bf16.mxu0 %v7795_v37  ;;  %6658 = vmatprep.subr.bf16.mxu1 %v7797_v60  ;;  %v7849_v37 = vld [vmem:[#allocation6 + $0x1148] ss:$36 sps:$4 sm:$0xff]  }
 0x2ca   :  { %v7848_v60 = vld [vmem:[#allocation6 + $0xa88] ss:$36 sps:$4 sm:$0xff]  }
 0x2cb   :  { %5248 = vmatmul.mubr.bf16.vlgmr.msra.gmra.mrb[4].mxu0 %v8186_v41  ;;  %5453 = vmatmul.mubr.bf16.vlgmr.msra.gmra.mrb[4].mxu1 %v8186_v41 }
 0x2cc   :  { %6637 = vmatpush3.bf16.msra.mxu0 %v7796_v44  ;;  %6659 = vmatpush3.bf16.msra.mxu1 %v7798_v61  ;;  %v7850_v44 = vld [vmem:[#allocation6 + $0xf08] ss:$36 sps:$4 sm:$0xff]   ;;  %v7851_v61 = vld [vmem:[#allocation6 + $0xd10] ss:$36 sps:$4 sm:$0xff]  }
 0x2cd   :  { %6638 = vmatprep.subr.bf16.mxu0 %v7799_v46  ;;  %6660 = vmatprep.subr.bf16.mxu1 %v7801_v47  ;;  %v7853_v46 = vld [vmem:[#allocation6 + $0x1190] ss:$36 sps:$4 sm:$0xff]  }
 0x2ce   :  { %5493 = vmatprep.mubr.bf16.mxu0 %v8126_v48  ;;  %5533 = vmatprep.mubr.bf16.mxu1 %v8138_v30  ;;  %v7812_v48 = vld [vmem:[#allocation6 + $0x140] ss:$36 sps:$4 sm:$0xff]   ;;  %v7852_v47 = vld [vmem:[#allocation6 + $0xad0] ss:$36 sps:$4 sm:$0xff]  }
 0x2cf   :  { %v7814_v30 = vld [vmem:[#allocation6 + $0x5c0] ss:$36 sps:$4 sm:$0xff]  }
 0x2d0   :  { %6639 = vmatpush3.bf16.msra.mxu0 %v7800_v49  ;;  %6661 = vmatpush3.bf16.msra.mxu1 %v7802_v51  ;;  %v7854_v49 = vld [vmem:[#allocation6 + $0xf50] ss:$36 sps:$4 sm:$0xff]   ;;  %v7855_v51 = vld [vmem:[#allocation6 + $0xd58] ss:$36 sps:$4 sm:$0xff]  }
 0x2d1   :  { %6640 = vmatprep.subr.bf16.mxu0 %v7803_v45  ;;  %6662 = vmatprep.subr.bf16.mxu1 %v7805_v52  ;;  %v7857_v45 = vld [vmem:[#allocation6 + $0x11d8] ss:$36 sps:$4 sm:$0xff]  }
 0x2d2   :  { %v7856_v52 = vld [vmem:[#allocation6 + $0xb18] ss:$36 sps:$4 sm:$0xff]  }
 0x2d4   :  { %6641 = vmatpush3.bf16.msra.mxu0 %v7804_v31  ;;  %6663 = vmatpush3.bf16.msra.mxu1 %v7806_v53  ;;  %v7858_v31 = vld [vmem:[#allocation6 + $0xf98] ss:$36 sps:$4 sm:$0xff]   ;;  %v7859_v53 = vld [vmem:[#allocation6 + $0x1460] ss:$36 sps:$4 sm:$0xff]  }
 0x2d5   :  { %6642 = vmatprep.subr.bf16.mxu0 %v7807_v54  ;;  %6664 = vmatprep.subr.bf16.mxu1 %v7809_v50  ;;  %v7860_v54 = vld [vmem:[#allocation6 + $0x1220] ss:$36 sps:$4 sm:$0xff]   ;;  %v7861_v50 = vld [vmem:[#allocation6 + $0x14a8] ss:$36 sps:$4 sm:$0xff]  }
 0x2d8   :  { %6643 = vmatpush3.bf16.msra.mxu0 %v7808_v57  ;;  %6665 = vmatpush3.bf16.msra.mxu1 %v7810_v58  ;;  %v7862_v57 = vld [vmem:[#allocation6 + $0x1268] ss:$36 sps:$4 sm:$0xff]   ;;  %v7863_v58 = vld [vmem:[#allocation6 + $0x14f0] ss:$36 sps:$4 sm:$0xff]  }
 0x2d9   :  { %6644 = vmatprep.subr.bf16.mxu0 %v7811_v59  ;;  %6666 = vmatprep.subr.bf16.mxu1 %v7813_v62  ;;  %v7864_v59 = vld [vmem:[#allocation6 + $0x12b0] ss:$36 sps:$4 sm:$0xff]   ;;  %v7865_v62 = vld [vmem:[#allocation6 + $0x1538] ss:$36 sps:$4 sm:$0xff]  }
 0x2dc   :  { %6645 = vmatpush3.bf16.msra.mxu0 %v7812_v48  ;;  %6667 = vmatpush3.bf16.msra.mxu1 %v7814_v30  ;;  %v7866_v48 = vld [vmem:[#allocation6 + $0x12f8] ss:$36 sps:$4 sm:$0xff]   ;;  %v7867_v30 = vld [vmem:[#allocation6 + $0x1580] ss:$36 sps:$4 sm:$0xff]  }
 0x2dd   :  { %6646 = vmatprep.subr.bf16.mxu0 %v7815_v63  ;;  %6668 = vmatprep.subr.bf16.mxu1 %v7817_v0  ;;  %v7868_v63 = vld [vmem:[#allocation6 + $0x1340] ss:$36 sps:$4 sm:$0xff]   ;;  %v7871_v0 = vld [vmem:[#allocation6 + $0x1610] ss:$36 sps:$4 sm:$0xff]  }
 0x2e0   :  { %6647 = vmatpush3.bf16.msra.mxu0 %v7816_v1  ;;  %6669 = vmatpush3.bf16.msra.mxu1 %v7818_v2  ;;  %v7873_v1 = vld [vmem:[#allocation6 + $0x1658] ss:$36 sps:$4 sm:$0xff]  }
 0x2e1   :  { %6648 = vmatprep.subr.bf16.mxu0 %v7819_v3  ;;  %6670 = vmatprep.subr.bf16.mxu1 %v7821_v6  ;;  %v7874_v2 = vld [vmem:[#allocation6 + $0x1418] ss:$36 sps:$4 sm:$0xff]   ;;  %v899_v3 = vsub.s32 4, %v8205_v27  ;;  %v907_v6 = vsub.s32 6, %v8205_v27 }
 0x2e4   :  { %6649 = vmatpush3.bf16.msra.mxu0 %v7820_v7  ;;  %6671 = vmatpush3.bf16.msra.mxu1 %v7822_v8  ;;  %v903_v7 = vsub.s32 5, %v8205_v27  ;;  %v911_v8 = vsub.s32 7, %v8205_v27 }
 0x2e5   :  { %6650 = vmatprep.subr.bf16.mxu0 %v7823_v9  ;;  %6672 = vmatprep.subr.bf16.mxu1 %v7825_v11  ;;  %v900_v9 = vrot.slane %v8209_v39, %v899_v3  ;;  %v908_v11 = vrot.slane %v8209_v39, %v907_v6 }
 0x2e8   :  { %6651 = vmatpush3.bf16.msra.mxu0 %v7824_v12  ;;  %6673 = vmatpush3.bf16.msra.mxu1 %v7826_v14  ;;  %v912_v12 = vrot.slane %v8209_v39, %v911_v8 }
 0x2e9   :  { %6680 = vmatprep.subr.bf16.mxu0 %v7827_v16  ;;  %6702 = vmatprep.subr.bf16.mxu1 %v7829_v17 }
 0x2eb   :  { %5494 = vmatmul.mubr.bf16.vlgmr.msra.gmra.mrb[8].mxu0 %v8130_v5  ;;  %5534 = vmatmul.mubr.bf16.vlgmr.msra.gmra.mrb[8].mxu1 %v8144_v10  ;;  %v7839_v5 = vld [vmem:[#allocation6 + $0xc38] ss:$36 sps:$4 sm:$0xff]  }
 0x2ec   :  { %6681 = vmatpush3.bf16.msra.mxu0 %v7828_v18  ;;  %6703 = vmatpush3.bf16.msra.mxu1 %v7830_v19  ;;  %v7841_v10 = vld [vmem:[#allocation6 + $0x10b8] ss:$36 sps:$4 sm:$0xff]  }
 0x2ed   :  { %6682 = vmatprep.subr.bf16.mxu0 %v7831_v23  ;;  %6704 = vmatprep.subr.bf16.mxu1 %v7833_v40 }
 0x2ee   :  { %5573 = vmatprep.mubr.bf16.mxu0 %v8150_v15  ;;  %5613 = vmatprep.mubr.bf16.mxu1 %v8164_v24  ;;  %v7844_v15 = vld [vmem:[#allocation6 + $0xa40] ss:$36 sps:$4 sm:$0xff]  }
 0x2ef   :  { %v7846_v24 = vld [vmem:[#allocation6 + $0xec0] ss:$36 sps:$4 sm:$0xff]  }
 0x2f0   :  { %6683 = vmatpush3.bf16.msra.mxu0 %v7832_v25  ;;  %6705 = vmatpush3.bf16.msra.mxu1 %v7834_v26 }
 0x2f1   :  { %6684 = vmatprep.subr.bf16.mxu0 %v7835_v13  ;;  %6706 = vmatprep.subr.bf16.mxu1 %v7837_v28 }
 0x2f4   :  { %6685 = vmatpush3.bf16.msra.mxu0 %v7836_v21  ;;  %6707 = vmatpush3.bf16.msra.mxu1 %v7838_v32 }
 0x2f5   :  { %6686 = vmatprep.subr.bf16.mxu0 %v7839_v5  ;;  %6708 = vmatprep.subr.bf16.mxu1 %v7841_v10 }
 0x2f8   :  { %6687 = vmatpush3.bf16.msra.mxu0 %v7840_v56  ;;  %6709 = vmatpush3.bf16.msra.mxu1 %v7842_v33 }
 0x2f9   :  { %6688 = vmatprep.subr.bf16.mxu0 %v7843_v34  ;;  %6710 = vmatprep.subr.bf16.mxu1 %v7845_v36 }
 0x2fc   :  { %6689 = vmatpush3.bf16.msra.mxu0 %v7844_v15  ;;  %6711 = vmatpush3.bf16.msra.mxu1 %v7846_v24 }
 0x2fd   :  { %6690 = vmatprep.subr.bf16.mxu0 %v7847_v38  ;;  %6712 = vmatprep.subr.bf16.mxu1 %v7849_v37 }
 0x300   :  { %6691 = vmatpush3.bf16.msra.mxu0 %v7848_v60  ;;  %6713 = vmatpush3.bf16.msra.mxu1 %v7850_v44 }
 0x301   :  { %6692 = vmatprep.subr.bf16.mxu0 %v7851_v61  ;;  %6714 = vmatprep.subr.bf16.mxu1 %v7853_v46 }
 0x304   :  { %6693 = vmatpush3.bf16.msra.mxu0 %v7852_v47  ;;  %6715 = vmatpush3.bf16.msra.mxu1 %v7854_v49 }
 0x305   :  { %6694 = vmatprep.subr.bf16.mxu0 %v7855_v51  ;;  %6716 = vmatprep.subr.bf16.mxu1 %v7857_v45 }
 0x308   :  { %6695 = vmatpush3.bf16.msra.mxu0 %v7856_v52  ;;  %6717 = vmatpush3.bf16.msra.mxu1 %v7858_v31 }
 0x309   :  { %6724 = vmatprep.subr.bf16.mxu0 %v7859_v53 }
 0x30b   :  { %5574 = vmatmul.mubr.bf16.vlgmr.msra.gmra.mrb[12].mxu0 %v8158_v20  ;;  %5614 = vmatmul.mubr.bf16.vlgmr.msra.gmra.mrb[12].mxu1 %v8172_v29  ;;  %v7869_v20 = vld [vmem:[#allocation6 + $0x15c8] ss:$36 sps:$4 sm:$0xff]  }
 0x30c   :  { %6725 = vmatpush3.bf16.msra.mxu0 %v7860_v54  ;;  %5653 = vmatprep.mubr.bf16.mxu0 %v8178_v35  ;;  %v7870_v29 = vld [vmem:[#allocation6 + $0x1388] ss:$36 sps:$4 sm:$0xff]   ;;  %v7872_v35 = vld [vmem:[#allocation6 + $0x13d0] ss:$36 sps:$4 sm:$0xff]  }
 0x30d   :  { %6726 = vmatprep.subr.bf16.mxu0 %v7861_v50 }
 0x310   :  { %6727 = vmatpush3.bf16.msra.mxu0 %v7862_v57 }
 0x311   :  { %6728 = vmatprep.subr.bf16.mxu0 %v7863_v58 }
 0x314   :  { %6729 = vmatpush3.bf16.msra.mxu0 %v7864_v59 }
 0x315   :  { %6730 = vmatprep.subr.bf16.mxu0 %v7865_v62 }
 0x318   :  { %6731 = vmatpush3.bf16.msra.mxu0 %v7866_v48 }
 0x319   :  { %6732 = vmatprep.subr.bf16.mxu0 %v7867_v30 }
 0x31c   :  { %6733 = vmatpush3.bf16.msra.mxu0 %v7868_v63 }
 0x31d   :  { %6734 = vmatprep.subr.bf16.mxu0 %v7869_v20 }
 0x320   :  { %6735 = vmatpush3.bf16.msra.mxu0 %v7870_v29  ;;  %v5905_v29 = vld [vmem:[#allocation8 + $0x8] ss:$0 sm:$0xff] }
 0x321   :  { %6736 = vmatprep.subr.bf16.mxu0 %v7871_v0 }
 0x324   :  { %6737 = vmatpush3.bf16.msra.mxu0 %v7872_v35  ;;  %v5850_v35 = vrot.slane %v8254_v4, %v907_v6 }
 0x325   :  { %6738 = vmatprep.subr.bf16.mxu0 %v7873_v1 }
 0x328   :  { %6739 = vmatpush3.bf16.msra.mxu0 %v7874_v2 }
 0x32b   :  { %5654 = vmatmul.mubr.bf16.vlgmr.msra.gmra.mrb[16].mxu0 %v8186_v41  ;;  %v904_v41 = vrot.slane %v8209_v39, %v903_v7 }
 0x39e   :  { %v5249_v14 = vpop.f32.mrb[4].mxu0  ;;  %v5454_v16 = vpop.f32.mrb[4].mxu1 }
 0x39f   :  { %v8302_v17 = vadd.f32 %v5249_v14, %v900_v9  ;;  %v8304_v18 = vadd.f32 %v5454_v16, %v908_v11  ;;  %v5251_v19 = vpop.f32.mrb[5].mxu0  ;;  %v5456_v23 = vpop.f32.mrb[5].mxu1 }
 0x3a0   :  { %v8306_v40 = vadd.f32 %v5251_v19, %v904_v41  ;;  %v8308_v25 = vadd.f32 %v5456_v23, %v912_v12  ;;  %v5253_v26 = vpop.f32.mrb[6].mxu0  ;;  %v5458_v13 = vpop.f32.mrb[6].mxu1 }
 0x3a1   :  { %v5688_v28 = vand.u32 2147483647, %v8302_v17  ;;  %v5254_v21 = vpop.f32.mrb[7].mxu0  ;;  %v5459_v32 = vpop.f32.mrb[7].mxu1  ;;  %v5690_v39 = vand.u32 2147483647, %v8304_v18  ;;  %vm5672_vm6 = vcmp.ne.f32.partialorder %v8302_v17, %v8302_v17  ;;  %vm5674_vm8 = vcmp.ne.f32.partialorder %v8304_v18, %v8304_v18 }
 0x3a2   :  { %v5689_v10 = vand.u32 2147483647, %v8306_v40  ;;  %v5691_v33 = vand.u32 2147483647, %v8308_v25  ;;  %v5664_v59 = vmax.f32 %v8302_v17, 0.0  ;;  %v5666_v62 = vmax.f32 %v8304_v18, 0.0 }
 0x3a3   :  { %v5696_v5 = vsub.f32 0.0, %v5688_v28  ;;  %v5698_v56 = vsub.f32 0.0, %v5690_v39  ;;  %v5665_v30 = vmax.f32 %v8306_v40, 0.0  ;;  %v5667_v20 = vmax.f32 %v8308_v25, 0.0 }
 0x3a4   :  { %v5697_v36 = vsub.f32 0.0, %v5689_v10  ;;  %v5699_v24 = vsub.f32 0.0, %v5691_v33  ;;  %vm5673_vm12 = vcmp.ne.f32.partialorder %v8306_v40, %v8306_v40  ;;  %vm5675_vm13 = vcmp.ne.f32.partialorder %v8308_v25, %v8308_v25 }
 0x3a5   :  { %v5707_v34 = vmul.f32 1.442695, %v5696_v5  ;;  %v5711_v15 = vmul.f32 1.442695, %v5698_v56 }
 0x3a6   :  { %v5709_v38 = vmul.f32 1.442695, %v5697_v36  ;;  %v5713_v37 = vmul.f32 1.442695, %v5699_v24 }
 0x3a7   :  { %7893 = vpow2.f32 %v5707_v34 }
 0x3a8   :  { %7895 = vpow2.f32 %v5711_v15 }
 0x3a9   :  { %7897 = vpow2.f32 %v5709_v38 }
 0x3aa   :  { %7899 = vpow2.f32 %v5713_v37 }
 0x3b1   :  { %v7894_v60 = vpop.eup %7893 }
 0x3b2   :  { %v7896_v44 = vpop.eup %7895  ;;  %v5744_v61 = vadd.f32 1.0, %v7894_v60  ;;  %v5747_v52 = vmul.f32 -0.5, %v7894_v60  ;;  %v5750_v54 = vand.u32 2147483647, %v7894_v60 }
 0x3b3   :  { %v7898_v46 = vpop.eup %7897  ;;  %v5762_v47 = vadd.f32 1.0, %v7896_v44  ;;  %v5765_v31 = vmul.f32 -0.5, %v7896_v44  ;;  %v5768_v48 = vand.u32 2147483647, %v7896_v44 }
 0x3b4   :  { %v7900_v49 = vpop.eup %7899  ;;  %7901 = vlog2.f32 %v5744_v61  ;;  %v5753_v51 = vadd.f32 1.0, %v7898_v46  ;;  %v5756_v53 = vmul.f32 -0.5, %v7898_v46  ;;  %v5748_v50 = vadd.f32 1.0, %v5747_v52 }
 0x3b5   :  { %7903 = vlog2.f32 %v5762_v47  ;;  %v5771_v45 = vadd.f32 1.0, %v7900_v49  ;;  %v5766_v57 = vadd.f32 1.0, %v5765_v31  ;;  %v5774_v58 = vmul.f32 -0.5, %v7900_v49 }
 0x3b6   :  { %7905 = vlog2.f32 %v5753_v51  ;;  %v5757_v63 = vadd.f32 1.0, %v5756_v53  ;;  %vm8320_vm7 = vcmp.lt.f32.partialorder %v5750_v54, 0.0004427343  ;;  %v5759_v1 = vand.u32 2147483647, %v7898_v46 }
 0x3b7   :  { %7907 = vlog2.f32 %v5771_v45  ;;  %v5749_v12 = vmul.f32 %v7894_v60, %v5748_v50  ;;  %v5767_v14 = vmul.f32 %v7896_v44, %v5766_v57  ;;  %v5775_v16 = vadd.f32 1.0, %v5774_v58 }
 0x3b8   :  { %v5777_v28 = vand.u32 2147483647, %v7900_v49  ;;  %vm5769_vm9 = vcmp.lt.f32.partialorder %v5768_v48, 0.0004427343  ;;  %v5758_v33 = vmul.f32 %v7898_v46, %v5757_v63  ;;  %vm5760_vm10 = vcmp.lt.f32.partialorder %v5759_v1, 0.0004427343 }
 0x3b9   :  { %v5776_v47 = vmul.f32 %v7900_v49, %v5775_v16  ;;  %v5838_v50 = vrot.slane %v8254_v4, %v895_v42 }
 0x3ba   :  { %vm5778_vm11 = vcmp.lt.f32.partialorder %v5777_v28, 0.0004427343 }
 0x3be   :  { %v7902_v0 = vpop.eup %7901  ;;  %v6652_v2 = vpop.f32.mrb[8].mxu0 }
 0x3bf   :  { %v6674_v9 = vpop.f32.mrb[8].mxu1  ;;  %v7904_v11 = vpop.eup %7903  ;;  %v5746_v41 = vmul.f32 0.6931472, %v7902_v0 }
 0x3c0   :  { %v6653_v19 = vpop.f32.mrb[9].mxu0  ;;  %v6675_v23 = vpop.f32.mrb[9].mxu1  ;;  %v5764_v13 = vmul.f32 0.6931472, %v7904_v11 }
 0x3c1   :  { %v7906_v26 = vpop.eup %7905  ;;  %v6654_v21 = vadd.f32 %v6653_v19, %v6652_v2  ;;  %v6655_v32 = vpop.f32.mrb[10].mxu0  ;;  %v6676_v39 = vadd.f32 %v6675_v23, %v6674_v9  ;;  %v5752_v10 = vsel %vm8320_vm7, %v5749_v12, %v5746_v41 }
 0x3c2   :  { %v6677_v5 = vpop.f32.mrb[10].mxu1  ;;  %v5755_v56 = vmul.f32 0.6931472, %v7906_v26  ;;  %v6656_v34 = vpop.f32.mrb[11].mxu0  ;;  %v5792_v24 = vadd.f32 %v5752_v10, %v5664_v59  ;;  %v5770_v38 = vsel %vm5769_vm9, %v5767_v14, %v5764_v13  ;;  %v5842_v59 = vrot.slane %v8254_v4, %v899_v3 }
 0x3c3   :  { %v6678_v36 = vpop.f32.mrb[11].mxu1  ;;  %v7908_v15 = vpop.eup %7907  ;;  %v5496_v37 = vadd.f32 %v6654_v21, %v5905_v29  ;;  %v5794_v60 = vadd.f32 %v5770_v38, %v5666_v62 }
 0x3c4   :  { %v5761_v44 = vsel %vm5760_vm10, %v5758_v33, %v5755_v56  ;;  %v5773_v61 = vmul.f32 0.6931472, %v7908_v15  ;;  %v5800_v51 = vsel %vm5672_vm6, %v8302_v17, %v5792_v24 }
 0x3c5   :  { %v5793_v45 = vadd.f32 %v5761_v44, %v5665_v30  ;;  %v5536_v52 = vadd.f32 %v6676_v39, %v5496_v37  ;;  %7909 = vtanh.f32 %v5800_v51  ;;  %v5802_v46 = vsel %vm5674_vm8, %v8304_v18, %v5794_v60 }
 0x3c6   :  { %v5779_v31 = vsel %vm5778_vm11, %v5776_v47, %v5773_v61  ;;  %7911 = vtanh.f32 %v5802_v46  ;;  %v5846_v30 = vrot.slane %v8254_v4, %v903_v7 }
 0x3c7   :  { %v5801_v49 = vsel %vm5673_vm12, %v8306_v40, %v5793_v45  ;;  %v5795_v53 = vadd.f32 %v5779_v31, %v5667_v20 }
 0x3c8   :  { %7913 = vtanh.f32 %v5801_v49 }
 0x3c9   :  { %v5803_v54 = vsel %vm5675_vm13, %v8308_v25, %v5795_v53 }
 0x3ca   :  { %7915 = vtanh.f32 %v5803_v54  ;;  %v5884_v54 = vand.u32 127, %v881_v22 }
 0x3cc   :  { %vm5885_vm0 = vcmp.eq.s32.totalorder %v5884_v54, 127 }
 0x3cf   :  { %v7910_v57 = vpop.eup %7909 }
 0x3d0   :  { %v7912_v58 = vpop.eup %7911  ;;  %v5816_v62 = vmul.f32 %v7910_v57, %v8302_v17 }
 0x3d1   :  { %v5818_v20 = vmul.f32 %v7912_v58, %v8304_v18 }
 0x3d2   :  { %v7914_v48 = vpop.eup %7913  ;;  %v5866_v29 = vmul.f32 %v5838_v50, %v5816_v62  ;;  %v5881_v50 = vstv %s8383_s4 }
 0x3d3   :  { %v5817_v63 = vmul.f32 %v7914_v48, %v8306_v40  ;;  %v5868_v1 = vmul.f32 %v5846_v30, %v5818_v20 }
 0x3d4   :  { %v7916_v0 = vpop.eup %7915  ;;  %v5873_v17 = vadd.f32 %v8272_v43, %v5866_v29 }
 0x3d5   :  { %v5819_v42 = vmul.f32 %v7916_v0, %v8308_v25  ;;  %v5867_v3 = vmul.f32 %v5842_v59, %v5817_v63 }
 0x3d7   :  { %v5874_v2 = vadd.f32 %v5873_v17, %v5867_v3  ;;  %v5869_v9 = vmul.f32 %v5850_v35, %v5819_v42 }
 0x3d9   :  { %v5875_v11 = vadd.f32 %v5874_v2, %v5868_v1 }
 0x3db   :  { %v5876_v7 = vadd.f32 %v5875_v11, %v5869_v9 }
 0x3de   :  { %v6696_v41 = vpop.f32.mrb[12].mxu0  ;;  %v6718_v40 = vpop.f32.mrb[12].mxu1 }
 0x3df   :  { %v6697_v12 = vpop.f32.mrb[13].mxu0  ;;  %v6719_v18 = vpop.f32.mrb[13].mxu1 }
 0x3e0   :  { %v6698_v14 = vadd.f32 %v6697_v12, %v6696_v41  ;;  %v6699_v16 = vpop.f32.mrb[14].mxu0  ;;  %v6720_v19 = vadd.f32 %v6719_v18, %v6718_v40  ;;  %v6721_v25 = vpop.f32.mrb[14].mxu1 }
 0x3e1   :  { %v6700_v23 = vpop.f32.mrb[15].mxu0  ;;  %v6722_v26 = vpop.f32.mrb[15].mxu1 }
 0x3e2   :  { %v5576_v13 = vadd.f32 %v6698_v14, %v5536_v52  ;;  %v5854_v52 = vrot.slane %v8254_v4, %v911_v8 }
 0x3e4   :  { %v5616_v6 = vadd.f32 %v6720_v19, %v5576_v13 }
 0x3fe   :  { %v6740_v28 = vpop.f32.mrb[16].mxu0 }
 0x3ff   :  { %v6741_v21 = vpop.f32.mrb[17].mxu0 }
 0x400   :  { %v6742_v43 = vadd.f32 %v6741_v21, %v6740_v28  ;;  %v6743_v32 = vpop.f32.mrb[18].mxu0 }
 0x401   :  { %v6744_v39 = vpop.f32.mrb[19].mxu0 }
 0x402   :  { %v5656_v5 = vadd.f32 %v6742_v43, %v5616_v6 }
 0x404   :  { %v5692_v10 = vand.u32 2147483647, %v5656_v5  ;;  %v5668_v61 = vmax.f32 %v5656_v5, 0.0  ;;  %vm5676_vm15 = vcmp.ne.f32.partialorder %v5656_v5, %v5656_v5 }
 0x406   :  { %v5700_v56 = vsub.f32 0.0, %v5692_v10 }
 0x408   :  { %v5715_v33 = vmul.f32 1.442695, %v5700_v56 }
 0x40a   :  { %7917 = vpow2.f32 %v5715_v33 }
 0x414   :  { %v7918_v34 = vpop.eup %7917 }
 0x415   :  { %v5780_v36 = vadd.f32 1.0, %v7918_v34  ;;  %v5783_v15 = vmul.f32 -0.5, %v7918_v34  ;;  %v5786_v38 = vand.u32 2147483647, %v7918_v34 }
 0x417   :  { %7919 = vlog2.f32 %v5780_v36  ;;  %v5784_v24 = vadd.f32 1.0, %v5783_v15  ;;  %vm5787_vm14 = vcmp.lt.f32.partialorder %v5786_v38, 0.0004427343 }
 0x419   :  { %v5785_v44 = vmul.f32 %v7918_v34, %v5784_v24 }
 0x421   :  { %v7920_v37 = vpop.eup %7919 }
 0x422   :  { %v5782_v60 = vmul.f32 0.6931472, %v7920_v37 }
 0x424   :  { %v5788_v47 = vsel %vm5787_vm14, %v5785_v44, %v5782_v60 }
 0x425   :  { %v5796_v51 = vadd.f32 %v5788_v47, %v5668_v61 }
 0x427   :  { %v5804_v45 = vsel %vm5676_vm15, %v5656_v5, %v5796_v51 }
 0x428   :  { %7921 = vtanh.f32 %v5804_v45 }
 0x432   :  { %v7922_v46 = vpop.eup %7921 }
 0x433   :  { %v5820_v31 = vmul.f32 %v7922_v46, %v5656_v5 }
 0x435   :  { %v5870_v49 = vmul.f32 %v5854_v52, %v5820_v31 }
 0x437   :  { %v5877_v53 = vadd.f32 %v5876_v7, %v5870_v49 }
 0x439   :  { %5878 = vadd.xlane.f32.xlu0 %v5877_v53 }
 0x4c6   :  { %v5879_v57 = vpop.xlane.xlu0 %5878 }
 0x4c7   :  { %v5882_v58 = vadd.f32 %v5881_v50, %v5879_v57 }
 0x4c9   :  { %v5886_v27 = vsel %vm5885_vm0, %v5882_v58, %v8225_v55 }
 0x4ca   :  { %5887 = vst [vmem:[#allocation11] sm:$0xff] %v5886_v27 }
 0x4cb   :  { %8022 = shalt.err (!%p8019_p8)
}
 0x4cc   :  { %s8023_s4 = scalar_lea.hbm %s8384_s5, 128 }
 0x4cd   :  { %p8024_p9 = scmp.ne.s32.totalorder %s8384_s5, %s8023_s4  ;;  %p8027_p10 = scmp.lt.u32.totalorder %s8023_s4, %s8384_s5 }
 0x4cf   :  { %p8029_p11 = pnand %p8027_p10, %p8024_p9 }
 0x4d1   :  { %8032 = shalt.err (!%p8029_p11)
}
 0x4d2   :  { %5897 = dma.vmem_to_hbm [thread:$0]  %s5895_s1, 128, %s8384_s5, [#allocation5]  }
 0x4d3   :  { %8039 = dma.done.wait [#allocation5], 128  }
 0x4d4   :  { %8040 = vsyncadd [#allocation5], 4294967168 }
 0x4d5   :  { %5901 = vsyncpa [#allocation4], 1 }
 0x4d6   :  { %5902 = vsyncpa [#allocation7], 1 }
 0x4d7   :  { %5903 = vsyncpa [#allocation10], 1 }
 0x4d8   :  { %5904 = vsyncpa [#allocation5], 1 }

</bundles_post_ra>
